<compile_context>
chip_gen: v7x
topology: tpu7x:2x2x1
jax: 0.10.0
libtpu: 0.0.40
codegen_flags: <defaults>
</compile_context>

<pallas_src>
import numpy as np
import jax
import jax.numpy as jnp
from jax.experimental import pallas as pl
from jax.experimental.pallas import tpu as pltpu

BN_EPS = 1e-5
THRESHOLD = -1e20
MXU_DTYPE = jnp.bfloat16  # matmul operand dtype; accumulation/epilogues in f32


# ----------------------------------------------------------------------------
# Static architecture plan (resnet18 spatial sizes / strides for an HxW input)
# ----------------------------------------------------------------------------
def _conv_out(h, w, k, s, p):
    return (h + 2 * p - k) // s + 1, (w + 2 * p - k) // s + 1


def _arch_plan(H, W):
    stem_hw = _conv_out(H, W, 7, 2, 3)              # conv7x7 / 2
    h, w = _conv_out(stem_hw[0], stem_hw[1], 3, 2, 1)   # maxpool3x3 / 2
    blocks = []
    for stage in range(4):
        for b in range(2):
            s = 2 if (stage > 0 and b == 0) else 1
            oh, ow = _conv_out(h, w, 3, s, 1)
            blocks.append({"h_in": h, "w_in": w, "h_out": oh, "w_out": ow,
                           "stride": s})
            h, w = oh, ow
    return stem_hw, blocks


def _ceil8(n):
    return ((n + 7) // 8) * 8


def _gather_matrix(h, w, k, stride, pad):
    """0/1 'selection im2col' matrix.

    Row block t = kh*k + kw (padded to a multiple of 8 rows so in-kernel slices
    stay sublane-aligned) selects, for every output pixel, the input pixel that
    tap (kh, kw) reads; all-zero rows encode zero padding / out-of-bounds taps.
    Shape: (k*k*ceil8(OH*OW), h*w).
    """
    oh, ow = _conv_out(h, w, k, stride, pad)
    s_out = oh * ow
    s_blk = _ceil8(s_out)
    g = np.zeros((k * k * s_blk, h * w), np.float32)
    for kh in range(k):
        for kw in range(k):
            t = kh * k + kw
            for oy in range(oh):
                for ox in range(ow):
                    iy = oy * stride + kh - pad
                    ix = ox * stride + kw - pad
                    if 0 <= iy < h and 0 <= ix < w:
                        g[t * s_blk + oy * ow + ox, iy * w + ix] = 1.0
    return g


def _stem_im2col(pressure_nchw, oh, ow):
    """(N, C, H, W) -> (N, OH*OW, 7*7*C) im2col for the 7x7/2 stem conv."""
    n, c, _, _ = pressure_nchw.shape
    x = jnp.transpose(pressure_nchw, (0, 2, 3, 1)).astype(jnp.float32)  # NHWC
    xp = jnp.pad(x, ((0, 0), (3, 3), (3, 3), (0, 0)))
    cols = []
    for kh in range(7):
        for kw in range(7):
            cols.append(xp[:, kh:kh + 2 * oh:2, kw:kw + 2 * ow:2, :])
    a = jnp.concatenate(cols, axis=-1)          # column order: (kh, kw, c)
    return a.reshape(n, oh * ow, 7 * 7 * c)


# ----------------------------------------------------------------------------
# Fused forward pass: one pallas_call for the whole network
# ----------------------------------------------------------------------------
@jax.jit
def smallnet_forward(params, pressure_nchw):
    """pressure_nchw: (N, C_in, H, W) float32 -> (N, inplanes*8) features."""
    n = pressure_nchw.shape[0]
    h_img, w_img = pressure_nchw.shape[2], pressure_nchw.shape[3]
    stem_hw, blk_plan = _arch_plan(h_img, w_img)
    h0, w0 = stem_hw
    s0 = h0 * w0
    h1, w1 = _conv_out(h0, w0, 3, 2, 1)
    s1 = h1 * w1
    s1_blk = _ceil8(s1)
    c_final = params["blocks"][-1]["conv2"]["w"].shape[1]

    # Stem im2col stays in XLA (it only touches the raw input); everything
    # downstream is fused into the Pallas kernel below.
    a_stem = _stem_im2col(pressure_nchw, h0, w0)            # (N, S0, 49*C_in)

    # ---- gather ("selection im2col") matrices, deduplicated ----------------
    g_keys, g_index = [], {}

    def reg_gather(h, w, k, s, p):
        key = (h, w, k, s, p)
        if key not in g_index:
            g_index[key] = len(g_keys)
            g_keys.append(key)
        return g_index[key]

    g_mp = reg_gather(h0, w0, 3, 2, 1)                      # maxpool windows

    blocks_static, w_list = [], []
    for bp, bw in zip(blk_plan, params["blocks"]):
        cin = bw["conv1"]["w"].shape[0] // 9
        cout = bw["conv1"]["w"].shape[1]
        s_in = bp["h_in"] * bp["w_in"]
        s_out = bp["h_out"] * bp["w_out"]
        stride = bp["stride"]
        info = {
            "cin": cin, "cout": cout, "s_out": s_out,
            # conv1 gather (stride s); None -> 1x1 map, centre tap only
            "g1": None if (s_in == 1 and stride == 1)
            else reg_gather(bp["h_in"], bp["w_in"], 3, stride, 1),
            # conv2 gather (always stride 1 on the output map)
            "g2": None if s_out == 1
            else reg_gather(bp["h_out"], bp["w_out"], 3, 1, 1),
            "down": "down" in bw,
        }
        w_list += [bw["conv1"]["w"], bw["conv1"]["b"],
                   bw["conv2"]["w"], bw["conv2"]["b"]]
        if info["down"]:
            info["gd"] = reg_gather(bp["h_in"], bp["w_in"], 1, stride, 0)
            w_list += [bw["down"]["w"], bw["down"]["b"]]
        blocks_static.append(info)

    g_arrays = [jnp.asarray(_gather_matrix(*k), dtype=MXU_DTYPE) for k in g_keys]
    n_g, n_w = len(g_arrays), len(w_list)

    inputs = [a_stem, params["stem"]["w"], params["stem"]["b"]] + g_arrays + w_list
    in_specs = [pl.BlockSpec((None, s0, a_stem.shape[2]), lambda i: (i, 0, 0))]
    in_specs += [pl.BlockSpec(x.shape, lambda i: (0, 0)) for x in inputs[1:]]

    def kernel(*refs):
        a_ref, sw_ref, sb_ref = refs[0], refs[1], refs[2]
        g_refs = refs[3:3 + n_g]
        w_refs = refs[3 + n_g:3 + n_g + n_w]
        o_ref = refs[-1]

        def mm(x, w):
            return jnp.dot(x.astype(MXU_DTYPE), w.astype(MXU_DTYPE),
                           preferred_element_type=jnp.float32)

        def conv3x3(x, g_ref, w_ref, b_ref, cin, s_out, relu):
            w = w_ref[...]
            if g_ref is None:                       # 1x1 map: centre tap only
                out = mm(x, w[4 * cin:5 * cin, :])
            else:
                s_blk = _ceil8(s_out)
                p = mm(g_ref[...], x)               # (9*s_blk, cin) tap gather
                out = mm(p[0:s_out, :], w[0:cin, :])
                for t in range(1, 9):
                    out = out + mm(p[t * s_blk:t * s_blk + s_out, :],
                                   w[t * cin:(t + 1) * cin, :])
            out = out + b_ref[...]
            return jnp.maximum(out, 0.0) if relu else out

        # stem: conv7x7/2 (+ folded BN) + ReLU
        x = jnp.maximum(mm(a_ref[...], sw_ref[...]) + sb_ref[...], 0.0)

        # maxpool 3x3/2 (zero rows in the gather == zero padding, safe post-ReLU)
        p = mm(g_refs[g_mp][...], x)
        x = p[0:s1, :]
        for t in range(1, 9):
            x = jnp.maximum(x, p[t * s1_blk:t * s1_blk + s1, :])

        # 4 stages x 2 BasicBlocks, fully fused (BN folded, residual+ReLU inline)
        wi = 0
        for blk in blocks_static:
            cin, cout, s_out = blk["cin"], blk["cout"], blk["s_out"]
            g1 = None if blk["g1"] is None else g_refs[blk["g1"]]
            g2 = None if blk["g2"] is None else g_refs[blk["g2"]]
            w1, b1, w2, b2 = w_refs[wi:wi + 4]
            wi += 4
            h = conv3x3(x, g1, w1, b1, cin, s_out, relu=True)
            h = conv3x3(h, g2, w2, b2, cout, s_out, relu=False)
            if blk["down"]:
                wd, bd = w_refs[wi:wi + 2]
                wi += 2
                sel = mm(g_refs[blk["gd"]][...], x)[0:s_out, :]
                idt = mm(sel, wd[...]) + bd[...]
            else:
                idt = x
            x = jnp.maximum(h + idt, 0.0)           # fused residual add + ReLU

        # adaptive avg pool + flatten + fc == Threshold(-1e20, -1e20)
        feat = jnp.sum(x, axis=0, keepdims=True) * (1.0 / x.shape[0])
        o_ref[...] = jnp.where(feat > THRESHOLD, feat, THRESHOLD)

    out = pl.pallas_call(
        kernel,
        out_shape=jax.ShapeDtypeStruct((n, 1, c_final), jnp.float32),
        grid=(n,),
        in_specs=in_specs,
        out_specs=pl.BlockSpec((None, 1, c_final), lambda i: (i, 0, 0)),
        compiler_params=pltpu.CompilerParams(
            dimension_semantics=("parallel",),  # batch split across TCs (v7x)
        ),
    )(*inputs)
    return out.reshape(n, c_final)


# ----------------------------------------------------------------------------
# Deterministic parameter initialization (synthetic; shapes from resnet18)
# ----------------------------------------------------------------------------
def init_params(key, inplanes=16, in_channels=1):
    keys = list(jax.random.split(key, 512))
    kidx = [0]

    def nk():
        k = keys[kidx[0]]
        kidx[0] += 1
        return k

    def make_conv_bn(cin, cout, ksize):
        fan_in = cin * ksize * ksize
        w = jax.random.normal(nk(), (cout, cin, ksize, ksize), jnp.float32) * \
            (2.0 / fan_in) ** 0.5
        gamma = 1.0 + 0.1 * jax.random.normal(nk(), (cout,), jnp.float32)
        beta = 0.1 * jax.random.normal(nk(), (cout,), jnp.float32)
        mean = 0.1 * jax.random.normal(nk(), (cout,), jnp.float32)
        var = 1.0 + 0.5 * jax.random.uniform(nk(), (cout,), jnp.float32)
        scale = gamma / jnp.sqrt(var + BN_EPS)
        shift = beta - mean * scale
        # (Cout, Cin, KH, KW) -> (KH*KW*Cin, Cout), row order (kh, kw, c),
        # with the eval-mode BN scale folded straight into the weights.
        wmat = jnp.transpose(w, (2, 3, 1, 0)).reshape(ksize * ksize * cin, cout)
        wmat = wmat * scale[None, :]
        return {"w": wmat.astype(MXU_DTYPE),
                "b": shift.reshape(1, cout).astype(jnp.float32)}

    params = {"stem": make_conv_bn(in_channels, inplanes, 7), "blocks": []}
    in_ch = inplanes
    for planes, first_stride in [(inplanes, 1), (inplanes * 2, 2),
                                 (inplanes * 4, 2), (inplanes * 8, 2)]:
        for b in range(2):
            s = first_stride if b == 0 else 1
            blk = {"conv1": make_conv_bn(in_ch, planes, 3),
                   "conv2": make_conv_bn(planes, planes, 3)}
            if s != 1 or in_ch != planes:
                blk["down"] = make_conv_bn(in_ch, planes, 1)
            params["blocks"].append(blk)
            in_ch = planes
    return params


# ----------------------------------------------------------------------------
if __name__ == "__main__":
    inplanes = 16
    key = jax.random.PRNGKey(0)
    kp, kx = jax.random.split(key)

    params = init_params(kp, inplanes=inplanes, in_channels=1)

    # pressure: (batch=2, channels=1, 32, 32) tactile frames, NCHW.
    pressure = jax.random.uniform(kx, (2, 1, 32, 32), jnp.float32)

    feat = smallnet_forward(params, pressure)
    feat = jax.block_until_ready(feat)

    assert feat.shape == (2, inplanes * 8), feat.shape
    assert bool(jnp.all(jnp.isfinite(feat))), "non-finite output"
    print("KERNEL_OK")
</pallas_src>

<mosaic_0001>
module attributes {stable_mosaic.version = 11 : i64} {
  func.func @kernel(%arg0: i32, %arg1: memref<1x256x49xf32, #tpu.memory_space<vmem>>, %arg2: memref<49x16xbf16, #tpu.memory_space<vmem>>, %arg3: memref<1x16xf32, #tpu.memory_space<vmem>>, %arg4: memref<576x256xbf16, #tpu.memory_space<vmem>>, %arg5: memref<576x64xbf16, #tpu.memory_space<vmem>>, %arg6: memref<144x64xbf16, #tpu.memory_space<vmem>>, %arg7: memref<144x16xbf16, #tpu.memory_space<vmem>>, %arg8: memref<16x64xbf16, #tpu.memory_space<vmem>>, %arg9: memref<72x16xbf16, #tpu.memory_space<vmem>>, %arg10: memref<72x4xbf16, #tpu.memory_space<vmem>>, %arg11: memref<8x16xbf16, #tpu.memory_space<vmem>>, %arg12: memref<72x4xbf16, #tpu.memory_space<vmem>>, %arg13: memref<8x4xbf16, #tpu.memory_space<vmem>>, %arg14: memref<144x16xbf16, #tpu.memory_space<vmem>>, %arg15: memref<1x16xf32, #tpu.memory_space<vmem>>, %arg16: memref<144x16xbf16, #tpu.memory_space<vmem>>, %arg17: memref<1x16xf32, #tpu.memory_space<vmem>>, %arg18: memref<144x16xbf16, #tpu.memory_space<vmem>>, %arg19: memref<1x16xf32, #tpu.memory_space<vmem>>, %arg20: memref<144x16xbf16, #tpu.memory_space<vmem>>, %arg21: memref<1x16xf32, #tpu.memory_space<vmem>>, %arg22: memref<144x32xbf16, #tpu.memory_space<vmem>>, %arg23: memref<1x32xf32, #tpu.memory_space<vmem>>, %arg24: memref<288x32xbf16, #tpu.memory_space<vmem>>, %arg25: memref<1x32xf32, #tpu.memory_space<vmem>>, %arg26: memref<16x32xbf16, #tpu.memory_space<vmem>>, %arg27: memref<1x32xf32, #tpu.memory_space<vmem>>, %arg28: memref<288x32xbf16, #tpu.memory_space<vmem>>, %arg29: memref<1x32xf32, #tpu.memory_space<vmem>>, %arg30: memref<288x32xbf16, #tpu.memory_space<vmem>>, %arg31: memref<1x32xf32, #tpu.memory_space<vmem>>, %arg32: memref<288x64xbf16, #tpu.memory_space<vmem>>, %arg33: memref<1x64xf32, #tpu.memory_space<vmem>>, %arg34: memref<576x64xbf16, #tpu.memory_space<vmem>>, %arg35: memref<1x64xf32, #tpu.memory_space<vmem>>, %arg36: memref<32x64xbf16, #tpu.memory_space<vmem>>, %arg37: memref<1x64xf32, #tpu.memory_space<vmem>>, %arg38: memref<576x64xbf16, #tpu.memory_space<vmem>>, %arg39: memref<1x64xf32, #tpu.memory_space<vmem>>, %arg40: memref<576x64xbf16, #tpu.memory_space<vmem>>, %arg41: memref<1x64xf32, #tpu.memory_space<vmem>>, %arg42: memref<576x128xbf16, #tpu.memory_space<vmem>>, %arg43: memref<1x128xf32, #tpu.memory_space<vmem>>, %arg44: memref<1152x128xbf16, #tpu.memory_space<vmem>>, %arg45: memref<1x128xf32, #tpu.memory_space<vmem>>, %arg46: memref<64x128xbf16, #tpu.memory_space<vmem>>, %arg47: memref<1x128xf32, #tpu.memory_space<vmem>>, %arg48: memref<1152x128xbf16, #tpu.memory_space<vmem>>, %arg49: memref<1x128xf32, #tpu.memory_space<vmem>>, %arg50: memref<1152x128xbf16, #tpu.memory_space<vmem>>, %arg51: memref<1x128xf32, #tpu.memory_space<vmem>>, %arg52: memref<1x1x128xf32, #tpu.memory_space<vmem>>) attributes {dimension_semantics = [#tpu.dimension_semantics<parallel>], iteration_bounds = array<i64: 2>, scalar_prefetch = 0 : i64, scratch_operands = 0 : i64, tpu.core_type = #tpu.core_type<tc>, window_params = [{transform_indices = @transform_0, window_bounds = array<i64: 1, 256, 49>}, {pipeline_mode = #tpu.pipeline_mode<synchronous>, transform_indices = @transform_1, window_bounds = array<i64: 49, 16>}, {pipeline_mode = #tpu.pipeline_mode<synchronous>, transform_indices = @transform_2, window_bounds = array<i64: 1, 16>}, {pipeline_mode = #tpu.pipeline_mode<synchronous>, transform_indices = @transform_3, window_bounds = array<i64: 576, 256>}, {pipeline_mode = #tpu.pipeline_mode<synchronous>, transform_indices = @transform_4, window_bounds = array<i64: 576, 64>}, {pipeline_mode = #tpu.pipeline_mode<synchronous>, transform_indices = @transform_5, window_bounds = array<i64: 144, 64>}, {pipeline_mode = #tpu.pipeline_mode<synchronous>, transform_indices = @transform_6, window_bounds = array<i64: 144, 16>}, {pipeline_mode = #tpu.pipeline_mode<synchronous>, transform_indices = @transform_7, window_bounds = array<i64: 16, 64>}, {pipeline_mode = #tpu.pipeline_mode<synchronous>, transform_indices = @transform_8, window_bounds = array<i64: 72, 16>}, {pipeline_mode = #tpu.pipeline_mode<synchronous>, transform_indices = @transform_9, window_bounds = array<i64: 72, 4>}, {pipeline_mode = #tpu.pipeline_mode<synchronous>, transform_indices = @transform_10, window_bounds = array<i64: 8, 16>}, {pipeline_mode = #tpu.pipeline_mode<synchronous>, transform_indices = @transform_11, window_bounds = array<i64: 72, 4>}, {pipeline_mode = #tpu.pipeline_mode<synchronous>, transform_indices = @transform_12, window_bounds = array<i64: 8, 4>}, {pipeline_mode = #tpu.pipeline_mode<synchronous>, transform_indices = @transform_13, window_bounds = array<i64: 144, 16>}, {pipeline_mode = #tpu.pipeline_mode<synchronous>, transform_indices = @transform_14, window_bounds = array<i64: 1, 16>}, {pipeline_mode = #tpu.pipeline_mode<synchronous>, transform_indices = @transform_15, window_bounds = array<i64: 144, 16>}, {pipeline_mode = #tpu.pipeline_mode<synchronous>, transform_indices = @transform_16, window_bounds = array<i64: 1, 16>}, {pipeline_mode = #tpu.pipeline_mode<synchronous>, transform_indices = @transform_17, window_bounds = array<i64: 144, 16>}, {pipeline_mode = #tpu.pipeline_mode<synchronous>, transform_indices = @transform_18, window_bounds = array<i64: 1, 16>}, {pipeline_mode = #tpu.pipeline_mode<synchronous>, transform_indices = @transform_19, window_bounds = array<i64: 144, 16>}, {pipeline_mode = #tpu.pipeline_mode<synchronous>, transform_indices = @transform_20, window_bounds = array<i64: 1, 16>}, {pipeline_mode = #tpu.pipeline_mode<synchronous>, transform_indices = @transform_21, window_bounds = array<i64: 144, 32>}, {pipeline_mode = #tpu.pipeline_mode<synchronous>, transform_indices = @transform_22, window_bounds = array<i64: 1, 32>}, {pipeline_mode = #tpu.pipeline_mode<synchronous>, transform_indices = @transform_23, window_bounds = array<i64: 288, 32>}, {pipeline_mode = #tpu.pipeline_mode<synchronous>, transform_indices = @transform_24, window_bounds = array<i64: 1, 32>}, {pipeline_mode = #tpu.pipeline_mode<synchronous>, transform_indices = @transform_25, window_bounds = array<i64: 16, 32>}, {pipeline_mode = #tpu.pipeline_mode<synchronous>, transform_indices = @transform_26, window_bounds = array<i64: 1, 32>}, {pipeline_mode = #tpu.pipeline_mode<synchronous>, transform_indices = @transform_27, window_bounds = array<i64: 288, 32>}, {pipeline_mode = #tpu.pipeline_mode<synchronous>, transform_indices = @transform_28, window_bounds = array<i64: 1, 32>}, {pipeline_mode = #tpu.pipeline_mode<synchronous>, transform_indices = @transform_29, window_bounds = array<i64: 288, 32>}, {pipeline_mode = #tpu.pipeline_mode<synchronous>, transform_indices = @transform_30, window_bounds = array<i64: 1, 32>}, {pipeline_mode = #tpu.pipeline_mode<synchronous>, transform_indices = @transform_31, window_bounds = array<i64: 288, 64>}, {pipeline_mode = #tpu.pipeline_mode<synchronous>, transform_indices = @transform_32, window_bounds = array<i64: 1, 64>}, {pipeline_mode = #tpu.pipeline_mode<synchronous>, transform_indices = @transform_33, window_bounds = array<i64: 576, 64>}, {pipeline_mode = #tpu.pipeline_mode<synchronous>, transform_indices = @transform_34, window_bounds = array<i64: 1, 64>}, {pipeline_mode = #tpu.pipeline_mode<synchronous>, transform_indices = @transform_35, window_bounds = array<i64: 32, 64>}, {pipeline_mode = #tpu.pipeline_mode<synchronous>, transform_indices = @transform_36, window_bounds = array<i64: 1, 64>}, {pipeline_mode = #tpu.pipeline_mode<synchronous>, transform_indices = @transform_37, window_bounds = array<i64: 576, 64>}, {pipeline_mode = #tpu.pipeline_mode<synchronous>, transform_indices = @transform_38, window_bounds = array<i64: 1, 64>}, {pipeline_mode = #tpu.pipeline_mode<synchronous>, transform_indices = @transform_39, window_bounds = array<i64: 576, 64>}, {pipeline_mode = #tpu.pipeline_mode<synchronous>, transform_indices = @transform_40, window_bounds = array<i64: 1, 64>}, {pipeline_mode = #tpu.pipeline_mode<synchronous>, transform_indices = @transform_41, window_bounds = array<i64: 576, 128>}, {pipeline_mode = #tpu.pipeline_mode<synchronous>, transform_indices = @transform_42, window_bounds = array<i64: 1, 128>}, {pipeline_mode = #tpu.pipeline_mode<synchronous>, transform_indices = @transform_43, window_bounds = array<i64: 1152, 128>}, {pipeline_mode = #tpu.pipeline_mode<synchronous>, transform_indices = @transform_44, window_bounds = array<i64: 1, 128>}, {pipeline_mode = #tpu.pipeline_mode<synchronous>, transform_indices = @transform_45, window_bounds = array<i64: 64, 128>}, {pipeline_mode = #tpu.pipeline_mode<synchronous>, transform_indices = @transform_46, window_bounds = array<i64: 1, 128>}, {pipeline_mode = #tpu.pipeline_mode<synchronous>, transform_indices = @transform_47, window_bounds = array<i64: 1152, 128>}, {pipeline_mode = #tpu.pipeline_mode<synchronous>, transform_indices = @transform_48, window_bounds = array<i64: 1, 128>}, {pipeline_mode = #tpu.pipeline_mode<synchronous>, transform_indices = @transform_49, window_bounds = array<i64: 1152, 128>}, {pipeline_mode = #tpu.pipeline_mode<synchronous>, transform_indices = @transform_50, window_bounds = array<i64: 1, 128>}, {transform_indices = @transform_51, window_bounds = array<i64: 1, 1, 128>}]} {
    %c0 = arith.constant 0 : index
    %c0_0 = arith.constant 0 : index
    %c0_1 = arith.constant 0 : index
    %0 = vector.load %arg1[%c0, %c0_0, %c0_1] : memref<1x256x49xf32, #tpu.memory_space<vmem>>, vector<1x256x49xf32>
    %1 = vector.shape_cast %0 : vector<1x256x49xf32> to vector<256x49xf32>
    %c0_2 = arith.constant 0 : index
    %c0_3 = arith.constant 0 : index
    %2 = vector.load %arg2[%c0_2, %c0_3] : memref<49x16xbf16, #tpu.memory_space<vmem>>, vector<49x16xbf16>
    %3 = arith.truncf %1 : vector<256x49xf32> to vector<256x49xbf16>
    %cst = arith.constant dense<0.000000e+00> : vector<256x16xf32>
    %4 = tpu.matmul %3, %2, %cst {dimension_numbers = #tpu.dot_dimension_numbers<[1], [0], [0], [1], [0, 0, 1, 1], [], []>} : vector<256x49xbf16>, vector<49x16xbf16>, vector<256x16xf32> -> vector<256x16xf32>
    %c0_4 = arith.constant 0 : index
    %c0_5 = arith.constant 0 : index
    %5 = vector.load %arg3[%c0_4, %c0_5] : memref<1x16xf32, #tpu.memory_space<vmem>>, vector<1x16xf32>
    %6 = vector.broadcast %5 : vector<1x16xf32> to vector<256x16xf32>
    %7 = arith.addf %4, %6 : vector<256x16xf32>
    %cst_6 = arith.constant 0.000000e+00 : f32
    %8 = vector.broadcast %cst_6 : f32 to vector<256x16xf32>
    %9 = arith.maximumf %7, %8 : vector<256x16xf32>
    %c0_7 = arith.constant 0 : index
    %c0_8 = arith.constant 0 : index
    %10 = vector.load %arg4[%c0_7, %c0_8] : memref<576x256xbf16, #tpu.memory_space<vmem>>, vector<576x256xbf16>
    %11 = arith.truncf %9 : vector<256x16xf32> to vector<256x16xbf16>
    %cst_9 = arith.constant dense<0.000000e+00> : vector<576x16xf32>
    %12 = tpu.matmul %10, %11, %cst_9 {dimension_numbers = #tpu.dot_dimension_numbers<[1], [0], [0], [1], [0, 0, 1, 1], [], []>} : vector<576x256xbf16>, vector<256x16xbf16>, vector<576x16xf32> -> vector<576x16xf32>
    %13 = vector.extract_strided_slice %12 {offsets = [0, 0], sizes = [64, 16], strides = [1, 1]} : vector<576x16xf32> to vector<64x16xf32>
    %14 = vector.extract_strided_slice %12 {offsets = [64, 0], sizes = [64, 16], strides = [1, 1]} : vector<576x16xf32> to vector<64x16xf32>
    %15 = arith.maximumf %13, %14 : vector<64x16xf32>
    %16 = vector.extract_strided_slice %12 {offsets = [128, 0], sizes = [64, 16], strides = [1, 1]} : vector<576x16xf32> to vector<64x16xf32>
    %17 = arith.maximumf %15, %16 : vector<64x16xf32>
    %18 = vector.extract_strided_slice %12 {offsets = [192, 0], sizes = [64, 16], strides = [1, 1]} : vector<576x16xf32> to vector<64x16xf32>
    %19 = arith.maximumf %17, %18 : vector<64x16xf32>
    %20 = vector.extract_strided_slice %12 {offsets = [256, 0], sizes = [64, 16], strides = [1, 1]} : vector<576x16xf32> to vector<64x16xf32>
    %21 = arith.maximumf %19, %20 : vector<64x16xf32>
    %22 = vector.extract_strided_slice %12 {offsets = [320, 0], sizes = [64, 16], strides = [1, 1]} : vector<576x16xf32> to vector<64x16xf32>
    %23 = arith.maximumf %21, %22 : vector<64x16xf32>
    %24 = vector.extract_strided_slice %12 {offsets = [384, 0], sizes = [64, 16], strides = [1, 1]} : vector<576x16xf32> to vector<64x16xf32>
    %25 = arith.maximumf %23, %24 : vector<64x16xf32>
    %26 = vector.extract_strided_slice %12 {offsets = [448, 0], sizes = [64, 16], strides = [1, 1]} : vector<576x16xf32> to vector<64x16xf32>
    %27 = arith.maximumf %25, %26 : vector<64x16xf32>
    %28 = vector.extract_strided_slice %12 {offsets = [512, 0], sizes = [64, 16], strides = [1, 1]} : vector<576x16xf32> to vector<64x16xf32>
    %29 = arith.maximumf %27, %28 : vector<64x16xf32>
    %c0_10 = arith.constant 0 : index
    %c0_11 = arith.constant 0 : index
    %30 = vector.load %arg14[%c0_10, %c0_11] : memref<144x16xbf16, #tpu.memory_space<vmem>>, vector<144x16xbf16>
    %c0_12 = arith.constant 0 : index
    %c0_13 = arith.constant 0 : index
    %31 = vector.load %arg5[%c0_12, %c0_13] : memref<576x64xbf16, #tpu.memory_space<vmem>>, vector<576x64xbf16>
    %32 = arith.truncf %29 : vector<64x16xf32> to vector<64x16xbf16>
    %cst_14 = arith.constant dense<0.000000e+00> : vector<576x16xf32>
    %33 = tpu.matmul %31, %32, %cst_14 {dimension_numbers = #tpu.dot_dimension_numbers<[1], [0], [0], [1], [0, 0, 1, 1], [], []>} : vector<576x64xbf16>, vector<64x16xbf16>, vector<576x16xf32> -> vector<576x16xf32>
    %34 = vector.extract_strided_slice %33 {offsets = [0, 0], sizes = [64, 16], strides = [1, 1]} : vector<576x16xf32> to vector<64x16xf32>
    %35 = vector.extract_strided_slice %30 {offsets = [0, 0], sizes = [16, 16], strides = [1, 1]} : vector<144x16xbf16> to vector<16x16xbf16>
    %36 = arith.truncf %34 : vector<64x16xf32> to vector<64x16xbf16>
    %cst_15 = arith.constant dense<0.000000e+00> : vector<64x16xf32>
    %37 = tpu.matmul %36, %35, %cst_15 {dimension_numbers = #tpu.dot_dimension_numbers<[1], [0], [0], [1], [0, 0, 1, 1], [], []>} : vector<64x16xbf16>, vector<16x16xbf16>, vector<64x16xf32> -> vector<64x16xf32>
    %38 = vector.extract_strided_slice %33 {offsets = [64, 0], sizes = [64, 16], strides = [1, 1]} : vector<576x16xf32> to vector<64x16xf32>
    %39 = vector.extract_strided_slice %30 {offsets = [16, 0], sizes = [16, 16], strides = [1, 1]} : vector<144x16xbf16> to vector<16x16xbf16>
    %40 = arith.truncf %38 : vector<64x16xf32> to vector<64x16xbf16>
    %cst_16 = arith.constant dense<0.000000e+00> : vector<64x16xf32>
    %41 = tpu.matmul %40, %39, %cst_16 {dimension_numbers = #tpu.dot_dimension_numbers<[1], [0], [0], [1], [0, 0, 1, 1], [], []>} : vector<64x16xbf16>, vector<16x16xbf16>, vector<64x16xf32> -> vector<64x16xf32>
    %42 = arith.addf %37, %41 : vector<64x16xf32>
    %43 = vector.extract_strided_slice %33 {offsets = [128, 0], sizes = [64, 16], strides = [1, 1]} : vector<576x16xf32> to vector<64x16xf32>
    %44 = vector.extract_strided_slice %30 {offsets = [32, 0], sizes = [16, 16], strides = [1, 1]} : vector<144x16xbf16> to vector<16x16xbf16>
    %45 = arith.truncf %43 : vector<64x16xf32> to vector<64x16xbf16>
    %cst_17 = arith.constant dense<0.000000e+00> : vector<64x16xf32>
    %46 = tpu.matmul %45, %44, %cst_17 {dimension_numbers = #tpu.dot_dimension_numbers<[1], [0], [0], [1], [0, 0, 1, 1], [], []>} : vector<64x16xbf16>, vector<16x16xbf16>, vector<64x16xf32> -> vector<64x16xf32>
    %47 = arith.addf %42, %46 : vector<64x16xf32>
    %48 = vector.extract_strided_slice %33 {offsets = [192, 0], sizes = [64, 16], strides = [1, 1]} : vector<576x16xf32> to vector<64x16xf32>
    %49 = vector.extract_strided_slice %30 {offsets = [48, 0], sizes = [16, 16], strides = [1, 1]} : vector<144x16xbf16> to vector<16x16xbf16>
    %50 = arith.truncf %48 : vector<64x16xf32> to vector<64x16xbf16>
    %cst_18 = arith.constant dense<0.000000e+00> : vector<64x16xf32>
    %51 = tpu.matmul %50, %49, %cst_18 {dimension_numbers = #tpu.dot_dimension_numbers<[1], [0], [0], [1], [0, 0, 1, 1], [], []>} : vector<64x16xbf16>, vector<16x16xbf16>, vector<64x16xf32> -> vector<64x16xf32>
    %52 = arith.addf %47, %51 : vector<64x16xf32>
    %53 = vector.extract_strided_slice %33 {offsets = [256, 0], sizes = [64, 16], strides = [1, 1]} : vector<576x16xf32> to vector<64x16xf32>
    %54 = vector.extract_strided_slice %30 {offsets = [64, 0], sizes = [16, 16], strides = [1, 1]} : vector<144x16xbf16> to vector<16x16xbf16>
    %55 = arith.truncf %53 : vector<64x16xf32> to vector<64x16xbf16>
    %cst_19 = arith.constant dense<0.000000e+00> : vector<64x16xf32>
    %56 = tpu.matmul %55, %54, %cst_19 {dimension_numbers = #tpu.dot_dimension_numbers<[1], [0], [0], [1], [0, 0, 1, 1], [], []>} : vector<64x16xbf16>, vector<16x16xbf16>, vector<64x16xf32> -> vector<64x16xf32>
    %57 = arith.addf %52, %56 : vector<64x16xf32>
    %58 = vector.extract_strided_slice %33 {offsets = [320, 0], sizes = [64, 16], strides = [1, 1]} : vector<576x16xf32> to vector<64x16xf32>
    %59 = vector.extract_strided_slice %30 {offsets = [80, 0], sizes = [16, 16], strides = [1, 1]} : vector<144x16xbf16> to vector<16x16xbf16>
    %60 = arith.truncf %58 : vector<64x16xf32> to vector<64x16xbf16>
    %cst_20 = arith.constant dense<0.000000e+00> : vector<64x16xf32>
    %61 = tpu.matmul %60, %59, %cst_20 {dimension_numbers = #tpu.dot_dimension_numbers<[1], [0], [0], [1], [0, 0, 1, 1], [], []>} : vector<64x16xbf16>, vector<16x16xbf16>, vector<64x16xf32> -> vector<64x16xf32>
    %62 = arith.addf %57, %61 : vector<64x16xf32>
    %63 = vector.extract_strided_slice %33 {offsets = [384, 0], sizes = [64, 16], strides = [1, 1]} : vector<576x16xf32> to vector<64x16xf32>
    %64 = vector.extract_strided_slice %30 {offsets = [96, 0], sizes = [16, 16], strides = [1, 1]} : vector<144x16xbf16> to vector<16x16xbf16>
    %65 = arith.truncf %63 : vector<64x16xf32> to vector<64x16xbf16>
    %cst_21 = arith.constant dense<0.000000e+00> : vector<64x16xf32>
    %66 = tpu.matmul %65, %64, %cst_21 {dimension_numbers = #tpu.dot_dimension_numbers<[1], [0], [0], [1], [0, 0, 1, 1], [], []>} : vector<64x16xbf16>, vector<16x16xbf16>, vector<64x16xf32> -> vector<64x16xf32>
    %67 = arith.addf %62, %66 : vector<64x16xf32>
    %68 = vector.extract_strided_slice %33 {offsets = [448, 0], sizes = [64, 16], strides = [1, 1]} : vector<576x16xf32> to vector<64x16xf32>
    %69 = vector.extract_strided_slice %30 {offsets = [112, 0], sizes = [16, 16], strides = [1, 1]} : vector<144x16xbf16> to vector<16x16xbf16>
    %70 = arith.truncf %68 : vector<64x16xf32> to vector<64x16xbf16>
    %cst_22 = arith.constant dense<0.000000e+00> : vector<64x16xf32>
    %71 = tpu.matmul %70, %69, %cst_22 {dimension_numbers = #tpu.dot_dimension_numbers<[1], [0], [0], [1], [0, 0, 1, 1], [], []>} : vector<64x16xbf16>, vector<16x16xbf16>, vector<64x16xf32> -> vector<64x16xf32>
    %72 = arith.addf %67, %71 : vector<64x16xf32>
    %73 = vector.extract_strided_slice %33 {offsets = [512, 0], sizes = [64, 16], strides = [1, 1]} : vector<576x16xf32> to vector<64x16xf32>
    %74 = vector.extract_strided_slice %30 {offsets = [128, 0], sizes = [16, 16], strides = [1, 1]} : vector<144x16xbf16> to vector<16x16xbf16>
    %75 = arith.truncf %73 : vector<64x16xf32> to vector<64x16xbf16>
    %cst_23 = arith.constant dense<0.000000e+00> : vector<64x16xf32>
    %76 = tpu.matmul %75, %74, %cst_23 {dimension_numbers = #tpu.dot_dimension_numbers<[1], [0], [0], [1], [0, 0, 1, 1], [], []>} : vector<64x16xbf16>, vector<16x16xbf16>, vector<64x16xf32> -> vector<64x16xf32>
    %77 = arith.addf %72, %76 : vector<64x16xf32>
    %c0_24 = arith.constant 0 : index
    %c0_25 = arith.constant 0 : index
    %78 = vector.load %arg15[%c0_24, %c0_25] : memref<1x16xf32, #tpu.memory_space<vmem>>, vector<1x16xf32>
    %79 = vector.broadcast %78 : vector<1x16xf32> to vector<64x16xf32>
    %80 = arith.addf %77, %79 : vector<64x16xf32>
    %cst_26 = arith.constant 0.000000e+00 : f32
    %81 = vector.broadcast %cst_26 : f32 to vector<64x16xf32>
    %82 = arith.maximumf %80, %81 : vector<64x16xf32>
    %c0_27 = arith.constant 0 : index
    %c0_28 = arith.constant 0 : index
    %83 = vector.load %arg16[%c0_27, %c0_28] : memref<144x16xbf16, #tpu.memory_space<vmem>>, vector<144x16xbf16>
    %c0_29 = arith.constant 0 : index
    %c0_30 = arith.constant 0 : index
    %84 = vector.load %arg5[%c0_29, %c0_30] : memref<576x64xbf16, #tpu.memory_space<vmem>>, vector<576x64xbf16>
    %85 = arith.truncf %82 : vector<64x16xf32> to vector<64x16xbf16>
    %cst_31 = arith.constant dense<0.000000e+00> : vector<576x16xf32>
    %86 = tpu.matmul %84, %85, %cst_31 {dimension_numbers = #tpu.dot_dimension_numbers<[1], [0], [0], [1], [0, 0, 1, 1], [], []>} : vector<576x64xbf16>, vector<64x16xbf16>, vector<576x16xf32> -> vector<576x16xf32>
    %87 = vector.extract_strided_slice %86 {offsets = [0, 0], sizes = [64, 16], strides = [1, 1]} : vector<576x16xf32> to vector<64x16xf32>
    %88 = vector.extract_strided_slice %83 {offsets = [0, 0], sizes = [16, 16], strides = [1, 1]} : vector<144x16xbf16> to vector<16x16xbf16>
    %89 = arith.truncf %87 : vector<64x16xf32> to vector<64x16xbf16>
    %cst_32 = arith.constant dense<0.000000e+00> : vector<64x16xf32>
    %90 = tpu.matmul %89, %88, %cst_32 {dimension_numbers = #tpu.dot_dimension_numbers<[1], [0], [0], [1], [0, 0, 1, 1], [], []>} : vector<64x16xbf16>, vector<16x16xbf16>, vector<64x16xf32> -> vector<64x16xf32>
    %91 = vector.extract_strided_slice %86 {offsets = [64, 0], sizes = [64, 16], strides = [1, 1]} : vector<576x16xf32> to vector<64x16xf32>
    %92 = vector.extract_strided_slice %83 {offsets = [16, 0], sizes = [16, 16], strides = [1, 1]} : vector<144x16xbf16> to vector<16x16xbf16>
    %93 = arith.truncf %91 : vector<64x16xf32> to vector<64x16xbf16>
    %cst_33 = arith.constant dense<0.000000e+00> : vector<64x16xf32>
    %94 = tpu.matmul %93, %92, %cst_33 {dimension_numbers = #tpu.dot_dimension_numbers<[1], [0], [0], [1], [0, 0, 1, 1], [], []>} : vector<64x16xbf16>, vector<16x16xbf16>, vector<64x16xf32> -> vector<64x16xf32>
    %95 = arith.addf %90, %94 : vector<64x16xf32>
    %96 = vector.extract_strided_slice %86 {offsets = [128, 0], sizes = [64, 16], strides = [1, 1]} : vector<576x16xf32> to vector<64x16xf32>
    %97 = vector.extract_strided_slice %83 {offsets = [32, 0], sizes = [16, 16], strides = [1, 1]} : vector<144x16xbf16> to vector<16x16xbf16>
    %98 = arith.truncf %96 : vector<64x16xf32> to vector<64x16xbf16>
    %cst_34 = arith.constant dense<0.000000e+00> : vector<64x16xf32>
    %99 = tpu.matmul %98, %97, %cst_34 {dimension_numbers = #tpu.dot_dimension_numbers<[1], [0], [0], [1], [0, 0, 1, 1], [], []>} : vector<64x16xbf16>, vector<16x16xbf16>, vector<64x16xf32> -> vector<64x16xf32>
    %100 = arith.addf %95, %99 : vector<64x16xf32>
    %101 = vector.extract_strided_slice %86 {offsets = [192, 0], sizes = [64, 16], strides = [1, 1]} : vector<576x16xf32> to vector<64x16xf32>
    %102 = vector.extract_strided_slice %83 {offsets = [48, 0], sizes = [16, 16], strides = [1, 1]} : vector<144x16xbf16> to vector<16x16xbf16>
    %103 = arith.truncf %101 : vector<64x16xf32> to vector<64x16xbf16>
    %cst_35 = arith.constant dense<0.000000e+00> : vector<64x16xf32>
    %104 = tpu.matmul %103, %102, %cst_35 {dimension_numbers = #tpu.dot_dimension_numbers<[1], [0], [0], [1], [0, 0, 1, 1], [], []>} : vector<64x16xbf16>, vector<16x16xbf16>, vector<64x16xf32> -> vector<64x16xf32>
    %105 = arith.addf %100, %104 : vector<64x16xf32>
    %106 = vector.extract_strided_slice %86 {offsets = [256, 0], sizes = [64, 16], strides = [1, 1]} : vector<576x16xf32> to vector<64x16xf32>
    %107 = vector.extract_strided_slice %83 {offsets = [64, 0], sizes = [16, 16], strides = [1, 1]} : vector<144x16xbf16> to vector<16x16xbf16>
    %108 = arith.truncf %106 : vector<64x16xf32> to vector<64x16xbf16>
    %cst_36 = arith.constant dense<0.000000e+00> : vector<64x16xf32>
    %109 = tpu.matmul %108, %107, %cst_36 {dimension_numbers = #tpu.dot_dimension_numbers<[1], [0], [0], [1], [0, 0, 1, 1], [], []>} : vector<64x16xbf16>, vector<16x16xbf16>, vector<64x16xf32> -> vector<64x16xf32>
    %110 = arith.addf %105, %109 : vector<64x16xf32>
    %111 = vector.extract_strided_slice %86 {offsets = [320, 0], sizes = [64, 16], strides = [1, 1]} : vector<576x16xf32> to vector<64x16xf32>
    %112 = vector.extract_strided_slice %83 {offsets = [80, 0], sizes = [16, 16], strides = [1, 1]} : vector<144x16xbf16> to vector<16x16xbf16>
    %113 = arith.truncf %111 : vector<64x16xf32> to vector<64x16xbf16>
    %cst_37 = arith.constant dense<0.000000e+00> : vector<64x16xf32>
    %114 = tpu.matmul %113, %112, %cst_37 {dimension_numbers = #tpu.dot_dimension_numbers<[1], [0], [0], [1], [0, 0, 1, 1], [], []>} : vector<64x16xbf16>, vector<16x16xbf16>, vector<64x16xf32> -> vector<64x16xf32>
    %115 = arith.addf %110, %114 : vector<64x16xf32>
    %116 = vector.extract_strided_slice %86 {offsets = [384, 0], sizes = [64, 16], strides = [1, 1]} : vector<576x16xf32> to vector<64x16xf32>
    %117 = vector.extract_strided_slice %83 {offsets = [96, 0], sizes = [16, 16], strides = [1, 1]} : vector<144x16xbf16> to vector<16x16xbf16>
    %118 = arith.truncf %116 : vector<64x16xf32> to vector<64x16xbf16>
    %cst_38 = arith.constant dense<0.000000e+00> : vector<64x16xf32>
    %119 = tpu.matmul %118, %117, %cst_38 {dimension_numbers = #tpu.dot_dimension_numbers<[1], [0], [0], [1], [0, 0, 1, 1], [], []>} : vector<64x16xbf16>, vector<16x16xbf16>, vector<64x16xf32> -> vector<64x16xf32>
    %120 = arith.addf %115, %119 : vector<64x16xf32>
    %121 = vector.extract_strided_slice %86 {offsets = [448, 0], sizes = [64, 16], strides = [1, 1]} : vector<576x16xf32> to vector<64x16xf32>
    %122 = vector.extract_strided_slice %83 {offsets = [112, 0], sizes = [16, 16], strides = [1, 1]} : vector<144x16xbf16> to vector<16x16xbf16>
    %123 = arith.truncf %121 : vector<64x16xf32> to vector<64x16xbf16>
    %cst_39 = arith.constant dense<0.000000e+00> : vector<64x16xf32>
    %124 = tpu.matmul %123, %122, %cst_39 {dimension_numbers = #tpu.dot_dimension_numbers<[1], [0], [0], [1], [0, 0, 1, 1], [], []>} : vector<64x16xbf16>, vector<16x16xbf16>, vector<64x16xf32> -> vector<64x16xf32>
    %125 = arith.addf %120, %124 : vector<64x16xf32>
    %126 = vector.extract_strided_slice %86 {offsets = [512, 0], sizes = [64, 16], strides = [1, 1]} : vector<576x16xf32> to vector<64x16xf32>
    %127 = vector.extract_strided_slice %83 {offsets = [128, 0], sizes = [16, 16], strides = [1, 1]} : vector<144x16xbf16> to vector<16x16xbf16>
    %128 = arith.truncf %126 : vector<64x16xf32> to vector<64x16xbf16>
    %cst_40 = arith.constant dense<0.000000e+00> : vector<64x16xf32>
    %129 = tpu.matmul %128, %127, %cst_40 {dimension_numbers = #tpu.dot_dimension_numbers<[1], [0], [0], [1], [0, 0, 1, 1], [], []>} : vector<64x16xbf16>, vector<16x16xbf16>, vector<64x16xf32> -> vector<64x16xf32>
    %130 = arith.addf %125, %129 : vector<64x16xf32>
    %c0_41 = arith.constant 0 : index
    %c0_42 = arith.constant 0 : index
    %131 = vector.load %arg17[%c0_41, %c0_42] : memref<1x16xf32, #tpu.memory_space<vmem>>, vector<1x16xf32>
    %132 = vector.broadcast %131 : vector<1x16xf32> to vector<64x16xf32>
    %133 = arith.addf %130, %132 : vector<64x16xf32>
    %134 = arith.addf %133, %29 : vector<64x16xf32>
    %cst_43 = arith.constant 0.000000e+00 : f32
    %135 = vector.broadcast %cst_43 : f32 to vector<64x16xf32>
    %136 = arith.maximumf %134, %135 : vector<64x16xf32>
    %c0_44 = arith.constant 0 : index
    %c0_45 = arith.constant 0 : index
    %137 = vector.load %arg18[%c0_44, %c0_45] : memref<144x16xbf16, #tpu.memory_space<vmem>>, vector<144x16xbf16>
    %c0_46 = arith.constant 0 : index
    %c0_47 = arith.constant 0 : index
    %138 = vector.load %arg5[%c0_46, %c0_47] : memref<576x64xbf16, #tpu.memory_space<vmem>>, vector<576x64xbf16>
    %139 = arith.truncf %136 : vector<64x16xf32> to vector<64x16xbf16>
    %cst_48 = arith.constant dense<0.000000e+00> : vector<576x16xf32>
    %140 = tpu.matmul %138, %139, %cst_48 {dimension_numbers = #tpu.dot_dimension_numbers<[1], [0], [0], [1], [0, 0, 1, 1], [], []>} : vector<576x64xbf16>, vector<64x16xbf16>, vector<576x16xf32> -> vector<576x16xf32>
    %141 = vector.extract_strided_slice %140 {offsets = [0, 0], sizes = [64, 16], strides = [1, 1]} : vector<576x16xf32> to vector<64x16xf32>
    %142 = vector.extract_strided_slice %137 {offsets = [0, 0], sizes = [16, 16], strides = [1, 1]} : vector<144x16xbf16> to vector<16x16xbf16>
    %143 = arith.truncf %141 : vector<64x16xf32> to vector<64x16xbf16>
    %cst_49 = arith.constant dense<0.000000e+00> : vector<64x16xf32>
    %144 = tpu.matmul %143, %142, %cst_49 {dimension_numbers = #tpu.dot_dimension_numbers<[1], [0], [0], [1], [0, 0, 1, 1], [], []>} : vector<64x16xbf16>, vector<16x16xbf16>, vector<64x16xf32> -> vector<64x16xf32>
    %145 = vector.extract_strided_slice %140 {offsets = [64, 0], sizes = [64, 16], strides = [1, 1]} : vector<576x16xf32> to vector<64x16xf32>
    %146 = vector.extract_strided_slice %137 {offsets = [16, 0], sizes = [16, 16], strides = [1, 1]} : vector<144x16xbf16> to vector<16x16xbf16>
    %147 = arith.truncf %145 : vector<64x16xf32> to vector<64x16xbf16>
    %cst_50 = arith.constant dense<0.000000e+00> : vector<64x16xf32>
    %148 = tpu.matmul %147, %146, %cst_50 {dimension_numbers = #tpu.dot_dimension_numbers<[1], [0], [0], [1], [0, 0, 1, 1], [], []>} : vector<64x16xbf16>, vector<16x16xbf16>, vector<64x16xf32> -> vector<64x16xf32>
    %149 = arith.addf %144, %148 : vector<64x16xf32>
    %150 = vector.extract_strided_slice %140 {offsets = [128, 0], sizes = [64, 16], strides = [1, 1]} : vector<576x16xf32> to vector<64x16xf32>
    %151 = vector.extract_strided_slice %137 {offsets = [32, 0], sizes = [16, 16], strides = [1, 1]} : vector<144x16xbf16> to vector<16x16xbf16>
    %152 = arith.truncf %150 : vector<64x16xf32> to vector<64x16xbf16>
    %cst_51 = arith.constant dense<0.000000e+00> : vector<64x16xf32>
    %153 = tpu.matmul %152, %151, %cst_51 {dimension_numbers = #tpu.dot_dimension_numbers<[1], [0], [0], [1], [0, 0, 1, 1], [], []>} : vector<64x16xbf16>, vector<16x16xbf16>, vector<64x16xf32> -> vector<64x16xf32>
    %154 = arith.addf %149, %153 : vector<64x16xf32>
    %155 = vector.extract_strided_slice %140 {offsets = [192, 0], sizes = [64, 16], strides = [1, 1]} : vector<576x16xf32> to vector<64x16xf32>
    %156 = vector.extract_strided_slice %137 {offsets = [48, 0], sizes = [16, 16], strides = [1, 1]} : vector<144x16xbf16> to vector<16x16xbf16>
    %157 = arith.truncf %155 : vector<64x16xf32> to vector<64x16xbf16>
    %cst_52 = arith.constant dense<0.000000e+00> : vector<64x16xf32>
    %158 = tpu.matmul %157, %156, %cst_52 {dimension_numbers = #tpu.dot_dimension_numbers<[1], [0], [0], [1], [0, 0, 1, 1], [], []>} : vector<64x16xbf16>, vector<16x16xbf16>, vector<64x16xf32> -> vector<64x16xf32>
    %159 = arith.addf %154, %158 : vector<64x16xf32>
    %160 = vector.extract_strided_slice %140 {offsets = [256, 0], sizes = [64, 16], strides = [1, 1]} : vector<576x16xf32> to vector<64x16xf32>
    %161 = vector.extract_strided_slice %137 {offsets = [64, 0], sizes = [16, 16], strides = [1, 1]} : vector<144x16xbf16> to vector<16x16xbf16>
    %162 = arith.truncf %160 : vector<64x16xf32> to vector<64x16xbf16>
    %cst_53 = arith.constant dense<0.000000e+00> : vector<64x16xf32>
    %163 = tpu.matmul %162, %161, %cst_53 {dimension_numbers = #tpu.dot_dimension_numbers<[1], [0], [0], [1], [0, 0, 1, 1], [], []>} : vector<64x16xbf16>, vector<16x16xbf16>, vector<64x16xf32> -> vector<64x16xf32>
    %164 = arith.addf %159, %163 : vector<64x16xf32>
    %165 = vector.extract_strided_slice %140 {offsets = [320, 0], sizes = [64, 16], strides = [1, 1]} : vector<576x16xf32> to vector<64x16xf32>
    %166 = vector.extract_strided_slice %137 {offsets = [80, 0], sizes = [16, 16], strides = [1, 1]} : vector<144x16xbf16> to vector<16x16xbf16>
    %167 = arith.truncf %165 : vector<64x16xf32> to vector<64x16xbf16>
    %cst_54 = arith.constant dense<0.000000e+00> : vector<64x16xf32>
    %168 = tpu.matmul %167, %166, %cst_54 {dimension_numbers = #tpu.dot_dimension_numbers<[1], [0], [0], [1], [0, 0, 1, 1], [], []>} : vector<64x16xbf16>, vector<16x16xbf16>, vector<64x16xf32> -> vector<64x16xf32>
    %169 = arith.addf %164, %168 : vector<64x16xf32>
    %170 = vector.extract_strided_slice %140 {offsets = [384, 0], sizes = [64, 16], strides = [1, 1]} : vector<576x16xf32> to vector<64x16xf32>
    %171 = vector.extract_strided_slice %137 {offsets = [96, 0], sizes = [16, 16], strides = [1, 1]} : vector<144x16xbf16> to vector<16x16xbf16>
    %172 = arith.truncf %170 : vector<64x16xf32> to vector<64x16xbf16>
    %cst_55 = arith.constant dense<0.000000e+00> : vector<64x16xf32>
    %173 = tpu.matmul %172, %171, %cst_55 {dimension_numbers = #tpu.dot_dimension_numbers<[1], [0], [0], [1], [0, 0, 1, 1], [], []>} : vector<64x16xbf16>, vector<16x16xbf16>, vector<64x16xf32> -> vector<64x16xf32>
    %174 = arith.addf %169, %173 : vector<64x16xf32>
    %175 = vector.extract_strided_slice %140 {offsets = [448, 0], sizes = [64, 16], strides = [1, 1]} : vector<576x16xf32> to vector<64x16xf32>
    %176 = vector.extract_strided_slice %137 {offsets = [112, 0], sizes = [16, 16], strides = [1, 1]} : vector<144x16xbf16> to vector<16x16xbf16>
    %177 = arith.truncf %175 : vector<64x16xf32> to vector<64x16xbf16>
    %cst_56 = arith.constant dense<0.000000e+00> : vector<64x16xf32>
    %178 = tpu.matmul %177, %176, %cst_56 {dimension_numbers = #tpu.dot_dimension_numbers<[1], [0], [0], [1], [0, 0, 1, 1], [], []>} : vector<64x16xbf16>, vector<16x16xbf16>, vector<64x16xf32> -> vector<64x16xf32>
    %179 = arith.addf %174, %178 : vector<64x16xf32>
    %180 = vector.extract_strided_slice %140 {offsets = [512, 0], sizes = [64, 16], strides = [1, 1]} : vector<576x16xf32> to vector<64x16xf32>
    %181 = vector.extract_strided_slice %137 {offsets = [128, 0], sizes = [16, 16], strides = [1, 1]} : vector<144x16xbf16> to vector<16x16xbf16>
    %182 = arith.truncf %180 : vector<64x16xf32> to vector<64x16xbf16>
    %cst_57 = arith.constant dense<0.000000e+00> : vector<64x16xf32>
    %183 = tpu.matmul %182, %181, %cst_57 {dimension_numbers = #tpu.dot_dimension_numbers<[1], [0], [0], [1], [0, 0, 1, 1], [], []>} : vector<64x16xbf16>, vector<16x16xbf16>, vector<64x16xf32> -> vector<64x16xf32>
    %184 = arith.addf %179, %183 : vector<64x16xf32>
    %c0_58 = arith.constant 0 : index
    %c0_59 = arith.constant 0 : index
    %185 = vector.load %arg19[%c0_58, %c0_59] : memref<1x16xf32, #tpu.memory_space<vmem>>, vector<1x16xf32>
    %186 = vector.broadcast %185 : vector<1x16xf32> to vector<64x16xf32>
    %187 = arith.addf %184, %186 : vector<64x16xf32>
    %cst_60 = arith.constant 0.000000e+00 : f32
    %188 = vector.broadcast %cst_60 : f32 to vector<64x16xf32>
    %189 = arith.maximumf %187, %188 : vector<64x16xf32>
    %c0_61 = arith.constant 0 : index
    %c0_62 = arith.constant 0 : index
    %190 = vector.load %arg20[%c0_61, %c0_62] : memref<144x16xbf16, #tpu.memory_space<vmem>>, vector<144x16xbf16>
    %c0_63 = arith.constant 0 : index
    %c0_64 = arith.constant 0 : index
    %191 = vector.load %arg5[%c0_63, %c0_64] : memref<576x64xbf16, #tpu.memory_space<vmem>>, vector<576x64xbf16>
    %192 = arith.truncf %189 : vector<64x16xf32> to vector<64x16xbf16>
    %cst_65 = arith.constant dense<0.000000e+00> : vector<576x16xf32>
    %193 = tpu.matmul %191, %192, %cst_65 {dimension_numbers = #tpu.dot_dimension_numbers<[1], [0], [0], [1], [0, 0, 1, 1], [], []>} : vector<576x64xbf16>, vector<64x16xbf16>, vector<576x16xf32> -> vector<576x16xf32>
    %194 = vector.extract_strided_slice %193 {offsets = [0, 0], sizes = [64, 16], strides = [1, 1]} : vector<576x16xf32> to vector<64x16xf32>
    %195 = vector.extract_strided_slice %190 {offsets = [0, 0], sizes = [16, 16], strides = [1, 1]} : vector<144x16xbf16> to vector<16x16xbf16>
    %196 = arith.truncf %194 : vector<64x16xf32> to vector<64x16xbf16>
    %cst_66 = arith.constant dense<0.000000e+00> : vector<64x16xf32>
    %197 = tpu.matmul %196, %195, %cst_66 {dimension_numbers = #tpu.dot_dimension_numbers<[1], [0], [0], [1], [0, 0, 1, 1], [], []>} : vector<64x16xbf16>, vector<16x16xbf16>, vector<64x16xf32> -> vector<64x16xf32>
    %198 = vector.extract_strided_slice %193 {offsets = [64, 0], sizes = [64, 16], strides = [1, 1]} : vector<576x16xf32> to vector<64x16xf32>
    %199 = vector.extract_strided_slice %190 {offsets = [16, 0], sizes = [16, 16], strides = [1, 1]} : vector<144x16xbf16> to vector<16x16xbf16>
    %200 = arith.truncf %198 : vector<64x16xf32> to vector<64x16xbf16>
    %cst_67 = arith.constant dense<0.000000e+00> : vector<64x16xf32>
    %201 = tpu.matmul %200, %199, %cst_67 {dimension_numbers = #tpu.dot_dimension_numbers<[1], [0], [0], [1], [0, 0, 1, 1], [], []>} : vector<64x16xbf16>, vector<16x16xbf16>, vector<64x16xf32> -> vector<64x16xf32>
    %202 = arith.addf %197, %201 : vector<64x16xf32>
    %203 = vector.extract_strided_slice %193 {offsets = [128, 0], sizes = [64, 16], strides = [1, 1]} : vector<576x16xf32> to vector<64x16xf32>
    %204 = vector.extract_strided_slice %190 {offsets = [32, 0], sizes = [16, 16], strides = [1, 1]} : vector<144x16xbf16> to vector<16x16xbf16>
    %205 = arith.truncf %203 : vector<64x16xf32> to vector<64x16xbf16>
    %cst_68 = arith.constant dense<0.000000e+00> : vector<64x16xf32>
    %206 = tpu.matmul %205, %204, %cst_68 {dimension_numbers = #tpu.dot_dimension_numbers<[1], [0], [0], [1], [0, 0, 1, 1], [], []>} : vector<64x16xbf16>, vector<16x16xbf16>, vector<64x16xf32> -> vector<64x16xf32>
    %207 = arith.addf %202, %206 : vector<64x16xf32>
    %208 = vector.extract_strided_slice %193 {offsets = [192, 0], sizes = [64, 16], strides = [1, 1]} : vector<576x16xf32> to vector<64x16xf32>
    %209 = vector.extract_strided_slice %190 {offsets = [48, 0], sizes = [16, 16], strides = [1, 1]} : vector<144x16xbf16> to vector<16x16xbf16>
    %210 = arith.truncf %208 : vector<64x16xf32> to vector<64x16xbf16>
    %cst_69 = arith.constant dense<0.000000e+00> : vector<64x16xf32>
    %211 = tpu.matmul %210, %209, %cst_69 {dimension_numbers = #tpu.dot_dimension_numbers<[1], [0], [0], [1], [0, 0, 1, 1], [], []>} : vector<64x16xbf16>, vector<16x16xbf16>, vector<64x16xf32> -> vector<64x16xf32>
    %212 = arith.addf %207, %211 : vector<64x16xf32>
    %213 = vector.extract_strided_slice %193 {offsets = [256, 0], sizes = [64, 16], strides = [1, 1]} : vector<576x16xf32> to vector<64x16xf32>
    %214 = vector.extract_strided_slice %190 {offsets = [64, 0], sizes = [16, 16], strides = [1, 1]} : vector<144x16xbf16> to vector<16x16xbf16>
    %215 = arith.truncf %213 : vector<64x16xf32> to vector<64x16xbf16>
    %cst_70 = arith.constant dense<0.000000e+00> : vector<64x16xf32>
    %216 = tpu.matmul %215, %214, %cst_70 {dimension_numbers = #tpu.dot_dimension_numbers<[1], [0], [0], [1], [0, 0, 1, 1], [], []>} : vector<64x16xbf16>, vector<16x16xbf16>, vector<64x16xf32> -> vector<64x16xf32>
    %217 = arith.addf %212, %216 : vector<64x16xf32>
    %218 = vector.extract_strided_slice %193 {offsets = [320, 0], sizes = [64, 16], strides = [1, 1]} : vector<576x16xf32> to vector<64x16xf32>
    %219 = vector.extract_strided_slice %190 {offsets = [80, 0], sizes = [16, 16], strides = [1, 1]} : vector<144x16xbf16> to vector<16x16xbf16>
    %220 = arith.truncf %218 : vector<64x16xf32> to vector<64x16xbf16>
    %cst_71 = arith.constant dense<0.000000e+00> : vector<64x16xf32>
    %221 = tpu.matmul %220, %219, %cst_71 {dimension_numbers = #tpu.dot_dimension_numbers<[1], [0], [0], [1], [0, 0, 1, 1], [], []>} : vector<64x16xbf16>, vector<16x16xbf16>, vector<64x16xf32> -> vector<64x16xf32>
    %222 = arith.addf %217, %221 : vector<64x16xf32>
    %223 = vector.extract_strided_slice %193 {offsets = [384, 0], sizes = [64, 16], strides = [1, 1]} : vector<576x16xf32> to vector<64x16xf32>
    %224 = vector.extract_strided_slice %190 {offsets = [96, 0], sizes = [16, 16], strides = [1, 1]} : vector<144x16xbf16> to vector<16x16xbf16>
    %225 = arith.truncf %223 : vector<64x16xf32> to vector<64x16xbf16>
    %cst_72 = arith.constant dense<0.000000e+00> : vector<64x16xf32>
    %226 = tpu.matmul %225, %224, %cst_72 {dimension_numbers = #tpu.dot_dimension_numbers<[1], [0], [0], [1], [0, 0, 1, 1], [], []>} : vector<64x16xbf16>, vector<16x16xbf16>, vector<64x16xf32> -> vector<64x16xf32>
    %227 = arith.addf %222, %226 : vector<64x16xf32>
    %228 = vector.extract_strided_slice %193 {offsets = [448, 0], sizes = [64, 16], strides = [1, 1]} : vector<576x16xf32> to vector<64x16xf32>
    %229 = vector.extract_strided_slice %190 {offsets = [112, 0], sizes = [16, 16], strides = [1, 1]} : vector<144x16xbf16> to vector<16x16xbf16>
    %230 = arith.truncf %228 : vector<64x16xf32> to vector<64x16xbf16>
    %cst_73 = arith.constant dense<0.000000e+00> : vector<64x16xf32>
    %231 = tpu.matmul %230, %229, %cst_73 {dimension_numbers = #tpu.dot_dimension_numbers<[1], [0], [0], [1], [0, 0, 1, 1], [], []>} : vector<64x16xbf16>, vector<16x16xbf16>, vector<64x16xf32> -> vector<64x16xf32>
    %232 = arith.addf %227, %231 : vector<64x16xf32>
    %233 = vector.extract_strided_slice %193 {offsets = [512, 0], sizes = [64, 16], strides = [1, 1]} : vector<576x16xf32> to vector<64x16xf32>
    %234 = vector.extract_strided_slice %190 {offsets = [128, 0], sizes = [16, 16], strides = [1, 1]} : vector<144x16xbf16> to vector<16x16xbf16>
    %235 = arith.truncf %233 : vector<64x16xf32> to vector<64x16xbf16>
    %cst_74 = arith.constant dense<0.000000e+00> : vector<64x16xf32>
    %236 = tpu.matmul %235, %234, %cst_74 {dimension_numbers = #tpu.dot_dimension_numbers<[1], [0], [0], [1], [0, 0, 1, 1], [], []>} : vector<64x16xbf16>, vector<16x16xbf16>, vector<64x16xf32> -> vector<64x16xf32>
    %237 = arith.addf %232, %236 : vector<64x16xf32>
    %c0_75 = arith.constant 0 : index
    %c0_76 = arith.constant 0 : index
    %238 = vector.load %arg21[%c0_75, %c0_76] : memref<1x16xf32, #tpu.memory_space<vmem>>, vector<1x16xf32>
    %239 = vector.broadcast %238 : vector<1x16xf32> to vector<64x16xf32>
    %240 = arith.addf %237, %239 : vector<64x16xf32>
    %241 = arith.addf %240, %136 : vector<64x16xf32>
    %cst_77 = arith.constant 0.000000e+00 : f32
    %242 = vector.broadcast %cst_77 : f32 to vector<64x16xf32>
    %243 = arith.maximumf %241, %242 : vector<64x16xf32>
    %c0_78 = arith.constant 0 : index
    %c0_79 = arith.constant 0 : index
    %244 = vector.load %arg22[%c0_78, %c0_79] : memref<144x32xbf16, #tpu.memory_space<vmem>>, vector<144x32xbf16>
    %c0_80 = arith.constant 0 : index
    %c0_81 = arith.constant 0 : index
    %245 = vector.load %arg6[%c0_80, %c0_81] : memref<144x64xbf16, #tpu.memory_space<vmem>>, vector<144x64xbf16>
    %246 = arith.truncf %243 : vector<64x16xf32> to vector<64x16xbf16>
    %cst_82 = arith.constant dense<0.000000e+00> : vector<144x16xf32>
    %247 = tpu.matmul %245, %246, %cst_82 {dimension_numbers = #tpu.dot_dimension_numbers<[1], [0], [0], [1], [0, 0, 1, 1], [], []>} : vector<144x64xbf16>, vector<64x16xbf16>, vector<144x16xf32> -> vector<144x16xf32>
    %248 = vector.extract_strided_slice %247 {offsets = [0, 0], sizes = [16, 16], strides = [1, 1]} : vector<144x16xf32> to vector<16x16xf32>
    %249 = vector.extract_strided_slice %244 {offsets = [0, 0], sizes = [16, 32], strides = [1, 1]} : vector<144x32xbf16> to vector<16x32xbf16>
    %250 = arith.truncf %248 : vector<16x16xf32> to vector<16x16xbf16>
    %cst_83 = arith.constant dense<0.000000e+00> : vector<16x32xf32>
    %251 = tpu.matmul %250, %249, %cst_83 {dimension_numbers = #tpu.dot_dimension_numbers<[1], [0], [0], [1], [0, 0, 1, 1], [], []>} : vector<16x16xbf16>, vector<16x32xbf16>, vector<16x32xf32> -> vector<16x32xf32>
    %252 = vector.extract_strided_slice %247 {offsets = [16, 0], sizes = [16, 16], strides = [1, 1]} : vector<144x16xf32> to vector<16x16xf32>
    %253 = vector.extract_strided_slice %244 {offsets = [16, 0], sizes = [16, 32], strides = [1, 1]} : vector<144x32xbf16> to vector<16x32xbf16>
    %254 = arith.truncf %252 : vector<16x16xf32> to vector<16x16xbf16>
    %cst_84 = arith.constant dense<0.000000e+00> : vector<16x32xf32>
    %255 = tpu.matmul %254, %253, %cst_84 {dimension_numbers = #tpu.dot_dimension_numbers<[1], [0], [0], [1], [0, 0, 1, 1], [], []>} : vector<16x16xbf16>, vector<16x32xbf16>, vector<16x32xf32> -> vector<16x32xf32>
    %256 = arith.addf %251, %255 : vector<16x32xf32>
    %257 = vector.extract_strided_slice %247 {offsets = [32, 0], sizes = [16, 16], strides = [1, 1]} : vector<144x16xf32> to vector<16x16xf32>
    %258 = vector.extract_strided_slice %244 {offsets = [32, 0], sizes = [16, 32], strides = [1, 1]} : vector<144x32xbf16> to vector<16x32xbf16>
    %259 = arith.truncf %257 : vector<16x16xf32> to vector<16x16xbf16>
    %cst_85 = arith.constant dense<0.000000e+00> : vector<16x32xf32>
    %260 = tpu.matmul %259, %258, %cst_85 {dimension_numbers = #tpu.dot_dimension_numbers<[1], [0], [0], [1], [0, 0, 1, 1], [], []>} : vector<16x16xbf16>, vector<16x32xbf16>, vector<16x32xf32> -> vector<16x32xf32>
    %261 = arith.addf %256, %260 : vector<16x32xf32>
    %262 = vector.extract_strided_slice %247 {offsets = [48, 0], sizes = [16, 16], strides = [1, 1]} : vector<144x16xf32> to vector<16x16xf32>
    %263 = vector.extract_strided_slice %244 {offsets = [48, 0], sizes = [16, 32], strides = [1, 1]} : vector<144x32xbf16> to vector<16x32xbf16>
    %264 = arith.truncf %262 : vector<16x16xf32> to vector<16x16xbf16>
    %cst_86 = arith.constant dense<0.000000e+00> : vector<16x32xf32>
    %265 = tpu.matmul %264, %263, %cst_86 {dimension_numbers = #tpu.dot_dimension_numbers<[1], [0], [0], [1], [0, 0, 1, 1], [], []>} : vector<16x16xbf16>, vector<16x32xbf16>, vector<16x32xf32> -> vector<16x32xf32>
    %266 = arith.addf %261, %265 : vector<16x32xf32>
    %267 = vector.extract_strided_slice %247 {offsets = [64, 0], sizes = [16, 16], strides = [1, 1]} : vector<144x16xf32> to vector<16x16xf32>
    %268 = vector.extract_strided_slice %244 {offsets = [64, 0], sizes = [16, 32], strides = [1, 1]} : vector<144x32xbf16> to vector<16x32xbf16>
    %269 = arith.truncf %267 : vector<16x16xf32> to vector<16x16xbf16>
    %cst_87 = arith.constant dense<0.000000e+00> : vector<16x32xf32>
    %270 = tpu.matmul %269, %268, %cst_87 {dimension_numbers = #tpu.dot_dimension_numbers<[1], [0], [0], [1], [0, 0, 1, 1], [], []>} : vector<16x16xbf16>, vector<16x32xbf16>, vector<16x32xf32> -> vector<16x32xf32>
    %271 = arith.addf %266, %270 : vector<16x32xf32>
    %272 = vector.extract_strided_slice %247 {offsets = [80, 0], sizes = [16, 16], strides = [1, 1]} : vector<144x16xf32> to vector<16x16xf32>
    %273 = vector.extract_strided_slice %244 {offsets = [80, 0], sizes = [16, 32], strides = [1, 1]} : vector<144x32xbf16> to vector<16x32xbf16>
    %274 = arith.truncf %272 : vector<16x16xf32> to vector<16x16xbf16>
    %cst_88 = arith.constant dense<0.000000e+00> : vector<16x32xf32>
    %275 = tpu.matmul %274, %273, %cst_88 {dimension_numbers = #tpu.dot_dimension_numbers<[1], [0], [0], [1], [0, 0, 1, 1], [], []>} : vector<16x16xbf16>, vector<16x32xbf16>, vector<16x32xf32> -> vector<16x32xf32>
    %276 = arith.addf %271, %275 : vector<16x32xf32>
    %277 = vector.extract_strided_slice %247 {offsets = [96, 0], sizes = [16, 16], strides = [1, 1]} : vector<144x16xf32> to vector<16x16xf32>
    %278 = vector.extract_strided_slice %244 {offsets = [96, 0], sizes = [16, 32], strides = [1, 1]} : vector<144x32xbf16> to vector<16x32xbf16>
    %279 = arith.truncf %277 : vector<16x16xf32> to vector<16x16xbf16>
    %cst_89 = arith.constant dense<0.000000e+00> : vector<16x32xf32>
    %280 = tpu.matmul %279, %278, %cst_89 {dimension_numbers = #tpu.dot_dimension_numbers<[1], [0], [0], [1], [0, 0, 1, 1], [], []>} : vector<16x16xbf16>, vector<16x32xbf16>, vector<16x32xf32> -> vector<16x32xf32>
    %281 = arith.addf %276, %280 : vector<16x32xf32>
    %282 = vector.extract_strided_slice %247 {offsets = [112, 0], sizes = [16, 16], strides = [1, 1]} : vector<144x16xf32> to vector<16x16xf32>
    %283 = vector.extract_strided_slice %244 {offsets = [112, 0], sizes = [16, 32], strides = [1, 1]} : vector<144x32xbf16> to vector<16x32xbf16>
    %284 = arith.truncf %282 : vector<16x16xf32> to vector<16x16xbf16>
    %cst_90 = arith.constant dense<0.000000e+00> : vector<16x32xf32>
    %285 = tpu.matmul %284, %283, %cst_90 {dimension_numbers = #tpu.dot_dimension_numbers<[1], [0], [0], [1], [0, 0, 1, 1], [], []>} : vector<16x16xbf16>, vector<16x32xbf16>, vector<16x32xf32> -> vector<16x32xf32>
    %286 = arith.addf %281, %285 : vector<16x32xf32>
    %287 = vector.extract_strided_slice %247 {offsets = [128, 0], sizes = [16, 16], strides = [1, 1]} : vector<144x16xf32> to vector<16x16xf32>
    %288 = vector.extract_strided_slice %244 {offsets = [128, 0], sizes = [16, 32], strides = [1, 1]} : vector<144x32xbf16> to vector<16x32xbf16>
    %289 = arith.truncf %287 : vector<16x16xf32> to vector<16x16xbf16>
    %cst_91 = arith.constant dense<0.000000e+00> : vector<16x32xf32>
    %290 = tpu.matmul %289, %288, %cst_91 {dimension_numbers = #tpu.dot_dimension_numbers<[1], [0], [0], [1], [0, 0, 1, 1], [], []>} : vector<16x16xbf16>, vector<16x32xbf16>, vector<16x32xf32> -> vector<16x32xf32>
    %291 = arith.addf %286, %290 : vector<16x32xf32>
    %c0_92 = arith.constant 0 : index
    %c0_93 = arith.constant 0 : index
    %292 = vector.load %arg23[%c0_92, %c0_93] : memref<1x32xf32, #tpu.memory_space<vmem>>, vector<1x32xf32>
    %293 = vector.broadcast %292 : vector<1x32xf32> to vector<16x32xf32>
    %294 = arith.addf %291, %293 : vector<16x32xf32>
    %cst_94 = arith.constant 0.000000e+00 : f32
    %295 = vector.broadcast %cst_94 : f32 to vector<16x32xf32>
    %296 = arith.maximumf %294, %295 : vector<16x32xf32>
    %c0_95 = arith.constant 0 : index
    %c0_96 = arith.constant 0 : index
    %297 = vector.load %arg24[%c0_95, %c0_96] : memref<288x32xbf16, #tpu.memory_space<vmem>>, vector<288x32xbf16>
    %c0_97 = arith.constant 0 : index
    %c0_98 = arith.constant 0 : index
    %298 = vector.load %arg7[%c0_97, %c0_98] : memref<144x16xbf16, #tpu.memory_space<vmem>>, vector<144x16xbf16>
    %299 = arith.truncf %296 : vector<16x32xf32> to vector<16x32xbf16>
    %cst_99 = arith.constant dense<0.000000e+00> : vector<144x32xf32>
    %300 = tpu.matmul %298, %299, %cst_99 {dimension_numbers = #tpu.dot_dimension_numbers<[1], [0], [0], [1], [0, 0, 1, 1], [], []>} : vector<144x16xbf16>, vector<16x32xbf16>, vector<144x32xf32> -> vector<144x32xf32>
    %301 = vector.extract_strided_slice %300 {offsets = [0, 0], sizes = [16, 32], strides = [1, 1]} : vector<144x32xf32> to vector<16x32xf32>
    %302 = vector.extract_strided_slice %297 {offsets = [0, 0], sizes = [32, 32], strides = [1, 1]} : vector<288x32xbf16> to vector<32x32xbf16>
    %303 = arith.truncf %301 : vector<16x32xf32> to vector<16x32xbf16>
    %cst_100 = arith.constant dense<0.000000e+00> : vector<16x32xf32>
    %304 = tpu.matmul %303, %302, %cst_100 {dimension_numbers = #tpu.dot_dimension_numbers<[1], [0], [0], [1], [0, 0, 1, 1], [], []>} : vector<16x32xbf16>, vector<32x32xbf16>, vector<16x32xf32> -> vector<16x32xf32>
    %305 = vector.extract_strided_slice %300 {offsets = [16, 0], sizes = [16, 32], strides = [1, 1]} : vector<144x32xf32> to vector<16x32xf32>
    %306 = vector.extract_strided_slice %297 {offsets = [32, 0], sizes = [32, 32], strides = [1, 1]} : vector<288x32xbf16> to vector<32x32xbf16>
    %307 = arith.truncf %305 : vector<16x32xf32> to vector<16x32xbf16>
    %cst_101 = arith.constant dense<0.000000e+00> : vector<16x32xf32>
    %308 = tpu.matmul %307, %306, %cst_101 {dimension_numbers = #tpu.dot_dimension_numbers<[1], [0], [0], [1], [0, 0, 1, 1], [], []>} : vector<16x32xbf16>, vector<32x32xbf16>, vector<16x32xf32> -> vector<16x32xf32>
    %309 = arith.addf %304, %308 : vector<16x32xf32>
    %310 = vector.extract_strided_slice %300 {offsets = [32, 0], sizes = [16, 32], strides = [1, 1]} : vector<144x32xf32> to vector<16x32xf32>
    %311 = vector.extract_strided_slice %297 {offsets = [64, 0], sizes = [32, 32], strides = [1, 1]} : vector<288x32xbf16> to vector<32x32xbf16>
    %312 = arith.truncf %310 : vector<16x32xf32> to vector<16x32xbf16>
    %cst_102 = arith.constant dense<0.000000e+00> : vector<16x32xf32>
    %313 = tpu.matmul %312, %311, %cst_102 {dimension_numbers = #tpu.dot_dimension_numbers<[1], [0], [0], [1], [0, 0, 1, 1], [], []>} : vector<16x32xbf16>, vector<32x32xbf16>, vector<16x32xf32> -> vector<16x32xf32>
    %314 = arith.addf %309, %313 : vector<16x32xf32>
    %315 = vector.extract_strided_slice %300 {offsets = [48, 0], sizes = [16, 32], strides = [1, 1]} : vector<144x32xf32> to vector<16x32xf32>
    %316 = vector.extract_strided_slice %297 {offsets = [96, 0], sizes = [32, 32], strides = [1, 1]} : vector<288x32xbf16> to vector<32x32xbf16>
    %317 = arith.truncf %315 : vector<16x32xf32> to vector<16x32xbf16>
    %cst_103 = arith.constant dense<0.000000e+00> : vector<16x32xf32>
    %318 = tpu.matmul %317, %316, %cst_103 {dimension_numbers = #tpu.dot_dimension_numbers<[1], [0], [0], [1], [0, 0, 1, 1], [], []>} : vector<16x32xbf16>, vector<32x32xbf16>, vector<16x32xf32> -> vector<16x32xf32>
    %319 = arith.addf %314, %318 : vector<16x32xf32>
    %320 = vector.extract_strided_slice %300 {offsets = [64, 0], sizes = [16, 32], strides = [1, 1]} : vector<144x32xf32> to vector<16x32xf32>
    %321 = vector.extract_strided_slice %297 {offsets = [128, 0], sizes = [32, 32], strides = [1, 1]} : vector<288x32xbf16> to vector<32x32xbf16>
    %322 = arith.truncf %320 : vector<16x32xf32> to vector<16x32xbf16>
    %cst_104 = arith.constant dense<0.000000e+00> : vector<16x32xf32>
    %323 = tpu.matmul %322, %321, %cst_104 {dimension_numbers = #tpu.dot_dimension_numbers<[1], [0], [0], [1], [0, 0, 1, 1], [], []>} : vector<16x32xbf16>, vector<32x32xbf16>, vector<16x32xf32> -> vector<16x32xf32>
    %324 = arith.addf %319, %323 : vector<16x32xf32>
    %325 = vector.extract_strided_slice %300 {offsets = [80, 0], sizes = [16, 32], strides = [1, 1]} : vector<144x32xf32> to vector<16x32xf32>
    %326 = vector.extract_strided_slice %297 {offsets = [160, 0], sizes = [32, 32], strides = [1, 1]} : vector<288x32xbf16> to vector<32x32xbf16>
    %327 = arith.truncf %325 : vector<16x32xf32> to vector<16x32xbf16>
    %cst_105 = arith.constant dense<0.000000e+00> : vector<16x32xf32>
    %328 = tpu.matmul %327, %326, %cst_105 {dimension_numbers = #tpu.dot_dimension_numbers<[1], [0], [0], [1], [0, 0, 1, 1], [], []>} : vector<16x32xbf16>, vector<32x32xbf16>, vector<16x32xf32> -> vector<16x32xf32>
    %329 = arith.addf %324, %328 : vector<16x32xf32>
    %330 = vector.extract_strided_slice %300 {offsets = [96, 0], sizes = [16, 32], strides = [1, 1]} : vector<144x32xf32> to vector<16x32xf32>
    %331 = vector.extract_strided_slice %297 {offsets = [192, 0], sizes = [32, 32], strides = [1, 1]} : vector<288x32xbf16> to vector<32x32xbf16>
    %332 = arith.truncf %330 : vector<16x32xf32> to vector<16x32xbf16>
    %cst_106 = arith.constant dense<0.000000e+00> : vector<16x32xf32>
    %333 = tpu.matmul %332, %331, %cst_106 {dimension_numbers = #tpu.dot_dimension_numbers<[1], [0], [0], [1], [0, 0, 1, 1], [], []>} : vector<16x32xbf16>, vector<32x32xbf16>, vector<16x32xf32> -> vector<16x32xf32>
    %334 = arith.addf %329, %333 : vector<16x32xf32>
    %335 = vector.extract_strided_slice %300 {offsets = [112, 0], sizes = [16, 32], strides = [1, 1]} : vector<144x32xf32> to vector<16x32xf32>
    %336 = vector.extract_strided_slice %297 {offsets = [224, 0], sizes = [32, 32], strides = [1, 1]} : vector<288x32xbf16> to vector<32x32xbf16>
    %337 = arith.truncf %335 : vector<16x32xf32> to vector<16x32xbf16>
    %cst_107 = arith.constant dense<0.000000e+00> : vector<16x32xf32>
    %338 = tpu.matmul %337, %336, %cst_107 {dimension_numbers = #tpu.dot_dimension_numbers<[1], [0], [0], [1], [0, 0, 1, 1], [], []>} : vector<16x32xbf16>, vector<32x32xbf16>, vector<16x32xf32> -> vector<16x32xf32>
    %339 = arith.addf %334, %338 : vector<16x32xf32>
    %340 = vector.extract_strided_slice %300 {offsets = [128, 0], sizes = [16, 32], strides = [1, 1]} : vector<144x32xf32> to vector<16x32xf32>
    %341 = vector.extract_strided_slice %297 {offsets = [256, 0], sizes = [32, 32], strides = [1, 1]} : vector<288x32xbf16> to vector<32x32xbf16>
    %342 = arith.truncf %340 : vector<16x32xf32> to vector<16x32xbf16>
    %cst_108 = arith.constant dense<0.000000e+00> : vector<16x32xf32>
    %343 = tpu.matmul %342, %341, %cst_108 {dimension_numbers = #tpu.dot_dimension_numbers<[1], [0], [0], [1], [0, 0, 1, 1], [], []>} : vector<16x32xbf16>, vector<32x32xbf16>, vector<16x32xf32> -> vector<16x32xf32>
    %344 = arith.addf %339, %343 : vector<16x32xf32>
    %c0_109 = arith.constant 0 : index
    %c0_110 = arith.constant 0 : index
    %345 = vector.load %arg25[%c0_109, %c0_110] : memref<1x32xf32, #tpu.memory_space<vmem>>, vector<1x32xf32>
    %346 = vector.broadcast %345 : vector<1x32xf32> to vector<16x32xf32>
    %347 = arith.addf %344, %346 : vector<16x32xf32>
    %c0_111 = arith.constant 0 : index
    %c0_112 = arith.constant 0 : index
    %348 = vector.load %arg8[%c0_111, %c0_112] : memref<16x64xbf16, #tpu.memory_space<vmem>>, vector<16x64xbf16>
    %349 = arith.truncf %243 : vector<64x16xf32> to vector<64x16xbf16>
    %cst_113 = arith.constant dense<0.000000e+00> : vector<16x16xf32>
    %350 = tpu.matmul %348, %349, %cst_113 {dimension_numbers = #tpu.dot_dimension_numbers<[1], [0], [0], [1], [0, 0, 1, 1], [], []>} : vector<16x64xbf16>, vector<64x16xbf16>, vector<16x16xf32> -> vector<16x16xf32>
    %c0_114 = arith.constant 0 : index
    %c0_115 = arith.constant 0 : index
    %351 = vector.load %arg26[%c0_114, %c0_115] : memref<16x32xbf16, #tpu.memory_space<vmem>>, vector<16x32xbf16>
    %352 = arith.truncf %350 : vector<16x16xf32> to vector<16x16xbf16>
    %cst_116 = arith.constant dense<0.000000e+00> : vector<16x32xf32>
    %353 = tpu.matmul %352, %351, %cst_116 {dimension_numbers = #tpu.dot_dimension_numbers<[1], [0], [0], [1], [0, 0, 1, 1], [], []>} : vector<16x16xbf16>, vector<16x32xbf16>, vector<16x32xf32> -> vector<16x32xf32>
    %c0_117 = arith.constant 0 : index
    %c0_118 = arith.constant 0 : index
    %354 = vector.load %arg27[%c0_117, %c0_118] : memref<1x32xf32, #tpu.memory_space<vmem>>, vector<1x32xf32>
    %355 = vector.broadcast %354 : vector<1x32xf32> to vector<16x32xf32>
    %356 = arith.addf %353, %355 : vector<16x32xf32>
    %357 = arith.addf %347, %356 : vector<16x32xf32>
    %cst_119 = arith.constant 0.000000e+00 : f32
    %358 = vector.broadcast %cst_119 : f32 to vector<16x32xf32>
    %359 = arith.maximumf %357, %358 : vector<16x32xf32>
    %c0_120 = arith.constant 0 : index
    %c0_121 = arith.constant 0 : index
    %360 = vector.load %arg28[%c0_120, %c0_121] : memref<288x32xbf16, #tpu.memory_space<vmem>>, vector<288x32xbf16>
    %c0_122 = arith.constant 0 : index
    %c0_123 = arith.constant 0 : index
    %361 = vector.load %arg7[%c0_122, %c0_123] : memref<144x16xbf16, #tpu.memory_space<vmem>>, vector<144x16xbf16>
    %362 = arith.truncf %359 : vector<16x32xf32> to vector<16x32xbf16>
    %cst_124 = arith.constant dense<0.000000e+00> : vector<144x32xf32>
    %363 = tpu.matmul %361, %362, %cst_124 {dimension_numbers = #tpu.dot_dimension_numbers<[1], [0], [0], [1], [0, 0, 1, 1], [], []>} : vector<144x16xbf16>, vector<16x32xbf16>, vector<144x32xf32> -> vector<144x32xf32>
    %364 = vector.extract_strided_slice %363 {offsets = [0, 0], sizes = [16, 32], strides = [1, 1]} : vector<144x32xf32> to vector<16x32xf32>
    %365 = vector.extract_strided_slice %360 {offsets = [0, 0], sizes = [32, 32], strides = [1, 1]} : vector<288x32xbf16> to vector<32x32xbf16>
    %366 = arith.truncf %364 : vector<16x32xf32> to vector<16x32xbf16>
    %cst_125 = arith.constant dense<0.000000e+00> : vector<16x32xf32>
    %367 = tpu.matmul %366, %365, %cst_125 {dimension_numbers = #tpu.dot_dimension_numbers<[1], [0], [0], [1], [0, 0, 1, 1], [], []>} : vector<16x32xbf16>, vector<32x32xbf16>, vector<16x32xf32> -> vector<16x32xf32>
    %368 = vector.extract_strided_slice %363 {offsets = [16, 0], sizes = [16, 32], strides = [1, 1]} : vector<144x32xf32> to vector<16x32xf32>
    %369 = vector.extract_strided_slice %360 {offsets = [32, 0], sizes = [32, 32], strides = [1, 1]} : vector<288x32xbf16> to vector<32x32xbf16>
    %370 = arith.truncf %368 : vector<16x32xf32> to vector<16x32xbf16>
    %cst_126 = arith.constant dense<0.000000e+00> : vector<16x32xf32>
    %371 = tpu.matmul %370, %369, %cst_126 {dimension_numbers = #tpu.dot_dimension_numbers<[1], [0], [0], [1], [0, 0, 1, 1], [], []>} : vector<16x32xbf16>, vector<32x32xbf16>, vector<16x32xf32> -> vector<16x32xf32>
    %372 = arith.addf %367, %371 : vector<16x32xf32>
    %373 = vector.extract_strided_slice %363 {offsets = [32, 0], sizes = [16, 32], strides = [1, 1]} : vector<144x32xf32> to vector<16x32xf32>
    %374 = vector.extract_strided_slice %360 {offsets = [64, 0], sizes = [32, 32], strides = [1, 1]} : vector<288x32xbf16> to vector<32x32xbf16>
    %375 = arith.truncf %373 : vector<16x32xf32> to vector<16x32xbf16>
    %cst_127 = arith.constant dense<0.000000e+00> : vector<16x32xf32>
    %376 = tpu.matmul %375, %374, %cst_127 {dimension_numbers = #tpu.dot_dimension_numbers<[1], [0], [0], [1], [0, 0, 1, 1], [], []>} : vector<16x32xbf16>, vector<32x32xbf16>, vector<16x32xf32> -> vector<16x32xf32>
    %377 = arith.addf %372, %376 : vector<16x32xf32>
    %378 = vector.extract_strided_slice %363 {offsets = [48, 0], sizes = [16, 32], strides = [1, 1]} : vector<144x32xf32> to vector<16x32xf32>
    %379 = vector.extract_strided_slice %360 {offsets = [96, 0], sizes = [32, 32], strides = [1, 1]} : vector<288x32xbf16> to vector<32x32xbf16>
    %380 = arith.truncf %378 : vector<16x32xf32> to vector<16x32xbf16>
    %cst_128 = arith.constant dense<0.000000e+00> : vector<16x32xf32>
    %381 = tpu.matmul %380, %379, %cst_128 {dimension_numbers = #tpu.dot_dimension_numbers<[1], [0], [0], [1], [0, 0, 1, 1], [], []>} : vector<16x32xbf16>, vector<32x32xbf16>, vector<16x32xf32> -> vector<16x32xf32>
    %382 = arith.addf %377, %381 : vector<16x32xf32>
    %383 = vector.extract_strided_slice %363 {offsets = [64, 0], sizes = [16, 32], strides = [1, 1]} : vector<144x32xf32> to vector<16x32xf32>
    %384 = vector.extract_strided_slice %360 {offsets = [128, 0], sizes = [32, 32], strides = [1, 1]} : vector<288x32xbf16> to vector<32x32xbf16>
    %385 = arith.truncf %383 : vector<16x32xf32> to vector<16x32xbf16>
    %cst_129 = arith.constant dense<0.000000e+00> : vector<16x32xf32>
    %386 = tpu.matmul %385, %384, %cst_129 {dimension_numbers = #tpu.dot_dimension_numbers<[1], [0], [0], [1], [0, 0, 1, 1], [], []>} : vector<16x32xbf16>, vector<32x32xbf16>, vector<16x32xf32> -> vector<16x32xf32>
    %387 = arith.addf %382, %386 : vector<16x32xf32>
    %388 = vector.extract_strided_slice %363 {offsets = [80, 0], sizes = [16, 32], strides = [1, 1]} : vector<144x32xf32> to vector<16x32xf32>
    %389 = vector.extract_strided_slice %360 {offsets = [160, 0], sizes = [32, 32], strides = [1, 1]} : vector<288x32xbf16> to vector<32x32xbf16>
    %390 = arith.truncf %388 : vector<16x32xf32> to vector<16x32xbf16>
    %cst_130 = arith.constant dense<0.000000e+00> : vector<16x32xf32>
    %391 = tpu.matmul %390, %389, %cst_130 {dimension_numbers = #tpu.dot_dimension_numbers<[1], [0], [0], [1], [0, 0, 1, 1], [], []>} : vector<16x32xbf16>, vector<32x32xbf16>, vector<16x32xf32> -> vector<16x32xf32>
    %392 = arith.addf %387, %391 : vector<16x32xf32>
    %393 = vector.extract_strided_slice %363 {offsets = [96, 0], sizes = [16, 32], strides = [1, 1]} : vector<144x32xf32> to vector<16x32xf32>
    %394 = vector.extract_strided_slice %360 {offsets = [192, 0], sizes = [32, 32], strides = [1, 1]} : vector<288x32xbf16> to vector<32x32xbf16>
    %395 = arith.truncf %393 : vector<16x32xf32> to vector<16x32xbf16>
    %cst_131 = arith.constant dense<0.000000e+00> : vector<16x32xf32>
    %396 = tpu.matmul %395, %394, %cst_131 {dimension_numbers = #tpu.dot_dimension_numbers<[1], [0], [0], [1], [0, 0, 1, 1], [], []>} : vector<16x32xbf16>, vector<32x32xbf16>, vector<16x32xf32> -> vector<16x32xf32>
    %397 = arith.addf %392, %396 : vector<16x32xf32>
    %398 = vector.extract_strided_slice %363 {offsets = [112, 0], sizes = [16, 32], strides = [1, 1]} : vector<144x32xf32> to vector<16x32xf32>
    %399 = vector.extract_strided_slice %360 {offsets = [224, 0], sizes = [32, 32], strides = [1, 1]} : vector<288x32xbf16> to vector<32x32xbf16>
    %400 = arith.truncf %398 : vector<16x32xf32> to vector<16x32xbf16>
    %cst_132 = arith.constant dense<0.000000e+00> : vector<16x32xf32>
    %401 = tpu.matmul %400, %399, %cst_132 {dimension_numbers = #tpu.dot_dimension_numbers<[1], [0], [0], [1], [0, 0, 1, 1], [], []>} : vector<16x32xbf16>, vector<32x32xbf16>, vector<16x32xf32> -> vector<16x32xf32>
    %402 = arith.addf %397, %401 : vector<16x32xf32>
    %403 = vector.extract_strided_slice %363 {offsets = [128, 0], sizes = [16, 32], strides = [1, 1]} : vector<144x32xf32> to vector<16x32xf32>
    %404 = vector.extract_strided_slice %360 {offsets = [256, 0], sizes = [32, 32], strides = [1, 1]} : vector<288x32xbf16> to vector<32x32xbf16>
    %405 = arith.truncf %403 : vector<16x32xf32> to vector<16x32xbf16>
    %cst_133 = arith.constant dense<0.000000e+00> : vector<16x32xf32>
    %406 = tpu.matmul %405, %404, %cst_133 {dimension_numbers = #tpu.dot_dimension_numbers<[1], [0], [0], [1], [0, 0, 1, 1], [], []>} : vector<16x32xbf16>, vector<32x32xbf16>, vector<16x32xf32> -> vector<16x32xf32>
    %407 = arith.addf %402, %406 : vector<16x32xf32>
    %c0_134 = arith.constant 0 : index
    %c0_135 = arith.constant 0 : index
    %408 = vector.load %arg29[%c0_134, %c0_135] : memref<1x32xf32, #tpu.memory_space<vmem>>, vector<1x32xf32>
    %409 = vector.broadcast %408 : vector<1x32xf32> to vector<16x32xf32>
    %410 = arith.addf %407, %409 : vector<16x32xf32>
    %cst_136 = arith.constant 0.000000e+00 : f32
    %411 = vector.broadcast %cst_136 : f32 to vector<16x32xf32>
    %412 = arith.maximumf %410, %411 : vector<16x32xf32>
    %c0_137 = arith.constant 0 : index
    %c0_138 = arith.constant 0 : index
    %413 = vector.load %arg30[%c0_137, %c0_138] : memref<288x32xbf16, #tpu.memory_space<vmem>>, vector<288x32xbf16>
    %c0_139 = arith.constant 0 : index
    %c0_140 = arith.constant 0 : index
    %414 = vector.load %arg7[%c0_139, %c0_140] : memref<144x16xbf16, #tpu.memory_space<vmem>>, vector<144x16xbf16>
    %415 = arith.truncf %412 : vector<16x32xf32> to vector<16x32xbf16>
    %cst_141 = arith.constant dense<0.000000e+00> : vector<144x32xf32>
    %416 = tpu.matmul %414, %415, %cst_141 {dimension_numbers = #tpu.dot_dimension_numbers<[1], [0], [0], [1], [0, 0, 1, 1], [], []>} : vector<144x16xbf16>, vector<16x32xbf16>, vector<144x32xf32> -> vector<144x32xf32>
    %417 = vector.extract_strided_slice %416 {offsets = [0, 0], sizes = [16, 32], strides = [1, 1]} : vector<144x32xf32> to vector<16x32xf32>
    %418 = vector.extract_strided_slice %413 {offsets = [0, 0], sizes = [32, 32], strides = [1, 1]} : vector<288x32xbf16> to vector<32x32xbf16>
    %419 = arith.truncf %417 : vector<16x32xf32> to vector<16x32xbf16>
    %cst_142 = arith.constant dense<0.000000e+00> : vector<16x32xf32>
    %420 = tpu.matmul %419, %418, %cst_142 {dimension_numbers = #tpu.dot_dimension_numbers<[1], [0], [0], [1], [0, 0, 1, 1], [], []>} : vector<16x32xbf16>, vector<32x32xbf16>, vector<16x32xf32> -> vector<16x32xf32>
    %421 = vector.extract_strided_slice %416 {offsets = [16, 0], sizes = [16, 32], strides = [1, 1]} : vector<144x32xf32> to vector<16x32xf32>
    %422 = vector.extract_strided_slice %413 {offsets = [32, 0], sizes = [32, 32], strides = [1, 1]} : vector<288x32xbf16> to vector<32x32xbf16>
    %423 = arith.truncf %421 : vector<16x32xf32> to vector<16x32xbf16>
    %cst_143 = arith.constant dense<0.000000e+00> : vector<16x32xf32>
    %424 = tpu.matmul %423, %422, %cst_143 {dimension_numbers = #tpu.dot_dimension_numbers<[1], [0], [0], [1], [0, 0, 1, 1], [], []>} : vector<16x32xbf16>, vector<32x32xbf16>, vector<16x32xf32> -> vector<16x32xf32>
    %425 = arith.addf %420, %424 : vector<16x32xf32>
    %426 = vector.extract_strided_slice %416 {offsets = [32, 0], sizes = [16, 32], strides = [1, 1]} : vector<144x32xf32> to vector<16x32xf32>
    %427 = vector.extract_strided_slice %413 {offsets = [64, 0], sizes = [32, 32], strides = [1, 1]} : vector<288x32xbf16> to vector<32x32xbf16>
    %428 = arith.truncf %426 : vector<16x32xf32> to vector<16x32xbf16>
    %cst_144 = arith.constant dense<0.000000e+00> : vector<16x32xf32>
    %429 = tpu.matmul %428, %427, %cst_144 {dimension_numbers = #tpu.dot_dimension_numbers<[1], [0], [0], [1], [0, 0, 1, 1], [], []>} : vector<16x32xbf16>, vector<32x32xbf16>, vector<16x32xf32> -> vector<16x32xf32>
    %430 = arith.addf %425, %429 : vector<16x32xf32>
    %431 = vector.extract_strided_slice %416 {offsets = [48, 0], sizes = [16, 32], strides = [1, 1]} : vector<144x32xf32> to vector<16x32xf32>
    %432 = vector.extract_strided_slice %413 {offsets = [96, 0], sizes = [32, 32], strides = [1, 1]} : vector<288x32xbf16> to vector<32x32xbf16>
    %433 = arith.truncf %431 : vector<16x32xf32> to vector<16x32xbf16>
    %cst_145 = arith.constant dense<0.000000e+00> : vector<16x32xf32>
    %434 = tpu.matmul %433, %432, %cst_145 {dimension_numbers = #tpu.dot_dimension_numbers<[1], [0], [0], [1], [0, 0, 1, 1], [], []>} : vector<16x32xbf16>, vector<32x32xbf16>, vector<16x32xf32> -> vector<16x32xf32>
    %435 = arith.addf %430, %434 : vector<16x32xf32>
    %436 = vector.extract_strided_slice %416 {offsets = [64, 0], sizes = [16, 32], strides = [1, 1]} : vector<144x32xf32> to vector<16x32xf32>
    %437 = vector.extract_strided_slice %413 {offsets = [128, 0], sizes = [32, 32], strides = [1, 1]} : vector<288x32xbf16> to vector<32x32xbf16>
    %438 = arith.truncf %436 : vector<16x32xf32> to vector<16x32xbf16>
    %cst_146 = arith.constant dense<0.000000e+00> : vector<16x32xf32>
    %439 = tpu.matmul %438, %437, %cst_146 {dimension_numbers = #tpu.dot_dimension_numbers<[1], [0], [0], [1], [0, 0, 1, 1], [], []>} : vector<16x32xbf16>, vector<32x32xbf16>, vector<16x32xf32> -> vector<16x32xf32>
    %440 = arith.addf %435, %439 : vector<16x32xf32>
    %441 = vector.extract_strided_slice %416 {offsets = [80, 0], sizes = [16, 32], strides = [1, 1]} : vector<144x32xf32> to vector<16x32xf32>
    %442 = vector.extract_strided_slice %413 {offsets = [160, 0], sizes = [32, 32], strides = [1, 1]} : vector<288x32xbf16> to vector<32x32xbf16>
    %443 = arith.truncf %441 : vector<16x32xf32> to vector<16x32xbf16>
    %cst_147 = arith.constant dense<0.000000e+00> : vector<16x32xf32>
    %444 = tpu.matmul %443, %442, %cst_147 {dimension_numbers = #tpu.dot_dimension_numbers<[1], [0], [0], [1], [0, 0, 1, 1], [], []>} : vector<16x32xbf16>, vector<32x32xbf16>, vector<16x32xf32> -> vector<16x32xf32>
    %445 = arith.addf %440, %444 : vector<16x32xf32>
    %446 = vector.extract_strided_slice %416 {offsets = [96, 0], sizes = [16, 32], strides = [1, 1]} : vector<144x32xf32> to vector<16x32xf32>
    %447 = vector.extract_strided_slice %413 {offsets = [192, 0], sizes = [32, 32], strides = [1, 1]} : vector<288x32xbf16> to vector<32x32xbf16>
    %448 = arith.truncf %446 : vector<16x32xf32> to vector<16x32xbf16>
    %cst_148 = arith.constant dense<0.000000e+00> : vector<16x32xf32>
    %449 = tpu.matmul %448, %447, %cst_148 {dimension_numbers = #tpu.dot_dimension_numbers<[1], [0], [0], [1], [0, 0, 1, 1], [], []>} : vector<16x32xbf16>, vector<32x32xbf16>, vector<16x32xf32> -> vector<16x32xf32>
    %450 = arith.addf %445, %449 : vector<16x32xf32>
    %451 = vector.extract_strided_slice %416 {offsets = [112, 0], sizes = [16, 32], strides = [1, 1]} : vector<144x32xf32> to vector<16x32xf32>
    %452 = vector.extract_strided_slice %413 {offsets = [224, 0], sizes = [32, 32], strides = [1, 1]} : vector<288x32xbf16> to vector<32x32xbf16>
    %453 = arith.truncf %451 : vector<16x32xf32> to vector<16x32xbf16>
    %cst_149 = arith.constant dense<0.000000e+00> : vector<16x32xf32>
    %454 = tpu.matmul %453, %452, %cst_149 {dimension_numbers = #tpu.dot_dimension_numbers<[1], [0], [0], [1], [0, 0, 1, 1], [], []>} : vector<16x32xbf16>, vector<32x32xbf16>, vector<16x32xf32> -> vector<16x32xf32>
    %455 = arith.addf %450, %454 : vector<16x32xf32>
    %456 = vector.extract_strided_slice %416 {offsets = [128, 0], sizes = [16, 32], strides = [1, 1]} : vector<144x32xf32> to vector<16x32xf32>
    %457 = vector.extract_strided_slice %413 {offsets = [256, 0], sizes = [32, 32], strides = [1, 1]} : vector<288x32xbf16> to vector<32x32xbf16>
    %458 = arith.truncf %456 : vector<16x32xf32> to vector<16x32xbf16>
    %cst_150 = arith.constant dense<0.000000e+00> : vector<16x32xf32>
    %459 = tpu.matmul %458, %457, %cst_150 {dimension_numbers = #tpu.dot_dimension_numbers<[1], [0], [0], [1], [0, 0, 1, 1], [], []>} : vector<16x32xbf16>, vector<32x32xbf16>, vector<16x32xf32> -> vector<16x32xf32>
    %460 = arith.addf %455, %459 : vector<16x32xf32>
    %c0_151 = arith.constant 0 : index
    %c0_152 = arith.constant 0 : index
    %461 = vector.load %arg31[%c0_151, %c0_152] : memref<1x32xf32, #tpu.memory_space<vmem>>, vector<1x32xf32>
    %462 = vector.broadcast %461 : vector<1x32xf32> to vector<16x32xf32>
    %463 = arith.addf %460, %462 : vector<16x32xf32>
    %464 = arith.addf %463, %359 : vector<16x32xf32>
    %cst_153 = arith.constant 0.000000e+00 : f32
    %465 = vector.broadcast %cst_153 : f32 to vector<16x32xf32>
    %466 = arith.maximumf %464, %465 : vector<16x32xf32>
    %c0_154 = arith.constant 0 : index
    %c0_155 = arith.constant 0 : index
    %467 = vector.load %arg32[%c0_154, %c0_155] : memref<288x64xbf16, #tpu.memory_space<vmem>>, vector<288x64xbf16>
    %c0_156 = arith.constant 0 : index
    %c0_157 = arith.constant 0 : index
    %468 = vector.load %arg9[%c0_156, %c0_157] : memref<72x16xbf16, #tpu.memory_space<vmem>>, vector<72x16xbf16>
    %469 = arith.truncf %466 : vector<16x32xf32> to vector<16x32xbf16>
    %cst_158 = arith.constant dense<0.000000e+00> : vector<72x32xf32>
    %470 = tpu.matmul %468, %469, %cst_158 {dimension_numbers = #tpu.dot_dimension_numbers<[1], [0], [0], [1], [0, 0, 1, 1], [], []>} : vector<72x16xbf16>, vector<16x32xbf16>, vector<72x32xf32> -> vector<72x32xf32>
    %471 = vector.extract_strided_slice %470 {offsets = [0, 0], sizes = [4, 32], strides = [1, 1]} : vector<72x32xf32> to vector<4x32xf32>
    %472 = vector.extract_strided_slice %467 {offsets = [0, 0], sizes = [32, 64], strides = [1, 1]} : vector<288x64xbf16> to vector<32x64xbf16>
    %473 = arith.truncf %471 : vector<4x32xf32> to vector<4x32xbf16>
    %cst_159 = arith.constant dense<0.000000e+00> : vector<4x64xf32>
    %474 = tpu.matmul %473, %472, %cst_159 {dimension_numbers = #tpu.dot_dimension_numbers<[1], [0], [0], [1], [0, 0, 1, 1], [], []>} : vector<4x32xbf16>, vector<32x64xbf16>, vector<4x64xf32> -> vector<4x64xf32>
    %475 = vector.extract_strided_slice %470 {offsets = [8, 0], sizes = [4, 32], strides = [1, 1]} : vector<72x32xf32> to vector<4x32xf32>
    %476 = vector.extract_strided_slice %467 {offsets = [32, 0], sizes = [32, 64], strides = [1, 1]} : vector<288x64xbf16> to vector<32x64xbf16>
    %477 = arith.truncf %475 : vector<4x32xf32> to vector<4x32xbf16>
    %cst_160 = arith.constant dense<0.000000e+00> : vector<4x64xf32>
    %478 = tpu.matmul %477, %476, %cst_160 {dimension_numbers = #tpu.dot_dimension_numbers<[1], [0], [0], [1], [0, 0, 1, 1], [], []>} : vector<4x32xbf16>, vector<32x64xbf16>, vector<4x64xf32> -> vector<4x64xf32>
    %479 = arith.addf %474, %478 : vector<4x64xf32>
    %480 = vector.extract_strided_slice %470 {offsets = [16, 0], sizes = [4, 32], strides = [1, 1]} : vector<72x32xf32> to vector<4x32xf32>
    %481 = vector.extract_strided_slice %467 {offsets = [64, 0], sizes = [32, 64], strides = [1, 1]} : vector<288x64xbf16> to vector<32x64xbf16>
    %482 = arith.truncf %480 : vector<4x32xf32> to vector<4x32xbf16>
    %cst_161 = arith.constant dense<0.000000e+00> : vector<4x64xf32>
    %483 = tpu.matmul %482, %481, %cst_161 {dimension_numbers = #tpu.dot_dimension_numbers<[1], [0], [0], [1], [0, 0, 1, 1], [], []>} : vector<4x32xbf16>, vector<32x64xbf16>, vector<4x64xf32> -> vector<4x64xf32>
    %484 = arith.addf %479, %483 : vector<4x64xf32>
    %485 = vector.extract_strided_slice %470 {offsets = [24, 0], sizes = [4, 32], strides = [1, 1]} : vector<72x32xf32> to vector<4x32xf32>
    %486 = vector.extract_strided_slice %467 {offsets = [96, 0], sizes = [32, 64], strides = [1, 1]} : vector<288x64xbf16> to vector<32x64xbf16>
    %487 = arith.truncf %485 : vector<4x32xf32> to vector<4x32xbf16>
    %cst_162 = arith.constant dense<0.000000e+00> : vector<4x64xf32>
    %488 = tpu.matmul %487, %486, %cst_162 {dimension_numbers = #tpu.dot_dimension_numbers<[1], [0], [0], [1], [0, 0, 1, 1], [], []>} : vector<4x32xbf16>, vector<32x64xbf16>, vector<4x64xf32> -> vector<4x64xf32>
    %489 = arith.addf %484, %488 : vector<4x64xf32>
    %490 = vector.extract_strided_slice %470 {offsets = [32, 0], sizes = [4, 32], strides = [1, 1]} : vector<72x32xf32> to vector<4x32xf32>
    %491 = vector.extract_strided_slice %467 {offsets = [128, 0], sizes = [32, 64], strides = [1, 1]} : vector<288x64xbf16> to vector<32x64xbf16>
    %492 = arith.truncf %490 : vector<4x32xf32> to vector<4x32xbf16>
    %cst_163 = arith.constant dense<0.000000e+00> : vector<4x64xf32>
    %493 = tpu.matmul %492, %491, %cst_163 {dimension_numbers = #tpu.dot_dimension_numbers<[1], [0], [0], [1], [0, 0, 1, 1], [], []>} : vector<4x32xbf16>, vector<32x64xbf16>, vector<4x64xf32> -> vector<4x64xf32>
    %494 = arith.addf %489, %493 : vector<4x64xf32>
    %495 = vector.extract_strided_slice %470 {offsets = [40, 0], sizes = [4, 32], strides = [1, 1]} : vector<72x32xf32> to vector<4x32xf32>
    %496 = vector.extract_strided_slice %467 {offsets = [160, 0], sizes = [32, 64], strides = [1, 1]} : vector<288x64xbf16> to vector<32x64xbf16>
    %497 = arith.truncf %495 : vector<4x32xf32> to vector<4x32xbf16>
    %cst_164 = arith.constant dense<0.000000e+00> : vector<4x64xf32>
    %498 = tpu.matmul %497, %496, %cst_164 {dimension_numbers = #tpu.dot_dimension_numbers<[1], [0], [0], [1], [0, 0, 1, 1], [], []>} : vector<4x32xbf16>, vector<32x64xbf16>, vector<4x64xf32> -> vector<4x64xf32>
    %499 = arith.addf %494, %498 : vector<4x64xf32>
    %500 = vector.extract_strided_slice %470 {offsets = [48, 0], sizes = [4, 32], strides = [1, 1]} : vector<72x32xf32> to vector<4x32xf32>
    %501 = vector.extract_strided_slice %467 {offsets = [192, 0], sizes = [32, 64], strides = [1, 1]} : vector<288x64xbf16> to vector<32x64xbf16>
    %502 = arith.truncf %500 : vector<4x32xf32> to vector<4x32xbf16>
    %cst_165 = arith.constant dense<0.000000e+00> : vector<4x64xf32>
    %503 = tpu.matmul %502, %501, %cst_165 {dimension_numbers = #tpu.dot_dimension_numbers<[1], [0], [0], [1], [0, 0, 1, 1], [], []>} : vector<4x32xbf16>, vector<32x64xbf16>, vector<4x64xf32> -> vector<4x64xf32>
    %504 = arith.addf %499, %503 : vector<4x64xf32>
    %505 = vector.extract_strided_slice %470 {offsets = [56, 0], sizes = [4, 32], strides = [1, 1]} : vector<72x32xf32> to vector<4x32xf32>
    %506 = vector.extract_strided_slice %467 {offsets = [224, 0], sizes = [32, 64], strides = [1, 1]} : vector<288x64xbf16> to vector<32x64xbf16>
    %507 = arith.truncf %505 : vector<4x32xf32> to vector<4x32xbf16>
    %cst_166 = arith.constant dense<0.000000e+00> : vector<4x64xf32>
    %508 = tpu.matmul %507, %506, %cst_166 {dimension_numbers = #tpu.dot_dimension_numbers<[1], [0], [0], [1], [0, 0, 1, 1], [], []>} : vector<4x32xbf16>, vector<32x64xbf16>, vector<4x64xf32> -> vector<4x64xf32>
    %509 = arith.addf %504, %508 : vector<4x64xf32>
    %510 = vector.extract_strided_slice %470 {offsets = [64, 0], sizes = [4, 32], strides = [1, 1]} : vector<72x32xf32> to vector<4x32xf32>
    %511 = vector.extract_strided_slice %467 {offsets = [256, 0], sizes = [32, 64], strides = [1, 1]} : vector<288x64xbf16> to vector<32x64xbf16>
    %512 = arith.truncf %510 : vector<4x32xf32> to vector<4x32xbf16>
    %cst_167 = arith.constant dense<0.000000e+00> : vector<4x64xf32>
    %513 = tpu.matmul %512, %511, %cst_167 {dimension_numbers = #tpu.dot_dimension_numbers<[1], [0], [0], [1], [0, 0, 1, 1], [], []>} : vector<4x32xbf16>, vector<32x64xbf16>, vector<4x64xf32> -> vector<4x64xf32>
    %514 = arith.addf %509, %513 : vector<4x64xf32>
    %c0_168 = arith.constant 0 : index
    %c0_169 = arith.constant 0 : index
    %515 = vector.load %arg33[%c0_168, %c0_169] : memref<1x64xf32, #tpu.memory_space<vmem>>, vector<1x64xf32>
    %516 = vector.broadcast %515 : vector<1x64xf32> to vector<4x64xf32>
    %517 = arith.addf %514, %516 : vector<4x64xf32>
    %cst_170 = arith.constant 0.000000e+00 : f32
    %518 = vector.broadcast %cst_170 : f32 to vector<4x64xf32>
    %519 = arith.maximumf %517, %518 : vector<4x64xf32>
    %c0_171 = arith.constant 0 : index
    %c0_172 = arith.constant 0 : index
    %520 = vector.load %arg34[%c0_171, %c0_172] : memref<576x64xbf16, #tpu.memory_space<vmem>>, vector<576x64xbf16>
    %c0_173 = arith.constant 0 : index
    %c0_174 = arith.constant 0 : index
    %521 = vector.load %arg10[%c0_173, %c0_174] : memref<72x4xbf16, #tpu.memory_space<vmem>>, vector<72x4xbf16>
    %522 = arith.truncf %519 : vector<4x64xf32> to vector<4x64xbf16>
    %cst_175 = arith.constant dense<0.000000e+00> : vector<72x64xf32>
    %523 = tpu.matmul %521, %522, %cst_175 {dimension_numbers = #tpu.dot_dimension_numbers<[1], [0], [0], [1], [0, 0, 1, 1], [], []>} : vector<72x4xbf16>, vector<4x64xbf16>, vector<72x64xf32> -> vector<72x64xf32>
    %524 = vector.extract_strided_slice %523 {offsets = [0, 0], sizes = [4, 64], strides = [1, 1]} : vector<72x64xf32> to vector<4x64xf32>
    %525 = vector.extract_strided_slice %520 {offsets = [0, 0], sizes = [64, 64], strides = [1, 1]} : vector<576x64xbf16> to vector<64x64xbf16>
    %526 = arith.truncf %524 : vector<4x64xf32> to vector<4x64xbf16>
    %cst_176 = arith.constant dense<0.000000e+00> : vector<4x64xf32>
    %527 = tpu.matmul %526, %525, %cst_176 {dimension_numbers = #tpu.dot_dimension_numbers<[1], [0], [0], [1], [0, 0, 1, 1], [], []>} : vector<4x64xbf16>, vector<64x64xbf16>, vector<4x64xf32> -> vector<4x64xf32>
    %528 = vector.extract_strided_slice %523 {offsets = [8, 0], sizes = [4, 64], strides = [1, 1]} : vector<72x64xf32> to vector<4x64xf32>
    %529 = vector.extract_strided_slice %520 {offsets = [64, 0], sizes = [64, 64], strides = [1, 1]} : vector<576x64xbf16> to vector<64x64xbf16>
    %530 = arith.truncf %528 : vector<4x64xf32> to vector<4x64xbf16>
    %cst_177 = arith.constant dense<0.000000e+00> : vector<4x64xf32>
    %531 = tpu.matmul %530, %529, %cst_177 {dimension_numbers = #tpu.dot_dimension_numbers<[1], [0], [0], [1], [0, 0, 1, 1], [], []>} : vector<4x64xbf16>, vector<64x64xbf16>, vector<4x64xf32> -> vector<4x64xf32>
    %532 = arith.addf %527, %531 : vector<4x64xf32>
    %533 = vector.extract_strided_slice %523 {offsets = [16, 0], sizes = [4, 64], strides = [1, 1]} : vector<72x64xf32> to vector<4x64xf32>
    %534 = vector.extract_strided_slice %520 {offsets = [128, 0], sizes = [64, 64], strides = [1, 1]} : vector<576x64xbf16> to vector<64x64xbf16>
    %535 = arith.truncf %533 : vector<4x64xf32> to vector<4x64xbf16>
    %cst_178 = arith.constant dense<0.000000e+00> : vector<4x64xf32>
    %536 = tpu.matmul %535, %534, %cst_178 {dimension_numbers = #tpu.dot_dimension_numbers<[1], [0], [0], [1], [0, 0, 1, 1], [], []>} : vector<4x64xbf16>, vector<64x64xbf16>, vector<4x64xf32> -> vector<4x64xf32>
    %537 = arith.addf %532, %536 : vector<4x64xf32>
    %538 = vector.extract_strided_slice %523 {offsets = [24, 0], sizes = [4, 64], strides = [1, 1]} : vector<72x64xf32> to vector<4x64xf32>
    %539 = vector.extract_strided_slice %520 {offsets = [192, 0], sizes = [64, 64], strides = [1, 1]} : vector<576x64xbf16> to vector<64x64xbf16>
    %540 = arith.truncf %538 : vector<4x64xf32> to vector<4x64xbf16>
    %cst_179 = arith.constant dense<0.000000e+00> : vector<4x64xf32>
    %541 = tpu.matmul %540, %539, %cst_179 {dimension_numbers = #tpu.dot_dimension_numbers<[1], [0], [0], [1], [0, 0, 1, 1], [], []>} : vector<4x64xbf16>, vector<64x64xbf16>, vector<4x64xf32> -> vector<4x64xf32>
    %542 = arith.addf %537, %541 : vector<4x64xf32>
    %543 = vector.extract_strided_slice %523 {offsets = [32, 0], sizes = [4, 64], strides = [1, 1]} : vector<72x64xf32> to vector<4x64xf32>
    %544 = vector.extract_strided_slice %520 {offsets = [256, 0], sizes = [64, 64], strides = [1, 1]} : vector<576x64xbf16> to vector<64x64xbf16>
    %545 = arith.truncf %543 : vector<4x64xf32> to vector<4x64xbf16>
    %cst_180 = arith.constant dense<0.000000e+00> : vector<4x64xf32>
    %546 = tpu.matmul %545, %544, %cst_180 {dimension_numbers = #tpu.dot_dimension_numbers<[1], [0], [0], [1], [0, 0, 1, 1], [], []>} : vector<4x64xbf16>, vector<64x64xbf16>, vector<4x64xf32> -> vector<4x64xf32>
    %547 = arith.addf %542, %546 : vector<4x64xf32>
    %548 = vector.extract_strided_slice %523 {offsets = [40, 0], sizes = [4, 64], strides = [1, 1]} : vector<72x64xf32> to vector<4x64xf32>
    %549 = vector.extract_strided_slice %520 {offsets = [320, 0], sizes = [64, 64], strides = [1, 1]} : vector<576x64xbf16> to vector<64x64xbf16>
    %550 = arith.truncf %548 : vector<4x64xf32> to vector<4x64xbf16>
    %cst_181 = arith.constant dense<0.000000e+00> : vector<4x64xf32>
    %551 = tpu.matmul %550, %549, %cst_181 {dimension_numbers = #tpu.dot_dimension_numbers<[1], [0], [0], [1], [0, 0, 1, 1], [], []>} : vector<4x64xbf16>, vector<64x64xbf16>, vector<4x64xf32> -> vector<4x64xf32>
    %552 = arith.addf %547, %551 : vector<4x64xf32>
    %553 = vector.extract_strided_slice %523 {offsets = [48, 0], sizes = [4, 64], strides = [1, 1]} : vector<72x64xf32> to vector<4x64xf32>
    %554 = vector.extract_strided_slice %520 {offsets = [384, 0], sizes = [64, 64], strides = [1, 1]} : vector<576x64xbf16> to vector<64x64xbf16>
    %555 = arith.truncf %553 : vector<4x64xf32> to vector<4x64xbf16>
    %cst_182 = arith.constant dense<0.000000e+00> : vector<4x64xf32>
    %556 = tpu.matmul %555, %554, %cst_182 {dimension_numbers = #tpu.dot_dimension_numbers<[1], [0], [0], [1], [0, 0, 1, 1], [], []>} : vector<4x64xbf16>, vector<64x64xbf16>, vector<4x64xf32> -> vector<4x64xf32>
    %557 = arith.addf %552, %556 : vector<4x64xf32>
    %558 = vector.extract_strided_slice %523 {offsets = [56, 0], sizes = [4, 64], strides = [1, 1]} : vector<72x64xf32> to vector<4x64xf32>
    %559 = vector.extract_strided_slice %520 {offsets = [448, 0], sizes = [64, 64], strides = [1, 1]} : vector<576x64xbf16> to vector<64x64xbf16>
    %560 = arith.truncf %558 : vector<4x64xf32> to vector<4x64xbf16>
    %cst_183 = arith.constant dense<0.000000e+00> : vector<4x64xf32>
    %561 = tpu.matmul %560, %559, %cst_183 {dimension_numbers = #tpu.dot_dimension_numbers<[1], [0], [0], [1], [0, 0, 1, 1], [], []>} : vector<4x64xbf16>, vector<64x64xbf16>, vector<4x64xf32> -> vector<4x64xf32>
    %562 = arith.addf %557, %561 : vector<4x64xf32>
    %563 = vector.extract_strided_slice %523 {offsets = [64, 0], sizes = [4, 64], strides = [1, 1]} : vector<72x64xf32> to vector<4x64xf32>
    %564 = vector.extract_strided_slice %520 {offsets = [512, 0], sizes = [64, 64], strides = [1, 1]} : vector<576x64xbf16> to vector<64x64xbf16>
    %565 = arith.truncf %563 : vector<4x64xf32> to vector<4x64xbf16>
    %cst_184 = arith.constant dense<0.000000e+00> : vector<4x64xf32>
    %566 = tpu.matmul %565, %564, %cst_184 {dimension_numbers = #tpu.dot_dimension_numbers<[1], [0], [0], [1], [0, 0, 1, 1], [], []>} : vector<4x64xbf16>, vector<64x64xbf16>, vector<4x64xf32> -> vector<4x64xf32>
    %567 = arith.addf %562, %566 : vector<4x64xf32>
    %c0_185 = arith.constant 0 : index
    %c0_186 = arith.constant 0 : index
    %568 = vector.load %arg35[%c0_185, %c0_186] : memref<1x64xf32, #tpu.memory_space<vmem>>, vector<1x64xf32>
    %569 = vector.broadcast %568 : vector<1x64xf32> to vector<4x64xf32>
    %570 = arith.addf %567, %569 : vector<4x64xf32>
    %c0_187 = arith.constant 0 : index
    %c0_188 = arith.constant 0 : index
    %571 = vector.load %arg11[%c0_187, %c0_188] : memref<8x16xbf16, #tpu.memory_space<vmem>>, vector<8x16xbf16>
    %572 = arith.truncf %466 : vector<16x32xf32> to vector<16x32xbf16>
    %cst_189 = arith.constant dense<0.000000e+00> : vector<8x32xf32>
    %573 = tpu.matmul %571, %572, %cst_189 {dimension_numbers = #tpu.dot_dimension_numbers<[1], [0], [0], [1], [0, 0, 1, 1], [], []>} : vector<8x16xbf16>, vector<16x32xbf16>, vector<8x32xf32> -> vector<8x32xf32>
    %574 = vector.extract_strided_slice %573 {offsets = [0, 0], sizes = [4, 32], strides = [1, 1]} : vector<8x32xf32> to vector<4x32xf32>
    %c0_190 = arith.constant 0 : index
    %c0_191 = arith.constant 0 : index
    %575 = vector.load %arg36[%c0_190, %c0_191] : memref<32x64xbf16, #tpu.memory_space<vmem>>, vector<32x64xbf16>
    %576 = arith.truncf %574 : vector<4x32xf32> to vector<4x32xbf16>
    %cst_192 = arith.constant dense<0.000000e+00> : vector<4x64xf32>
    %577 = tpu.matmul %576, %575, %cst_192 {dimension_numbers = #tpu.dot_dimension_numbers<[1], [0], [0], [1], [0, 0, 1, 1], [], []>} : vector<4x32xbf16>, vector<32x64xbf16>, vector<4x64xf32> -> vector<4x64xf32>
    %c0_193 = arith.constant 0 : index
    %c0_194 = arith.constant 0 : index
    %578 = vector.load %arg37[%c0_193, %c0_194] : memref<1x64xf32, #tpu.memory_space<vmem>>, vector<1x64xf32>
    %579 = vector.broadcast %578 : vector<1x64xf32> to vector<4x64xf32>
    %580 = arith.addf %577, %579 : vector<4x64xf32>
    %581 = arith.addf %570, %580 : vector<4x64xf32>
    %cst_195 = arith.constant 0.000000e+00 : f32
    %582 = vector.broadcast %cst_195 : f32 to vector<4x64xf32>
    %583 = arith.maximumf %581, %582 : vector<4x64xf32>
    %c0_196 = arith.constant 0 : index
    %c0_197 = arith.constant 0 : index
    %584 = vector.load %arg38[%c0_196, %c0_197] : memref<576x64xbf16, #tpu.memory_space<vmem>>, vector<576x64xbf16>
    %c0_198 = arith.constant 0 : index
    %c0_199 = arith.constant 0 : index
    %585 = vector.load %arg10[%c0_198, %c0_199] : memref<72x4xbf16, #tpu.memory_space<vmem>>, vector<72x4xbf16>
    %586 = arith.truncf %583 : vector<4x64xf32> to vector<4x64xbf16>
    %cst_200 = arith.constant dense<0.000000e+00> : vector<72x64xf32>
    %587 = tpu.matmul %585, %586, %cst_200 {dimension_numbers = #tpu.dot_dimension_numbers<[1], [0], [0], [1], [0, 0, 1, 1], [], []>} : vector<72x4xbf16>, vector<4x64xbf16>, vector<72x64xf32> -> vector<72x64xf32>
    %588 = vector.extract_strided_slice %587 {offsets = [0, 0], sizes = [4, 64], strides = [1, 1]} : vector<72x64xf32> to vector<4x64xf32>
    %589 = vector.extract_strided_slice %584 {offsets = [0, 0], sizes = [64, 64], strides = [1, 1]} : vector<576x64xbf16> to vector<64x64xbf16>
    %590 = arith.truncf %588 : vector<4x64xf32> to vector<4x64xbf16>
    %cst_201 = arith.constant dense<0.000000e+00> : vector<4x64xf32>
    %591 = tpu.matmul %590, %589, %cst_201 {dimension_numbers = #tpu.dot_dimension_numbers<[1], [0], [0], [1], [0, 0, 1, 1], [], []>} : vector<4x64xbf16>, vector<64x64xbf16>, vector<4x64xf32> -> vector<4x64xf32>
    %592 = vector.extract_strided_slice %587 {offsets = [8, 0], sizes = [4, 64], strides = [1, 1]} : vector<72x64xf32> to vector<4x64xf32>
    %593 = vector.extract_strided_slice %584 {offsets = [64, 0], sizes = [64, 64], strides = [1, 1]} : vector<576x64xbf16> to vector<64x64xbf16>
    %594 = arith.truncf %592 : vector<4x64xf32> to vector<4x64xbf16>
    %cst_202 = arith.constant dense<0.000000e+00> : vector<4x64xf32>
    %595 = tpu.matmul %594, %593, %cst_202 {dimension_numbers = #tpu.dot_dimension_numbers<[1], [0], [0], [1], [0, 0, 1, 1], [], []>} : vector<4x64xbf16>, vector<64x64xbf16>, vector<4x64xf32> -> vector<4x64xf32>
    %596 = arith.addf %591, %595 : vector<4x64xf32>
    %597 = vector.extract_strided_slice %587 {offsets = [16, 0], sizes = [4, 64], strides = [1, 1]} : vector<72x64xf32> to vector<4x64xf32>
    %598 = vector.extract_strided_slice %584 {offsets = [128, 0], sizes = [64, 64], strides = [1, 1]} : vector<576x64xbf16> to vector<64x64xbf16>
    %599 = arith.truncf %597 : vector<4x64xf32> to vector<4x64xbf16>
    %cst_203 = arith.constant dense<0.000000e+00> : vector<4x64xf32>
    %600 = tpu.matmul %599, %598, %cst_203 {dimension_numbers = #tpu.dot_dimension_numbers<[1], [0], [0], [1], [0, 0, 1, 1], [], []>} : vector<4x64xbf16>, vector<64x64xbf16>, vector<4x64xf32> -> vector<4x64xf32>
    %601 = arith.addf %596, %600 : vector<4x64xf32>
    %602 = vector.extract_strided_slice %587 {offsets = [24, 0], sizes = [4, 64], strides = [1, 1]} : vector<72x64xf32> to vector<4x64xf32>
    %603 = vector.extract_strided_slice %584 {offsets = [192, 0], sizes = [64, 64], strides = [1, 1]} : vector<576x64xbf16> to vector<64x64xbf16>
    %604 = arith.truncf %602 : vector<4x64xf32> to vector<4x64xbf16>
    %cst_204 = arith.constant dense<0.000000e+00> : vector<4x64xf32>
    %605 = tpu.matmul %604, %603, %cst_204 {dimension_numbers = #tpu.dot_dimension_numbers<[1], [0], [0], [1], [0, 0, 1, 1], [], []>} : vector<4x64xbf16>, vector<64x64xbf16>, vector<4x64xf32> -> vector<4x64xf32>
    %606 = arith.addf %601, %605 : vector<4x64xf32>
    %607 = vector.extract_strided_slice %587 {offsets = [32, 0], sizes = [4, 64], strides = [1, 1]} : vector<72x64xf32> to vector<4x64xf32>
    %608 = vector.extract_strided_slice %584 {offsets = [256, 0], sizes = [64, 64], strides = [1, 1]} : vector<576x64xbf16> to vector<64x64xbf16>
    %609 = arith.truncf %607 : vector<4x64xf32> to vector<4x64xbf16>
    %cst_205 = arith.constant dense<0.000000e+00> : vector<4x64xf32>
    %610 = tpu.matmul %609, %608, %cst_205 {dimension_numbers = #tpu.dot_dimension_numbers<[1], [0], [0], [1], [0, 0, 1, 1], [], []>} : vector<4x64xbf16>, vector<64x64xbf16>, vector<4x64xf32> -> vector<4x64xf32>
    %611 = arith.addf %606, %610 : vector<4x64xf32>
    %612 = vector.extract_strided_slice %587 {offsets = [40, 0], sizes = [4, 64], strides = [1, 1]} : vector<72x64xf32> to vector<4x64xf32>
    %613 = vector.extract_strided_slice %584 {offsets = [320, 0], sizes = [64, 64], strides = [1, 1]} : vector<576x64xbf16> to vector<64x64xbf16>
    %614 = arith.truncf %612 : vector<4x64xf32> to vector<4x64xbf16>
    %cst_206 = arith.constant dense<0.000000e+00> : vector<4x64xf32>
    %615 = tpu.matmul %614, %613, %cst_206 {dimension_numbers = #tpu.dot_dimension_numbers<[1], [0], [0], [1], [0, 0, 1, 1], [], []>} : vector<4x64xbf16>, vector<64x64xbf16>, vector<4x64xf32> -> vector<4x64xf32>
    %616 = arith.addf %611, %615 : vector<4x64xf32>
    %617 = vector.extract_strided_slice %587 {offsets = [48, 0], sizes = [4, 64], strides = [1, 1]} : vector<72x64xf32> to vector<4x64xf32>
    %618 = vector.extract_strided_slice %584 {offsets = [384, 0], sizes = [64, 64], strides = [1, 1]} : vector<576x64xbf16> to vector<64x64xbf16>
    %619 = arith.truncf %617 : vector<4x64xf32> to vector<4x64xbf16>
    %cst_207 = arith.constant dense<0.000000e+00> : vector<4x64xf32>
    %620 = tpu.matmul %619, %618, %cst_207 {dimension_numbers = #tpu.dot_dimension_numbers<[1], [0], [0], [1], [0, 0, 1, 1], [], []>} : vector<4x64xbf16>, vector<64x64xbf16>, vector<4x64xf32> -> vector<4x64xf32>
    %621 = arith.addf %616, %620 : vector<4x64xf32>
    %622 = vector.extract_strided_slice %587 {offsets = [56, 0], sizes = [4, 64], strides = [1, 1]} : vector<72x64xf32> to vector<4x64xf32>
    %623 = vector.extract_strided_slice %584 {offsets = [448, 0], sizes = [64, 64], strides = [1, 1]} : vector<576x64xbf16> to vector<64x64xbf16>
    %624 = arith.truncf %622 : vector<4x64xf32> to vector<4x64xbf16>
    %cst_208 = arith.constant dense<0.000000e+00> : vector<4x64xf32>
    %625 = tpu.matmul %624, %623, %cst_208 {dimension_numbers = #tpu.dot_dimension_numbers<[1], [0], [0], [1], [0, 0, 1, 1], [], []>} : vector<4x64xbf16>, vector<64x64xbf16>, vector<4x64xf32> -> vector<4x64xf32>
    %626 = arith.addf %621, %625 : vector<4x64xf32>
    %627 = vector.extract_strided_slice %587 {offsets = [64, 0], sizes = [4, 64], strides = [1, 1]} : vector<72x64xf32> to vector<4x64xf32>
    %628 = vector.extract_strided_slice %584 {offsets = [512, 0], sizes = [64, 64], strides = [1, 1]} : vector<576x64xbf16> to vector<64x64xbf16>
    %629 = arith.truncf %627 : vector<4x64xf32> to vector<4x64xbf16>
    %cst_209 = arith.constant dense<0.000000e+00> : vector<4x64xf32>
    %630 = tpu.matmul %629, %628, %cst_209 {dimension_numbers = #tpu.dot_dimension_numbers<[1], [0], [0], [1], [0, 0, 1, 1], [], []>} : vector<4x64xbf16>, vector<64x64xbf16>, vector<4x64xf32> -> vector<4x64xf32>
    %631 = arith.addf %626, %630 : vector<4x64xf32>
    %c0_210 = arith.constant 0 : index
    %c0_211 = arith.constant 0 : index
    %632 = vector.load %arg39[%c0_210, %c0_211] : memref<1x64xf32, #tpu.memory_space<vmem>>, vector<1x64xf32>
    %633 = vector.broadcast %632 : vector<1x64xf32> to vector<4x64xf32>
    %634 = arith.addf %631, %633 : vector<4x64xf32>
    %cst_212 = arith.constant 0.000000e+00 : f32
    %635 = vector.broadcast %cst_212 : f32 to vector<4x64xf32>
    %636 = arith.maximumf %634, %635 : vector<4x64xf32>
    %c0_213 = arith.constant 0 : index
    %c0_214 = arith.constant 0 : index
    %637 = vector.load %arg40[%c0_213, %c0_214] : memref<576x64xbf16, #tpu.memory_space<vmem>>, vector<576x64xbf16>
    %c0_215 = arith.constant 0 : index
    %c0_216 = arith.constant 0 : index
    %638 = vector.load %arg10[%c0_215, %c0_216] : memref<72x4xbf16, #tpu.memory_space<vmem>>, vector<72x4xbf16>
    %639 = arith.truncf %636 : vector<4x64xf32> to vector<4x64xbf16>
    %cst_217 = arith.constant dense<0.000000e+00> : vector<72x64xf32>
    %640 = tpu.matmul %638, %639, %cst_217 {dimension_numbers = #tpu.dot_dimension_numbers<[1], [0], [0], [1], [0, 0, 1, 1], [], []>} : vector<72x4xbf16>, vector<4x64xbf16>, vector<72x64xf32> -> vector<72x64xf32>
    %641 = vector.extract_strided_slice %640 {offsets = [0, 0], sizes = [4, 64], strides = [1, 1]} : vector<72x64xf32> to vector<4x64xf32>
    %642 = vector.extract_strided_slice %637 {offsets = [0, 0], sizes = [64, 64], strides = [1, 1]} : vector<576x64xbf16> to vector<64x64xbf16>
    %643 = arith.truncf %641 : vector<4x64xf32> to vector<4x64xbf16>
    %cst_218 = arith.constant dense<0.000000e+00> : vector<4x64xf32>
    %644 = tpu.matmul %643, %642, %cst_218 {dimension_numbers = #tpu.dot_dimension_numbers<[1], [0], [0], [1], [0, 0, 1, 1], [], []>} : vector<4x64xbf16>, vector<64x64xbf16>, vector<4x64xf32> -> vector<4x64xf32>
    %645 = vector.extract_strided_slice %640 {offsets = [8, 0], sizes = [4, 64], strides = [1, 1]} : vector<72x64xf32> to vector<4x64xf32>
    %646 = vector.extract_strided_slice %637 {offsets = [64, 0], sizes = [64, 64], strides = [1, 1]} : vector<576x64xbf16> to vector<64x64xbf16>
    %647 = arith.truncf %645 : vector<4x64xf32> to vector<4x64xbf16>
    %cst_219 = arith.constant dense<0.000000e+00> : vector<4x64xf32>
    %648 = tpu.matmul %647, %646, %cst_219 {dimension_numbers = #tpu.dot_dimension_numbers<[1], [0], [0], [1], [0, 0, 1, 1], [], []>} : vector<4x64xbf16>, vector<64x64xbf16>, vector<4x64xf32> -> vector<4x64xf32>
    %649 = arith.addf %644, %648 : vector<4x64xf32>
    %650 = vector.extract_strided_slice %640 {offsets = [16, 0], sizes = [4, 64], strides = [1, 1]} : vector<72x64xf32> to vector<4x64xf32>
    %651 = vector.extract_strided_slice %637 {offsets = [128, 0], sizes = [64, 64], strides = [1, 1]} : vector<576x64xbf16> to vector<64x64xbf16>
    %652 = arith.truncf %650 : vector<4x64xf32> to vector<4x64xbf16>
    %cst_220 = arith.constant dense<0.000000e+00> : vector<4x64xf32>
    %653 = tpu.matmul %652, %651, %cst_220 {dimension_numbers = #tpu.dot_dimension_numbers<[1], [0], [0], [1], [0, 0, 1, 1], [], []>} : vector<4x64xbf16>, vector<64x64xbf16>, vector<4x64xf32> -> vector<4x64xf32>
    %654 = arith.addf %649, %653 : vector<4x64xf32>
    %655 = vector.extract_strided_slice %640 {offsets = [24, 0], sizes = [4, 64], strides = [1, 1]} : vector<72x64xf32> to vector<4x64xf32>
    %656 = vector.extract_strided_slice %637 {offsets = [192, 0], sizes = [64, 64], strides = [1, 1]} : vector<576x64xbf16> to vector<64x64xbf16>
    %657 = arith.truncf %655 : vector<4x64xf32> to vector<4x64xbf16>
    %cst_221 = arith.constant dense<0.000000e+00> : vector<4x64xf32>
    %658 = tpu.matmul %657, %656, %cst_221 {dimension_numbers = #tpu.dot_dimension_numbers<[1], [0], [0], [1], [0, 0, 1, 1], [], []>} : vector<4x64xbf16>, vector<64x64xbf16>, vector<4x64xf32> -> vector<4x64xf32>
    %659 = arith.addf %654, %658 : vector<4x64xf32>
    %660 = vector.extract_strided_slice %640 {offsets = [32, 0], sizes = [4, 64], strides = [1, 1]} : vector<72x64xf32> to vector<4x64xf32>
    %661 = vector.extract_strided_slice %637 {offsets = [256, 0], sizes = [64, 64], strides = [1, 1]} : vector<576x64xbf16> to vector<64x64xbf16>
    %662 = arith.truncf %660 : vector<4x64xf32> to vector<4x64xbf16>
    %cst_222 = arith.constant dense<0.000000e+00> : vector<4x64xf32>
    %663 = tpu.matmul %662, %661, %cst_222 {dimension_numbers = #tpu.dot_dimension_numbers<[1], [0], [0], [1], [0, 0, 1, 1], [], []>} : vector<4x64xbf16>, vector<64x64xbf16>, vector<4x64xf32> -> vector<4x64xf32>
    %664 = arith.addf %659, %663 : vector<4x64xf32>
    %665 = vector.extract_strided_slice %640 {offsets = [40, 0], sizes = [4, 64], strides = [1, 1]} : vector<72x64xf32> to vector<4x64xf32>
    %666 = vector.extract_strided_slice %637 {offsets = [320, 0], sizes = [64, 64], strides = [1, 1]} : vector<576x64xbf16> to vector<64x64xbf16>
    %667 = arith.truncf %665 : vector<4x64xf32> to vector<4x64xbf16>
    %cst_223 = arith.constant dense<0.000000e+00> : vector<4x64xf32>
    %668 = tpu.matmul %667, %666, %cst_223 {dimension_numbers = #tpu.dot_dimension_numbers<[1], [0], [0], [1], [0, 0, 1, 1], [], []>} : vector<4x64xbf16>, vector<64x64xbf16>, vector<4x64xf32> -> vector<4x64xf32>
    %669 = arith.addf %664, %668 : vector<4x64xf32>
    %670 = vector.extract_strided_slice %640 {offsets = [48, 0], sizes = [4, 64], strides = [1, 1]} : vector<72x64xf32> to vector<4x64xf32>
    %671 = vector.extract_strided_slice %637 {offsets = [384, 0], sizes = [64, 64], strides = [1, 1]} : vector<576x64xbf16> to vector<64x64xbf16>
    %672 = arith.truncf %670 : vector<4x64xf32> to vector<4x64xbf16>
    %cst_224 = arith.constant dense<0.000000e+00> : vector<4x64xf32>
    %673 = tpu.matmul %672, %671, %cst_224 {dimension_numbers = #tpu.dot_dimension_numbers<[1], [0], [0], [1], [0, 0, 1, 1], [], []>} : vector<4x64xbf16>, vector<64x64xbf16>, vector<4x64xf32> -> vector<4x64xf32>
    %674 = arith.addf %669, %673 : vector<4x64xf32>
    %675 = vector.extract_strided_slice %640 {offsets = [56, 0], sizes = [4, 64], strides = [1, 1]} : vector<72x64xf32> to vector<4x64xf32>
    %676 = vector.extract_strided_slice %637 {offsets = [448, 0], sizes = [64, 64], strides = [1, 1]} : vector<576x64xbf16> to vector<64x64xbf16>
    %677 = arith.truncf %675 : vector<4x64xf32> to vector<4x64xbf16>
    %cst_225 = arith.constant dense<0.000000e+00> : vector<4x64xf32>
    %678 = tpu.matmul %677, %676, %cst_225 {dimension_numbers = #tpu.dot_dimension_numbers<[1], [0], [0], [1], [0, 0, 1, 1], [], []>} : vector<4x64xbf16>, vector<64x64xbf16>, vector<4x64xf32> -> vector<4x64xf32>
    %679 = arith.addf %674, %678 : vector<4x64xf32>
    %680 = vector.extract_strided_slice %640 {offsets = [64, 0], sizes = [4, 64], strides = [1, 1]} : vector<72x64xf32> to vector<4x64xf32>
    %681 = vector.extract_strided_slice %637 {offsets = [512, 0], sizes = [64, 64], strides = [1, 1]} : vector<576x64xbf16> to vector<64x64xbf16>
    %682 = arith.truncf %680 : vector<4x64xf32> to vector<4x64xbf16>
    %cst_226 = arith.constant dense<0.000000e+00> : vector<4x64xf32>
    %683 = tpu.matmul %682, %681, %cst_226 {dimension_numbers = #tpu.dot_dimension_numbers<[1], [0], [0], [1], [0, 0, 1, 1], [], []>} : vector<4x64xbf16>, vector<64x64xbf16>, vector<4x64xf32> -> vector<4x64xf32>
    %684 = arith.addf %679, %683 : vector<4x64xf32>
    %c0_227 = arith.constant 0 : index
    %c0_228 = arith.constant 0 : index
    %685 = vector.load %arg41[%c0_227, %c0_228] : memref<1x64xf32, #tpu.memory_space<vmem>>, vector<1x64xf32>
    %686 = vector.broadcast %685 : vector<1x64xf32> to vector<4x64xf32>
    %687 = arith.addf %684, %686 : vector<4x64xf32>
    %688 = arith.addf %687, %583 : vector<4x64xf32>
    %cst_229 = arith.constant 0.000000e+00 : f32
    %689 = vector.broadcast %cst_229 : f32 to vector<4x64xf32>
    %690 = arith.maximumf %688, %689 : vector<4x64xf32>
    %c0_230 = arith.constant 0 : index
    %c0_231 = arith.constant 0 : index
    %691 = vector.load %arg42[%c0_230, %c0_231] : memref<576x128xbf16, #tpu.memory_space<vmem>>, vector<576x128xbf16>
    %c0_232 = arith.constant 0 : index
    %c0_233 = arith.constant 0 : index
    %692 = vector.load %arg12[%c0_232, %c0_233] : memref<72x4xbf16, #tpu.memory_space<vmem>>, vector<72x4xbf16>
    %693 = arith.truncf %690 : vector<4x64xf32> to vector<4x64xbf16>
    %cst_234 = arith.constant dense<0.000000e+00> : vector<72x64xf32>
    %694 = tpu.matmul %692, %693, %cst_234 {dimension_numbers = #tpu.dot_dimension_numbers<[1], [0], [0], [1], [0, 0, 1, 1], [], []>} : vector<72x4xbf16>, vector<4x64xbf16>, vector<72x64xf32> -> vector<72x64xf32>
    %695 = vector.extract_strided_slice %694 {offsets = [0, 0], sizes = [1, 64], strides = [1, 1]} : vector<72x64xf32> to vector<1x64xf32>
    %696 = vector.extract_strided_slice %691 {offsets = [0, 0], sizes = [64, 128], strides = [1, 1]} : vector<576x128xbf16> to vector<64x128xbf16>
    %697 = arith.truncf %695 : vector<1x64xf32> to vector<1x64xbf16>
    %cst_235 = arith.constant dense<0.000000e+00> : vector<1x128xf32>
    %698 = tpu.matmul %697, %696, %cst_235 {dimension_numbers = #tpu.dot_dimension_numbers<[1], [0], [0], [1], [0, 0, 1, 1], [], []>} : vector<1x64xbf16>, vector<64x128xbf16>, vector<1x128xf32> -> vector<1x128xf32>
    %699 = vector.extract_strided_slice %694 {offsets = [8, 0], sizes = [1, 64], strides = [1, 1]} : vector<72x64xf32> to vector<1x64xf32>
    %700 = vector.extract_strided_slice %691 {offsets = [64, 0], sizes = [64, 128], strides = [1, 1]} : vector<576x128xbf16> to vector<64x128xbf16>
    %701 = arith.truncf %699 : vector<1x64xf32> to vector<1x64xbf16>
    %cst_236 = arith.constant dense<0.000000e+00> : vector<1x128xf32>
    %702 = tpu.matmul %701, %700, %cst_236 {dimension_numbers = #tpu.dot_dimension_numbers<[1], [0], [0], [1], [0, 0, 1, 1], [], []>} : vector<1x64xbf16>, vector<64x128xbf16>, vector<1x128xf32> -> vector<1x128xf32>
    %703 = arith.addf %698, %702 : vector<1x128xf32>
    %704 = vector.extract_strided_slice %694 {offsets = [16, 0], sizes = [1, 64], strides = [1, 1]} : vector<72x64xf32> to vector<1x64xf32>
    %705 = vector.extract_strided_slice %691 {offsets = [128, 0], sizes = [64, 128], strides = [1, 1]} : vector<576x128xbf16> to vector<64x128xbf16>
    %706 = arith.truncf %704 : vector<1x64xf32> to vector<1x64xbf16>
    %cst_237 = arith.constant dense<0.000000e+00> : vector<1x128xf32>
    %707 = tpu.matmul %706, %705, %cst_237 {dimension_numbers = #tpu.dot_dimension_numbers<[1], [0], [0], [1], [0, 0, 1, 1], [], []>} : vector<1x64xbf16>, vector<64x128xbf16>, vector<1x128xf32> -> vector<1x128xf32>
    %708 = arith.addf %703, %707 : vector<1x128xf32>
    %709 = vector.extract_strided_slice %694 {offsets = [24, 0], sizes = [1, 64], strides = [1, 1]} : vector<72x64xf32> to vector<1x64xf32>
    %710 = vector.extract_strided_slice %691 {offsets = [192, 0], sizes = [64, 128], strides = [1, 1]} : vector<576x128xbf16> to vector<64x128xbf16>
    %711 = arith.truncf %709 : vector<1x64xf32> to vector<1x64xbf16>
    %cst_238 = arith.constant dense<0.000000e+00> : vector<1x128xf32>
    %712 = tpu.matmul %711, %710, %cst_238 {dimension_numbers = #tpu.dot_dimension_numbers<[1], [0], [0], [1], [0, 0, 1, 1], [], []>} : vector<1x64xbf16>, vector<64x128xbf16>, vector<1x128xf32> -> vector<1x128xf32>
    %713 = arith.addf %708, %712 : vector<1x128xf32>
    %714 = vector.extract_strided_slice %694 {offsets = [32, 0], sizes = [1, 64], strides = [1, 1]} : vector<72x64xf32> to vector<1x64xf32>
    %715 = vector.extract_strided_slice %691 {offsets = [256, 0], sizes = [64, 128], strides = [1, 1]} : vector<576x128xbf16> to vector<64x128xbf16>
    %716 = arith.truncf %714 : vector<1x64xf32> to vector<1x64xbf16>
    %cst_239 = arith.constant dense<0.000000e+00> : vector<1x128xf32>
    %717 = tpu.matmul %716, %715, %cst_239 {dimension_numbers = #tpu.dot_dimension_numbers<[1], [0], [0], [1], [0, 0, 1, 1], [], []>} : vector<1x64xbf16>, vector<64x128xbf16>, vector<1x128xf32> -> vector<1x128xf32>
    %718 = arith.addf %713, %717 : vector<1x128xf32>
    %719 = vector.extract_strided_slice %694 {offsets = [40, 0], sizes = [1, 64], strides = [1, 1]} : vector<72x64xf32> to vector<1x64xf32>
    %720 = vector.extract_strided_slice %691 {offsets = [320, 0], sizes = [64, 128], strides = [1, 1]} : vector<576x128xbf16> to vector<64x128xbf16>
    %721 = arith.truncf %719 : vector<1x64xf32> to vector<1x64xbf16>
    %cst_240 = arith.constant dense<0.000000e+00> : vector<1x128xf32>
    %722 = tpu.matmul %721, %720, %cst_240 {dimension_numbers = #tpu.dot_dimension_numbers<[1], [0], [0], [1], [0, 0, 1, 1], [], []>} : vector<1x64xbf16>, vector<64x128xbf16>, vector<1x128xf32> -> vector<1x128xf32>
    %723 = arith.addf %718, %722 : vector<1x128xf32>
    %724 = vector.extract_strided_slice %694 {offsets = [48, 0], sizes = [1, 64], strides = [1, 1]} : vector<72x64xf32> to vector<1x64xf32>
    %725 = vector.extract_strided_slice %691 {offsets = [384, 0], sizes = [64, 128], strides = [1, 1]} : vector<576x128xbf16> to vector<64x128xbf16>
    %726 = arith.truncf %724 : vector<1x64xf32> to vector<1x64xbf16>
    %cst_241 = arith.constant dense<0.000000e+00> : vector<1x128xf32>
    %727 = tpu.matmul %726, %725, %cst_241 {dimension_numbers = #tpu.dot_dimension_numbers<[1], [0], [0], [1], [0, 0, 1, 1], [], []>} : vector<1x64xbf16>, vector<64x128xbf16>, vector<1x128xf32> -> vector<1x128xf32>
    %728 = arith.addf %723, %727 : vector<1x128xf32>
    %729 = vector.extract_strided_slice %694 {offsets = [56, 0], sizes = [1, 64], strides = [1, 1]} : vector<72x64xf32> to vector<1x64xf32>
    %730 = vector.extract_strided_slice %691 {offsets = [448, 0], sizes = [64, 128], strides = [1, 1]} : vector<576x128xbf16> to vector<64x128xbf16>
    %731 = arith.truncf %729 : vector<1x64xf32> to vector<1x64xbf16>
    %cst_242 = arith.constant dense<0.000000e+00> : vector<1x128xf32>
    %732 = tpu.matmul %731, %730, %cst_242 {dimension_numbers = #tpu.dot_dimension_numbers<[1], [0], [0], [1], [0, 0, 1, 1], [], []>} : vector<1x64xbf16>, vector<64x128xbf16>, vector<1x128xf32> -> vector<1x128xf32>
    %733 = arith.addf %728, %732 : vector<1x128xf32>
    %734 = vector.extract_strided_slice %694 {offsets = [64, 0], sizes = [1, 64], strides = [1, 1]} : vector<72x64xf32> to vector<1x64xf32>
    %735 = vector.extract_strided_slice %691 {offsets = [512, 0], sizes = [64, 128], strides = [1, 1]} : vector<576x128xbf16> to vector<64x128xbf16>
    %736 = arith.truncf %734 : vector<1x64xf32> to vector<1x64xbf16>
    %cst_243 = arith.constant dense<0.000000e+00> : vector<1x128xf32>
    %737 = tpu.matmul %736, %735, %cst_243 {dimension_numbers = #tpu.dot_dimension_numbers<[1], [0], [0], [1], [0, 0, 1, 1], [], []>} : vector<1x64xbf16>, vector<64x128xbf16>, vector<1x128xf32> -> vector<1x128xf32>
    %738 = arith.addf %733, %737 : vector<1x128xf32>
    %c0_244 = arith.constant 0 : index
    %c0_245 = arith.constant 0 : index
    %739 = vector.load %arg43[%c0_244, %c0_245] : memref<1x128xf32, #tpu.memory_space<vmem>>, vector<1x128xf32>
    %740 = arith.addf %738, %739 : vector<1x128xf32>
    %cst_246 = arith.constant 0.000000e+00 : f32
    %741 = vector.broadcast %cst_246 : f32 to vector<1x128xf32>
    %742 = arith.maximumf %740, %741 : vector<1x128xf32>
    %c0_247 = arith.constant 0 : index
    %c0_248 = arith.constant 0 : index
    %743 = vector.load %arg44[%c0_247, %c0_248] : memref<1152x128xbf16, #tpu.memory_space<vmem>>, vector<1152x128xbf16>
    %744 = vector.extract_strided_slice %743 {offsets = [512, 0], sizes = [128, 128], strides = [1, 1]} : vector<1152x128xbf16> to vector<128x128xbf16>
    %745 = arith.truncf %742 : vector<1x128xf32> to vector<1x128xbf16>
    %cst_249 = arith.constant dense<0.000000e+00> : vector<1x128xf32>
    %746 = tpu.matmul %745, %744, %cst_249 {dimension_numbers = #tpu.dot_dimension_numbers<[1], [0], [0], [1], [0, 0, 1, 1], [], []>} : vector<1x128xbf16>, vector<128x128xbf16>, vector<1x128xf32> -> vector<1x128xf32>
    %c0_250 = arith.constant 0 : index
    %c0_251 = arith.constant 0 : index
    %747 = vector.load %arg45[%c0_250, %c0_251] : memref<1x128xf32, #tpu.memory_space<vmem>>, vector<1x128xf32>
    %748 = arith.addf %746, %747 : vector<1x128xf32>
    %c0_252 = arith.constant 0 : index
    %c0_253 = arith.constant 0 : index
    %749 = vector.load %arg13[%c0_252, %c0_253] : memref<8x4xbf16, #tpu.memory_space<vmem>>, vector<8x4xbf16>
    %750 = arith.truncf %690 : vector<4x64xf32> to vector<4x64xbf16>
    %cst_254 = arith.constant dense<0.000000e+00> : vector<8x64xf32>
    %751 = tpu.matmul %749, %750, %cst_254 {dimension_numbers = #tpu.dot_dimension_numbers<[1], [0], [0], [1], [0, 0, 1, 1], [], []>} : vector<8x4xbf16>, vector<4x64xbf16>, vector<8x64xf32> -> vector<8x64xf32>
    %752 = vector.extract_strided_slice %751 {offsets = [0, 0], sizes = [1, 64], strides = [1, 1]} : vector<8x64xf32> to vector<1x64xf32>
    %c0_255 = arith.constant 0 : index
    %c0_256 = arith.constant 0 : index
    %753 = vector.load %arg46[%c0_255, %c0_256] : memref<64x128xbf16, #tpu.memory_space<vmem>>, vector<64x128xbf16>
    %754 = arith.truncf %752 : vector<1x64xf32> to vector<1x64xbf16>
    %cst_257 = arith.constant dense<0.000000e+00> : vector<1x128xf32>
    %755 = tpu.matmul %754, %753, %cst_257 {dimension_numbers = #tpu.dot_dimension_numbers<[1], [0], [0], [1], [0, 0, 1, 1], [], []>} : vector<1x64xbf16>, vector<64x128xbf16>, vector<1x128xf32> -> vector<1x128xf32>
    %c0_258 = arith.constant 0 : index
    %c0_259 = arith.constant 0 : index
    %756 = vector.load %arg47[%c0_258, %c0_259] : memref<1x128xf32, #tpu.memory_space<vmem>>, vector<1x128xf32>
    %757 = arith.addf %755, %756 : vector<1x128xf32>
    %758 = arith.addf %748, %757 : vector<1x128xf32>
    %cst_260 = arith.constant 0.000000e+00 : f32
    %759 = vector.broadcast %cst_260 : f32 to vector<1x128xf32>
    %760 = arith.maximumf %758, %759 : vector<1x128xf32>
    %c0_261 = arith.constant 0 : index
    %c0_262 = arith.constant 0 : index
    %761 = vector.load %arg48[%c0_261, %c0_262] : memref<1152x128xbf16, #tpu.memory_space<vmem>>, vector<1152x128xbf16>
    %762 = vector.extract_strided_slice %761 {offsets = [512, 0], sizes = [128, 128], strides = [1, 1]} : vector<1152x128xbf16> to vector<128x128xbf16>
    %763 = arith.truncf %760 : vector<1x128xf32> to vector<1x128xbf16>
    %cst_263 = arith.constant dense<0.000000e+00> : vector<1x128xf32>
    %764 = tpu.matmul %763, %762, %cst_263 {dimension_numbers = #tpu.dot_dimension_numbers<[1], [0], [0], [1], [0, 0, 1, 1], [], []>} : vector<1x128xbf16>, vector<128x128xbf16>, vector<1x128xf32> -> vector<1x128xf32>
    %c0_264 = arith.constant 0 : index
    %c0_265 = arith.constant 0 : index
    %765 = vector.load %arg49[%c0_264, %c0_265] : memref<1x128xf32, #tpu.memory_space<vmem>>, vector<1x128xf32>
    %766 = arith.addf %764, %765 : vector<1x128xf32>
    %cst_266 = arith.constant 0.000000e+00 : f32
    %767 = vector.broadcast %cst_266 : f32 to vector<1x128xf32>
    %768 = arith.maximumf %766, %767 : vector<1x128xf32>
    %c0_267 = arith.constant 0 : index
    %c0_268 = arith.constant 0 : index
    %769 = vector.load %arg50[%c0_267, %c0_268] : memref<1152x128xbf16, #tpu.memory_space<vmem>>, vector<1152x128xbf16>
    %770 = vector.extract_strided_slice %769 {offsets = [512, 0], sizes = [128, 128], strides = [1, 1]} : vector<1152x128xbf16> to vector<128x128xbf16>
    %771 = arith.truncf %768 : vector<1x128xf32> to vector<1x128xbf16>
    %cst_269 = arith.constant dense<0.000000e+00> : vector<1x128xf32>
    %772 = tpu.matmul %771, %770, %cst_269 {dimension_numbers = #tpu.dot_dimension_numbers<[1], [0], [0], [1], [0, 0, 1, 1], [], []>} : vector<1x128xbf16>, vector<128x128xbf16>, vector<1x128xf32> -> vector<1x128xf32>
    %c0_270 = arith.constant 0 : index
    %c0_271 = arith.constant 0 : index
    %773 = vector.load %arg51[%c0_270, %c0_271] : memref<1x128xf32, #tpu.memory_space<vmem>>, vector<1x128xf32>
    %774 = arith.addf %772, %773 : vector<1x128xf32>
    %775 = arith.addf %774, %760 : vector<1x128xf32>
    %cst_272 = arith.constant 0.000000e+00 : f32
    %776 = vector.broadcast %cst_272 : f32 to vector<1x128xf32>
    %777 = arith.maximumf %775, %776 : vector<1x128xf32>
    %cst_273 = arith.constant dense<0.000000e+00> : vector<128xf32>
    %778 = vector.multi_reduction <add>, %777, %cst_273 [0] : vector<1x128xf32> to vector<128xf32>
    %779 = vector.shape_cast %778 : vector<128xf32> to vector<1x128xf32>
    %cst_274 = arith.constant 1.000000e+00 : f32
    %780 = vector.broadcast %cst_274 : f32 to vector<1x128xf32>
    %781 = arith.mulf %779, %780 : vector<1x128xf32>
    %cst_275 = arith.constant -1.000000e+20 : f32
    %782 = vector.broadcast %cst_275 : f32 to vector<1x128xf32>
    %783 = arith.cmpf ogt, %781, %782 : vector<1x128xf32>
    %cst_276 = arith.constant -1.000000e+20 : f32
    %784 = vector.broadcast %cst_276 : f32 to vector<1x128xf32>
    %785 = arith.select %783, %781, %784 : vector<1x128xi1>, vector<1x128xf32>
    %c0_277 = arith.constant 0 : index
    %c0_278 = arith.constant 0 : index
    %c0_279 = arith.constant 0 : index
    %786 = vector.load %arg52[%c0_277, %c0_278, %c0_279] : memref<1x1x128xf32, #tpu.memory_space<vmem>>, vector<1x1x128xf32>
    %787 = vector.shape_cast %786 : vector<1x1x128xf32> to vector<1x128xf32>
    %788 = vector.shape_cast %785 : vector<1x128xf32> to vector<1x1x128xf32>
    tpu.vector_store %arg52[%c0_277, %c0_278, %c0_279], %788 {strides = array<i32>} : memref<1x1x128xf32, #tpu.memory_space<vmem>>, vector<1x1x128xf32>,
    return
  }
  func.func @transform_0(%arg0: i32) -> (i32, i32, i32) {
    %c0_i32 = arith.constant 0 : i32
    %c0_i32_0 = arith.constant 0 : i32
    %c0_i32_1 = arith.constant 0 : i32
    return %arg0, %c0_i32, %c0_i32_0 : i32, i32, i32
  }
  func.func @transform_1(%arg0: i32) -> (i32, i32) {
    %c0_i32 = arith.constant 0 : i32
    %c0_i32_0 = arith.constant 0 : i32
    %c0_i32_1 = arith.constant 0 : i32
    return %c0_i32, %c0_i32_0 : i32, i32
  }
  func.func @transform_2(%arg0: i32) -> (i32, i32) {
    %c0_i32 = arith.constant 0 : i32
    %c0_i32_0 = arith.constant 0 : i32
    %c0_i32_1 = arith.constant 0 : i32
    return %c0_i32, %c0_i32_0 : i32, i32
  }
  func.func @transform_3(%arg0: i32) -> (i32, i32) {
    %c0_i32 = arith.constant 0 : i32
    %c0_i32_0 = arith.constant 0 : i32
    %c0_i32_1 = arith.constant 0 : i32
    return %c0_i32, %c0_i32_0 : i32, i32
  }
  func.func @transform_4(%arg0: i32) -> (i32, i32) {
    %c0_i32 = arith.constant 0 : i32
    %c0_i32_0 = arith.constant 0 : i32
    %c0_i32_1 = arith.constant 0 : i32
    return %c0_i32, %c0_i32_0 : i32, i32
  }
  func.func @transform_5(%arg0: i32) -> (i32, i32) {
    %c0_i32 = arith.constant 0 : i32
    %c0_i32_0 = arith.constant 0 : i32
    %c0_i32_1 = arith.constant 0 : i32
    return %c0_i32, %c0_i32_0 : i32, i32
  }
  func.func @transform_6(%arg0: i32) -> (i32, i32) {
    %c0_i32 = arith.constant 0 : i32
    %c0_i32_0 = arith.constant 0 : i32
    %c0_i32_1 = arith.constant 0 : i32
    return %c0_i32, %c0_i32_0 : i32, i32
  }
  func.func @transform_7(%arg0: i32) -> (i32, i32) {
    %c0_i32 = arith.constant 0 : i32
    %c0_i32_0 = arith.constant 0 : i32
    %c0_i32_1 = arith.constant 0 : i32
    return %c0_i32, %c0_i32_0 : i32, i32
  }
  func.func @transform_8(%arg0: i32) -> (i32, i32) {
    %c0_i32 = arith.constant 0 : i32
    %c0_i32_0 = arith.constant 0 : i32
    %c0_i32_1 = arith.constant 0 : i32
    return %c0_i32, %c0_i32_0 : i32, i32
  }
  func.func @transform_9(%arg0: i32) -> (i32, i32) {
    %c0_i32 = arith.constant 0 : i32
    %c0_i32_0 = arith.constant 0 : i32
    %c0_i32_1 = arith.constant 0 : i32
    return %c0_i32, %c0_i32_0 : i32, i32
  }
  func.func @transform_10(%arg0: i32) -> (i32, i32) {
    %c0_i32 = arith.constant 0 : i32
    %c0_i32_0 = arith.constant 0 : i32
    %c0_i32_1 = arith.constant 0 : i32
    return %c0_i32, %c0_i32_0 : i32, i32
  }
  func.func @transform_11(%arg0: i32) -> (i32, i32) {
    %c0_i32 = arith.constant 0 : i32
    %c0_i32_0 = arith.constant 0 : i32
    %c0_i32_1 = arith.constant 0 : i32
    return %c0_i32, %c0_i32_0 : i32, i32
  }
  func.func @transform_12(%arg0: i32) -> (i32, i32) {
    %c0_i32 = arith.constant 0 : i32
    %c0_i32_0 = arith.constant 0 : i32
    %c0_i32_1 = arith.constant 0 : i32
    return %c0_i32, %c0_i32_0 : i32, i32
  }
  func.func @transform_13(%arg0: i32) -> (i32, i32) {
    %c0_i32 = arith.constant 0 : i32
    %c0_i32_0 = arith.constant 0 : i32
    %c0_i32_1 = arith.constant 0 : i32
    return %c0_i32, %c0_i32_0 : i32, i32
  }
  func.func @transform_14(%arg0: i32) -> (i32, i32) {
    %c0_i32 = arith.constant 0 : i32
    %c0_i32_0 = arith.constant 0 : i32
    %c0_i32_1 = arith.constant 0 : i32
    return %c0_i32, %c0_i32_0 : i32, i32
  }
  func.func @transform_15(%arg0: i32) -> (i32, i32) {
    %c0_i32 = arith.constant 0 : i32
    %c0_i32_0 = arith.constant 0 : i32
    %c0_i32_1 = arith.constant 0 : i32
    return %c0_i32, %c0_i32_0 : i32, i32
  }
  func.func @transform_16(%arg0: i32) -> (i32, i32) {
    %c0_i32 = arith.constant 0 : i32
    %c0_i32_0 = arith.constant 0 : i32
    %c0_i32_1 = arith.constant 0 : i32
    return %c0_i32, %c0_i32_0 : i32, i32
  }
  func.func @transform_17(%arg0: i32) -> (i32, i32) {
    %c0_i32 = arith.constant 0 : i32
    %c0_i32_0 = arith.constant 0 : i32
    %c0_i32_1 = arith.constant 0 : i32
    return %c0_i32, %c0_i32_0 : i32, i32
  }
  func.func @transform_18(%arg0: i32) -> (i32, i32) {
    %c0_i32 = arith.constant 0 : i32
    %c0_i32_0 = arith.constant 0 : i32
    %c0_i32_1 = arith.constant 0 : i32
    return %c0_i32, %c0_i32_0 : i32, i32
  }
  func.func @transform_19(%arg0: i32) -> (i32, i32) {
    %c0_i32 = arith.constant 0 : i32
    %c0_i32_0 = arith.constant 0 : i32
    %c0_i32_1 = arith.constant 0 : i32
    return %c0_i32, %c0_i32_0 : i32, i32
  }
  func.func @transform_20(%arg0: i32) -> (i32, i32) {
    %c0_i32 = arith.constant 0 : i32
    %c0_i32_0 = arith.constant 0 : i32
    %c0_i32_1 = arith.constant 0 : i32
    return %c0_i32, %c0_i32_0 : i32, i32
  }
  func.func @transform_21(%arg0: i32) -> (i32, i32) {
    %c0_i32 = arith.constant 0 : i32
    %c0_i32_0 = arith.constant 0 : i32
    %c0_i32_1 = arith.constant 0 : i32
    return %c0_i32, %c0_i32_0 : i32, i32
  }
  func.func @transform_22(%arg0: i32) -> (i32, i32) {
    %c0_i32 = arith.constant 0 : i32
    %c0_i32_0 = arith.constant 0 : i32
    %c0_i32_1 = arith.constant 0 : i32
    return %c0_i32, %c0_i32_0 : i32, i32
  }
  func.func @transform_23(%arg0: i32) -> (i32, i32) {
    %c0_i32 = arith.constant 0 : i32
    %c0_i32_0 = arith.constant 0 : i32
    %c0_i32_1 = arith.constant 0 : i32
    return %c0_i32, %c0_i32_0 : i32, i32
  }
  func.func @transform_24(%arg0: i32) -> (i32, i32) {
    %c0_i32 = arith.constant 0 : i32
    %c0_i32_0 = arith.constant 0 : i32
    %c0_i32_1 = arith.constant 0 : i32
    return %c0_i32, %c0_i32_0 : i32, i32
  }
  func.func @transform_25(%arg0: i32) -> (i32, i32) {
    %c0_i32 = arith.constant 0 : i32
    %c0_i32_0 = arith.constant 0 : i32
    %c0_i32_1 = arith.constant 0 : i32
    return %c0_i32, %c0_i32_0 : i32, i32
  }
  func.func @transform_26(%arg0: i32) -> (i32, i32) {
    %c0_i32 = arith.constant 0 : i32
    %c0_i32_0 = arith.constant 0 : i32
    %c0_i32_1 = arith.constant 0 : i32
    return %c0_i32, %c0_i32_0 : i32, i32
  }
  func.func @transform_27(%arg0: i32) -> (i32, i32) {
    %c0_i32 = arith.constant 0 : i32
    %c0_i32_0 = arith.constant 0 : i32
    %c0_i32_1 = arith.constant 0 : i32
    return %c0_i32, %c0_i32_0 : i32, i32
  }
  func.func @transform_28(%arg0: i32) -> (i32, i32) {
    %c0_i32 = arith.constant 0 : i32
    %c0_i32_0 = arith.constant 0 : i32
    %c0_i32_1 = arith.constant 0 : i32
    return %c0_i32, %c0_i32_0 : i32, i32
  }
  func.func @transform_29(%arg0: i32) -> (i32, i32) {
    %c0_i32 = arith.constant 0 : i32
    %c0_i32_0 = arith.constant 0 : i32
    %c0_i32_1 = arith.constant 0 : i32
    return %c0_i32, %c0_i32_0 : i32, i32
  }
  func.func @transform_30(%arg0: i32) -> (i32, i32) {
    %c0_i32 = arith.constant 0 : i32
    %c0_i32_0 = arith.constant 0 : i32
    %c0_i32_1 = arith.constant 0 : i32
    return %c0_i32, %c0_i32_0 : i32, i32
  }
  func.func @transform_31(%arg0: i32) -> (i32, i32) {
    %c0_i32 = arith.constant 0 : i32
    %c0_i32_0 = arith.constant 0 : i32
    %c0_i32_1 = arith.constant 0 : i32
    return %c0_i32, %c0_i32_0 : i32, i32
  }
  func.func @transform_32(%arg0: i32) -> (i32, i32) {
    %c0_i32 = arith.constant 0 : i32
    %c0_i32_0 = arith.constant 0 : i32
    %c0_i32_1 = arith.constant 0 : i32
    return %c0_i32, %c0_i32_0 : i32, i32
  }
  func.func @transform_33(%arg0: i32) -> (i32, i32) {
    %c0_i32 = arith.constant 0 : i32
    %c0_i32_0 = arith.constant 0 : i32
    %c0_i32_1 = arith.constant 0 : i32
    return %c0_i32, %c0_i32_0 : i32, i32
  }
  func.func @transform_34(%arg0: i32) -> (i32, i32) {
    %c0_i32 = arith.constant 0 : i32
    %c0_i32_0 = arith.constant 0 : i32
    %c0_i32_1 = arith.constant 0 : i32
    return %c0_i32, %c0_i32_0 : i32, i32
  }
  func.func @transform_35(%arg0: i32) -> (i32, i32) {
    %c0_i32 = arith.constant 0 : i32
    %c0_i32_0 = arith.constant 0 : i32
    %c0_i32_1 = arith.constant 0 : i32
    return %c0_i32, %c0_i32_0 : i32, i32
  }
  func.func @transform_36(%arg0: i32) -> (i32, i32) {
    %c0_i32 = arith.constant 0 : i32
    %c0_i32_0 = arith.constant 0 : i32
    %c0_i32_1 = arith.constant 0 : i32
    return %c0_i32, %c0_i32_0 : i32, i32
  }
  func.func @transform_37(%arg0: i32) -> (i32, i32) {
    %c0_i32 = arith.constant 0 : i32
    %c0_i32_0 = arith.constant 0 : i32
    %c0_i32_1 = arith.constant 0 : i32
    return %c0_i32, %c0_i32_0 : i32, i32
  }
  func.func @transform_38(%arg0: i32) -> (i32, i32) {
    %c0_i32 = arith.constant 0 : i32
    %c0_i32_0 = arith.constant 0 : i32
    %c0_i32_1 = arith.constant 0 : i32
    return %c0_i32, %c0_i32_0 : i32, i32
  }
  func.func @transform_39(%arg0: i32) -> (i32, i32) {
    %c0_i32 = arith.constant 0 : i32
    %c0_i32_0 = arith.constant 0 : i32
    %c0_i32_1 = arith.constant 0 : i32
    return %c0_i32, %c0_i32_0 : i32, i32
  }
  func.func @transform_40(%arg0: i32) -> (i32, i32) {
    %c0_i32 = arith.constant 0 : i32
    %c0_i32_0 = arith.constant 0 : i32
    %c0_i32_1 = arith.constant 0 : i32
    return %c0_i32, %c0_i32_0 : i32, i32
  }
  func.func @transform_41(%arg0: i32) -> (i32, i32) {
    %c0_i32 = arith.constant 0 : i32
    %c0_i32_0 = arith.constant 0 : i32
    %c0_i32_1 = arith.constant 0 : i32
    return %c0_i32, %c0_i32_0 : i32, i32
  }
  func.func @transform_42(%arg0: i32) -> (i32, i32) {
    %c0_i32 = arith.constant 0 : i32
    %c0_i32_0 = arith.constant 0 : i32
    %c0_i32_1 = arith.constant 0 : i32
    return %c0_i32, %c0_i32_0 : i32, i32
  }
  func.func @transform_43(%arg0: i32) -> (i32, i32) {
    %c0_i32 = arith.constant 0 : i32
    %c0_i32_0 = arith.constant 0 : i32
    %c0_i32_1 = arith.constant 0 : i32
    return %c0_i32, %c0_i32_0 : i32, i32
  }
  func.func @transform_44(%arg0: i32) -> (i32, i32) {
    %c0_i32 = arith.constant 0 : i32
    %c0_i32_0 = arith.constant 0 : i32
    %c0_i32_1 = arith.constant 0 : i32
    return %c0_i32, %c0_i32_0 : i32, i32
  }
  func.func @transform_45(%arg0: i32) -> (i32, i32) {
    %c0_i32 = arith.constant 0 : i32
    %c0_i32_0 = arith.constant 0 : i32
    %c0_i32_1 = arith.constant 0 : i32
    return %c0_i32, %c0_i32_0 : i32, i32
  }
  func.func @transform_46(%arg0: i32) -> (i32, i32) {
    %c0_i32 = arith.constant 0 : i32
    %c0_i32_0 = arith.constant 0 : i32
    %c0_i32_1 = arith.constant 0 : i32
    return %c0_i32, %c0_i32_0 : i32, i32
  }
  func.func @transform_47(%arg0: i32) -> (i32, i32) {
    %c0_i32 = arith.constant 0 : i32
    %c0_i32_0 = arith.constant 0 : i32
    %c0_i32_1 = arith.constant 0 : i32
    return %c0_i32, %c0_i32_0 : i32, i32
  }
  func.func @transform_48(%arg0: i32) -> (i32, i32) {
    %c0_i32 = arith.constant 0 : i32
    %c0_i32_0 = arith.constant 0 : i32
    %c0_i32_1 = arith.constant 0 : i32
    return %c0_i32, %c0_i32_0 : i32, i32
  }
  func.func @transform_49(%arg0: i32) -> (i32, i32) {
    %c0_i32 = arith.constant 0 : i32
    %c0_i32_0 = arith.constant 0 : i32
    %c0_i32_1 = arith.constant 0 : i32
    return %c0_i32, %c0_i32_0 : i32, i32
  }
  func.func @transform_50(%arg0: i32) -> (i32, i32) {
    %c0_i32 = arith.constant 0 : i32
    %c0_i32_0 = arith.constant 0 : i32
    %c0_i32_1 = arith.constant 0 : i32
    return %c0_i32, %c0_i32_0 : i32, i32
  }
  func.func @transform_51(%arg0: i32) -> (i32, i32, i32) {
    %c0_i32 = arith.constant 0 : i32
    %c0_i32_0 = arith.constant 0 : i32
    %c0_i32_1 = arith.constant 0 : i32
    return %arg0, %c0_i32, %c0_i32_0 : i32, i32, i32
  }
}

</mosaic_0001>

<bundles_post_ra>
// kernel: smallnet_forward.1
= control target key start
LH: loop header
LB: loop body
LE: loop exit
PB: predicated region body
PF: predicated region fallthrough
CT: control target
= control target key end

     0   :  { %s20612_s6 = smov 1   ;;  %s20613_s10 = smov 2   ;;  %s23354_s0 = inlined_call_operand.smem [shape: u32[52], index: -1, kind: input, shape index: {}] }
   0x1   :  { %s20685_s5 = sld [smem:[%s23354_s0]]   ;;  %s20614_s14 = smov 3  }
   0x2   :  { %s20690_s9 = sld [smem:[%s23354_s0 + %s20612_s6]]   ;;  %s20615_s18 = smov 4  }
   0x3   :  { %s20695_s13 = sld [smem:[%s23354_s0 + %s20613_s10]]   ;;  %s20616_s22 = smov 5  }
   0x4   :  { %s20700_s17 = sld [smem:[%s23354_s0 + %s20614_s14]]   ;;  %s20617_s26 = smov 6  }
   0x5   :  { %s20705_s21 = sld [smem:[%s23354_s0 + %s20615_s18]]   ;;  %s20618_s30 = smov 7  }
   0x6   :  { %s20710_s25 = sld [smem:[%s23354_s0 + %s20616_s22]]   ;;  %s20619_s4 = smov 8  }
   0x7   :  { %23406 = sst [smem:[#allocation27_spill]] %s20685_s5  ;;  %s20620_s10 = smov 9  }
   0x8   :  { %s20715_s29 = sld [smem:[%s23354_s0 + %s20617_s26]]   ;;  %s20621_s15 = smov 10  }
   0x9   :  { %s20720_s3 = sld [smem:[%s23354_s0 + %s20618_s30]]   ;;  %s20622_s20 = smov 11  }
   0xa   :  { %s20725_s8 = sld [smem:[%s23354_s0 + %s20619_s4]]   ;;  %s20623_s26 = smov 12  }
   0xb   :  { %s20730_s14 = sld [smem:[%s23354_s0 + %s20620_s10]]   ;;  %s20624_s1 = smov 13  }
   0xc   :  { %23407 = sst [smem:[#allocation28_spill]] %s20710_s25  ;;  %s20625_s7 = smov 14  }
   0xd   :  { %s20735_s19 = sld [smem:[%s23354_s0 + %s20621_s15]]   ;;  %s20626_s15 = smov 15  }
   0xe   :  { %23408 = sst [smem:[#allocation29_spill]] %s20715_s29  ;;  %s20627_s22 = smov 16  }
   0xf   :  { %23409 = sst [smem:[#allocation30_spill]] %s20720_s3  ;;  %s20628_s28 = smov 17  }
  0x10   :  { %23410 = sst [smem:[#allocation31_spill]] %s20725_s8 }
  0x11   :  { %23411 = sst [smem:[#allocation32_spill]] %s20730_s14 }
  0x12   :  { %s20740_s24 = sld [smem:[%s23354_s0 + %s20622_s20]]  }
  0x13   :  { %23412 = sst [smem:[#allocation33_spill]] %s20735_s19 }
  0x14   :  { %s20745_s30 = sld [smem:[%s23354_s0 + %s20623_s26]]  }
  0x15   :  { %s20750_s6 = sld [smem:[%s23354_s0 + %s20624_s1]]  }
  0x16   :  { %s20755_s12 = sld [smem:[%s23354_s0 + %s20625_s7]]   ;;  %s20629_s7 = smov 18  }
  0x17   :  { %s20760_s20 = sld [smem:[%s23354_s0 + %s20626_s15]]   ;;  %s20630_s15 = smov 19  }
  0x18   :  { %23413 = sst [smem:[#allocation34_spill]] %s20740_s24 }
  0x19   :  { %s20765_s27 = sld [smem:[%s23354_s0 + %s20627_s22]]   ;;  %s20631_s22 = smov 20  }
  0x1a   :  { %23414 = sst [smem:[#allocation35_spill]] %s20745_s30 }
  0x1b   :  { %23415 = sst [smem:[#allocation36_spill]] %s20750_s6 }
  0x1c   :  { %23416 = sst [smem:[#allocation37_spill]] %s20755_s12 }
  0x1d   :  { %23417 = sst [smem:[#allocation38_spill]] %s20760_s20 }
  0x1e   :  { %s20770_s4 = sld [smem:[%s23354_s0 + %s20628_s28]]   ;;  %s20632_s28 = smov 21  }
  0x1f   :  { %23418 = sst [smem:[#allocation39_spill]] %s20765_s27 }
  0x20   :  { %s20775_s30 = sld [smem:[%s23354_s0 + %s20629_s7]]   ;;  %s20633_s7 = smov 22  }
  0x21   :  { %s20780_s24 = sld [smem:[%s23354_s0 + %s20630_s15]]   ;;  %s20634_s15 = smov 23  }
  0x22   :  { %s20785_s19 = sld [smem:[%s23354_s0 + %s20631_s22]]   ;;  %s20635_s22 = smov 24  }
  0x23   :  { %s20790_s14 = sld [smem:[%s23354_s0 + %s20632_s28]]   ;;  %s20636_s28 = smov 25  }
  0x24   :  { %23419 = sst [smem:[#allocation40_spill]] %s20770_s4 }
  0x25   :  { %s20795_s8 = sld [smem:[%s23354_s0 + %s20633_s7]]   ;;  %s20637_s7 = smov 26  }
  0x26   :  { %23420 = sst [smem:[#allocation41_spill]] %s20775_s30 }
  0x27   :  { %23421 = sst [smem:[#allocation42_spill]] %s20780_s24 }
  0x28   :  { %23422 = sst [smem:[#allocation43_spill]] %s20785_s19 }
  0x29   :  { %23423 = sst [smem:[#allocation44_spill]] %s20790_s14 }
  0x2a   :  { %s20800_s3 = sld [smem:[%s23354_s0 + %s20634_s15]]   ;;  %s20638_s15 = smov 27  }
  0x2b   :  { %23424 = sst [smem:[#allocation45_spill]] %s20795_s8 }
  0x2c   :  { %s20805_s29 = sld [smem:[%s23354_s0 + %s20635_s22]]   ;;  %s20639_s22 = smov 28  }
  0x2d   :  { %s20810_s14 = sld [smem:[%s23354_s0 + %s20636_s28]]   ;;  %s20640_s28 = smov 29  }
  0x2e   :  { %s20815_s8 = sld [smem:[%s23354_s0 + %s20637_s7]]   ;;  %s20641_s7 = smov 30  }
  0x30   :  { %23425 = sst [smem:[#allocation46_spill]] %s20800_s3 }
  0x31   :  { %s20820_s3 = sld [smem:[%s23354_s0 + %s20638_s15]]   ;;  %s20642_s15 = smov 31  }
  0x32   :  { %23426 = sst [smem:[#allocation47_spill]] %s20805_s29 }
  0x33   :  { %23427 = sst [smem:[#allocation48_spill]] %s20810_s14 }
  0x34   :  { %23428 = sst [smem:[#allocation49_spill]] %s20815_s8 }
  0x35   :  { %s20825_s29 = sld [smem:[%s23354_s0 + %s20639_s22]]   ;;  %s20643_s22 = smov 32  }
  0x36   :  { %s20830_s14 = sld [smem:[%s23354_s0 + %s20640_s28]]   ;;  %s20644_s28 = smov 33  }
  0x37   :  { %23429 = sst [smem:[#allocation50_spill]] %s20820_s3 }
  0x38   :  { %s20835_s8 = sld [smem:[%s23354_s0 + %s20641_s7]]   ;;  %s20645_s7 = smov 34  }
  0x39   :  { %s20840_s3 = sld [smem:[%s23354_s0 + %s20642_s15]]   ;;  %s20646_s15 = smov 35  }
  0x3b   :  { %23430 = sst [smem:[#allocation51_spill]] %s20825_s29 }
  0x3c   :  { %23431 = sst [smem:[#allocation52_spill]] %s20830_s14 }
  0x3d   :  { %s20845_s29 = sld [smem:[%s23354_s0 + %s20643_s22]]   ;;  %s20647_s22 = smov 36  }
  0x3e   :  { %23432 = sst [smem:[#allocation53_spill]] %s20835_s8 }
  0x3f   :  { %23433 = sst [smem:[#allocation54_spill]] %s20840_s3 }
  0x40   :  { %s20850_s14 = sld [smem:[%s23354_s0 + %s20644_s28]]   ;;  %s20648_s28 = smov 37  }
  0x41   :  { %s20855_s8 = sld [smem:[%s23354_s0 + %s20645_s7]]   ;;  %s20649_s7 = smov 38  }
  0x42   :  { %s20860_s3 = sld [smem:[%s23354_s0 + %s20646_s15]]   ;;  %s20650_s15 = smov 39  }
  0x43   :  { %s20865_s25 = sld [smem:[%s23354_s0 + %s20647_s22]]   ;;  %s20651_s22 = smov 40  }
  0x44   :  { %s20875_s19 = sld [smem:[%s23354_s0 + %s20649_s7]]   ;;  %s20653_s7 = smov 42  }
  0x45   :  { %s20885_s24 = sld [smem:[%s23354_s0 + %s20651_s22]]   ;;  %s20655_s22 = smov 44  }
  0x46   :  { %23434 = sst [smem:[#allocation55_spill]] %s20850_s14 }
  0x47   :  { %23435 = sst [smem:[#allocation56_spill]] %s20855_s8 }
  0x48   :  { %23436 = sst [smem:[#allocation57_spill]] %s20860_s3 }
  0x49   :  { %s20870_s14 = sld [smem:[%s23354_s0 + %s20648_s28]]   ;;  %s20652_s28 = smov 41  }
  0x4a   :  { %23438 = sst [smem:[#allocation59_spill]] %s20875_s19 }
  0x4b   :  { %s20880_s3 = sld [smem:[%s23354_s0 + %s20650_s15]]   ;;  %s20654_s15 = smov 43  }
  0x4c   :  { %s20895_s30 = sld [smem:[%s23354_s0 + %s20653_s7]]   ;;  %s20657_s7 = smov 46  }
  0x4d   :  { %s20905_s4 = sld [smem:[%s23354_s0 + %s20655_s22]]   ;;  %s20659_s22 = smov 48  }
  0x4e   :  { %s20915_s27 = sld [smem:[%s23354_s0 + %s20657_s7]]   ;;  %s20661_s7 = smov 50  }
  0x4f   :  { %23437 = sst [smem:[#allocation58_spill]] %s20870_s14 }
  0x50   :  { %s20890_s14 = sld [smem:[%s23354_s0 + %s20652_s28]]   ;;  %s20656_s28 = smov 45  }
  0x51   :  { %23439 = sst [smem:[#allocation60_spill]] %s20880_s3 }
  0x52   :  { %s20900_s3 = sld [smem:[%s23354_s0 + %s20654_s15]]   ;;  %s20658_s15 = smov 47  }
  0x53   :  { %23442 = sst [smem:[#allocation63_spill]] %s20905_s4 }
  0x54   :  { %s20925_s20 = sld [smem:[%s23354_s0 + %s20659_s22]]  }
  0x55   :  { %s20935_s12 = sld [smem:[%s23354_s0 + %s20661_s7]]  }
  0x56   :  { %23440 = sst [smem:[#allocation61_spill]] %s20890_s14 }
  0x57   :  { %s20910_s14 = sld [smem:[%s23354_s0 + %s20656_s28]]   ;;  %s20660_s28 = smov 49  }
  0x58   :  { %23441 = sst [smem:[#allocation62_spill]] %s20900_s3 }
  0x59   :  { %s20920_s3 = sld [smem:[%s23354_s0 + %s20658_s15]]   ;;  %s20662_s15 = smov 51  }
  0x5d   :  { %23443 = sst [smem:[#allocation64_spill]] %s20910_s14 }
  0x5e   :  { %s20930_s14 = sld [smem:[%s23354_s0 + %s20660_s28]]  }
  0x5f   :  { %23444 = sst [smem:[#allocation65_spill]] %s20920_s3 }
  0x60   :  { %s20940_s3 = sld [smem:[%s23354_s0 + %s20662_s15]]  }
  0x61   :  { %108 = vsyncpa [#allocation3], 0 }
  0x62   :  { %109 = vsyncpa [#allocation6], 0 }
  0x63   :  { %110 = vsyncpa [#allocation9], 0 }
  0x64   :  { %111 = vsyncpa [#allocation12], 0 }
  0x65   :  { %112 = vsyncpa [#allocation15], 0 }
  0x66   :  { %113 = vsyncpa [#allocation18], 0 }
  0x67   :  { %114 = vsyncpa [#allocation4], 0 }
  0x68   :  { %116 = vsyncpa [#allocation4 + $0x1], 0  ;;  %s20942_s22 = smov 0   ;;  %s20944_s23 = smov 0  }
  0x69   :  { %s20946_s26 = smov 0   ;;  %s20948_s28 = smov 0  }
  0x6a LB: > { %s23445_s6 = sld [smem:[#allocation36_spill]]  ;;  %s23446_s4 = sld [smem:[#allocation63_spill]]  ;;  %s20610_s28 = sphi %s20948_s28, %s23528_s28   ;;  %s20606_s26 = sphi %s20946_s26, %s23530_s26   ;;  %s20602_s23 = sphi %s20944_s23, %s23532_s23   ;;  %s20598_s22 = sphi %s20942_s22, %s23531_s22  }
  0x6b   : > { %s23447_s19 = sld [smem:[#allocation59_spill]]  ;;  %s23448_s8 = sld [smem:[#allocation56_spill]] }
  0x6c   : > { %23449 = sst [smem:[#allocation66_spill]] %s20598_s22  ;;  %s20963_s0 = sadd.s32 4294967295, %s20610_s28  }
  0x6d   : > { %23450 = sst [smem:[#allocation67_spill]] %s20606_s26  ;;  %s15600_s1 = sadd.s32 4294967294, %s20610_s28  }
  0x6e   : > { %s20967_s2 = sadd.s32 1, %s20610_s28   ;;  %s1205_s7 = sadd.s32 1, %s20606_s26 }
  0x6f   : > { %23451 = sst [smem:[#allocation68_spill]] %s20967_s2  ;;  %s1202_s10 = ssub.s32 %s20610_s28, %s20967_s2 }
  0x70   : > { %p1215_p0 = scmp.ne.s32.totalorder %s20606_s26, %s20602_s23  ;;  %p1203_p1 = scmp.eq.s32.totalorder %s1202_s10, 0 }
  0x71   : > { %p1216_p2 = scmp.eq.s32.totalorder %s20963_s0, 1  ;;  %p1221_p3 = scmp.ne.s32.totalorder %s20602_s23, %s20598_s22 }
  0x72   : > { %p1222_p4 = scmp.eq.s32.totalorder %s15600_s1, 1  ;;  %p15601_p7 = scmp.ge.s32.totalorder %s20610_s28, 1 }
  0x73   : > { %s20978_s11 = scalar_select %p1203_p1, %s20606_s26, %s1205_s7  }
  0x74   : > { %p20980_p5 = por %p1216_p2, %p1215_p0  ;;  %p20984_p6 = por %p1222_p4, %p1221_p3 }
  0x75   : > { %23452 = sst [smem:[#allocation69_spill]] %s20978_s11  ;;  %p1229_p8 = scmp.lt.s32.totalorder %s20610_s28, 3 }
  0x76   : > { %s23453_s15 = scalar_select %p20980_p5, 1, 0 }
  0x77   : > { %s23454_s16 = scalar_select %p20984_p6, 1, 0 }
  0x78   : > { %p23381_p9 = scmp.eq.s32.totalorder %s20963_s0, 0  ;;  %p20991_p10 = pnand %p15601_p7, %p1229_p8 }
  0x79   : > { %23455 = sst [smem:[#allocation70_spill]] %s23454_s16  ;;  %s20663_s1 = smov [#allocation5]  }
  0x7a   : > { %s23456_s18 = scalar_select %p20991_p10, 1, 0 }
  0x7b   : > { %s1349_s7 = sshll.u32 %s20663_s1, 4  ;;  %p19582_p11 = pneg %p20991_p10  ;;  %s1350_s7 = int_to_ptr.vmem [resolvable:$true] %s1349_s7 }
  0x7c   : > { %s20664_s10 = smov [#allocation8]   ;;  %s20665_s2 = smov [#allocation11]  }
  0x7d   : > { %s1377_s11 = sshll.u32 %s20664_s10, 4  ;;  %p20999_p12 = pnand %p23381_p9, %p19582_p11  ;;  %s21003_s11 = int_to_ptr.vmem [resolvable:$true] %s1377_s11 }
  0x7e   : > { %s1405_s16 = sshll.u32 %s20665_s2, 4  ;;  %s20244_s22 = scalar_lea.hbm %s23448_s8, 16  ;;  %s21005_s16 = int_to_ptr.vmem [resolvable:$true] %s1405_s16 }
  0x7f   : > { %p20245_p13 = scmp.ne.s32.totalorder %s23448_s8, %s20244_s22  ;;  %p21011_p0 = pneg %p20999_p12 }
  0x80   : > { %p20251_p3 = scmp.lt.u32.totalorder %s20244_s22, %s23448_s8 }
  0x81   : > { %p20247_p1 = pnand %p21011_p0, %p20245_p13 }
  0x83   : > { %p20248_p2 = pneg %p20247_p1 }
  0x85   : > { %p20253_p4 = pnand %p20251_p3, %p20248_p2 }
  0x87   : > { %20256 = shalt.err (!%p20253_p4)
}
  0x88   : > { %s20257_s10 = scalar_lea.vmem %s1350_s7, 16  ;;  %s20264_s2 = scalar_lea.vmem %s1350_s7, 32 }
  0x89   : > { %p20258_p7 = scmp.ne.s32.totalorder %s1350_s7, %s20257_s10  ;;  %p20265_p9 = scmp.lt.s32.totalorder %s1350_s7, %s1350_s7 }
  0x8a   : > { %p20266_p6 = scmp.lt.s32.totalorder %s20264_s2, %s20257_s10 }
  0x8b   : > { %p20260_p8 = pnand %p20258_p7, %p21011_p0 }
  0x8c   : > { %p20267_p5 = por %p20266_p6, %p20265_p9 }
  0x8d   : > { %p20261_p11 = pneg %p20260_p8 }
  0x8f   : > { %p20268_p10 = pnand %p20267_p5, %p20261_p11 }
  0x91   : > { %20271 = shalt.err (!%p20268_p10)
}
  0x92   : > { %19588 = dma.hbm_to_vmem [thread:$0]  (!%p20999_p12), %s23448_s8, 16, %s1350_s7, [#allocation6]  }
  0x93   : > { %s20272_s22 = scalar_lea.hbm %s23447_s19, 16 }
  0x94   : > { %p20273_p13 = scmp.ne.s32.totalorder %s23447_s19, %s20272_s22  ;;  %p20279_p3 = scmp.lt.u32.totalorder %s20272_s22, %s23447_s19 }
  0x96   : > { %p20275_p1 = pnand %p20273_p13, %p21011_p0 }
  0x98   : > { %p20276_p2 = pneg %p20275_p1 }
  0x9a   : > { %p20281_p4 = pnand %p20279_p3, %p20276_p2 }
  0x9c   : > { %20284 = shalt.err (!%p20281_p4)
}
  0x9d   : > { %s20285_s10 = scalar_lea.vmem %s21003_s11, 16  ;;  %s20292_s2 = scalar_lea.vmem %s21003_s11, 32 }
  0x9e   : > { %p20286_p5 = scmp.ne.s32.totalorder %s21003_s11, %s20285_s10  ;;  %p20293_p10 = scmp.lt.s32.totalorder %s21003_s11, %s21003_s11 }
  0x9f   : > { %p20294_p7 = scmp.lt.s32.totalorder %s20292_s2, %s20285_s10 }
  0xa0   : > { %p20288_p6 = pnand %p20286_p5, %p21011_p0 }
  0xa1   : > { %p20295_p8 = por %p20294_p7, %p20293_p10 }
  0xa2   : > { %p20289_p9 = pneg %p20288_p6 }
  0xa4   : > { %p20296_p11 = pnand %p20295_p8, %p20289_p9 }
  0xa6   : > { %20299 = shalt.err (!%p20296_p11)
}
  0xa7   : > { %19594 = dma.hbm_to_vmem [thread:$0]  (!%p20999_p12), %s23447_s19, 16, %s21003_s11, [#allocation9]  }
  0xa8   : > { %s20300_s7 = scalar_lea.hbm %s20895_s30, 16 }
  0xa9   : > { %p20301_p13 = scmp.ne.s32.totalorder %s20895_s30, %s20300_s7  ;;  %p20307_p3 = scmp.lt.u32.totalorder %s20300_s7, %s20895_s30 }
  0xab   : > { %p20303_p1 = pnand %p20301_p13, %p21011_p0 }
  0xad   : > { %p20304_p2 = pneg %p20303_p1 }
  0xaf   : > { %p20309_p4 = pnand %p20307_p3, %p20304_p2 }
  0xb1   : > { %20312 = shalt.err (!%p20309_p4)
}
  0xb2   : > { %s20313_s22 = scalar_lea.vmem %s21005_s16, 16  ;;  %s20320_s10 = scalar_lea.vmem %s21005_s16, 32 }
  0xb3   : > { %p20314_p5 = scmp.ne.s32.totalorder %s21005_s16, %s20313_s22  ;;  %p20321_p10 = scmp.lt.s32.totalorder %s21005_s16, %s21005_s16 }
  0xb4   : > { %p20322_p7 = scmp.lt.s32.totalorder %s20320_s10, %s20313_s22 }
  0xb5   : > { %p20316_p6 = pnand %p20314_p5, %p21011_p0 }
  0xb6   : > { %p20323_p8 = por %p20322_p7, %p20321_p10 }
  0xb7   : > { %p20317_p9 = pneg %p20316_p6 }
  0xb9   : > { %p20324_p11 = pnand %p20323_p8, %p20317_p9 }
  0xbb   : > { %20327 = shalt.err (!%p20324_p11)
}
  0xbc   : > { %19600 = dma.hbm_to_vmem [thread:$0]  (!%p20999_p12), %s20895_s30, 16, %s21005_s16, [#allocation12]  }
  0xbd   : > { %s20666_s11 = smov [#allocation14]   ;;  %s20667_s7 = smov [#allocation2]  }
  0xbe   : > { %s1433_s2 = sshll.u32 %s20666_s11, 4  ;;  %s1335_s8 = sshll.u32 %s20667_s7, 4  ;;  %s1434_s2 = int_to_ptr.vmem [resolvable:$true] %s1433_s2  ;;  %s1336_s8 = int_to_ptr.vmem [resolvable:$true] %s1335_s8 }
  0xbf   : > { %s20328_s19 = scalar_lea.hbm %s20915_s27, 16 }
  0xc0   : > { %p20329_p13 = scmp.ne.s32.totalorder %s20915_s27, %s20328_s19  ;;  %p20335_p3 = scmp.lt.u32.totalorder %s20328_s19, %s20915_s27 }
  0xc2   : > { %p20331_p1 = pnand %p20329_p13, %p21011_p0 }
  0xc4   : > { %p20332_p2 = pneg %p20331_p1 }
  0xc6   : > { %p20337_p4 = pnand %p20335_p3, %p20332_p2 }
  0xc8   : > { %20340 = shalt.err (!%p20337_p4)
}
  0xc9   : > { %s20341_s22 = scalar_lea.vmem %s1434_s2, 16  ;;  %s20348_s16 = scalar_lea.vmem %s1434_s2, 32 }
  0xca   : > { %p20342_p5 = scmp.ne.s32.totalorder %s1434_s2, %s20341_s22  ;;  %p20349_p10 = scmp.lt.s32.totalorder %s1434_s2, %s1434_s2 }
  0xcb   : > { %p20350_p7 = scmp.lt.s32.totalorder %s20348_s16, %s20341_s22 }
  0xcc   : > { %p20344_p6 = pnand %p20342_p5, %p21011_p0 }
  0xcd   : > { %p20351_p8 = por %p20350_p7, %p20349_p10 }
  0xce   : > { %p20345_p9 = pneg %p20344_p6 }
  0xd0   : > { %p20352_p11 = pnand %p20351_p8, %p20345_p9 }
  0xd2   : > { %20355 = shalt.err (!%p20352_p11)
}
  0xd3   : > { %19606 = dma.hbm_to_vmem [thread:$0]  (!%p20999_p12), %s20915_s27, 16, %s1434_s2, [#allocation15]  }
  0xd4   : > { %s20356_s19 = scalar_lea.hbm %s20845_s29, 16 }
  0xd5   : > { %p20357_p13 = scmp.ne.s32.totalorder %s20845_s29, %s20356_s19  ;;  %p20363_p3 = scmp.lt.u32.totalorder %s20356_s19, %s20845_s29 }
  0xd7   : > { %p20359_p1 = pnand %p20357_p13, %p21011_p0 }
  0xd9   : > { %p20360_p2 = pneg %p20359_p1 }
  0xdb   : > { %p20365_p4 = pnand %p20363_p3, %p20360_p2 }
  0xdd   : > { %20368 = shalt.err (!%p20365_p4)
}
  0xde   : > { %s20369_s10 = scalar_lea.vmem %s1336_s8, 16  ;;  %s20376_s11 = scalar_lea.vmem %s1336_s8, 32 }
  0xdf   : > { %p20370_p5 = scmp.ne.s32.totalorder %s1336_s8, %s20369_s10  ;;  %p20377_p10 = scmp.lt.s32.totalorder %s1336_s8, %s1336_s8 }
  0xe0   : > { %p20378_p7 = scmp.lt.s32.totalorder %s20376_s11, %s20369_s10 }
  0xe1   : > { %p20372_p6 = pnand %p20370_p5, %p21011_p0 }
  0xe2   : > { %p20379_p8 = por %p20378_p7, %p20377_p10 }
  0xe3   : > { %p20373_p9 = pneg %p20372_p6 }
  0xe5   : > { %p20380_p11 = pnand %p20379_p8, %p20373_p9 }
  0xe7   : > { %20383 = shalt.err (!%p20380_p11)
}
  0xe8   : > { %19585 = dma.hbm_to_vmem [thread:$0]  (!%p20999_p12), %s20845_s29, 16, %s1336_s8, [#allocation3]  }
  0xe9   : > { %s20668_s2 = smov [#allocation7]   ;;  %s20669_s22 = smov [#allocation10]  }
  0xea   : > { %s1363_s7 = sshll.u32 %s20668_s2, 4  ;;  %s1391_s16 = sshll.u32 %s20669_s22, 4  ;;  %s1364_s7 = int_to_ptr.vmem [resolvable:$true] %s1363_s7  ;;  %s1392_s16 = int_to_ptr.vmem [resolvable:$true] %s1391_s16 }
  0xeb   : > { %s20384_s19 = scalar_lea.hbm %s20865_s25, 16 }
  0xec   : > { %p20385_p13 = scmp.ne.s32.totalorder %s20865_s25, %s20384_s19  ;;  %p20391_p3 = scmp.lt.u32.totalorder %s20384_s19, %s20865_s25 }
  0xee   : > { %p20387_p1 = pnand %p20385_p13, %p21011_p0 }
  0xf0   : > { %p20388_p2 = pneg %p20387_p1 }
  0xf2   : > { %p20393_p4 = pnand %p20391_p3, %p20388_p2 }
  0xf4   : > { %20396 = shalt.err (!%p20393_p4)
}
  0xf5   : > { %s20397_s10 = scalar_lea.vmem %s1364_s7, 16  ;;  %s20404_s8 = scalar_lea.vmem %s1364_s7, 32 }
  0xf6   : > { %p20398_p5 = scmp.ne.s32.totalorder %s1364_s7, %s20397_s10  ;;  %p20405_p10 = scmp.lt.s32.totalorder %s1364_s7, %s1364_s7 }
  0xf7   : > { %p20406_p7 = scmp.lt.s32.totalorder %s20404_s8, %s20397_s10 }
  0xf8   : > { %p20400_p6 = pnand %p20398_p5, %p21011_p0 }
  0xf9   : > { %p20407_p8 = por %p20406_p7, %p20405_p10 }
  0xfa   : > { %p20401_p9 = pneg %p20400_p6 }
  0xfc   : > { %p20408_p11 = pnand %p20407_p8, %p20401_p9 }
  0xfe   : > { %20411 = shalt.err (!%p20408_p11)
}
  0xff   : > { %19591 = dma.hbm_to_vmem [thread:$0]  (!%p20999_p12), %s20865_s25, 16, %s1364_s7, [#allocation6]  }
 0x100   : > { %s20412_s11 = scalar_lea.hbm %s20885_s24, 16 }
 0x101   : > { %p20413_p13 = scmp.ne.s32.totalorder %s20885_s24, %s20412_s11  ;;  %p20419_p3 = scmp.lt.u32.totalorder %s20412_s11, %s20885_s24 }
 0x103   : > { %p20415_p1 = pnand %p20413_p13, %p21011_p0 }
 0x105   : > { %p20416_p2 = pneg %p20415_p1 }
 0x107   : > { %p20421_p4 = pnand %p20419_p3, %p20416_p2 }
 0x109   : > { %20424 = shalt.err (!%p20421_p4)
}
 0x10a   : > { %s20425_s2 = scalar_lea.vmem %s1392_s16, 16  ;;  %s20432_s22 = scalar_lea.vmem %s1392_s16, 32 }
 0x10b   : > { %p20426_p5 = scmp.ne.s32.totalorder %s1392_s16, %s20425_s2  ;;  %p20433_p10 = scmp.lt.s32.totalorder %s1392_s16, %s1392_s16 }
 0x10c   : > { %p20434_p7 = scmp.lt.s32.totalorder %s20432_s22, %s20425_s2 }
 0x10d   : > { %p20428_p6 = pnand %p20426_p5, %p21011_p0 }
 0x10e   : > { %p20435_p8 = por %p20434_p7, %p20433_p10 }
 0x10f   : > { %p20429_p9 = pneg %p20428_p6 }
 0x111   : > { %p20436_p11 = pnand %p20435_p8, %p20429_p9 }
 0x113   : > { %20439 = shalt.err (!%p20436_p11)
}
 0x114   : > { %19597 = dma.hbm_to_vmem [thread:$0]  (!%p20999_p12), %s20885_s24, 16, %s1392_s16, [#allocation9]  }
 0x115   : > { %s20670_s7 = smov [#allocation13]   ;;  %s20671_s10 = smov [#allocation16]  }
 0x116   : > { %s1419_s19 = sshll.u32 %s20670_s7, 4  ;;  %s1447_s8 = sshll.u32 %s20671_s10, 4  ;;  %s1420_s19 = int_to_ptr.vmem [resolvable:$true] %s1419_s19  ;;  %s1448_s8 = int_to_ptr.vmem [resolvable:$true] %s1447_s8 }
 0x117   : > { %s20440_s11 = scalar_lea.hbm %s23446_s4, 16 }
 0x118   : > { %p20441_p13 = scmp.ne.s32.totalorder %s23446_s4, %s20440_s11  ;;  %p20447_p3 = scmp.lt.u32.totalorder %s20440_s11, %s23446_s4 }
 0x11a   : > { %p20443_p1 = pnand %p20441_p13, %p21011_p0 }
 0x11c   : > { %p20444_p2 = pneg %p20443_p1 }
 0x11e   : > { %p20449_p4 = pnand %p20447_p3, %p20444_p2 }
 0x120   : > { %20452 = shalt.err (!%p20449_p4)
}
 0x121   : > { %s20453_s2 = scalar_lea.vmem %s1420_s19, 16  ;;  %s20460_s16 = scalar_lea.vmem %s1420_s19, 32 }
 0x122   : > { %p20454_p5 = scmp.ne.s32.totalorder %s1420_s19, %s20453_s2  ;;  %p20461_p10 = scmp.lt.s32.totalorder %s1420_s19, %s1420_s19 }
 0x123   : > { %p20462_p7 = scmp.lt.s32.totalorder %s20460_s16, %s20453_s2 }
 0x124   : > { %p20456_p6 = pnand %p20454_p5, %p21011_p0 }
 0x125   : > { %p20463_p8 = por %p20462_p7, %p20461_p10 }
 0x126   : > { %p20457_p9 = pneg %p20456_p6 }
 0x128   : > { %p20464_p11 = pnand %p20463_p8, %p20457_p9 }
 0x12a   : > { %20467 = shalt.err (!%p20464_p11)
}
 0x12b   : > { %19603 = dma.hbm_to_vmem [thread:$0]  (!%p20999_p12), %s23446_s4, 16, %s1420_s19, [#allocation12]  }
 0x12c   : > { %s20468_s22 = scalar_lea.hbm %s20925_s20, 16 }
 0x12d   : > { %p20469_p13 = scmp.ne.s32.totalorder %s20925_s20, %s20468_s22  ;;  %p20475_p3 = scmp.lt.u32.totalorder %s20468_s22, %s20925_s20 }
 0x12f   : > { %p20471_p1 = pnand %p20469_p13, %p21011_p0 }
 0x131   : > { %p20472_p2 = pneg %p20471_p1 }
 0x133   : > { %p20477_p4 = pnand %p20475_p3, %p20472_p2 }
 0x135   : > { %20480 = shalt.err (!%p20477_p4)
}
 0x136   : > { %s20481_s7 = scalar_lea.vmem %s1448_s8, 16  ;;  %s20488_s10 = scalar_lea.vmem %s1448_s8, 32 }
 0x137   : > { %p20482_p5 = scmp.ne.s32.totalorder %s1448_s8, %s20481_s7  ;;  %p20489_p10 = scmp.lt.s32.totalorder %s1448_s8, %s1448_s8 }
 0x138   : > { %p20490_p7 = scmp.lt.s32.totalorder %s20488_s10, %s20481_s7 }
 0x139   : > { %p20484_p6 = pnand %p20482_p5, %p21011_p0 }
 0x13a   : > { %p20491_p8 = por %p20490_p7, %p20489_p10 }
 0x13b   : > { %p20485_p9 = pneg %p20484_p6 }
 0x13d   : > { %p20492_p11 = pnand %p20491_p8, %p20485_p9 }
 0x13f   : > { %20495 = shalt.err (!%p20492_p11)
}
 0x140   : > { %19609 = dma.hbm_to_vmem [thread:$0]  (!%p20999_p12), %s20925_s20, 16, %s1448_s8, [#allocation15]  }
 0x141   : > { %s20672_s19 = smov [#allocation17]   ;;  %s20496_s2 = scalar_lea.hbm %s20935_s12, 16 }
 0x142   : > { %s1461_s11 = sshll.u32 %s20672_s19, 4  ;;  %p20497_p13 = scmp.ne.s32.totalorder %s20935_s12, %s20496_s2  ;;  %s1462_s11 = int_to_ptr.vmem [resolvable:$true] %s1461_s11 }
 0x143   : > { %p20503_p3 = scmp.lt.u32.totalorder %s20496_s2, %s20935_s12 }
 0x144   : > { %p20499_p1 = pnand %p20497_p13, %p21011_p0 }
 0x146   : > { %p20500_p2 = pneg %p20499_p1 }
 0x148   : > { %p20505_p4 = pnand %p20503_p3, %p20500_p2 }
 0x14a   : > { %20508 = shalt.err (!%p20505_p4)
}
 0x14b   : > { %s20509_s16 = scalar_lea.vmem %s1462_s11, 16  ;;  %s20516_s22 = scalar_lea.vmem %s1462_s11, 32 }
 0x14c   : > { %p20510_p5 = scmp.ne.s32.totalorder %s1462_s11, %s20509_s16  ;;  %p20517_p10 = scmp.lt.s32.totalorder %s1462_s11, %s1462_s11 }
 0x14d   : > { %p20518_p7 = scmp.lt.s32.totalorder %s20516_s22, %s20509_s16 }
 0x14e   : > { %p20512_p6 = pnand %p20510_p5, %p21011_p0 }
 0x14f   : > { %p20519_p8 = por %p20518_p7, %p20517_p10 }
 0x150   : > { %p20513_p9 = pneg %p20512_p6 }
 0x152   : > { %p20520_p11 = pnand %p20519_p8, %p20513_p9 }
 0x154   : > { %20523 = shalt.err (!%p20520_p11)
}
 0x155   : > { %19612 = dma.hbm_to_vmem [thread:$0]  (!%p20999_p12), %s20935_s12, 16, %s1462_s11, [#allocation18]  }
 0x156   : > { %p23459_p13 = scmp.ne.s32.totalorder %s23456_s18, 0 }
 0x157   : > { %p23460_p1 = scmp.eq.s32.totalorder (!%p23459_p13), %s20963_s0, 0 }
 0x158   : > { %1482 = sbr.rel (%p23459_p13) target bundleno = 8957 (0x22fd), region = 224 }
 0x15f   : > { %20569 = dma.done.wait (%p23460_p1), [#allocation3], 16   ;;  %p23461_p2 = pmov %p23460_p1 }
 0x160   : > { %p23462_p0 = pmov %p23460_p1 }
 0x161   : > { %20571 = vsyncadd (%p23461_p2), [#allocation3], 4294967280 }
 0x162   : > { %20573 = dma.done.wait (%p23462_p0), [#allocation6], 32   ;;  %p23463_p3 = pmov %p23462_p0 }
 0x163   : > { %p23464_p4 = pmov %p23462_p0 }
 0x164   : > { %20575 = vsyncadd (%p23463_p3), [#allocation6], 4294967264 }
 0x165   : > { %20577 = dma.done.wait (%p23464_p4), [#allocation9], 32   ;;  %p23465_p12 = pmov %p23462_p0 }
 0x166   : > { %p23466_p5 = pmov %p23462_p0 }
 0x167   : > { %20579 = vsyncadd (%p23465_p12), [#allocation9], 4294967264 }
 0x168   : > { %20581 = dma.done.wait (%p23466_p5), [#allocation12], 32   ;;  %p23467_p6 = pmov %p23462_p0 }
 0x169   : > { %p23468_p9 = pmov %p23462_p0 }
 0x16a   : > { %20583 = vsyncadd (%p23467_p6), [#allocation12], 4294967264 }
 0x16b   : > { %20585 = dma.done.wait (%p23468_p9), [#allocation15], 32   ;;  %p23469_p10 = pmov %p23462_p0 }
 0x16c   : > { %p23470_p7 = pmov %p23462_p0 }
 0x16d   : > { %20587 = vsyncadd (%p23469_p10), [#allocation15], 4294967264 }
 0x16e   : > { %20589 = dma.done.wait (%p23470_p7), [#allocation18], 16   ;;  %p23471_p8 = pmov %p23462_p0 }
 0x16f   : > { %s23472_s5 = sld [smem:[#allocation27_spill]]  ;;  %p1637_p11 = scmp.lt.s32.totalorder %s20963_s0, 1  ;;  %v19734_v0 = vld [vmem:[%s20690_s9] sm:$0xff]   ;;  %v19735_v1 = vld [vmem:[%s20690_s9 + $0x8] sm:$0xff]   ;;  %vm1775_vm0 = vcmask 1040384   ;;  %v19736_v3 = vld [vmem:[%s20690_s9 + $0x10] sm:$0xff]  }
 0x170   : > { %20591 = vsyncadd (%p23471_p8), [#allocation18], 4294967280  ;;  %17320 = vmatprep.subr.bf16.mxu1 %v19734_v0  ;;  %v19737_v4 = vld [vmem:[%s20690_s9 + $0x18] ss:$0 sps:$4 sm:$0x11]   ;;  %vm1726_vm1 = vcmask 400384  }
 0x171   : > { %s1638_s26 = scalar_select %p1637_p11, %s20963_s0, 1  ;;  %17321 = vmatpush3.bf16.msra.mxu1 %v19734_v0  ;;  %v20673_v6 = vmov 0   ;;  %v19740_v55 = vld [vmem:[%s20700_s17 + $0x4] ss:$8 sps:$4 sm:$0xff]   ;;  %v21212_v56 = vld [vmem:[%s20695_s13] ss:$0 sm:$0xff] }
 0x172   : > { %17322 = vmatprep.subr.bf16.mxu1 %v19735_v1  ;;  %v1777_v7 = vsel %vm1775_vm0, 65535, %v20673_v6  ;;  %vm3081_vm2 = vcmask 523264   ;;  %vm3525_vm3 = vcmask 130048   ;;  %s23473_s8 = sld [smem:[#allocation37_spill]]  ;;  %s23474_s7 = sld [smem:[#allocation38_spill]]  ;;  %vm20675_vm4 = vmmov 0  }
 0x173   : > { %s16534_s18 = sshll.u32 %s1638_s26, 8  ;;  %v1779_v9 = vand.u32 %v19737_v4, %v1777_v7  ;;  %s23475_s10 = sld [smem:[#allocation39_spill]]  ;;  %vm8952_vm5 = vcmask 261120   ;;  %vm11749_vm6 = vcmask 1041408   ;;  %vm11733_vm7 = vcmask 31744  }
 0x174   : > { %s23476_s19 = sld [smem:[#allocation40_spill]]  ;;  %s23477_s11 = sld [smem:[#allocation41_spill]] }
 0x175   : > { %s21155_s1 = scalar_lea.vmem %s23472_s5, %s16534_s18  ;;  %17323 = vmatpush3.bf16.msra.mxu1 %v19735_v1  ;;  %s23478_s2 = sld [smem:[#allocation42_spill]] }
 0x176   : > { %v1643_v2 = vld [vmem:[%s21155_s1] sm:$0xff]  ;;  %v1644_v5 = vld [vmem:[%s21155_s1 + $0x8] sm:$0xff]  ;;  %17324 = vmatprep.subr.bf16.mxu1 %v19736_v3  ;;  %v1645_v10 = vld [vmem:[%s21155_s1 + $0x10] sm:$0xff]  ;;  %s23479_s16 = sld [smem:[#allocation43_spill]]  ;;  %s23480_s22 = sld [smem:[#allocation28_spill]] }
 0x177   : > { %v1682_v8 = vpack.c.bf16 %v1644_v5, %v1643_v2  ;;  %v1646_v11 = vld [vmem:[%s21155_s1 + $0x18] sm:$0xff]  ;;  %v1647_v12 = vld [vmem:[%s21155_s1 + $0x20] sm:$0xff]  ;;  %v1648_v13 = vld [vmem:[%s21155_s1 + $0x28] sm:$0xff]  ;;  %s23484_s26 = sld [smem:[#allocation44_spill]]  ;;  %p23524_p1 = scmp.ne.s32.totalorder %s23453_s15, 0 }
 0x178   : > { %v1683_v14 = vpack.c.bf16 %v1646_v11, %v1645_v10  ;;  %v1684_v15 = vpack.c.bf16 %v1648_v13, %v1647_v12  ;;  %v1649_v16 = vld [vmem:[%s21155_s1 + $0x30] sm:$0xff]  ;;  %v1650_v17 = vld [vmem:[%s21155_s1 + $0x38] sm:$0xff]  ;;  %v1651_v18 = vld [vmem:[%s21155_s1 + $0x40] sm:$0xff] }
 0x179   : > { %17328 = vmatprep.mubr.msk.bf16.mxu1 %vm1726_vm1, %v1682_v8  ;;  %17325 = vmatpush3.bf16.msra.mxu1 %v19736_v3  ;;  %v1652_v19 = vld [vmem:[%s21155_s1 + $0x48] sm:$0xff]  ;;  %v1685_v20 = vpack.c.bf16 %v1650_v17, %v1649_v16  ;;  %v1653_v22 = vld [vmem:[%s21155_s1 + $0x50] sm:$0xff]  ;;  %v1654_v23 = vld [vmem:[%s21155_s1 + $0x58] sm:$0xff] }
 0x17a   : > { %17326 = vmatprep.subr.bf16.mxu1 %v1779_v9  ;;  %v1686_v21 = vpack.c.bf16 %v1652_v19, %v1651_v18  ;;  %v1655_v24 = vld [vmem:[%s21155_s1 + $0x60] sm:$0xff]  ;;  %v1656_v25 = vld [vmem:[%s21155_s1 + $0x68] sm:$0xff]  ;;  %v1687_v26 = vpack.c.bf16 %v1654_v23, %v1653_v22  ;;  %v1657_v28 = vld [vmem:[%s21155_s1 + $0x70] sm:$0xff] }
 0x17b   : > { %v1688_v27 = vpack.c.bf16 %v1656_v25, %v1655_v24  ;;  %v1658_v29 = vld [vmem:[%s21155_s1 + $0x78] sm:$0xff]  ;;  %v1659_v30 = vld [vmem:[%s21155_s1 + $0x80] sm:$0xff]  ;;  %v1660_v31 = vld [vmem:[%s21155_s1 + $0x88] sm:$0xff] }
 0x17c   : > { %v1689_v32 = vpack.c.bf16 %v1658_v29, %v1657_v28  ;;  %v1690_v33 = vpack.c.bf16 %v1660_v31, %v1659_v30  ;;  %v1661_v34 = vld [vmem:[%s21155_s1 + $0x90] sm:$0xff]  ;;  %v1662_v35 = vld [vmem:[%s21155_s1 + $0x98] sm:$0xff]  ;;  %v1663_v36 = vld [vmem:[%s21155_s1 + $0xa0] sm:$0xff]  ;;  %s23481_s18 = smov %s23480_s22 }
 0x17d   : > { %17327 = vmatpush3.bf16.msra.mxu1 %v1779_v9  ;;  %v1664_v37 = vld [vmem:[%s21155_s1 + $0xa8] sm:$0xff]  ;;  %v1691_v38 = vpack.c.bf16 %v1662_v35, %v1661_v34  ;;  %v1665_v40 = vld [vmem:[%s21155_s1 + $0xb0] sm:$0xff]  ;;  %v1666_v41 = vld [vmem:[%s21155_s1 + $0xb8] sm:$0xff] }
 0x17e   : > { %2422 = vmatprep.subr.bf16.mxu1 %v20673_v6  ;;  %v1692_v39 = vpack.c.bf16 %v1664_v37, %v1663_v36  ;;  %v1667_v42 = vld [vmem:[%s21155_s1 + $0xc0] sm:$0xff]  ;;  %v1668_v43 = vld [vmem:[%s21155_s1 + $0xc8] sm:$0xff]  ;;  %v1693_v44 = vpack.c.bf16 %v1666_v41, %v1665_v40  ;;  %v1669_v46 = vld [vmem:[%s21155_s1 + $0xd0] sm:$0xff] }
 0x17f   : > { %v1694_v45 = vpack.c.bf16 %v1668_v43, %v1667_v42  ;;  %v1670_v47 = vld [vmem:[%s21155_s1 + $0xd8] sm:$0xff]  ;;  %v1671_v48 = vld [vmem:[%s21155_s1 + $0xe0] sm:$0xff]  ;;  %v1672_v49 = vld [vmem:[%s21155_s1 + $0xe8] sm:$0xff] }
 0x180   : > { %17329 = vmatmul.mubr.msk.bf16.vlgmr.msra.gmra.mrb[0].mxu1 %vm1726_vm1, %v1683_v14  ;;  %v1695_v50 = vpack.c.bf16 %v1670_v47, %v1669_v46  ;;  %v1696_v51 = vpack.c.bf16 %v1672_v49, %v1671_v48  ;;  %v1673_v52 = vld [vmem:[%s21155_s1 + $0xf0] sm:$0xff]  ;;  %v1674_v53 = vld [vmem:[%s21155_s1 + $0xf8] sm:$0xff]  ;;  %s23485_s1 = smov %s23484_s26 }
 0x181   : > { %17332 = vmatprep.mubr.msk.bf16.mxu1 %vm1726_vm1, %v1684_v15  ;;  %v1697_v54 = vpack.c.bf16 %v1674_v53, %v1673_v52 }
 0x188   : > { %17333 = vmatmul.mubr.msk.bf16.gmra.mrb[4].mxu1 %vm1726_vm1, %v1685_v20 }
 0x189   : > { %17336 = vmatprep.mubr.msk.bf16.mxu1 %vm1726_vm1, %v1686_v21 }
 0x190   : > { %17337 = vmatmul.mubr.msk.bf16.gmra.mrb[8].mxu1 %vm1726_vm1, %v1687_v26 }
 0x191   : > { %17340 = vmatprep.mubr.msk.bf16.mxu1 %vm1726_vm1, %v1688_v27 }
 0x198   : > { %17341 = vmatmul.mubr.msk.bf16.gmra.mrb[12].mxu1 %vm1726_vm1, %v1689_v32 }
 0x199   : > { %17344 = vmatprep.mubr.msk.bf16.mxu1 %vm1726_vm1, %v1690_v33 }
 0x1a0   : > { %17345 = vmatmul.mubr.msk.bf16.gmra.mrb[16].mxu1 %vm1726_vm1, %v1691_v38 }
 0x1a1   : > { %17348 = vmatprep.mubr.msk.bf16.mxu1 %vm1726_vm1, %v1692_v39 }
 0x1a8   : > { %17349 = vmatmul.mubr.msk.bf16.gmra.mrb[20].mxu1 %vm1726_vm1, %v1693_v44 }
 0x1a9   : > { %17352 = vmatprep.mubr.msk.bf16.mxu1 %vm1726_vm1, %v1694_v45 }
 0x1b0   : > { %17353 = vmatmul.mubr.msk.bf16.gmra.mrb[24].mxu1 %vm1726_vm1, %v1695_v50 }
 0x1b1   : > { %17356 = vmatprep.mubr.msk.bf16.mxu1 %vm1726_vm1, %v1696_v51 }
 0x1b8   : > { %17357 = vmatmul.mubr.msk.bf16.gmra.mrb[28].mxu1 %vm1726_vm1, %v1697_v54 }
 0x1b9   : > { %2454 = vmatprep.mubr.bf16.mxu1 %v19740_v55 }
 0x253   : > { %v17330_v57 = vpop.f32.mrb[0].mxu1 }
 0x254   : > { %v1824_v58 = vadd.f32 %v17330_v57, %v21212_v56  ;;  %v1815_v59 = vpop.f32.mrb[1].mxu1 }
 0x255   : > { %v1816_v60 = vadd.f32 %v21212_v56, %v1815_v59  ;;  %v17331_v61 = vpop.f32.mrb[2].mxu1 }
 0x256   : > { %v1827_v62 = vadd.f32 %v17331_v61, %v21212_v56  ;;  %v1818_v63 = vpop.f32.mrb[3].mxu1  ;;  %v1944_v1 = vmax.f32 %v1824_v58, 0.0 }
 0x257   : > { %v1819_v0 = vadd.f32 %v21212_v56, %v1818_v63  ;;  %v1942_v3 = vmax.f32 %v1816_v60, 0.0 }
 0x258   : > { %v1945_v2 = vmax.f32 %v1827_v62, 0.0 }
 0x259   : > { %v1943_v4 = vmax.f32 %v1819_v0, 0.0 }
 0x25a   : > { %v2047_v5 = vpack.c.bf16 %v1945_v2, %v1944_v1 }
 0x25b   : > { %v2046_v7 = vpack.c.bf16 %v1943_v4, %v1942_v3  ;;  %v17334_v8 = vpop.f32.mrb[4].mxu1 }
 0x25c   : > { %v1840_v9 = vadd.f32 %v17334_v8, %v21212_v56  ;;  %v1831_v10 = vpop.f32.mrb[5].mxu1 }
 0x25d   : > { %v1832_v11 = vadd.f32 %v21212_v56, %v1831_v10  ;;  %v17335_v12 = vpop.f32.mrb[6].mxu1  ;;  %2423 = vmatpush1.bf16.msra.mxu1 %v2046_v7 }
 0x25e   : > { %v1843_v13 = vadd.f32 %v17335_v12, %v21212_v56  ;;  %v1834_v14 = vpop.f32.mrb[7].mxu1  ;;  %2424 = vmatprep.subr.bf16.mxu1 %v20673_v6  ;;  %v1948_v16 = vmax.f32 %v1840_v9, 0.0 }
 0x25f   : > { %v1835_v15 = vadd.f32 %v21212_v56, %v1834_v14  ;;  %v1946_v18 = vmax.f32 %v1832_v11, 0.0 }
 0x260   : > { %v1949_v17 = vmax.f32 %v1843_v13, 0.0 }
 0x261   : > { %v1947_v19 = vmax.f32 %v1835_v15, 0.0  ;;  %2425 = vmatpush1.bf16.msra.mxu1 %v2047_v5 }
 0x262   : > { %v2049_v20 = vpack.c.bf16 %v1949_v17, %v1948_v16  ;;  %2426 = vmatprep.subr.bf16.mxu1 %v20673_v6 }
 0x263   : > { %v2048_v21 = vpack.c.bf16 %v1947_v19, %v1946_v18  ;;  %v17338_v22 = vpop.f32.mrb[8].mxu1 }
 0x264   : > { %v1856_v23 = vadd.f32 %v17338_v22, %v21212_v56  ;;  %v1847_v24 = vpop.f32.mrb[9].mxu1 }
 0x265   : > { %v1848_v25 = vadd.f32 %v21212_v56, %v1847_v24  ;;  %v17339_v26 = vpop.f32.mrb[10].mxu1  ;;  %2427 = vmatpush1.bf16.msra.mxu1 %v2048_v21 }
 0x266   : > { %v1859_v27 = vadd.f32 %v17339_v26, %v21212_v56  ;;  %v1850_v28 = vpop.f32.mrb[11].mxu1  ;;  %2428 = vmatprep.subr.bf16.mxu1 %v20673_v6  ;;  %v1952_v30 = vmax.f32 %v1856_v23, 0.0 }
 0x267   : > { %v1851_v29 = vadd.f32 %v21212_v56, %v1850_v28  ;;  %v1950_v32 = vmax.f32 %v1848_v25, 0.0 }
 0x268   : > { %v1953_v31 = vmax.f32 %v1859_v27, 0.0 }
 0x269   : > { %v1951_v33 = vmax.f32 %v1851_v29, 0.0  ;;  %2429 = vmatpush1.bf16.msra.mxu1 %v2049_v20 }
 0x26a   : > { %v2051_v34 = vpack.c.bf16 %v1953_v31, %v1952_v30  ;;  %2430 = vmatprep.subr.bf16.mxu1 %v20673_v6 }
 0x26b   : > { %v2050_v35 = vpack.c.bf16 %v1951_v33, %v1950_v32  ;;  %v17342_v36 = vpop.f32.mrb[12].mxu1 }
 0x26c   : > { %v1872_v37 = vadd.f32 %v17342_v36, %v21212_v56  ;;  %v1863_v38 = vpop.f32.mrb[13].mxu1 }
 0x26d   : > { %v1864_v39 = vadd.f32 %v21212_v56, %v1863_v38  ;;  %v17343_v40 = vpop.f32.mrb[14].mxu1  ;;  %2431 = vmatpush1.bf16.msra.mxu1 %v2050_v35 }
 0x26e   : > { %v1875_v41 = vadd.f32 %v17343_v40, %v21212_v56  ;;  %v1866_v42 = vpop.f32.mrb[15].mxu1  ;;  %2432 = vmatprep.subr.bf16.mxu1 %v20673_v6  ;;  %v1956_v44 = vmax.f32 %v1872_v37, 0.0 }
 0x26f   : > { %v1867_v43 = vadd.f32 %v21212_v56, %v1866_v42  ;;  %v1954_v46 = vmax.f32 %v1864_v39, 0.0 }
 0x270   : > { %v1957_v45 = vmax.f32 %v1875_v41, 0.0 }
 0x271   : > { %v1955_v47 = vmax.f32 %v1867_v43, 0.0  ;;  %2433 = vmatpush1.bf16.msra.mxu1 %v2051_v34 }
 0x272   : > { %v2053_v48 = vpack.c.bf16 %v1957_v45, %v1956_v44  ;;  %2434 = vmatprep.subr.bf16.mxu1 %v20673_v6  ;;  %v19738_v44 = vld [vmem:[%s20700_s17] ss:$8 sps:$4 sm:$0xff]   ;;  %v19743_v45 = vld [vmem:[%s20700_s17 + $0x10] ss:$8 sps:$4 sm:$0xff]  }
 0x273   : > { %v2052_v49 = vpack.c.bf16 %v1955_v47, %v1954_v46  ;;  %v17346_v50 = vpop.f32.mrb[16].mxu1  ;;  %v19744_v46 = vld [vmem:[%s20700_s17 + $0x24] ss:$8 sps:$4 sm:$0xff]   ;;  %v19746_v47 = vld [vmem:[%s20700_s17 + $0x20] ss:$8 sps:$4 sm:$0xff]  }
 0x274   : > { %v1888_v51 = vadd.f32 %v17346_v50, %v21212_v56  ;;  %v1879_v52 = vpop.f32.mrb[17].mxu1  ;;  %v19752_v50 = vld [vmem:[%s20700_s17 + $0x40] ss:$8 sps:$4 sm:$0xff]  }
 0x275   : > { %v1880_v53 = vadd.f32 %v21212_v56, %v1879_v52  ;;  %v17347_v54 = vpop.f32.mrb[18].mxu1  ;;  %2435 = vmatpush1.bf16.msra.mxu1 %v2052_v49  ;;  %v19750_v49 = vld [vmem:[%s20700_s17 + $0x44] ss:$8 sps:$4 sm:$0xff]   ;;  %v19755_v52 = vld [vmem:[%s20700_s17 + $0x50] ss:$8 sps:$4 sm:$0xff]  }
 0x276   : > { %v1891_v55 = vadd.f32 %v17347_v54, %v21212_v56  ;;  %v1882_v57 = vpop.f32.mrb[19].mxu1  ;;  %2436 = vmatprep.subr.bf16.mxu1 %v20673_v6  ;;  %v1960_v59 = vmax.f32 %v1888_v51, 0.0  ;;  %v19753_v51 = vld [vmem:[%s20700_s17 + $0x54] ss:$8 sps:$4 sm:$0xff]   ;;  %v19758_v54 = vld [vmem:[%s20700_s17 + $0x60] ss:$8 sps:$4 sm:$0xff]  }
 0x277   : > { %v1883_v58 = vadd.f32 %v21212_v56, %v1882_v57  ;;  %v1958_v61 = vmax.f32 %v1880_v53, 0.0  ;;  %v19756_v53 = vld [vmem:[%s20700_s17 + $0x64] ss:$8 sps:$4 sm:$0xff]   ;;  %v19761_v57 = vld [vmem:[%s20700_s17 + $0x70] ss:$8 sps:$4 sm:$0xff]  }
 0x278   : > { %v1961_v60 = vmax.f32 %v1891_v55, 0.0  ;;  %v19759_v55 = vld [vmem:[%s20700_s17 + $0x74] ss:$8 sps:$4 sm:$0xff]  }
 0x279   : > { %v1959_v62 = vmax.f32 %v1883_v58, 0.0  ;;  %2437 = vmatpush1.bf16.msra.mxu1 %v2053_v48  ;;  %v19747_v48 = vld [vmem:[%s20700_s17 + $0x34] ss:$8 sps:$4 sm:$0xff]   ;;  %v19762_v58 = vld [vmem:[%s20700_s17 + $0x84] ss:$8 sps:$4 sm:$0xff]  }
 0x27a   : > { %v2055_v63 = vpack.c.bf16 %v1961_v60, %v1960_v59  ;;  %2438 = vmatprep.subr.bf16.mxu1 %v20673_v6  ;;  %v19764_v59 = vld [vmem:[%s20700_s17 + $0x80] ss:$8 sps:$4 sm:$0xff]   ;;  %v19765_v60 = vld [vmem:[%s20700_s17 + $0x94] ss:$8 sps:$4 sm:$0xff]  }
 0x27b   : > { %v2054_v0 = vpack.c.bf16 %v1959_v62, %v1958_v61  ;;  %v17350_v1 = vpop.f32.mrb[20].mxu1  ;;  %v19767_v61 = vld [vmem:[%s20700_s17 + $0x90] ss:$8 sps:$4 sm:$0xff]   ;;  %v19768_v62 = vld [vmem:[%s20700_s17 + $0xa4] ss:$8 sps:$4 sm:$0xff]  }
 0x27c   : > { %v1904_v2 = vadd.f32 %v17350_v1, %v21212_v56  ;;  %v1895_v3 = vpop.f32.mrb[21].mxu1  ;;  %v19773_v1 = vld [vmem:[%s20700_s17 + $0xb0] ss:$8 sps:$4 sm:$0xff]  }
 0x27d   : > { %v1896_v4 = vadd.f32 %v21212_v56, %v1895_v3  ;;  %v17351_v5 = vpop.f32.mrb[22].mxu1  ;;  %2439 = vmatpush1.bf16.msra.mxu1 %v2054_v0  ;;  %v19771_v0 = vld [vmem:[%s20700_s17 + $0xb4] ss:$8 sps:$4 sm:$0xff]   ;;  %v19776_v3 = vld [vmem:[%s20700_s17 + $0xc0] ss:$8 sps:$4 sm:$0xff]  }
 0x27e   : > { %v1907_v7 = vadd.f32 %v17351_v5, %v21212_v56  ;;  %v1898_v8 = vpop.f32.mrb[23].mxu1  ;;  %2440 = vmatprep.subr.bf16.mxu1 %v20673_v6  ;;  %v1964_v10 = vmax.f32 %v1904_v2, 0.0  ;;  %v19774_v2 = vld [vmem:[%s20700_s17 + $0xc4] ss:$8 sps:$4 sm:$0xff]   ;;  %v19779_v5 = vld [vmem:[%s20700_s17 + $0xd0] ss:$8 sps:$4 sm:$0xff]  }
 0x27f   : > { %v1899_v9 = vadd.f32 %v21212_v56, %v1898_v8  ;;  %v1962_v12 = vmax.f32 %v1896_v4, 0.0  ;;  %v19777_v4 = vld [vmem:[%s20700_s17 + $0xd4] ss:$8 sps:$4 sm:$0xff]   ;;  %v19782_v8 = vld [vmem:[%s20700_s17 + $0xe0] ss:$8 sps:$4 sm:$0xff]  }
 0x280   : > { %v1965_v11 = vmax.f32 %v1907_v7, 0.0  ;;  %v19780_v7 = vld [vmem:[%s20700_s17 + $0xe4] ss:$8 sps:$4 sm:$0xff]  }
 0x281   : > { %v1963_v13 = vmax.f32 %v1899_v9, 0.0  ;;  %2441 = vmatpush1.bf16.msra.mxu1 %v2055_v63  ;;  %v19770_v63 = vld [vmem:[%s20700_s17 + $0xa0] ss:$8 sps:$4 sm:$0xff]   ;;  %v19783_v9 = vld [vmem:[%s20700_s17 + $0xf4] ss:$8 sps:$4 sm:$0xff]  }
 0x282   : > { %v2057_v14 = vpack.c.bf16 %v1965_v11, %v1964_v10  ;;  %2442 = vmatprep.subr.bf16.mxu1 %v20673_v6  ;;  %v19785_v10 = vld [vmem:[%s20700_s17 + $0xf0] ss:$8 sps:$4 sm:$0xff]   ;;  %v19786_v11 = vld [vmem:[%s20700_s17 + $0x104] ss:$8 sps:$4 sm:$0xff]  }
 0x283   : > { %v2056_v15 = vpack.c.bf16 %v1963_v13, %v1962_v12  ;;  %v17354_v16 = vpop.f32.mrb[24].mxu1  ;;  %v19788_v12 = vld [vmem:[%s20700_s17 + $0x100] ss:$8 sps:$4 sm:$0xff]   ;;  %v19789_v13 = vld [vmem:[%s20700_s17 + $0x114] ss:$8 sps:$4 sm:$0xff]  }
 0x284   : > { %v1920_v17 = vadd.f32 %v17354_v16, %v21212_v56  ;;  %v1911_v18 = vpop.f32.mrb[25].mxu1  ;;  %v19794_v16 = vld [vmem:[%s20700_s17 + $0x120] ss:$8 sps:$4 sm:$0xff]  }
 0x285   : > { %v1912_v19 = vadd.f32 %v21212_v56, %v1911_v18  ;;  %v17355_v20 = vpop.f32.mrb[26].mxu1  ;;  %2443 = vmatpush1.bf16.msra.mxu1 %v2056_v15  ;;  %v19792_v15 = vld [vmem:[%s20700_s17 + $0x124] ss:$8 sps:$4 sm:$0xff]   ;;  %v19797_v18 = vld [vmem:[%s20700_s17 + $0x130] ss:$8 sps:$4 sm:$0xff]  }
 0x286   : > { %v1923_v21 = vadd.f32 %v17355_v20, %v21212_v56  ;;  %v1914_v22 = vpop.f32.mrb[27].mxu1  ;;  %2444 = vmatprep.subr.bf16.mxu1 %v20673_v6  ;;  %v1968_v24 = vmax.f32 %v1920_v17, 0.0  ;;  %v19795_v17 = vld [vmem:[%s20700_s17 + $0x134] ss:$8 sps:$4 sm:$0xff]   ;;  %v19800_v20 = vld [vmem:[%s20700_s17 + $0x140] ss:$8 sps:$4 sm:$0xff]  }
 0x287   : > { %v1915_v23 = vadd.f32 %v21212_v56, %v1914_v22  ;;  %v1966_v26 = vmax.f32 %v1912_v19, 0.0  ;;  %v19798_v19 = vld [vmem:[%s20700_s17 + $0x144] ss:$8 sps:$4 sm:$0xff]   ;;  %v19803_v22 = vld [vmem:[%s20700_s17 + $0x150] ss:$8 sps:$4 sm:$0xff]  }
 0x288   : > { %v1969_v25 = vmax.f32 %v1923_v21, 0.0  ;;  %v19801_v21 = vld [vmem:[%s20700_s17 + $0x154] ss:$8 sps:$4 sm:$0xff]  }
 0x289   : > { %v1967_v27 = vmax.f32 %v1915_v23, 0.0  ;;  %2445 = vmatpush1.bf16.msra.mxu1 %v2057_v14  ;;  %v19791_v14 = vld [vmem:[%s20700_s17 + $0x110] ss:$8 sps:$4 sm:$0xff]   ;;  %v19804_v23 = vld [vmem:[%s20700_s17 + $0x164] ss:$8 sps:$4 sm:$0xff]  }
 0x28a   : > { %v2059_v28 = vpack.c.bf16 %v1969_v25, %v1968_v24  ;;  %2446 = vmatprep.subr.bf16.mxu1 %v20673_v6  ;;  %v19806_v24 = vld [vmem:[%s20700_s17 + $0x160] ss:$8 sps:$4 sm:$0xff]   ;;  %v19807_v25 = vld [vmem:[%s20700_s17 + $0x174] ss:$8 sps:$4 sm:$0xff]  }
 0x28b   : > { %v2058_v29 = vpack.c.bf16 %v1967_v27, %v1966_v26  ;;  %v17358_v30 = vpop.f32.mrb[28].mxu1  ;;  %v19809_v26 = vld [vmem:[%s20700_s17 + $0x170] ss:$8 sps:$4 sm:$0xff]   ;;  %v19810_v27 = vld [vmem:[%s20700_s17 + $0x184] ss:$8 sps:$4 sm:$0xff]  }
 0x28c   : > { %v1936_v31 = vadd.f32 %v17358_v30, %v21212_v56  ;;  %v1927_v32 = vpop.f32.mrb[29].mxu1  ;;  %v19815_v30 = vld [vmem:[%s20700_s17 + $0x190] ss:$8 sps:$4 sm:$0xff]  }
 0x28d   : > { %v1928_v33 = vadd.f32 %v21212_v56, %v1927_v32  ;;  %v17359_v34 = vpop.f32.mrb[30].mxu1  ;;  %2447 = vmatpush1.bf16.msra.mxu1 %v2058_v29  ;;  %v19813_v29 = vld [vmem:[%s20700_s17 + $0x194] ss:$8 sps:$4 sm:$0xff]   ;;  %v19818_v32 = vld [vmem:[%s20700_s17 + $0x1a0] ss:$8 sps:$4 sm:$0xff]  }
 0x28e   : > { %v1939_v35 = vadd.f32 %v17359_v34, %v21212_v56  ;;  %v1930_v36 = vpop.f32.mrb[31].mxu1  ;;  %2448 = vmatprep.subr.bf16.mxu1 %v20673_v6  ;;  %v1972_v38 = vmax.f32 %v1936_v31, 0.0  ;;  %v19816_v31 = vld [vmem:[%s20700_s17 + $0x1a4] ss:$8 sps:$4 sm:$0xff]  }
 0x28f   : > { %v1931_v37 = vadd.f32 %v21212_v56, %v1930_v36  ;;  %v1970_v40 = vmax.f32 %v1928_v33, 0.0  ;;  %v19741_v56 = vld [vmem:[%s20700_s17 + $0x14] ss:$8 sps:$4 sm:$0xff]   ;;  %v19821_v36 = vld [vmem:[%s20700_s17 + $0x1b0] ss:$8 sps:$4 sm:$0xff]  }
 0x290   : > { %v1973_v39 = vmax.f32 %v1939_v35, 0.0  ;;  %v19819_v33 = vld [vmem:[%s20700_s17 + $0x1b4] ss:$8 sps:$4 sm:$0xff]  }
 0x291   : > { %v1971_v41 = vmax.f32 %v1931_v37, 0.0  ;;  %2449 = vmatpush1.bf16.msra.mxu1 %v2059_v28  ;;  %v19812_v28 = vld [vmem:[%s20700_s17 + $0x180] ss:$8 sps:$4 sm:$0xff]  }
 0x292   : > { %v2061_v42 = vpack.c.bf16 %v1973_v39, %v1972_v38  ;;  %2450 = vmatprep.subr.bf16.mxu1 %v20673_v6  ;;  %v19822_v38 = vld [vmem:[%s20700_s17 + $0x1c4] ss:$8 sps:$4 sm:$0xff]  }
 0x293   : > { %v2060_v43 = vpack.c.bf16 %v1971_v41, %v1970_v40 }
 0x295   : > { %2451 = vmatpush1.bf16.msra.mxu1 %v2060_v43 }
 0x296   : > { %2452 = vmatprep.subr.bf16.mxu1 %v20673_v6  ;;  %v19749_v6 = vld [vmem:[%s20700_s17 + $0x30] ss:$8 sps:$4 sm:$0xff]  }
 0x299   : > { %2453 = vmatpush1.bf16.msra.mxu1 %v2061_v42  ;;  %v19824_v42 = vld [vmem:[%s20700_s17 + $0x1c0] ss:$8 sps:$4 sm:$0xff]  }
 0x29c   : > { %2455 = vmatmul.mubr.bf16.vlgmr.msra.gmra.mrb[32].mxu1 %v19738_v44  ;;  %v19825_v44 = vld [vmem:[%s20700_s17 + $0x1d4] ss:$8 sps:$4 sm:$0xff]  }
 0x29d   : > { %2462 = vmatprep.mubr.bf16.mxu1 %v19741_v56 }
 0x2a4   : > { %2463 = vmatmul.mubr.bf16.gmra.mrb[36].mxu1 %v19743_v45 }
 0x2a5   : > { %2470 = vmatprep.mubr.bf16.mxu1 %v19744_v46 }
 0x2ac   : > { %2471 = vmatmul.mubr.bf16.gmra.mrb[40].mxu1 %v19746_v47  ;;  %v19827_v47 = vld [vmem:[%s20700_s17 + $0x1d0] ss:$8 sps:$4 sm:$0xff]  }
 0x2ad   : > { %2478 = vmatprep.mubr.bf16.mxu1 %v19747_v48 }
 0x2b4   : > { %2479 = vmatmul.mubr.bf16.gmra.mrb[44].mxu1 %v19749_v6  ;;  %v19828_v6 = vld [vmem:[%s20700_s17 + $0x1e4] ss:$8 sps:$4 sm:$0xff]  }
 0x2b5   : > { %2486 = vmatprep.mubr.bf16.mxu1 %v19750_v49 }
 0x2bc   : > { %2487 = vmatmul.mubr.bf16.gmra.mrb[48].mxu1 %v19752_v50 }
 0x2bd   : > { %2494 = vmatprep.mubr.bf16.mxu1 %v19753_v51 }
 0x2c4   : > { %2495 = vmatmul.mubr.bf16.gmra.mrb[52].mxu1 %v19755_v52  ;;  %v19830_v52 = vld [vmem:[%s20700_s17 + $0x1e0] ss:$8 sps:$4 sm:$0xff]  }
 0x2c5   : > { %2502 = vmatprep.mubr.bf16.mxu1 %v19756_v53 }
 0x2cc   : > { %2503 = vmatmul.mubr.bf16.gmra.mrb[56].mxu1 %v19758_v54  ;;  %v19831_v54 = vld [vmem:[%s20700_s17 + $0x1f4] ss:$8 sps:$4 sm:$0xff]  }
 0x2cd   : > { %2510 = vmatprep.mubr.bf16.mxu1 %v19759_v55 }
 0x2d4   : > { %2511 = vmatmul.mubr.bf16.gmra.mrb[60].mxu1 %v19761_v57 }
 0x2d5   : > { %2518 = vmatprep.mubr.bf16.mxu1 %v19762_v58 }
 0x2dc   : > { %2519 = vmatmul.mubr.bf16.gmra.mrb[64].mxu1 %v19764_v59 }
 0x2dd   : > { %2526 = vmatprep.mubr.bf16.mxu1 %v19765_v60  ;;  %v19833_v60 = vld [vmem:[%s20700_s17 + $0x1f0] ss:$8 sps:$4 sm:$0xff]  }
 0x2e4   : > { %2527 = vmatmul.mubr.bf16.gmra.mrb[68].mxu1 %v19767_v61 }
 0x2e5   : > { %2534 = vmatprep.mubr.bf16.mxu1 %v19768_v62  ;;  %v19834_v62 = vld [vmem:[%s20700_s17 + $0x204] ss:$8 sps:$4 sm:$0xff]  }
 0x2ec   : > { %2535 = vmatmul.mubr.bf16.gmra.mrb[72].mxu1 %v19770_v63 }
 0x2ed   : > { %2542 = vmatprep.mubr.bf16.mxu1 %v19771_v0 }
 0x2f4   : > { %2543 = vmatmul.mubr.bf16.gmra.mrb[76].mxu1 %v19773_v1 }
 0x2f5   : > { %2550 = vmatprep.mubr.bf16.mxu1 %v19774_v2 }
 0x2fc   : > { %2551 = vmatmul.mubr.bf16.gmra.mrb[80].mxu1 %v19776_v3 }
 0x2fd   : > { %2558 = vmatprep.mubr.bf16.mxu1 %v19777_v4  ;;  %v19836_v4 = vld [vmem:[%s20700_s17 + $0x200] ss:$8 sps:$4 sm:$0xff]  }
 0x304   : > { %2559 = vmatmul.mubr.bf16.gmra.mrb[84].mxu1 %v19779_v5 }
 0x305   : > { %2566 = vmatprep.mubr.bf16.mxu1 %v19780_v7  ;;  %v19837_v7 = vld [vmem:[%s20700_s17 + $0x214] ss:$8 sps:$4 sm:$0xff]  }
 0x30c   : > { %2567 = vmatmul.mubr.bf16.gmra.mrb[88].mxu1 %v19782_v8 }
 0x30d   : > { %2574 = vmatprep.mubr.bf16.mxu1 %v19783_v9 }
 0x314   : > { %2575 = vmatmul.mubr.bf16.gmra.mrb[92].mxu1 %v19785_v10 }
 0x315   : > { %2582 = vmatprep.mubr.bf16.mxu1 %v19786_v11 }
 0x31c   : > { %2583 = vmatmul.mubr.bf16.gmra.mrb[96].mxu1 %v19788_v12 }
 0x31d   : > { %2590 = vmatprep.mubr.bf16.mxu1 %v19789_v13  ;;  %v19839_v13 = vld [vmem:[%s20700_s17 + $0x210] ss:$8 sps:$4 sm:$0xff]  }
 0x324   : > { %2591 = vmatmul.mubr.bf16.gmra.mrb[100].mxu1 %v19791_v14 }
 0x325   : > { %2598 = vmatprep.mubr.bf16.mxu1 %v19792_v15  ;;  %v19840_v15 = vld [vmem:[%s20700_s17 + $0x224] ss:$8 sps:$4 sm:$0xff]  }
 0x32c   : > { %2599 = vmatmul.mubr.bf16.gmra.mrb[104].mxu1 %v19794_v16 }
 0x32d   : > { %2606 = vmatprep.mubr.bf16.mxu1 %v19795_v17 }
 0x334   : > { %2607 = vmatmul.mubr.bf16.gmra.mrb[108].mxu1 %v19797_v18 }
 0x335   : > { %2614 = vmatprep.mubr.bf16.mxu1 %v19798_v19 }
 0x33c   : > { %2615 = vmatmul.mubr.bf16.gmra.mrb[112].mxu1 %v19800_v20 }
 0x33d   : > { %2622 = vmatprep.mubr.bf16.mxu1 %v19801_v21  ;;  %v19842_v21 = vld [vmem:[%s20700_s17 + $0x220] ss:$8 sps:$4 sm:$0xff]  }
 0x344   : > { %2623 = vmatmul.mubr.bf16.gmra.mrb[116].mxu1 %v19803_v22 }
 0x345   : > { %2630 = vmatprep.mubr.bf16.mxu1 %v19804_v23  ;;  %v19843_v23 = vld [vmem:[%s20700_s17 + $0x234] ss:$8 sps:$4 sm:$0xff]  }
 0x34c   : > { %2631 = vmatmul.mubr.bf16.gmra.mrb[120].mxu1 %v19806_v24 }
 0x34d   : > { %2638 = vmatprep.mubr.bf16.mxu1 %v19807_v25 }
 0x354   : > { %2639 = vmatmul.mubr.bf16.gmra.mrb[124].mxu1 %v19809_v26 }
 0x355   : > { %2646 = vmatprep.mubr.bf16.mxu1 %v19810_v27 }
 0x35c   : > { %2647 = vmatmul.mubr.bf16.gmra.mrb[128].mxu1 %v19812_v28 }
 0x35d   : > { %2654 = vmatprep.mubr.bf16.mxu1 %v19813_v29  ;;  %v19845_v29 = vld [vmem:[%s20700_s17 + $0x230] ss:$8 sps:$4 sm:$0xff]  }
 0x364   : > { %2655 = vmatmul.mubr.bf16.gmra.mrb[132].mxu1 %v19815_v30 }
 0x365   : > { %2662 = vmatprep.mubr.bf16.mxu1 %v19816_v31 }
 0x36c   : > { %2663 = vmatmul.mubr.bf16.gmra.mrb[136].mxu1 %v19818_v32 }
 0x36d   : > { %2670 = vmatprep.mubr.bf16.mxu1 %v19819_v33 }
 0x36f   : > { %v21315_v34 = vpop.f32.mrb[32].mxu1 }
 0x370   : > { %v2458_v35 = vpop.f32.mrb[33].mxu1 }
 0x371   : > { %v21318_v37 = vpop.f32.mrb[34].mxu1 }
 0x372   : > { %v2461_v39 = vpop.f32.mrb[35].mxu1 }
 0x374   : > { %2671 = vmatmul.mubr.bf16.gmra.mrb[140].mxu1 %v19821_v36 }
 0x375   : > { %2678 = vmatprep.mubr.bf16.mxu1 %v19822_v38 }
 0x377   : > { %v21321_v40 = vpop.f32.mrb[36].mxu1 }
 0x378   : > { %v2466_v41 = vpop.f32.mrb[37].mxu1 }
 0x379   : > { %v21324_v43 = vpop.f32.mrb[38].mxu1 }
 0x37a   : > { %v2469_v56 = vpop.f32.mrb[39].mxu1 }
 0x37c   : > { %2679 = vmatmul.mubr.bf16.gmra.mrb[144].mxu1 %v19824_v42 }
 0x37d   : > { %2686 = vmatprep.mubr.bf16.mxu1 %v19825_v44 }
 0x37f   : > { %v21327_v45 = vpop.f32.mrb[40].mxu1 }
 0x380   : > { %v2474_v46 = vpop.f32.mrb[41].mxu1 }
 0x381   : > { %v21330_v48 = vpop.f32.mrb[42].mxu1 }
 0x382   : > { %v2477_v49 = vpop.f32.mrb[43].mxu1 }
 0x384   : > { %2687 = vmatmul.mubr.bf16.gmra.mrb[148].mxu1 %v19827_v47 }
 0x385   : > { %2694 = vmatprep.mubr.bf16.mxu1 %v19828_v6 }
 0x387   : > { %v21333_v50 = vpop.f32.mrb[44].mxu1 }
 0x388   : > { %v2482_v51 = vpop.f32.mrb[45].mxu1 }
 0x389   : > { %v21336_v53 = vpop.f32.mrb[46].mxu1 }
 0x38a   : > { %v2485_v55 = vpop.f32.mrb[47].mxu1 }
 0x38c   : > { %2695 = vmatmul.mubr.bf16.gmra.mrb[152].mxu1 %v19830_v52 }
 0x38d   : > { %2702 = vmatprep.mubr.bf16.mxu1 %v19831_v54 }
 0x38f   : > { %v2488_v57 = vpop.f32.mrb[48].mxu1 }
 0x390   : > { %v2743_v58 = vmax.f32 %v21315_v34, %v2488_v57  ;;  %v2490_v59 = vpop.f32.mrb[49].mxu1 }
 0x391   : > { %v2491_v61 = vpop.f32.mrb[50].mxu1 }
 0x392   : > { %v2744_v63 = vmax.f32 %v21318_v37, %v2491_v61  ;;  %v2493_v0 = vpop.f32.mrb[51].mxu1 }
 0x394   : > { %2703 = vmatmul.mubr.bf16.gmra.mrb[156].mxu1 %v19833_v60 }
 0x395   : > { %2710 = vmatprep.mubr.bf16.mxu1 %v19834_v62 }
 0x397   : > { %v2496_v1 = vpop.f32.mrb[52].mxu1 }
 0x398   : > { %v2745_v2 = vmax.f32 %v21321_v40, %v2496_v1  ;;  %v2498_v3 = vpop.f32.mrb[53].mxu1 }
 0x399   : > { %v2499_v5 = vpop.f32.mrb[54].mxu1 }
 0x39a   : > { %v2746_v8 = vmax.f32 %v21324_v43, %v2499_v5  ;;  %v2501_v9 = vpop.f32.mrb[55].mxu1 }
 0x39c   : > { %2711 = vmatmul.mubr.bf16.gmra.mrb[160].mxu1 %v19836_v4 }
 0x39d   : > { %2718 = vmatprep.mubr.bf16.mxu1 %v19837_v7 }
 0x39f   : > { %v2504_v10 = vpop.f32.mrb[56].mxu1 }
 0x3a0   : > { %v2747_v11 = vmax.f32 %v21327_v45, %v2504_v10  ;;  %v2506_v12 = vpop.f32.mrb[57].mxu1 }
 0x3a1   : > { %v2507_v14 = vpop.f32.mrb[58].mxu1 }
 0x3a2   : > { %v2748_v16 = vmax.f32 %v21330_v48, %v2507_v14  ;;  %v2509_v17 = vpop.f32.mrb[59].mxu1 }
 0x3a4   : > { %2719 = vmatmul.mubr.bf16.gmra.mrb[164].mxu1 %v19839_v13 }
 0x3a5   : > { %2726 = vmatprep.mubr.bf16.mxu1 %v19840_v15 }
 0x3a7   : > { %v2512_v18 = vpop.f32.mrb[60].mxu1 }
 0x3a8   : > { %v2749_v19 = vmax.f32 %v21333_v50, %v2512_v18  ;;  %v2514_v20 = vpop.f32.mrb[61].mxu1 }
 0x3a9   : > { %v2515_v22 = vpop.f32.mrb[62].mxu1 }
 0x3aa   : > { %v2750_v24 = vmax.f32 %v21336_v53, %v2515_v22  ;;  %v2517_v25 = vpop.f32.mrb[63].mxu1 }
 0x3ac   : > { %2727 = vmatmul.mubr.bf16.gmra.mrb[168].mxu1 %v19842_v21 }
 0x3ad   : > { %2734 = vmatprep.mubr.bf16.mxu1 %v19843_v23 }
 0x3af   : > { %v2520_v26 = vpop.f32.mrb[64].mxu1 }
 0x3b0   : > { %v2751_v27 = vmax.f32 %v2743_v58, %v2520_v26  ;;  %v2522_v28 = vpop.f32.mrb[65].mxu1 }
 0x3b1   : > { %v2523_v30 = vpop.f32.mrb[66].mxu1 }
 0x3b2   : > { %v2752_v31 = vmax.f32 %v2744_v63, %v2523_v30  ;;  %v2525_v32 = vpop.f32.mrb[67].mxu1 }
 0x3b4   : > { %2735 = vmatmul.mubr.bf16.gmra.mrb[172].mxu1 %v19845_v29 }
 0x3b7   : > { %v2528_v33 = vpop.f32.mrb[68].mxu1 }
 0x3b8   : > { %v2753_v34 = vmax.f32 %v2745_v2, %v2528_v33  ;;  %v2530_v35 = vpop.f32.mrb[69].mxu1 }
 0x3b9   : > { %v2531_v36 = vpop.f32.mrb[70].mxu1 }
 0x3ba   : > { %v2754_v37 = vmax.f32 %v2746_v8, %v2531_v36  ;;  %v2533_v38 = vpop.f32.mrb[71].mxu1  ;;  %v21357_v36 = vld [vmem:[%s20705_s21] sm:$0xff]  }
 0x3bb   : > { %17368 = vmatprep.mubr.msk.bf16.mxu0 %vm3081_vm2, %v21357_v36 }
 0x3bf   : > { %v2536_v39 = vpop.f32.mrb[72].mxu1 }
 0x3c0   : > { %v2755_v40 = vmax.f32 %v2747_v11, %v2536_v39  ;;  %v2538_v41 = vpop.f32.mrb[73].mxu1 }
 0x3c1   : > { %v2539_v42 = vpop.f32.mrb[74].mxu1 }
 0x3c2   : > { %v2756_v43 = vmax.f32 %v2748_v16, %v2539_v42  ;;  %v2541_v44 = vpop.f32.mrb[75].mxu1 }
 0x3c7   : > { %v2544_v56 = vpop.f32.mrb[76].mxu1 }
 0x3c8   : > { %v2757_v45 = vmax.f32 %v2749_v19, %v2544_v56  ;;  %v2546_v46 = vpop.f32.mrb[77].mxu1 }
 0x3c9   : > { %v2547_v47 = vpop.f32.mrb[78].mxu1 }
 0x3ca   : > { %v2758_v48 = vmax.f32 %v2750_v24, %v2547_v47  ;;  %v2549_v6 = vpop.f32.mrb[79].mxu1 }
 0x3cf   : > { %v2552_v49 = vpop.f32.mrb[80].mxu1 }
 0x3d0   : > { %v2759_v50 = vmax.f32 %v2751_v27, %v2552_v49  ;;  %v2554_v51 = vpop.f32.mrb[81].mxu1 }
 0x3d1   : > { %v2555_v52 = vpop.f32.mrb[82].mxu1 }
 0x3d2   : > { %v2760_v53 = vmax.f32 %v2752_v31, %v2555_v52  ;;  %v2557_v54 = vpop.f32.mrb[83].mxu1  ;;  %v21362_v52 = vld [vmem:[%s20705_s21 + $0x30] sm:$0xff]  }
 0x3d3   : > { %17550 = vmatprep.mubr.msk.bf16.mxu1 %vm3081_vm2, %v21362_v52 }
 0x3d7   : > { %v2560_v55 = vpop.f32.mrb[84].mxu1 }
 0x3d8   : > { %v2761_v57 = vmax.f32 %v2753_v34, %v2560_v55  ;;  %v2562_v58 = vpop.f32.mrb[85].mxu1 }
 0x3d9   : > { %v2563_v59 = vpop.f32.mrb[86].mxu1 }
 0x3da   : > { %v2762_v60 = vmax.f32 %v2754_v37, %v2563_v59  ;;  %v2565_v61 = vpop.f32.mrb[87].mxu1 }
 0x3df   : > { %v2568_v62 = vpop.f32.mrb[88].mxu1 }
 0x3e0   : > { %v2763_v63 = vmax.f32 %v2755_v40, %v2568_v62  ;;  %v2570_v0 = vpop.f32.mrb[89].mxu1 }
 0x3e1   : > { %v2571_v1 = vpop.f32.mrb[90].mxu1 }
 0x3e2   : > { %v2764_v2 = vmax.f32 %v2756_v43, %v2571_v1  ;;  %v2573_v3 = vpop.f32.mrb[91].mxu1 }
 0x3e7   : > { %v2576_v4 = vpop.f32.mrb[92].mxu1 }
 0x3e8   : > { %v2765_v5 = vmax.f32 %v2757_v45, %v2576_v4  ;;  %v2578_v7 = vpop.f32.mrb[93].mxu1 }
 0x3e9   : > { %v2579_v8 = vpop.f32.mrb[94].mxu1 }
 0x3ea   : > { %v2766_v9 = vmax.f32 %v2758_v48, %v2579_v8  ;;  %v2581_v10 = vpop.f32.mrb[95].mxu1 }
 0x3ef   : > { %v2584_v11 = vpop.f32.mrb[96].mxu1 }
 0x3f0   : > { %v2767_v12 = vmax.f32 %v2759_v50, %v2584_v11  ;;  %v2586_v13 = vpop.f32.mrb[97].mxu1 }
 0x3f1   : > { %v2587_v14 = vpop.f32.mrb[98].mxu1 }
 0x3f2   : > { %v2768_v15 = vmax.f32 %v2760_v53, %v2587_v14  ;;  %v2589_v16 = vpop.f32.mrb[99].mxu1 }
 0x3f7   : > { %v2592_v17 = vpop.f32.mrb[100].mxu1 }
 0x3f8   : > { %v2769_v18 = vmax.f32 %v2761_v57, %v2592_v17  ;;  %v2594_v19 = vpop.f32.mrb[101].mxu1 }
 0x3f9   : > { %v2595_v20 = vpop.f32.mrb[102].mxu1 }
 0x3fa   : > { %v2770_v21 = vmax.f32 %v2762_v60, %v2595_v20  ;;  %v2597_v22 = vpop.f32.mrb[103].mxu1 }
 0x3ff   : > { %v2600_v23 = vpop.f32.mrb[104].mxu1 }
 0x400   : > { %v2771_v24 = vmax.f32 %v2763_v63, %v2600_v23  ;;  %v2602_v25 = vpop.f32.mrb[105].mxu1 }
 0x401   : > { %v2603_v26 = vpop.f32.mrb[106].mxu1 }
 0x402   : > { %v2772_v27 = vmax.f32 %v2764_v2, %v2603_v26  ;;  %v2605_v28 = vpop.f32.mrb[107].mxu1 }
 0x407   : > { %v2608_v29 = vpop.f32.mrb[108].mxu1 }
 0x408   : > { %v2773_v30 = vmax.f32 %v2765_v5, %v2608_v29  ;;  %v2610_v31 = vpop.f32.mrb[109].mxu1 }
 0x409   : > { %v2611_v32 = vpop.f32.mrb[110].mxu1 }
 0x40a   : > { %v2774_v33 = vmax.f32 %v2766_v9, %v2611_v32  ;;  %v2613_v34 = vpop.f32.mrb[111].mxu1 }
 0x40f   : > { %v2616_v35 = vpop.f32.mrb[112].mxu1 }
 0x410   : > { %v2775_v37 = vmax.f32 %v2767_v12, %v2616_v35  ;;  %v2618_v38 = vpop.f32.mrb[113].mxu1 }
 0x411   : > { %v2619_v39 = vpop.f32.mrb[114].mxu1 }
 0x412   : > { %v2776_v40 = vmax.f32 %v2768_v15, %v2619_v39  ;;  %v2621_v41 = vpop.f32.mrb[115].mxu1 }
 0x417   : > { %v2624_v42 = vpop.f32.mrb[116].mxu1 }
 0x418   : > { %v2777_v43 = vmax.f32 %v2769_v18, %v2624_v42  ;;  %v2626_v44 = vpop.f32.mrb[117].mxu1 }
 0x419   : > { %v2627_v56 = vpop.f32.mrb[118].mxu1 }
 0x41a   : > { %v2778_v45 = vmax.f32 %v2770_v21, %v2627_v56  ;;  %v2629_v46 = vpop.f32.mrb[119].mxu1 }
 0x41f   : > { %v2632_v47 = vpop.f32.mrb[120].mxu1 }
 0x420   : > { %v2779_v48 = vmax.f32 %v2771_v24, %v2632_v47  ;;  %v2634_v6 = vpop.f32.mrb[121].mxu1 }
 0x421   : > { %v2635_v49 = vpop.f32.mrb[122].mxu1 }
 0x422   : > { %v2780_v50 = vmax.f32 %v2772_v27, %v2635_v49  ;;  %v2637_v51 = vpop.f32.mrb[123].mxu1 }
 0x427   : > { %v2640_v53 = vpop.f32.mrb[124].mxu1 }
 0x428   : > { %v2781_v54 = vmax.f32 %v2773_v30, %v2640_v53  ;;  %v2642_v55 = vpop.f32.mrb[125].mxu1 }
 0x429   : > { %v2643_v57 = vpop.f32.mrb[126].mxu1 }
 0x42a   : > { %v2782_v58 = vmax.f32 %v2774_v33, %v2643_v57  ;;  %v2645_v59 = vpop.f32.mrb[127].mxu1 }
 0x42f   : > { %v2648_v60 = vpop.f32.mrb[128].mxu1 }
 0x430   : > { %v2783_v61 = vmax.f32 %v2775_v37, %v2648_v60  ;;  %v2650_v62 = vpop.f32.mrb[129].mxu1 }
 0x431   : > { %v2651_v63 = vpop.f32.mrb[130].mxu1 }
 0x432   : > { %v2784_v0 = vmax.f32 %v2776_v40, %v2651_v63  ;;  %v2653_v1 = vpop.f32.mrb[131].mxu1 }
 0x437   : > { %v2656_v2 = vpop.f32.mrb[132].mxu1 }
 0x438   : > { %v2785_v3 = vmax.f32 %v2777_v43, %v2656_v2  ;;  %v2658_v4 = vpop.f32.mrb[133].mxu1 }
 0x439   : > { %v2659_v5 = vpop.f32.mrb[134].mxu1 }
 0x43a   : > { %v2786_v7 = vmax.f32 %v2778_v45, %v2659_v5  ;;  %v2661_v8 = vpop.f32.mrb[135].mxu1 }
 0x43f   : > { %v2664_v9 = vpop.f32.mrb[136].mxu1 }
 0x440   : > { %v2787_v10 = vmax.f32 %v2779_v48, %v2664_v9  ;;  %v2666_v11 = vpop.f32.mrb[137].mxu1 }
 0x441   : > { %v2667_v12 = vpop.f32.mrb[138].mxu1  ;;  %v21391_v11 = vld [vmem:[%s20705_s21 + $0x8] sm:$0xff]  }
 0x442   : > { %v2788_v13 = vmax.f32 %v2780_v50, %v2667_v12  ;;  %v2669_v14 = vpop.f32.mrb[139].mxu1  ;;  %v21394_v12 = vld [vmem:[%s20705_s21 + $0x10] sm:$0xff]  }
 0x443   : > { %v21404_v14 = vld [vmem:[%s20705_s21 + $0x20] sm:$0xff]  }
 0x447   : > { %v2672_v15 = vpop.f32.mrb[140].mxu1 }
 0x448   : > { %v2789_v16 = vmax.f32 %v2781_v54, %v2672_v15  ;;  %v2674_v17 = vpop.f32.mrb[141].mxu1  ;;  %v21411_v15 = vld [vmem:[%s20705_s21 + $0x28] sm:$0xff]  }
 0x449   : > { %v2675_v18 = vpop.f32.mrb[142].mxu1  ;;  %v21421_v17 = vld [vmem:[%s20705_s21 + $0x40] sm:$0xff]  }
 0x44a   : > { %v2790_v19 = vmax.f32 %v2782_v58, %v2675_v18  ;;  %v2677_v20 = vpop.f32.mrb[143].mxu1  ;;  %v21428_v18 = vld [vmem:[%s20705_s21 + $0x48] sm:$0xff]  }
 0x44b   : > { %v21441_v20 = vld [vmem:[%s20705_s21 + $0x60] sm:$0xff]  }
 0x44f   : > { %v2680_v21 = vpop.f32.mrb[144].mxu1 }
 0x450   : > { %v2791_v22 = vmax.f32 %v2783_v61, %v2680_v21  ;;  %v2682_v23 = vpop.f32.mrb[145].mxu1  ;;  %v21448_v21 = vld [vmem:[%s20705_s21 + $0x68] sm:$0xff]  }
 0x451   : > { %v2683_v24 = vpop.f32.mrb[146].mxu1  ;;  %v21458_v23 = vld [vmem:[%s20705_s21 + $0x78] sm:$0xff]  }
 0x452   : > { %v2792_v25 = vmax.f32 %v2784_v0, %v2683_v24  ;;  %v2685_v26 = vpop.f32.mrb[147].mxu1  ;;  %v21461_v24 = vld [vmem:[%s20705_s21 + $0x80] sm:$0xff]  }
 0x453   : > { %v21471_v26 = vld [vmem:[%s20705_s21 + $0x90] sm:$0xff]  }
 0x457   : > { %v2688_v27 = vpop.f32.mrb[148].mxu1 }
 0x458   : > { %v2793_v28 = vmax.f32 %v2785_v3, %v2688_v27  ;;  %v2690_v29 = vpop.f32.mrb[149].mxu1  ;;  %v21478_v27 = vld [vmem:[%s20705_s21 + $0x98] sm:$0xff]  }
 0x459   : > { %v2691_v30 = vpop.f32.mrb[150].mxu1  ;;  %v21488_v29 = vld [vmem:[%s20705_s21 + $0xa8] sm:$0xff]  }
 0x45a   : > { %v2794_v31 = vmax.f32 %v2786_v7, %v2691_v30  ;;  %v2693_v32 = vpop.f32.mrb[151].mxu1  ;;  %v21491_v30 = vld [vmem:[%s20705_s21 + $0xb0] sm:$0xff]  }
 0x45b   : > { %v21501_v32 = vld [vmem:[%s20705_s21 + $0xc0] sm:$0xff]  }
 0x45f   : > { %v2696_v33 = vpop.f32.mrb[152].mxu1 }
 0x460   : > { %v2795_v34 = vmax.f32 %v2787_v10, %v2696_v33  ;;  %v2698_v35 = vpop.f32.mrb[153].mxu1  ;;  %v21508_v33 = vld [vmem:[%s20705_s21 + $0xc8] sm:$0xff]  }
 0x461   : > { %v2699_v37 = vpop.f32.mrb[154].mxu1  ;;  %v21518_v35 = vld [vmem:[%s20705_s21 + $0xd8] sm:$0xff]  }
 0x462   : > { %v2796_v38 = vmax.f32 %v2788_v13, %v2699_v37  ;;  %v2701_v39 = vpop.f32.mrb[155].mxu1  ;;  %v21401_v13 = vld [vmem:[%s20705_s21 + $0x18] sm:$0xff]   ;;  %v19882_v37 = vld [vmem:[%s23445_s6 + $0x8] sm:$0xff]  }
 0x463   : > { %v21529_v39 = vld [vmem:[%s20705_s21 + $0xe8] sm:$0xff]  }
 0x467   : > { %v2704_v40 = vpop.f32.mrb[156].mxu1 }
 0x468   : > { %v2797_v41 = vmax.f32 %v2789_v16, %v2704_v40  ;;  %v2706_v42 = vpop.f32.mrb[157].mxu1  ;;  %v21418_v16 = vld [vmem:[%s20705_s21 + $0x38] sm:$0xff]   ;;  %v21532_v40 = vld [vmem:[%s20705_s21 + $0xf0] sm:$0xff]  }
 0x469   : > { %v2707_v43 = vpop.f32.mrb[158].mxu1  ;;  %v21540_v42 = vld [vmem:[%s20705_s21 + $0xf8] sm:$0xff]  }
 0x46a   : > { %v2798_v44 = vmax.f32 %v2790_v19, %v2707_v43  ;;  %v2709_v56 = vpop.f32.mrb[159].mxu1  ;;  %v21431_v19 = vld [vmem:[%s20705_s21 + $0x50] sm:$0xff]   ;;  %v21543_v43 = vld [vmem:[%s20705_s21 + $0x100] sm:$0xff]  }
 0x46b   : > { %v21553_v56 = vld [vmem:[%s20705_s21 + $0x110] sm:$0xff]  }
 0x46f   : > { %v2712_v45 = vpop.f32.mrb[160].mxu1 }
 0x470   : > { %v2714_v46 = vpop.f32.mrb[161].mxu1  ;;  %v21366_v47 = vmax.f32 %v2791_v22, %v2712_v45  ;;  %v21451_v22 = vld [vmem:[%s20705_s21 + $0x70] sm:$0xff]   ;;  %v21560_v45 = vld [vmem:[%s20705_s21 + $0x118] sm:$0xff]  }
 0x471   : > { %v2715_v48 = vpop.f32.mrb[162].mxu1 }
 0x472   : > { %v2717_v6 = vpop.f32.mrb[163].mxu1  ;;  %v21368_v49 = vmax.f32 %v2792_v25, %v2715_v48  ;;  %v21468_v25 = vld [vmem:[%s20705_s21 + $0x88] sm:$0xff]  }
 0x474   : > { %v2897_v50 = vpack.c.bf16 %v21368_v49, %v21366_v47 }
 0x476   : > { %17360 = vmatprep.subr.bf16.mxu0 %v2897_v50 }
 0x477   : > { %v2720_v51 = vpop.f32.mrb[164].mxu1  ;;  %17361 = vmatpush3.bf16.msra.mxu0 %v2897_v50 }
 0x478   : > { %v2722_v53 = vpop.f32.mrb[165].mxu1  ;;  %v21372_v54 = vmax.f32 %v2793_v28, %v2720_v51  ;;  %v21481_v28 = vld [vmem:[%s20705_s21 + $0xa0] sm:$0xff]  }
 0x479   : > { %v2723_v55 = vpop.f32.mrb[166].mxu1 }
 0x47a   : > { %v2725_v57 = vpop.f32.mrb[167].mxu1  ;;  %v21374_v58 = vmax.f32 %v2794_v31, %v2723_v55  ;;  %v21498_v31 = vld [vmem:[%s20705_s21 + $0xb8] sm:$0xff]  }
 0x47c   : > { %v2898_v59 = vpack.c.bf16 %v21374_v58, %v21372_v54 }
 0x47e   : > { %17362 = vmatprep.subr.bf16.mxu0 %v2898_v59 }
 0x47f   : > { %v2728_v60 = vpop.f32.mrb[168].mxu1  ;;  %17363 = vmatpush3.bf16.msra.mxu0 %v2898_v59 }
 0x480   : > { %v21378_v61 = vmax.f32 %v2795_v34, %v2728_v60  ;;  %v2730_v62 = vpop.f32.mrb[169].mxu1  ;;  %v21511_v34 = vld [vmem:[%s20705_s21 + $0xd0] sm:$0xff]  }
 0x481   : > { %v2731_v63 = vpop.f32.mrb[170].mxu1 }
 0x482   : > { %v21380_v0 = vmax.f32 %v2796_v38, %v2731_v63  ;;  %v2733_v1 = vpop.f32.mrb[171].mxu1  ;;  %v21522_v38 = vld [vmem:[%s20705_s21 + $0xe0] sm:$0xff]  }
 0x484   : > { %v2899_v2 = vpack.c.bf16 %v21380_v0, %v21378_v61 }
 0x486   : > { %17364 = vmatprep.subr.bf16.mxu0 %v2899_v2 }
 0x487   : > { %v2736_v3 = vpop.f32.mrb[172].mxu1  ;;  %17365 = vmatpush3.bf16.msra.mxu0 %v2899_v2 }
 0x488   : > { %v21384_v4 = vmax.f32 %v2797_v41, %v2736_v3  ;;  %v2738_v5 = vpop.f32.mrb[173].mxu1  ;;  %v19883_v41 = vld [vmem:[%s23445_s6] sm:$0xff]  }
 0x489   : > { %v2739_v7 = vpop.f32.mrb[174].mxu1 }
 0x48a   : > { %v21386_v8 = vmax.f32 %v2798_v44, %v2739_v7  ;;  %v2741_v9 = vpop.f32.mrb[175].mxu1  ;;  %v21550_v44 = vld [vmem:[%s20705_s21 + $0x108] sm:$0xff]  }
 0x48c   : > { %v2900_v10 = vpack.c.bf16 %v21386_v8, %v21384_v4 }
 0x48e   : > { %17366 = vmatprep.subr.bf16.mxu0 %v2900_v10 }
 0x48f   : > { %17367 = vmatpush3.bf16.msra.mxu0 %v2900_v10  ;;  %v19884_v10 = vld [vmem:[%s23445_s6 + $0x10] sm:$0xff]  }
 0x490   : > { %17440 = vmatprep.subr.bf16.mxu0 %v19882_v37 }
 0x492   : > { %17369 = vmatmul.mubr.msk.bf16.vlgmr.msra.gmra.mrb[0].mxu0 %vm3081_vm2, %v21391_v11 }
 0x493   : > { %17372 = vmatprep.mubr.msk.bf16.mxu0 %vm3081_vm2, %v21394_v12  ;;  %17441 = vmatpush3.bf16.msra.mxu0 %v19882_v37 }
 0x494   : > { %17450 = vmatprep.subr.bf16.mxu0 %v19883_v41 }
 0x49a   : > { %17373 = vmatmul.mubr.msk.bf16.gmra.mrb[4].mxu0 %vm3081_vm2, %v21401_v13 }
 0x49b   : > { %17376 = vmatprep.mubr.msk.bf16.mxu0 %vm3081_vm2, %v21404_v14 }
 0x4a2   : > { %17377 = vmatmul.mubr.msk.bf16.gmra.mrb[8].mxu0 %vm3081_vm2, %v21411_v15 }
 0x4a3   : > { %17380 = vmatprep.mubr.msk.bf16.mxu0 %vm3081_vm2, %v21362_v52  ;;  %v21438_v52 = vld [vmem:[%s20705_s21 + $0x58] sm:$0xff]  }
 0x4aa   : > { %17381 = vmatmul.mubr.msk.bf16.gmra.mrb[12].mxu0 %vm3081_vm2, %v21418_v16 }
 0x4ab   : > { %17384 = vmatprep.mubr.msk.bf16.mxu0 %vm3081_vm2, %v21421_v17 }
 0x4b2   : > { %17385 = vmatmul.mubr.msk.bf16.gmra.mrb[16].mxu0 %vm3081_vm2, %v21428_v18 }
 0x4b3   : > { %17388 = vmatprep.mubr.msk.bf16.mxu0 %vm3081_vm2, %v21431_v19 }
 0x4ba   : > { %17389 = vmatmul.mubr.msk.bf16.gmra.mrb[20].mxu0 %vm3081_vm2, %v21438_v52 }
 0x4bb   : > { %17392 = vmatprep.mubr.msk.bf16.mxu0 %vm3081_vm2, %v21441_v20 }
 0x4c2   : > { %17393 = vmatmul.mubr.msk.bf16.gmra.mrb[24].mxu0 %vm3081_vm2, %v21448_v21 }
 0x4c3   : > { %17396 = vmatprep.mubr.msk.bf16.mxu0 %vm3081_vm2, %v21451_v22 }
 0x4ca   : > { %17397 = vmatmul.mubr.msk.bf16.gmra.mrb[28].mxu0 %vm3081_vm2, %v21458_v23 }
 0x4cb   : > { %17400 = vmatprep.mubr.msk.bf16.mxu0 %vm3081_vm2, %v21461_v24 }
 0x4d2   : > { %17401 = vmatmul.mubr.msk.bf16.gmra.mrb[32].mxu0 %vm3081_vm2, %v21468_v25 }
 0x4d3   : > { %17404 = vmatprep.mubr.msk.bf16.mxu0 %vm3081_vm2, %v21471_v26 }
 0x4da   : > { %17405 = vmatmul.mubr.msk.bf16.gmra.mrb[36].mxu0 %vm3081_vm2, %v21478_v27 }
 0x4db   : > { %17408 = vmatprep.mubr.msk.bf16.mxu0 %vm3081_vm2, %v21481_v28 }
 0x4e2   : > { %17409 = vmatmul.mubr.msk.bf16.gmra.mrb[40].mxu0 %vm3081_vm2, %v21488_v29 }
 0x4e3   : > { %17412 = vmatprep.mubr.msk.bf16.mxu0 %vm3081_vm2, %v21491_v30 }
 0x4ea   : > { %17413 = vmatmul.mubr.msk.bf16.gmra.mrb[44].mxu0 %vm3081_vm2, %v21498_v31 }
 0x4eb   : > { %17416 = vmatprep.mubr.msk.bf16.mxu0 %vm3081_vm2, %v21501_v32 }
 0x4f2   : > { %17417 = vmatmul.mubr.msk.bf16.gmra.mrb[48].mxu0 %vm3081_vm2, %v21508_v33 }
 0x4f3   : > { %17420 = vmatprep.mubr.msk.bf16.mxu0 %vm3081_vm2, %v21511_v34 }
 0x4fa   : > { %17421 = vmatmul.mubr.msk.bf16.gmra.mrb[52].mxu0 %vm3081_vm2, %v21518_v35 }
 0x4fb   : > { %17424 = vmatprep.mubr.msk.bf16.mxu0 %vm3081_vm2, %v21522_v38 }
 0x502   : > { %17425 = vmatmul.mubr.msk.bf16.gmra.mrb[56].mxu0 %vm3081_vm2, %v21529_v39 }
 0x503   : > { %17428 = vmatprep.mubr.msk.bf16.mxu0 %vm3081_vm2, %v21532_v40 }
 0x50a   : > { %17429 = vmatmul.mubr.msk.bf16.gmra.mrb[60].mxu0 %vm3081_vm2, %v21540_v42 }
 0x50b   : > { %17432 = vmatprep.mubr.msk.bf16.mxu0 %vm3081_vm2, %v21543_v43 }
 0x512   : > { %17433 = vmatmul.mubr.msk.bf16.gmra.mrb[64].mxu0 %vm3081_vm2, %v21550_v44 }
 0x513   : > { %17436 = vmatprep.mubr.msk.bf16.mxu0 %vm3081_vm2, %v21553_v56 }
 0x51a   : > { %17437 = vmatmul.mubr.msk.bf16.gmra.mrb[68].mxu0 %vm3081_vm2, %v21560_v45 }
 0x565   : > { %v17370_v46 = vpop.f32.mrb[0].mxu0 }
 0x566   : > { %v3224_v48 = vpop.f32.mrb[1].mxu0 }
 0x567   : > { %v17371_v6 = vpop.f32.mrb[2].mxu0 }
 0x568   : > { %v3512_v50 = vpack.c.bf16 %v17371_v6, %v17370_v46  ;;  %v3227_v51 = vpop.f32.mrb[3].mxu0 }
 0x569   : > { %v3511_v53 = vpack.c.bf16 %v3227_v51, %v3224_v48 }
 0x56d   : > { %v17374_v55 = vpop.f32.mrb[4].mxu0 }
 0x56e   : > { %v3240_v57 = vpop.f32.mrb[5].mxu0 }
 0x56f   : > { %v17375_v59 = vpop.f32.mrb[6].mxu0 }
 0x570   : > { %v3514_v60 = vpack.c.bf16 %v17375_v59, %v17374_v55  ;;  %v3243_v62 = vpop.f32.mrb[7].mxu0 }
 0x571   : > { %v3513_v63 = vpack.c.bf16 %v3243_v62, %v3240_v57 }
 0x575   : > { %v17378_v1 = vpop.f32.mrb[8].mxu0 }
 0x576   : > { %v3256_v2 = vpop.f32.mrb[9].mxu0 }
 0x577   : > { %v17379_v3 = vpop.f32.mrb[10].mxu0 }
 0x578   : > { %v3516_v5 = vpack.c.bf16 %v17379_v3, %v17378_v1  ;;  %v3259_v7 = vpop.f32.mrb[11].mxu0 }
 0x579   : > { %v3515_v9 = vpack.c.bf16 %v3259_v7, %v3256_v2 }
 0x57b   : > { %17442 = vmatprep.mubr.msk.bf16.mxu0 %vm3525_vm3, %v3515_v9 }
 0x57c   : > { %17443 = vmatmul.mubr.msk.bf16.vlgmr.msra.gmra.mrb[72].mxu0 %vm3525_vm3, %v3516_v5 }
 0x57d   : > { %v17382_v37 = vpop.f32.mrb[12].mxu0  ;;  %17451 = vmatpush3.bf16.msra.mxu0 %v19883_v41  ;;  %v19885_v41 = vld [vmem:[%s23445_s6 + $0x18] sm:$0xff]  }
 0x57e   : > { %v3272_v46 = vpop.f32.mrb[13].mxu0  ;;  %17460 = vmatprep.subr.bf16.mxu0 %v19884_v10 }
 0x57f   : > { %v17383_v48 = vpop.f32.mrb[14].mxu0 }
 0x580   : > { %v3518_v6 = vpack.c.bf16 %v17383_v48, %v17382_v37  ;;  %v3275_v51 = vpop.f32.mrb[15].mxu0 }
 0x581   : > { %v3517_v55 = vpack.c.bf16 %v3275_v51, %v3272_v46 }
 0x583   : > { %17446 = vmatprep.mubr.msk.bf16.mxu0 %vm3525_vm3, %v3517_v55 }
 0x584   : > { %17447 = vmatmul.mubr.msk.bf16.gmra.mrb[76].mxu0 %vm3525_vm3, %v3518_v6 }
 0x585   : > { %17452 = vmatprep.mubr.msk.bf16.mxu0 %vm3525_vm3, %v3511_v53  ;;  %v17386_v57 = vpop.f32.mrb[16].mxu0 }
 0x586   : > { %v3288_v59 = vpop.f32.mrb[17].mxu0 }
 0x587   : > { %v17387_v62 = vpop.f32.mrb[18].mxu0 }
 0x588   : > { %v3687_v1 = vpack.c.bf16 %v17387_v62, %v17386_v57  ;;  %v3291_v2 = vpop.f32.mrb[19].mxu0 }
 0x589   : > { %v3686_v3 = vpack.c.bf16 %v3291_v2, %v3288_v59 }
 0x58c   : > { %17453 = vmatmul.mubr.msk.bf16.vlgmr.msra.gmra.mrb[72].mxu0 %vm3525_vm3, %v3512_v50 }
 0x58d   : > { %17456 = vmatprep.mubr.msk.bf16.mxu0 %vm3525_vm3, %v3513_v63  ;;  %17461 = vmatpush3.bf16.msra.mxu0 %v19884_v10  ;;  %v17390_v5 = vpop.f32.mrb[20].mxu0  ;;  %v19886_v63 = vld [vmem:[%s23445_s6 + $0x20] sm:$0xff]  }
 0x58e   : > { %v3304_v7 = vpop.f32.mrb[21].mxu0  ;;  %17470 = vmatprep.subr.bf16.mxu0 %v19885_v41 }
 0x58f   : > { %v17391_v9 = vpop.f32.mrb[22].mxu0 }
 0x590   : > { %v3689_v37 = vpack.c.bf16 %v17391_v9, %v17390_v5  ;;  %v3307_v46 = vpop.f32.mrb[23].mxu0 }
 0x591   : > { %v3688_v53 = vpack.c.bf16 %v3307_v46, %v3304_v7 }
 0x594   : > { %17457 = vmatmul.mubr.msk.bf16.gmra.mrb[76].mxu0 %vm3525_vm3, %v3514_v60 }
 0x595   : > { %17462 = vmatprep.mubr.msk.bf16.mxu0 %vm3525_vm3, %v3686_v3  ;;  %v17394_v48 = vpop.f32.mrb[24].mxu0 }
 0x596   : > { %v3320_v6 = vpop.f32.mrb[25].mxu0 }
 0x597   : > { %v17395_v51 = vpop.f32.mrb[26].mxu0 }
 0x598   : > { %v3782_v55 = vpack.c.bf16 %v17395_v51, %v17394_v48  ;;  %v3323_v50 = vpop.f32.mrb[27].mxu0 }
 0x599   : > { %v3781_v57 = vpack.c.bf16 %v3323_v50, %v3320_v6 }
 0x59c   : > { %17463 = vmatmul.mubr.msk.bf16.vlgmr.msra.gmra.mrb[72].mxu0 %vm3525_vm3, %v3687_v1 }
 0x59d   : > { %17466 = vmatprep.mubr.msk.bf16.mxu0 %vm3525_vm3, %v3688_v53  ;;  %17471 = vmatpush3.bf16.msra.mxu0 %v19885_v41  ;;  %v17398_v10 = vpop.f32.mrb[28].mxu0  ;;  %v19887_v53 = vld [vmem:[%s23445_s6 + $0x28] sm:$0xff]  }
 0x59e   : > { %v3336_v59 = vpop.f32.mrb[29].mxu0  ;;  %17480 = vmatprep.subr.bf16.mxu0 %v19886_v63 }
 0x59f   : > { %v17399_v62 = vpop.f32.mrb[30].mxu0 }
 0x5a0   : > { %v3784_v60 = vpack.c.bf16 %v17399_v62, %v17398_v10  ;;  %v3339_v2 = vpop.f32.mrb[31].mxu0 }
 0x5a1   : > { %v3783_v3 = vpack.c.bf16 %v3339_v2, %v3336_v59 }
 0x5a4   : > { %17467 = vmatmul.mubr.msk.bf16.gmra.mrb[76].mxu0 %vm3525_vm3, %v3689_v37 }
 0x5a5   : > { %17472 = vmatprep.mubr.msk.bf16.mxu0 %vm3525_vm3, %v3781_v57  ;;  %v17402_v5 = vpop.f32.mrb[32].mxu0 }
 0x5a6   : > { %v3352_v7 = vpop.f32.mrb[33].mxu0 }
 0x5a7   : > { %v17403_v9 = vpop.f32.mrb[34].mxu0 }
 0x5a8   : > { %v3877_v46 = vpack.c.bf16 %v17403_v9, %v17402_v5  ;;  %v3355_v1 = vpop.f32.mrb[35].mxu0 }
 0x5a9   : > { %v3876_v48 = vpack.c.bf16 %v3355_v1, %v3352_v7 }
 0x5ac   : > { %17473 = vmatmul.mubr.msk.bf16.vlgmr.msra.gmra.mrb[72].mxu0 %vm3525_vm3, %v3782_v55 }
 0x5ad   : > { %17476 = vmatprep.mubr.msk.bf16.mxu0 %vm3525_vm3, %v3783_v3  ;;  %17481 = vmatpush3.bf16.msra.mxu0 %v19886_v63  ;;  %v17406_v41 = vpop.f32.mrb[36].mxu0  ;;  %v19888_v3 = vld [vmem:[%s23445_s6 + $0x30] sm:$0xff]  }
 0x5ae   : > { %v3368_v6 = vpop.f32.mrb[37].mxu0  ;;  %17490 = vmatprep.subr.bf16.mxu0 %v19887_v53 }
 0x5af   : > { %v17407_v51 = vpop.f32.mrb[38].mxu0 }
 0x5b0   : > { %v3879_v37 = vpack.c.bf16 %v17407_v51, %v17406_v41  ;;  %v3371_v50 = vpop.f32.mrb[39].mxu0 }
 0x5b1   : > { %v3878_v57 = vpack.c.bf16 %v3371_v50, %v3368_v6 }
 0x5b4   : > { %17477 = vmatmul.mubr.msk.bf16.gmra.mrb[76].mxu0 %vm3525_vm3, %v3784_v60 }
 0x5b5   : > { %17482 = vmatprep.mubr.msk.bf16.mxu0 %vm3525_vm3, %v3876_v48  ;;  %v17410_v10 = vpop.f32.mrb[40].mxu0 }
 0x5b6   : > { %v3384_v59 = vpop.f32.mrb[41].mxu0 }
 0x5b7   : > { %v17411_v62 = vpop.f32.mrb[42].mxu0 }
 0x5b8   : > { %v3972_v2 = vpack.c.bf16 %v17411_v62, %v17410_v10  ;;  %v3387_v55 = vpop.f32.mrb[43].mxu0 }
 0x5b9   : > { %v3971_v5 = vpack.c.bf16 %v3387_v55, %v3384_v59 }
 0x5bc   : > { %17483 = vmatmul.mubr.msk.bf16.vlgmr.msra.gmra.mrb[72].mxu0 %vm3525_vm3, %v3877_v46 }
 0x5bd   : > { %17486 = vmatprep.mubr.msk.bf16.mxu0 %vm3525_vm3, %v3878_v57  ;;  %17491 = vmatpush3.bf16.msra.mxu0 %v19887_v53  ;;  %v17414_v63 = vpop.f32.mrb[44].mxu0  ;;  %v19889_v57 = vld [vmem:[%s23445_s6 + $0x38] sm:$0xff]  }
 0x5be   : > { %v3400_v7 = vpop.f32.mrb[45].mxu0  ;;  %17500 = vmatprep.subr.bf16.mxu0 %v19888_v3 }
 0x5bf   : > { %v17415_v9 = vpop.f32.mrb[46].mxu0 }
 0x5c0   : > { %v3974_v60 = vpack.c.bf16 %v17415_v9, %v17414_v63  ;;  %v3403_v1 = vpop.f32.mrb[47].mxu0 }
 0x5c1   : > { %v3973_v48 = vpack.c.bf16 %v3403_v1, %v3400_v7 }
 0x5c4   : > { %17487 = vmatmul.mubr.msk.bf16.gmra.mrb[76].mxu0 %vm3525_vm3, %v3879_v37 }
 0x5c5   : > { %17492 = vmatprep.mubr.msk.bf16.mxu0 %vm3525_vm3, %v3971_v5  ;;  %v17418_v41 = vpop.f32.mrb[48].mxu0 }
 0x5c6   : > { %v3416_v6 = vpop.f32.mrb[49].mxu0 }
 0x5c7   : > { %v17419_v51 = vpop.f32.mrb[50].mxu0 }
 0x5c8   : > { %v4067_v50 = vpack.c.bf16 %v17419_v51, %v17418_v41  ;;  %v3419_v46 = vpop.f32.mrb[51].mxu0 }
 0x5c9   : > { %v4066_v10 = vpack.c.bf16 %v3419_v46, %v3416_v6 }
 0x5cc   : > { %17493 = vmatmul.mubr.msk.bf16.vlgmr.msra.gmra.mrb[72].mxu0 %vm3525_vm3, %v3972_v2 }
 0x5cd   : > { %17496 = vmatprep.mubr.msk.bf16.mxu0 %vm3525_vm3, %v3973_v48  ;;  %17501 = vmatpush3.bf16.msra.mxu0 %v19888_v3  ;;  %v17422_v53 = vpop.f32.mrb[52].mxu0  ;;  %v19890_v48 = vld [vmem:[%s23445_s6 + $0x40] sm:$0xff]  }
 0x5ce   : > { %v3432_v59 = vpop.f32.mrb[53].mxu0  ;;  %17510 = vmatprep.subr.bf16.mxu0 %v19889_v57 }
 0x5cf   : > { %v17423_v62 = vpop.f32.mrb[54].mxu0 }
 0x5d0   : > { %v4069_v37 = vpack.c.bf16 %v17423_v62, %v17422_v53  ;;  %v3435_v55 = vpop.f32.mrb[55].mxu0 }
 0x5d1   : > { %v4068_v5 = vpack.c.bf16 %v3435_v55, %v3432_v59 }
 0x5d4   : > { %17497 = vmatmul.mubr.msk.bf16.gmra.mrb[76].mxu0 %vm3525_vm3, %v3974_v60 }
 0x5d5   : > { %17502 = vmatprep.mubr.msk.bf16.mxu0 %vm3525_vm3, %v4066_v10  ;;  %v17426_v63 = vpop.f32.mrb[56].mxu0 }
 0x5d6   : > { %v3448_v7 = vpop.f32.mrb[57].mxu0 }
 0x5d7   : > { %v17427_v9 = vpop.f32.mrb[58].mxu0 }
 0x5d8   : > { %v4162_v1 = vpack.c.bf16 %v17427_v9, %v17426_v63  ;;  %v3451_v2 = vpop.f32.mrb[59].mxu0 }
 0x5d9   : > { %v4161_v41 = vpack.c.bf16 %v3451_v2, %v3448_v7 }
 0x5dc   : > { %17503 = vmatmul.mubr.msk.bf16.vlgmr.msra.gmra.mrb[72].mxu0 %vm3525_vm3, %v4067_v50 }
 0x5dd   : > { %17506 = vmatprep.mubr.msk.bf16.mxu0 %vm3525_vm3, %v4068_v5  ;;  %17511 = vmatpush3.bf16.msra.mxu0 %v19889_v57  ;;  %v17430_v3 = vpop.f32.mrb[60].mxu0 }
 0x5de   : > { %v3464_v6 = vpop.f32.mrb[61].mxu0  ;;  %17520 = vmatprep.subr.bf16.mxu0 %v19890_v48 }
 0x5df   : > { %v17431_v51 = vpop.f32.mrb[62].mxu0 }
 0x5e0   : > { %v4164_v46 = vpack.c.bf16 %v17431_v51, %v17430_v3  ;;  %v3467_v60 = vpop.f32.mrb[63].mxu0 }
 0x5e1   : > { %v4163_v53 = vpack.c.bf16 %v3467_v60, %v3464_v6 }
 0x5e4   : > { %17507 = vmatmul.mubr.msk.bf16.gmra.mrb[76].mxu0 %vm3525_vm3, %v4069_v37 }
 0x5e5   : > { %17512 = vmatprep.mubr.msk.bf16.mxu0 %vm3525_vm3, %v4161_v41  ;;  %v17434_v10 = vpop.f32.mrb[64].mxu0 }
 0x5e6   : > { %v3480_v59 = vpop.f32.mrb[65].mxu0 }
 0x5e7   : > { %v17435_v62 = vpop.f32.mrb[66].mxu0 }
 0x5e8   : > { %v4257_v55 = vpack.c.bf16 %v17435_v62, %v17434_v10  ;;  %v3483_v63 = vpop.f32.mrb[67].mxu0 }
 0x5e9   : > { %v4256_v50 = vpack.c.bf16 %v3483_v63, %v3480_v59 }
 0x5ec   : > { %17513 = vmatmul.mubr.msk.bf16.vlgmr.msra.gmra.mrb[72].mxu0 %vm3525_vm3, %v4162_v1  ;;  %v15836_v1 = vld [vmem:[%s23473_s8] ss:$0 sm:$0xff]  ;;  %s23486_s8 = sld [smem:[#allocation45_spill]] }
 0x5ed   : > { %17516 = vmatprep.mubr.msk.bf16.mxu0 %vm3525_vm3, %v4163_v53  ;;  %17521 = vmatpush3.bf16.msra.mxu0 %v19890_v48  ;;  %v17438_v57 = vpop.f32.mrb[68].mxu0 }
 0x5ee   : > { %v3496_v5 = vpop.f32.mrb[69].mxu0 }
 0x5ef   : > { %v17439_v7 = vpop.f32.mrb[70].mxu0 }
 0x5f0   : > { %v4259_v9 = vpack.c.bf16 %v17439_v7, %v17438_v57  ;;  %v3499_v2 = vpop.f32.mrb[71].mxu0 }
 0x5f1   : > { %v4258_v37 = vpack.c.bf16 %v3499_v2, %v3496_v5 }
 0x5f4   : > { %17517 = vmatmul.mubr.msk.bf16.gmra.mrb[76].mxu0 %vm3525_vm3, %v4164_v46 }
 0x5f5   : > { %17522 = vmatprep.mubr.msk.bf16.mxu0 %vm3525_vm3, %v4256_v50 }
 0x5fc   : > { %17523 = vmatmul.mubr.msk.bf16.vlgmr.msra.gmra.mrb[72].mxu0 %vm3525_vm3, %v4257_v55 }
 0x5fd   : > { %17526 = vmatprep.mubr.msk.bf16.mxu0 %vm3525_vm3, %v4258_v37 }
 0x604   : > { %17527 = vmatmul.mubr.msk.bf16.gmra.mrb[76].mxu0 %vm3525_vm3, %v4259_v9 }
 0x605   : > { %17538 = vmatprep.mubr.msk.bf16.mxu0 %vm3081_vm2, %v21357_v36 }
 0x6cf   : > { %v17524_v41 = vpop.f32.mrb[72].mxu0 }
 0x6d0   : > { %v4360_v48 = vadd.f32 %v17524_v41, %v15836_v1  ;;  %v4312_v3 = vpop.f32.mrb[73].mxu0 }
 0x6d1   : > { %v4358_v6 = vadd.f32 %v15836_v1, %v4312_v3  ;;  %v17525_v51 = vpop.f32.mrb[74].mxu0 }
 0x6d2   : > { %v4361_v60 = vadd.f32 %v17525_v51, %v15836_v1  ;;  %v4315_v53 = vpop.f32.mrb[75].mxu0  ;;  %v4368_v10 = vmax.f32 %v4360_v48, 0.0 }
 0x6d3   : > { %v4359_v46 = vadd.f32 %v15836_v1, %v4315_v53  ;;  %v4366_v62 = vmax.f32 %v4358_v6, 0.0 }
 0x6d4   : > { %v4369_v59 = vmax.f32 %v4361_v60, 0.0 }
 0x6d5   : > { %v4367_v55 = vmax.f32 %v4359_v46, 0.0 }
 0x6d6   : > { %v4393_v63 = vpack.c.bf16 %v4369_v59, %v4368_v10 }
 0x6d7   : > { %v4392_v50 = vpack.c.bf16 %v4367_v55, %v4366_v62  ;;  %v17528_v57 = vpop.f32.mrb[76].mxu0 }
 0x6d8   : > { %v4364_v5 = vadd.f32 %v17528_v57, %v15836_v1  ;;  %v4328_v7 = vpop.f32.mrb[77].mxu0 }
 0x6d9   : > { %v4362_v9 = vadd.f32 %v15836_v1, %v4328_v7  ;;  %v17529_v2 = vpop.f32.mrb[78].mxu0  ;;  %17530 = vmatprep.subr.bf16.mxu0 %v4392_v50  ;;  %19192 = vmatprep.subr.bf16.mxu1 %v4392_v50 }
 0x6da   : > { %v4365_v37 = vadd.f32 %v17529_v2, %v15836_v1  ;;  %v4331_v41 = vpop.f32.mrb[79].mxu0  ;;  %17531 = vmatpush3.bf16.msra.mxu0 %v4392_v50  ;;  %19196 = vmatpush3.bf16.msra.mxu1 %v4392_v50  ;;  %v4372_v48 = vmax.f32 %v4364_v5, 0.0 }
 0x6db   : > { %v4363_v3 = vadd.f32 %v15836_v1, %v4331_v41  ;;  %17532 = vmatprep.subr.bf16.mxu0 %v4393_v63  ;;  %19193 = vmatprep.subr.bf16.mxu1 %v4393_v63  ;;  %v4370_v6 = vmax.f32 %v4362_v9, 0.0  ;;  %v19893_v9 = vld [vmem:[%s23474_s7 + $0x10] sm:$0xff]  }
 0x6dc   : > { %v4373_v51 = vmax.f32 %v4365_v37, 0.0 }
 0x6dd   : > { %v4371_v60 = vmax.f32 %v4363_v3, 0.0 }
 0x6de   : > { %v4395_v53 = vpack.c.bf16 %v4373_v51, %v4372_v48  ;;  %17533 = vmatpush3.bf16.msra.mxu0 %v4393_v63  ;;  %19197 = vmatpush3.bf16.msra.mxu1 %v4393_v63 }
 0x6df   : > { %v4394_v46 = vpack.c.bf16 %v4371_v60, %v4370_v6 }
 0x6e1   : > { %17534 = vmatprep.subr.bf16.mxu0 %v4394_v46  ;;  %19194 = vmatprep.subr.bf16.mxu1 %v4394_v46 }
 0x6e2   : > { %17535 = vmatpush3.bf16.msra.mxu0 %v4394_v46  ;;  %19198 = vmatpush3.bf16.msra.mxu1 %v4394_v46 }
 0x6e3   : > { %17536 = vmatprep.subr.bf16.mxu0 %v4395_v53  ;;  %19195 = vmatprep.subr.bf16.mxu1 %v4395_v53 }
 0x6e6   : > { %17537 = vmatpush3.bf16.msra.mxu0 %v4395_v53  ;;  %19199 = vmatpush3.bf16.msra.mxu1 %v4395_v53 }
 0x6e9   : > { %17539 = vmatmul.mubr.msk.bf16.vlgmr.msra.gmra.mrb[80].mxu0 %vm3081_vm2, %v21391_v11  ;;  %17551 = vmatmul.mubr.msk.bf16.vlgmr.msra.gmra.mrb[176].mxu1 %vm3081_vm2, %v21418_v16  ;;  %v19891_v11 = vld [vmem:[%s23474_s7 + $0x8] sm:$0xff]  }
 0x6ea   : > { %17542 = vmatprep.mubr.msk.bf16.mxu0 %vm3081_vm2, %v21394_v12  ;;  %17554 = vmatprep.mubr.msk.bf16.mxu1 %vm3081_vm2, %v21421_v17  ;;  %v19892_v12 = vld [vmem:[%s23474_s7] sm:$0xff]  }
 0x6eb   : > { %17610 = vmatprep.subr.bf16.mxu0 %v19891_v11 }
 0x6ec   : > { %17611 = vmatpush3.bf16.msra.mxu0 %v19891_v11 }
 0x6ed   : > { %17620 = vmatprep.subr.bf16.mxu0 %v19892_v12 }
 0x6f1   : > { %17543 = vmatmul.mubr.msk.bf16.gmra.mrb[84].mxu0 %vm3081_vm2, %v21401_v13  ;;  %17555 = vmatmul.mubr.msk.bf16.gmra.mrb[180].mxu1 %vm3081_vm2, %v21428_v18 }
 0x6f2   : > { %17546 = vmatprep.mubr.msk.bf16.mxu0 %vm3081_vm2, %v21404_v14  ;;  %17558 = vmatprep.mubr.msk.bf16.mxu1 %vm3081_vm2, %v21431_v19 }
 0x6f9   : > { %17547 = vmatmul.mubr.msk.bf16.gmra.mrb[88].mxu0 %vm3081_vm2, %v21411_v15  ;;  %17559 = vmatmul.mubr.msk.bf16.gmra.mrb[184].mxu1 %vm3081_vm2, %v21438_v52 }
 0x6fa   : > { %17562 = vmatprep.mubr.msk.bf16.mxu1 %vm3081_vm2, %v21441_v20 }
 0x701   : > { %17563 = vmatmul.mubr.msk.bf16.gmra.mrb[188].mxu1 %vm3081_vm2, %v21448_v21 }
 0x702   : > { %17566 = vmatprep.mubr.msk.bf16.mxu1 %vm3081_vm2, %v21451_v22 }
 0x709   : > { %17567 = vmatmul.mubr.msk.bf16.gmra.mrb[192].mxu1 %vm3081_vm2, %v21458_v23 }
 0x70a   : > { %17570 = vmatprep.mubr.msk.bf16.mxu1 %vm3081_vm2, %v21461_v24 }
 0x711   : > { %17571 = vmatmul.mubr.msk.bf16.gmra.mrb[196].mxu1 %vm3081_vm2, %v21468_v25 }
 0x712   : > { %17574 = vmatprep.mubr.msk.bf16.mxu1 %vm3081_vm2, %v21471_v26 }
 0x719   : > { %17575 = vmatmul.mubr.msk.bf16.gmra.mrb[200].mxu1 %vm3081_vm2, %v21478_v27 }
 0x71a   : > { %17578 = vmatprep.mubr.msk.bf16.mxu1 %vm3081_vm2, %v21481_v28 }
 0x721   : > { %17579 = vmatmul.mubr.msk.bf16.gmra.mrb[204].mxu1 %vm3081_vm2, %v21488_v29 }
 0x722   : > { %17582 = vmatprep.mubr.msk.bf16.mxu1 %vm3081_vm2, %v21491_v30 }
 0x729   : > { %17583 = vmatmul.mubr.msk.bf16.gmra.mrb[208].mxu1 %vm3081_vm2, %v21498_v31 }
 0x72a   : > { %17586 = vmatprep.mubr.msk.bf16.mxu1 %vm3081_vm2, %v21501_v32 }
 0x731   : > { %17587 = vmatmul.mubr.msk.bf16.gmra.mrb[212].mxu1 %vm3081_vm2, %v21508_v33 }
 0x732   : > { %17590 = vmatprep.mubr.msk.bf16.mxu1 %vm3081_vm2, %v21511_v34 }
 0x739   : > { %17591 = vmatmul.mubr.msk.bf16.gmra.mrb[216].mxu1 %vm3081_vm2, %v21518_v35 }
 0x73a   : > { %17594 = vmatprep.mubr.msk.bf16.mxu1 %vm3081_vm2, %v21522_v38 }
 0x741   : > { %17595 = vmatmul.mubr.msk.bf16.gmra.mrb[220].mxu1 %vm3081_vm2, %v21529_v39 }
 0x742   : > { %17598 = vmatprep.mubr.msk.bf16.mxu1 %vm3081_vm2, %v21532_v40 }
 0x749   : > { %17599 = vmatmul.mubr.msk.bf16.gmra.mrb[224].mxu1 %vm3081_vm2, %v21540_v42 }
 0x74a   : > { %17602 = vmatprep.mubr.msk.bf16.mxu1 %vm3081_vm2, %v21543_v43 }
 0x751   : > { %17603 = vmatmul.mubr.msk.bf16.gmra.mrb[228].mxu1 %vm3081_vm2, %v21550_v44 }
 0x752   : > { %17606 = vmatprep.mubr.msk.bf16.mxu1 %vm3081_vm2, %v21553_v56 }
 0x759   : > { %17607 = vmatmul.mubr.msk.bf16.gmra.mrb[232].mxu1 %vm3081_vm2, %v21560_v45 }
 0x75a   : > { %17708 = vmatprep.mubr.msk.bf16.mxu1 %vm3081_vm2, %v21357_v36 }
 0x7bc   : > { %v17540_v13 = vpop.f32.mrb[80].mxu0  ;;  %v17552_v14 = vpop.f32.mrb[176].mxu1 }
 0x7bd   : > { %v4430_v15 = vpop.f32.mrb[81].mxu0  ;;  %v4478_v16 = vpop.f32.mrb[177].mxu1 }
 0x7be   : > { %v17541_v17 = vpop.f32.mrb[82].mxu0  ;;  %v17553_v18 = vpop.f32.mrb[178].mxu1 }
 0x7bf   : > { %v4718_v19 = vpack.c.bf16 %v17541_v17, %v17540_v13  ;;  %v4433_v52 = vpop.f32.mrb[83].mxu0  ;;  %v4724_v20 = vpack.c.bf16 %v17553_v18, %v17552_v14  ;;  %v4481_v21 = vpop.f32.mrb[179].mxu1  ;;  %v19894_v14 = vld [vmem:[%s23474_s7 + $0x18] sm:$0xff]  }
 0x7c0   : > { %v4717_v22 = vpack.c.bf16 %v4433_v52, %v4430_v15  ;;  %v4723_v23 = vpack.c.bf16 %v4481_v21, %v4478_v16 }
 0x7c4   : > { %v17544_v24 = vpop.f32.mrb[84].mxu0  ;;  %v21682_v25 = vpop.f32.mrb[180].mxu1 }
 0x7c5   : > { %v4446_v26 = vpop.f32.mrb[85].mxu0  ;;  %v4494_v27 = vpop.f32.mrb[181].mxu1 }
 0x7c6   : > { %v17545_v36 = vpop.f32.mrb[86].mxu0  ;;  %v17557_v28 = vpop.f32.mrb[182].mxu1 }
 0x7c7   : > { %v4720_v29 = vpack.c.bf16 %v17545_v36, %v17544_v24  ;;  %v4449_v30 = vpop.f32.mrb[87].mxu0  ;;  %v4892_v31 = vpack.c.bf16 %v17557_v28, %v21682_v25  ;;  %v4497_v32 = vpop.f32.mrb[183].mxu1  ;;  %v19895_v25 = vld [vmem:[%s23474_s7 + $0x20] sm:$0xff]  }
 0x7c8   : > { %v4719_v33 = vpack.c.bf16 %v4449_v30, %v4446_v26  ;;  %v4891_v34 = vpack.c.bf16 %v4497_v32, %v4494_v27 }
 0x7cc   : > { %v17548_v35 = vpop.f32.mrb[88].mxu0  ;;  %v17560_v38 = vpop.f32.mrb[184].mxu1 }
 0x7cd   : > { %v4462_v1 = vpop.f32.mrb[89].mxu0  ;;  %v4510_v10 = vpop.f32.mrb[185].mxu1 }
 0x7ce   : > { %v17549_v59 = vpop.f32.mrb[90].mxu0  ;;  %v17561_v62 = vpop.f32.mrb[186].mxu1 }
 0x7cf   : > { %v4722_v55 = vpack.c.bf16 %v17549_v59, %v17548_v35  ;;  %v4465_v63 = vpop.f32.mrb[91].mxu0  ;;  %v4894_v50 = vpack.c.bf16 %v17561_v62, %v17560_v38  ;;  %v4513_v57 = vpop.f32.mrb[187].mxu1 }
 0x7d0   : > { %v4721_v5 = vpack.c.bf16 %v4465_v63, %v4462_v1  ;;  %v4893_v7 = vpack.c.bf16 %v4513_v57, %v4510_v10  ;;  %v19896_v1 = vld [vmem:[%s23474_s7 + $0x28] sm:$0xff]  }
 0x7d2   : > { %17612 = vmatprep.mubr.msk.bf16.mxu0 %vm3525_vm3, %v4721_v5 }
 0x7d3   : > { %17613 = vmatmul.mubr.msk.bf16.vlgmr.msra.gmra.mrb[92].mxu0 %vm3525_vm3, %v4722_v55 }
 0x7d4   : > { %17616 = vmatprep.mubr.msk.bf16.mxu0 %vm3525_vm3, %v4723_v23  ;;  %17621 = vmatpush3.bf16.msra.mxu0 %v19892_v12  ;;  %v17564_v2 = vpop.f32.mrb[188].mxu1 }
 0x7d5   : > { %17630 = vmatprep.subr.bf16.mxu0 %v19893_v9  ;;  %v4526_v37 = vpop.f32.mrb[189].mxu1 }
 0x7d6   : > { %v17565_v41 = vpop.f32.mrb[190].mxu1 }
 0x7d7   : > { %v4987_v3 = vpack.c.bf16 %v17565_v41, %v17564_v2  ;;  %v4529_v48 = vpop.f32.mrb[191].mxu1  ;;  %v19897_v41 = vld [vmem:[%s23474_s7 + $0x30] sm:$0xff]  }
 0x7d8   : > { %v4986_v51 = vpack.c.bf16 %v4529_v48, %v4526_v37 }
 0x7db   : > { %17617 = vmatmul.mubr.msk.bf16.gmra.mrb[96].mxu0 %vm3525_vm3, %v4724_v20 }
 0x7dc   : > { %17622 = vmatprep.mubr.msk.bf16.mxu0 %vm3525_vm3, %v4717_v22  ;;  %v17568_v6 = vpop.f32.mrb[192].mxu1 }
 0x7dd   : > { %v4542_v60 = vpop.f32.mrb[193].mxu1 }
 0x7de   : > { %v17569_v53 = vpop.f32.mrb[194].mxu1 }
 0x7df   : > { %v4989_v46 = vpack.c.bf16 %v17569_v53, %v17568_v6  ;;  %v4545_v11 = vpop.f32.mrb[195].mxu1 }
 0x7e0   : > { %v4988_v13 = vpack.c.bf16 %v4545_v11, %v4542_v60 }
 0x7e3   : > { %17623 = vmatmul.mubr.msk.bf16.vlgmr.msra.gmra.mrb[92].mxu0 %vm3525_vm3, %v4718_v19 }
 0x7e4   : > { %17626 = vmatprep.mubr.msk.bf16.mxu0 %vm3525_vm3, %v4719_v33  ;;  %17631 = vmatpush3.bf16.msra.mxu0 %v19893_v9  ;;  %v17572_v12 = vpop.f32.mrb[196].mxu1 }
 0x7e5   : > { %17640 = vmatprep.subr.bf16.mxu0 %v19894_v14  ;;  %v4558_v15 = vpop.f32.mrb[197].mxu1 }
 0x7e6   : > { %v17573_v16 = vpop.f32.mrb[198].mxu1 }
 0x7e7   : > { %v5082_v17 = vpack.c.bf16 %v17573_v16, %v17572_v12  ;;  %v4561_v18 = vpop.f32.mrb[199].mxu1  ;;  %v19898_v16 = vld [vmem:[%s23474_s7 + $0x38] sm:$0xff]  }
 0x7e8   : > { %v5081_v52 = vpack.c.bf16 %v4561_v18, %v4558_v15 }
 0x7eb   : > { %17627 = vmatmul.mubr.msk.bf16.gmra.mrb[96].mxu0 %vm3525_vm3, %v4720_v29 }
 0x7ec   : > { %17632 = vmatprep.mubr.msk.bf16.mxu0 %vm3525_vm3, %v4891_v34  ;;  %v17576_v20 = vpop.f32.mrb[200].mxu1 }
 0x7ed   : > { %v4574_v21 = vpop.f32.mrb[201].mxu1 }
 0x7ee   : > { %v17577_v22 = vpop.f32.mrb[202].mxu1 }
 0x7ef   : > { %v5084_v23 = vpack.c.bf16 %v17577_v22, %v17576_v20  ;;  %v4577_v19 = vpop.f32.mrb[203].mxu1 }
 0x7f0   : > { %v5083_v24 = vpack.c.bf16 %v4577_v19, %v4574_v21 }
 0x7f3   : > { %17633 = vmatmul.mubr.msk.bf16.vlgmr.msra.gmra.mrb[92].mxu0 %vm3525_vm3, %v4892_v31 }
 0x7f4   : > { %17636 = vmatprep.mubr.msk.bf16.mxu0 %vm3525_vm3, %v4893_v7  ;;  %17641 = vmatpush3.bf16.msra.mxu0 %v19894_v14  ;;  %v17580_v26 = vpop.f32.mrb[204].mxu1 }
 0x7f5   : > { %17650 = vmatprep.subr.bf16.mxu0 %v19895_v25  ;;  %v4590_v27 = vpop.f32.mrb[205].mxu1 }
 0x7f6   : > { %v17581_v36 = vpop.f32.mrb[206].mxu1 }
 0x7f7   : > { %v5177_v28 = vpack.c.bf16 %v17581_v36, %v17580_v26  ;;  %v4593_v29 = vpop.f32.mrb[207].mxu1  ;;  %v19899_v36 = vld [vmem:[%s23474_s7 + $0x40] sm:$0xff]  }
 0x7f8   : > { %v5176_v30 = vpack.c.bf16 %v4593_v29, %v4590_v27 }
 0x7fb   : > { %17637 = vmatmul.mubr.msk.bf16.gmra.mrb[96].mxu0 %vm3525_vm3, %v4894_v50 }
 0x7fc   : > { %17642 = vmatprep.mubr.msk.bf16.mxu0 %vm3525_vm3, %v4986_v51  ;;  %v17584_v32 = vpop.f32.mrb[208].mxu1 }
 0x7fd   : > { %v4606_v33 = vpop.f32.mrb[209].mxu1 }
 0x7fe   : > { %v17585_v34 = vpop.f32.mrb[210].mxu1 }
 0x7ff   : > { %v5179_v35 = vpack.c.bf16 %v17585_v34, %v17584_v32  ;;  %v4609_v31 = vpop.f32.mrb[211].mxu1 }
 0x800   : > { %v5178_v38 = vpack.c.bf16 %v4609_v31, %v4606_v33 }
 0x803   : > { %17643 = vmatmul.mubr.msk.bf16.vlgmr.msra.gmra.mrb[92].mxu0 %vm3525_vm3, %v4987_v3 }
 0x804   : > { %17646 = vmatprep.mubr.msk.bf16.mxu0 %vm3525_vm3, %v4988_v13  ;;  %17651 = vmatpush3.bf16.msra.mxu0 %v19895_v25  ;;  %v17588_v10 = vpop.f32.mrb[212].mxu1 }
 0x805   : > { %17660 = vmatprep.subr.bf16.mxu0 %v19896_v1  ;;  %v4622_v59 = vpop.f32.mrb[213].mxu1 }
 0x806   : > { %v17589_v62 = vpop.f32.mrb[214].mxu1 }
 0x807   : > { %v5272_v55 = vpack.c.bf16 %v17589_v62, %v17588_v10  ;;  %v4625_v63 = vpop.f32.mrb[215].mxu1 }
 0x808   : > { %v5271_v50 = vpack.c.bf16 %v4625_v63, %v4622_v59 }
 0x80b   : > { %17647 = vmatmul.mubr.msk.bf16.gmra.mrb[96].mxu0 %vm3525_vm3, %v4989_v46 }
 0x80c   : > { %17652 = vmatprep.mubr.msk.bf16.mxu0 %vm3525_vm3, %v5081_v52  ;;  %v17592_v57 = vpop.f32.mrb[216].mxu1 }
 0x80d   : > { %v4638_v5 = vpop.f32.mrb[217].mxu1 }
 0x80e   : > { %v17593_v7 = vpop.f32.mrb[218].mxu1 }
 0x80f   : > { %v5274_v9 = vpack.c.bf16 %v17593_v7, %v17592_v57  ;;  %v4641_v2 = vpop.f32.mrb[219].mxu1 }
 0x810   : > { %v5273_v37 = vpack.c.bf16 %v4641_v2, %v4638_v5 }
 0x813   : > { %17653 = vmatmul.mubr.msk.bf16.vlgmr.msra.gmra.mrb[92].mxu0 %vm3525_vm3, %v5082_v17 }
 0x814   : > { %17656 = vmatprep.mubr.msk.bf16.mxu0 %vm3525_vm3, %v5083_v24  ;;  %17661 = vmatpush3.bf16.msra.mxu0 %v19896_v1  ;;  %v17596_v3 = vpop.f32.mrb[220].mxu1 }
 0x815   : > { %17670 = vmatprep.subr.bf16.mxu0 %v19897_v41  ;;  %v4654_v48 = vpop.f32.mrb[221].mxu1 }
 0x816   : > { %v17597_v51 = vpop.f32.mrb[222].mxu1 }
 0x817   : > { %v5367_v6 = vpack.c.bf16 %v17597_v51, %v17596_v3  ;;  %v4657_v60 = vpop.f32.mrb[223].mxu1 }
 0x818   : > { %v5366_v53 = vpack.c.bf16 %v4657_v60, %v4654_v48 }
 0x81b   : > { %17657 = vmatmul.mubr.msk.bf16.gmra.mrb[96].mxu0 %vm3525_vm3, %v5084_v23 }
 0x81c   : > { %17662 = vmatprep.mubr.msk.bf16.mxu0 %vm3525_vm3, %v5176_v30  ;;  %v17600_v46 = vpop.f32.mrb[224].mxu1 }
 0x81d   : > { %v4670_v11 = vpop.f32.mrb[225].mxu1 }
 0x81e   : > { %v17601_v13 = vpop.f32.mrb[226].mxu1 }
 0x81f   : > { %v5369_v14 = vpack.c.bf16 %v17601_v13, %v17600_v46  ;;  %v4673_v12 = vpop.f32.mrb[227].mxu1  ;;  %v21778_v46 = vld [vmem:[%s20705_s21 + $0x8] sm:$0xff]   ;;  %v21788_v13 = vld [vmem:[%s20705_s21 + $0x18] sm:$0xff]  }
 0x820   : > { %v5368_v15 = vpack.c.bf16 %v4673_v12, %v4670_v11  ;;  %v21783_v11 = vld [vmem:[%s20705_s21 + $0x10] sm:$0xff]   ;;  %v21798_v12 = vld [vmem:[%s20705_s21 + $0x28] sm:$0xff]  }
 0x823   : > { %17663 = vmatmul.mubr.msk.bf16.vlgmr.msra.gmra.mrb[92].mxu0 %vm3525_vm3, %v5177_v28  ;;  %v15918_v28 = vld [vmem:[%s23475_s10] ss:$0 sm:$0xff]  ;;  %s23487_s10 = sld [smem:[#allocation29_spill]] }
 0x824   : > { %17666 = vmatprep.mubr.msk.bf16.mxu0 %vm3525_vm3, %v5178_v38  ;;  %17671 = vmatpush3.bf16.msra.mxu0 %v19897_v41  ;;  %v17604_v17 = vpop.f32.mrb[228].mxu1 }
 0x825   : > { %17680 = vmatprep.subr.bf16.mxu0 %v19898_v16  ;;  %v4686_v18 = vpop.f32.mrb[229].mxu1 }
 0x826   : > { %v17605_v52 = vpop.f32.mrb[230].mxu1 }
 0x827   : > { %v5462_v20 = vpack.c.bf16 %v17605_v52, %v17604_v17  ;;  %v4689_v21 = vpop.f32.mrb[231].mxu1  ;;  %v21813_v17 = vld [vmem:[%s20705_s21 + $0x40] sm:$0xff]   ;;  %v21823_v52 = vld [vmem:[%s20705_s21 + $0x50] sm:$0xff]  }
 0x828   : > { %v5461_v22 = vpack.c.bf16 %v4689_v21, %v4686_v18  ;;  %v21818_v18 = vld [vmem:[%s20705_s21 + $0x48] sm:$0xff]   ;;  %v21833_v21 = vld [vmem:[%s20705_s21 + $0x60] sm:$0xff]  }
 0x82b   : > { %17667 = vmatmul.mubr.msk.bf16.gmra.mrb[96].mxu0 %vm3525_vm3, %v5179_v35 }
 0x82c   : > { %17672 = vmatprep.mubr.msk.bf16.mxu0 %vm3525_vm3, %v5271_v50  ;;  %v17608_v23 = vpop.f32.mrb[232].mxu1 }
 0x82d   : > { %v4702_v19 = vpop.f32.mrb[233].mxu1 }
 0x82e   : > { %v17609_v24 = vpop.f32.mrb[234].mxu1 }
 0x82f   : > { %v5464_v25 = vpack.c.bf16 %v17609_v24, %v17608_v23  ;;  %v4705_v26 = vpop.f32.mrb[235].mxu1  ;;  %v21843_v23 = vld [vmem:[%s20705_s21 + $0x70] sm:$0xff]   ;;  %v21853_v24 = vld [vmem:[%s20705_s21 + $0x80] sm:$0xff]  }
 0x830   : > { %v5463_v27 = vpack.c.bf16 %v4705_v26, %v4702_v19  ;;  %v21848_v19 = vld [vmem:[%s20705_s21 + $0x78] sm:$0xff]   ;;  %v21863_v26 = vld [vmem:[%s20705_s21 + $0x90] sm:$0xff]  }
 0x833   : > { %17673 = vmatmul.mubr.msk.bf16.vlgmr.msra.gmra.mrb[92].mxu0 %vm3525_vm3, %v5272_v55 }
 0x834   : > { %17676 = vmatprep.mubr.msk.bf16.mxu0 %vm3525_vm3, %v5273_v37  ;;  %17681 = vmatpush3.bf16.msra.mxu0 %v19898_v16  ;;  %v21808_v16 = vld [vmem:[%s20705_s21 + $0x38] sm:$0xff]  }
 0x835   : > { %17690 = vmatprep.subr.bf16.mxu0 %v19899_v36 }
 0x83b   : > { %17677 = vmatmul.mubr.msk.bf16.gmra.mrb[96].mxu0 %vm3525_vm3, %v5274_v9 }
 0x83c   : > { %17682 = vmatprep.mubr.msk.bf16.mxu0 %vm3525_vm3, %v5366_v53 }
 0x843   : > { %17683 = vmatmul.mubr.msk.bf16.vlgmr.msra.gmra.mrb[92].mxu0 %vm3525_vm3, %v5367_v6 }
 0x844   : > { %17686 = vmatprep.mubr.msk.bf16.mxu0 %vm3525_vm3, %v5368_v15  ;;  %17691 = vmatpush3.bf16.msra.mxu0 %v19899_v36  ;;  %v21803_v15 = vld [vmem:[%s20705_s21 + $0x30] sm:$0xff]   ;;  %v21873_v36 = vld [vmem:[%s20705_s21 + $0xa0] sm:$0xff]  }
 0x84b   : > { %17687 = vmatmul.mubr.msk.bf16.gmra.mrb[96].mxu0 %vm3525_vm3, %v5369_v14  ;;  %v21793_v14 = vld [vmem:[%s20705_s21 + $0x20] sm:$0xff]  }
 0x84c   : > { %17692 = vmatprep.mubr.msk.bf16.mxu0 %vm3525_vm3, %v5461_v22  ;;  %v21838_v22 = vld [vmem:[%s20705_s21 + $0x68] sm:$0xff]  }
 0x853   : > { %17693 = vmatmul.mubr.msk.bf16.vlgmr.msra.gmra.mrb[92].mxu0 %vm3525_vm3, %v5462_v20  ;;  %v21828_v20 = vld [vmem:[%s20705_s21 + $0x58] sm:$0xff]  }
 0x854   : > { %17696 = vmatprep.mubr.msk.bf16.mxu0 %vm3525_vm3, %v5463_v27  ;;  %v21868_v27 = vld [vmem:[%s20705_s21 + $0x98] sm:$0xff]  }
 0x85b   : > { %17697 = vmatmul.mubr.msk.bf16.gmra.mrb[96].mxu0 %vm3525_vm3, %v5464_v25  ;;  %v21858_v25 = vld [vmem:[%s20705_s21 + $0x88] sm:$0xff]  }
 0x926   : > { %v17694_v29 = vpop.f32.mrb[92].mxu0 }
 0x927   : > { %v5517_v30 = vpop.f32.mrb[93].mxu0  ;;  %v5565_v32 = vadd.f32 %v17694_v29, %v15918_v28  ;;  %v21883_v29 = vld [vmem:[%s20705_s21 + $0xb0] sm:$0xff]  }
 0x928   : > { %v5563_v33 = vadd.f32 %v15918_v28, %v5517_v30  ;;  %v17695_v34 = vpop.f32.mrb[94].mxu0  ;;  %v21888_v30 = vld [vmem:[%s20705_s21 + $0xb8] sm:$0xff]  }
 0x929   : > { %v5566_v35 = vadd.f32 %v17695_v34, %v15918_v28  ;;  %v5520_v31 = vpop.f32.mrb[95].mxu0  ;;  %v21736_v59 = vadd.f32 %v5565_v32, %v21372_v54  ;;  %v21893_v32 = vld [vmem:[%s20705_s21 + $0xc0] sm:$0xff]   ;;  %v21903_v34 = vld [vmem:[%s20705_s21 + $0xd0] sm:$0xff]  }
 0x92a   : > { %v21730_v38 = vadd.f32 %v5563_v33, %v21366_v47  ;;  %v5564_v1 = vadd.f32 %v15918_v28, %v5520_v31  ;;  %v21898_v33 = vld [vmem:[%s20705_s21 + $0xc8] sm:$0xff]   ;;  %v21909_v31 = vld [vmem:[%s20705_s21 + $0xd8] sm:$0xff]  }
 0x92b   : > { %v21733_v10 = vadd.f32 %v5566_v35, %v21374_v58  ;;  %v5581_v58 = vmax.f32 %v21736_v59, 0.0  ;;  %v19900_v35 = vld [vmem:[%s23476_s19 + $0x8] sm:$0xff]  }
 0x92c   : > { %v21739_v62 = vadd.f32 %v5564_v1, %v21368_v49  ;;  %v5579_v63 = vmax.f32 %v21730_v38, 0.0  ;;  %17780 = vmatprep.subr.bf16.mxu0 %v19900_v35  ;;  %v21914_v1 = vld [vmem:[%s20705_s21 + $0xe0] sm:$0xff]  }
 0x92d   : > { %v5582_v57 = vmax.f32 %v21733_v10, 0.0  ;;  %17781 = vmatpush3.bf16.msra.mxu0 %v19900_v35 }
 0x92e   : > { %v17698_v55 = vpop.f32.mrb[96].mxu0  ;;  %v5580_v50 = vmax.f32 %v21739_v62, 0.0 }
 0x92f   : > { %v5533_v5 = vpop.f32.mrb[97].mxu0  ;;  %v5569_v47 = vadd.f32 %v17698_v55, %v15918_v28  ;;  %v5606_v3 = vpack.c.bf16 %v5582_v57, %v5581_v58  ;;  %v19901_v55 = vld [vmem:[%s23476_s19] sm:$0xff]  }
 0x930   : > { %v5567_v7 = vadd.f32 %v15918_v28, %v5533_v5  ;;  %v17699_v9 = vpop.f32.mrb[98].mxu0  ;;  %v5605_v54 = vpack.c.bf16 %v5580_v50, %v5579_v63  ;;  %17790 = vmatprep.subr.bf16.mxu0 %v19901_v55 }
 0x931   : > { %v5570_v49 = vadd.f32 %v17699_v9, %v15918_v28  ;;  %v5536_v2 = vpop.f32.mrb[99].mxu0  ;;  %v21760_v51 = vadd.f32 %v5569_v47, %v21384_v4 }
 0x932   : > { %v21750_v37 = vadd.f32 %v5567_v7, %v21378_v61  ;;  %v5568_v41 = vadd.f32 %v15918_v28, %v5536_v2  ;;  %17700 = vmatprep.subr.bf16.mxu1 %v5605_v54  ;;  %v21878_v28 = vld [vmem:[%s20705_s21 + $0xa8] sm:$0xff]  }
 0x933   : > { %v21757_v48 = vadd.f32 %v5570_v49, %v21386_v8  ;;  %17701 = vmatpush3.bf16.msra.mxu1 %v5605_v54  ;;  %v5585_v8 = vmax.f32 %v21760_v51, 0.0 }
 0x934   : > { %v21763_v6 = vadd.f32 %v5568_v41, %v21380_v0  ;;  %17702 = vmatprep.subr.bf16.mxu1 %v5606_v3  ;;  %v5583_v61 = vmax.f32 %v21750_v37, 0.0 }
 0x935   : > { %v23387_v53 = vmax.f32 %v21757_v48, 0.0 }
 0x936   : > { %v23386_v60 = vmax.f32 %v21763_v6, 0.0 }
 0x937   : > { %17703 = vmatpush3.bf16.msra.mxu1 %v5606_v3  ;;  %v5608_v0 = vpack.c.bf16 %v23387_v53, %v5585_v8 }
 0x938   : > { %v5607_v4 = vpack.c.bf16 %v23386_v60, %v5583_v61 }
 0x93a   : > { %17704 = vmatprep.subr.bf16.mxu1 %v5607_v4 }
 0x93b   : > { %17705 = vmatpush3.bf16.msra.mxu1 %v5607_v4 }
 0x93c   : > { %17706 = vmatprep.subr.bf16.mxu1 %v5608_v0 }
 0x93f   : > { %17707 = vmatpush3.bf16.msra.mxu1 %v5608_v0 }
 0x942   : > { %17709 = vmatmul.mubr.msk.bf16.vlgmr.msra.gmra.mrb[236].mxu1 %vm3081_vm2, %v21778_v46 }
 0x943   : > { %17712 = vmatprep.mubr.msk.bf16.mxu1 %vm3081_vm2, %v21783_v11 }
 0x94a   : > { %17713 = vmatmul.mubr.msk.bf16.gmra.mrb[240].mxu1 %vm3081_vm2, %v21788_v13 }
 0x94b   : > { %17716 = vmatprep.mubr.msk.bf16.mxu1 %vm3081_vm2, %v21793_v14 }
 0x952   : > { %17717 = vmatmul.mubr.msk.bf16.gmra.mrb[244].mxu1 %vm3081_vm2, %v21798_v12 }
 0x953   : > { %17720 = vmatprep.mubr.msk.bf16.mxu1 %vm3081_vm2, %v21803_v15 }
 0x95a   : > { %17721 = vmatmul.mubr.msk.bf16.gmra.mrb[248].mxu1 %vm3081_vm2, %v21808_v16 }
 0x95b   : > { %17724 = vmatprep.mubr.msk.bf16.mxu1 %vm3081_vm2, %v21813_v17 }
 0x962   : > { %17725 = vmatmul.mubr.msk.bf16.gmra.mrb[252].mxu1 %vm3081_vm2, %v21818_v18 }
 0x963   : > { %17728 = vmatprep.mubr.msk.bf16.mxu1 %vm3081_vm2, %v21823_v52 }
 0x96a   : > { %17729 = vmatmul.mubr.msk.bf16.gmra.mrb[0].mxu1 %vm3081_vm2, %v21828_v20 }
 0x96b   : > { %17732 = vmatprep.mubr.msk.bf16.mxu1 %vm3081_vm2, %v21833_v21 }
 0x972   : > { %17733 = vmatmul.mubr.msk.bf16.gmra.mrb[4].mxu1 %vm3081_vm2, %v21838_v22 }
 0x973   : > { %17736 = vmatprep.mubr.msk.bf16.mxu1 %vm3081_vm2, %v21843_v23 }
 0x97a   : > { %17737 = vmatmul.mubr.msk.bf16.gmra.mrb[8].mxu1 %vm3081_vm2, %v21848_v19 }
 0x97b   : > { %17740 = vmatprep.mubr.msk.bf16.mxu1 %vm3081_vm2, %v21853_v24 }
 0x982   : > { %17741 = vmatmul.mubr.msk.bf16.gmra.mrb[12].mxu1 %vm3081_vm2, %v21858_v25 }
 0x983   : > { %17744 = vmatprep.mubr.msk.bf16.mxu1 %vm3081_vm2, %v21863_v26 }
 0x98a   : > { %17745 = vmatmul.mubr.msk.bf16.gmra.mrb[16].mxu1 %vm3081_vm2, %v21868_v27 }
 0x98b   : > { %17748 = vmatprep.mubr.msk.bf16.mxu1 %vm3081_vm2, %v21873_v36 }
 0x992   : > { %17749 = vmatmul.mubr.msk.bf16.gmra.mrb[20].mxu1 %vm3081_vm2, %v21878_v28 }
 0x993   : > { %17752 = vmatprep.mubr.msk.bf16.mxu1 %vm3081_vm2, %v21883_v29 }
 0x99a   : > { %17753 = vmatmul.mubr.msk.bf16.gmra.mrb[24].mxu1 %vm3081_vm2, %v21888_v30 }
 0x99b   : > { %17756 = vmatprep.mubr.msk.bf16.mxu1 %vm3081_vm2, %v21893_v32 }
 0x9a2   : > { %17757 = vmatmul.mubr.msk.bf16.gmra.mrb[28].mxu1 %vm3081_vm2, %v21898_v33 }
 0x9a3   : > { %17760 = vmatprep.mubr.msk.bf16.mxu1 %vm3081_vm2, %v21903_v34 }
 0x9aa   : > { %17761 = vmatmul.mubr.msk.bf16.gmra.mrb[32].mxu1 %vm3081_vm2, %v21909_v31 }
 0x9ab   : > { %17764 = vmatprep.mubr.msk.bf16.mxu1 %vm3081_vm2, %v21914_v1 }
 0x9b2   : > { %17765 = vmatmul.mubr.msk.bf16.gmra.mrb[36].mxu1 %vm3081_vm2, %v21529_v39  ;;  %v20236_v39 = vld [vmem:[%s20705_s21] sm:$0xff]  }
 0x9b3   : > { %17768 = vmatprep.mubr.msk.bf16.mxu1 %vm3081_vm2, %v21532_v40 }
 0x9ba   : > { %17769 = vmatmul.mubr.msk.bf16.gmra.mrb[40].mxu1 %vm3081_vm2, %v21540_v42 }
 0x9bb   : > { %17772 = vmatprep.mubr.msk.bf16.mxu1 %vm3081_vm2, %v21543_v43 }
 0x9c2   : > { %17773 = vmatmul.mubr.msk.bf16.gmra.mrb[44].mxu1 %vm3081_vm2, %v21550_v44 }
 0x9c3   : > { %17776 = vmatprep.mubr.msk.bf16.mxu1 %vm3081_vm2, %v21553_v56 }
 0x9ca   : > { %17777 = vmatmul.mubr.msk.bf16.gmra.mrb[48].mxu1 %vm3081_vm2, %v21560_v45 }
 0x9cb   : > { %17878 = vmatprep.mubr.msk.bf16.mxu1 %vm3081_vm2, %v20236_v39  ;;  %v19902_v39 = vld [vmem:[%s23476_s19 + $0x10] sm:$0xff]  }
 0xa15   : > { %v17710_v40 = vpop.f32.mrb[236].mxu1 }
 0xa16   : > { %v5643_v5 = vpop.f32.mrb[237].mxu1 }
 0xa17   : > { %v17711_v47 = vpop.f32.mrb[238].mxu1 }
 0xa18   : > { %v5931_v42 = vpack.c.bf16 %v17711_v47, %v17710_v40  ;;  %v5646_v7 = vpop.f32.mrb[239].mxu1 }
 0xa19   : > { %v5930_v9 = vpack.c.bf16 %v5646_v7, %v5643_v5 }
 0xa1d   : > { %v17714_v43 = vpop.f32.mrb[240].mxu1 }
 0xa1e   : > { %v5659_v54 = vpop.f32.mrb[241].mxu1 }
 0xa1f   : > { %v17715_v49 = vpop.f32.mrb[242].mxu1 }
 0xa20   : > { %v5933_v44 = vpack.c.bf16 %v17715_v49, %v17714_v43  ;;  %v5662_v2 = vpop.f32.mrb[243].mxu1 }
 0xa21   : > { %v5932_v41 = vpack.c.bf16 %v5662_v2, %v5659_v54 }
 0xa25   : > { %v17718_v56 = vpop.f32.mrb[244].mxu1 }
 0xa26   : > { %v5675_v3 = vpop.f32.mrb[245].mxu1 }
 0xa27   : > { %v17719_v4 = vpop.f32.mrb[246].mxu1 }
 0xa28   : > { %v5935_v45 = vpack.c.bf16 %v17719_v4, %v17718_v56  ;;  %v5678_v0 = vpop.f32.mrb[247].mxu1 }
 0xa29   : > { %v5934_v35 = vpack.c.bf16 %v5678_v0, %v5675_v3 }
 0xa2b   : > { %17782 = vmatprep.mubr.msk.bf16.mxu0 %vm3525_vm3, %v5934_v35 }
 0xa2c   : > { %17783 = vmatmul.mubr.msk.bf16.vlgmr.msra.gmra.mrb[100].mxu0 %vm3525_vm3, %v5935_v45 }
 0xa2d   : > { %v17722_v40 = vpop.f32.mrb[248].mxu1  ;;  %17791 = vmatpush3.bf16.msra.mxu0 %v19901_v55  ;;  %v19903_v55 = vld [vmem:[%s23476_s19 + $0x18] sm:$0xff]  }
 0xa2e   : > { %v5691_v5 = vpop.f32.mrb[249].mxu1  ;;  %17800 = vmatprep.subr.bf16.mxu0 %v19902_v39 }
 0xa2f   : > { %v17723_v47 = vpop.f32.mrb[250].mxu1 }
 0xa30   : > { %v5937_v7 = vpack.c.bf16 %v17723_v47, %v17722_v40  ;;  %v5694_v43 = vpop.f32.mrb[251].mxu1 }
 0xa31   : > { %v5936_v54 = vpack.c.bf16 %v5694_v43, %v5691_v5 }
 0xa33   : > { %17786 = vmatprep.mubr.msk.bf16.mxu0 %vm3525_vm3, %v5936_v54 }
 0xa34   : > { %17787 = vmatmul.mubr.msk.bf16.gmra.mrb[104].mxu0 %vm3525_vm3, %v5937_v7 }
 0xa35   : > { %17792 = vmatprep.mubr.msk.bf16.mxu0 %vm3525_vm3, %v5930_v9  ;;  %v17726_v49 = vpop.f32.mrb[252].mxu1 }
 0xa36   : > { %v5707_v2 = vpop.f32.mrb[253].mxu1 }
 0xa37   : > { %v17727_v56 = vpop.f32.mrb[254].mxu1 }
 0xa38   : > { %v6105_v3 = vpack.c.bf16 %v17727_v56, %v17726_v49  ;;  %v5710_v4 = vpop.f32.mrb[255].mxu1 }
 0xa39   : > { %v6104_v45 = vpack.c.bf16 %v5710_v4, %v5707_v2 }
 0xa3c   : > { %17793 = vmatmul.mubr.msk.bf16.vlgmr.msra.gmra.mrb[100].mxu0 %vm3525_vm3, %v5931_v42 }
 0xa3d   : > { %17796 = vmatprep.mubr.msk.bf16.mxu0 %vm3525_vm3, %v5932_v41  ;;  %17801 = vmatpush3.bf16.msra.mxu0 %v19902_v39  ;;  %v17730_v0 = vpop.f32.mrb[0].mxu1  ;;  %v19904_v41 = vld [vmem:[%s23476_s19 + $0x20] sm:$0xff]  }
 0xa3e   : > { %v5723_v35 = vpop.f32.mrb[1].mxu1  ;;  %17810 = vmatprep.subr.bf16.mxu0 %v19903_v55 }
 0xa3f   : > { %v17731_v40 = vpop.f32.mrb[2].mxu1 }
 0xa40   : > { %v6107_v5 = vpack.c.bf16 %v17731_v40, %v17730_v0  ;;  %v5726_v47 = vpop.f32.mrb[3].mxu1 }
 0xa41   : > { %v6106_v9 = vpack.c.bf16 %v5726_v47, %v5723_v35 }
 0xa44   : > { %17797 = vmatmul.mubr.msk.bf16.gmra.mrb[104].mxu0 %vm3525_vm3, %v5933_v44 }
 0xa45   : > { %17802 = vmatprep.mubr.msk.bf16.mxu0 %vm3525_vm3, %v6104_v45  ;;  %v17734_v7 = vpop.f32.mrb[4].mxu1 }
 0xa46   : > { %v5739_v43 = vpop.f32.mrb[5].mxu1 }
 0xa47   : > { %v17735_v54 = vpop.f32.mrb[6].mxu1 }
 0xa48   : > { %v6200_v49 = vpack.c.bf16 %v17735_v54, %v17734_v7  ;;  %v5742_v42 = vpop.f32.mrb[7].mxu1 }
 0xa49   : > { %v6199_v2 = vpack.c.bf16 %v5742_v42, %v5739_v43 }
 0xa4c   : > { %17803 = vmatmul.mubr.msk.bf16.vlgmr.msra.gmra.mrb[100].mxu0 %vm3525_vm3, %v6105_v3 }
 0xa4d   : > { %17806 = vmatprep.mubr.msk.bf16.mxu0 %vm3525_vm3, %v6106_v9  ;;  %17811 = vmatpush3.bf16.msra.mxu0 %v19903_v55  ;;  %v17738_v39 = vpop.f32.mrb[8].mxu1  ;;  %v19905_v9 = vld [vmem:[%s23476_s19 + $0x28] sm:$0xff]  }
 0xa4e   : > { %v5755_v56 = vpop.f32.mrb[9].mxu1  ;;  %17820 = vmatprep.subr.bf16.mxu0 %v19904_v41 }
 0xa4f   : > { %v17739_v4 = vpop.f32.mrb[10].mxu1 }
 0xa50   : > { %v6202_v44 = vpack.c.bf16 %v17739_v4, %v17738_v39  ;;  %v5758_v0 = vpop.f32.mrb[11].mxu1 }
 0xa51   : > { %v6201_v45 = vpack.c.bf16 %v5758_v0, %v5755_v56 }
 0xa54   : > { %17807 = vmatmul.mubr.msk.bf16.gmra.mrb[104].mxu0 %vm3525_vm3, %v6107_v5 }
 0xa55   : > { %17812 = vmatprep.mubr.msk.bf16.mxu0 %vm3525_vm3, %v6199_v2  ;;  %v17742_v35 = vpop.f32.mrb[12].mxu1 }
 0xa56   : > { %v5771_v40 = vpop.f32.mrb[13].mxu1 }
 0xa57   : > { %v17743_v47 = vpop.f32.mrb[14].mxu1 }
 0xa58   : > { %v5774_v7 = vpop.f32.mrb[15].mxu1  ;;  %v6295_v3 = vpack.c.bf16 %v17743_v47, %v17742_v35 }
 0xa59   : > { %v6294_v43 = vpack.c.bf16 %v5774_v7, %v5771_v40 }
 0xa5c   : > { %17813 = vmatmul.mubr.msk.bf16.vlgmr.msra.gmra.mrb[100].mxu0 %vm3525_vm3, %v6200_v49 }
 0xa5d   : > { %17816 = vmatprep.mubr.msk.bf16.mxu0 %vm3525_vm3, %v6201_v45  ;;  %17821 = vmatpush3.bf16.msra.mxu0 %v19904_v41  ;;  %v17746_v55 = vpop.f32.mrb[16].mxu1  ;;  %v19906_v45 = vld [vmem:[%s23476_s19 + $0x30] sm:$0xff]  }
 0xa5e   : > { %v5787_v54 = vpop.f32.mrb[17].mxu1  ;;  %17830 = vmatprep.subr.bf16.mxu0 %v19905_v9 }
 0xa5f   : > { %v17747_v42 = vpop.f32.mrb[18].mxu1 }
 0xa60   : > { %v6297_v5 = vpack.c.bf16 %v17747_v42, %v17746_v55  ;;  %v5790_v39 = vpop.f32.mrb[19].mxu1 }
 0xa61   : > { %v6296_v2 = vpack.c.bf16 %v5790_v39, %v5787_v54 }
 0xa64   : > { %17817 = vmatmul.mubr.msk.bf16.gmra.mrb[104].mxu0 %vm3525_vm3, %v6202_v44 }
 0xa65   : > { %17822 = vmatprep.mubr.msk.bf16.mxu0 %vm3525_vm3, %v6294_v43  ;;  %v17750_v56 = vpop.f32.mrb[20].mxu1 }
 0xa66   : > { %v5803_v4 = vpop.f32.mrb[21].mxu1 }
 0xa67   : > { %v17751_v0 = vpop.f32.mrb[22].mxu1 }
 0xa68   : > { %v6390_v35 = vpack.c.bf16 %v17751_v0, %v17750_v56  ;;  %v5806_v49 = vpop.f32.mrb[23].mxu1 }
 0xa69   : > { %v6389_v40 = vpack.c.bf16 %v5806_v49, %v5803_v4 }
 0xa6c   : > { %17823 = vmatmul.mubr.msk.bf16.vlgmr.msra.gmra.mrb[100].mxu0 %vm3525_vm3, %v6295_v3 }
 0xa6d   : > { %17826 = vmatprep.mubr.msk.bf16.mxu0 %vm3525_vm3, %v6296_v2  ;;  %17831 = vmatpush3.bf16.msra.mxu0 %v19905_v9  ;;  %v17754_v41 = vpop.f32.mrb[24].mxu1  ;;  %v19907_v2 = vld [vmem:[%s23476_s19 + $0x38] sm:$0xff]  }
 0xa6e   : > { %v5819_v47 = vpop.f32.mrb[25].mxu1  ;;  %17840 = vmatprep.subr.bf16.mxu0 %v19906_v45 }
 0xa6f   : > { %v17755_v7 = vpop.f32.mrb[26].mxu1 }
 0xa70   : > { %v6392_v44 = vpack.c.bf16 %v17755_v7, %v17754_v41  ;;  %v5822_v55 = vpop.f32.mrb[27].mxu1 }
 0xa71   : > { %v6391_v43 = vpack.c.bf16 %v5822_v55, %v5819_v47 }
 0xa74   : > { %17827 = vmatmul.mubr.msk.bf16.gmra.mrb[104].mxu0 %vm3525_vm3, %v6297_v5 }
 0xa75   : > { %17832 = vmatprep.mubr.msk.bf16.mxu0 %vm3525_vm3, %v6389_v40  ;;  %v17758_v54 = vpop.f32.mrb[28].mxu1 }
 0xa76   : > { %v5835_v42 = vpop.f32.mrb[29].mxu1 }
 0xa77   : > { %v17759_v39 = vpop.f32.mrb[30].mxu1 }
 0xa78   : > { %v6485_v56 = vpack.c.bf16 %v17759_v39, %v17758_v54  ;;  %v5838_v3 = vpop.f32.mrb[31].mxu1 }
 0xa79   : > { %v6484_v4 = vpack.c.bf16 %v5838_v3, %v5835_v42 }
 0xa7c   : > { %17833 = vmatmul.mubr.msk.bf16.vlgmr.msra.gmra.mrb[100].mxu0 %vm3525_vm3, %v6390_v35 }
 0xa7d   : > { %17836 = vmatprep.mubr.msk.bf16.mxu0 %vm3525_vm3, %v6391_v43  ;;  %17841 = vmatpush3.bf16.msra.mxu0 %v19906_v45  ;;  %v17762_v9 = vpop.f32.mrb[32].mxu1  ;;  %v19908_v43 = vld [vmem:[%s23476_s19 + $0x40] sm:$0xff]  }
 0xa7e   : > { %v5851_v0 = vpop.f32.mrb[33].mxu1  ;;  %17850 = vmatprep.subr.bf16.mxu0 %v19907_v2 }
 0xa7f   : > { %v17763_v49 = vpop.f32.mrb[34].mxu1 }
 0xa80   : > { %v6487_v5 = vpack.c.bf16 %v17763_v49, %v17762_v9  ;;  %v5854_v41 = vpop.f32.mrb[35].mxu1 }
 0xa81   : > { %v6486_v40 = vpack.c.bf16 %v5854_v41, %v5851_v0 }
 0xa84   : > { %17837 = vmatmul.mubr.msk.bf16.gmra.mrb[104].mxu0 %vm3525_vm3, %v6392_v44 }
 0xa85   : > { %17842 = vmatprep.mubr.msk.bf16.mxu0 %vm3525_vm3, %v6484_v4  ;;  %v17766_v47 = vpop.f32.mrb[36].mxu1 }
 0xa86   : > { %v5867_v7 = vpop.f32.mrb[37].mxu1 }
 0xa87   : > { %v17767_v55 = vpop.f32.mrb[38].mxu1 }
 0xa88   : > { %v6580_v54 = vpack.c.bf16 %v17767_v55, %v17766_v47  ;;  %v5870_v35 = vpop.f32.mrb[39].mxu1 }
 0xa89   : > { %v6579_v42 = vpack.c.bf16 %v5870_v35, %v5867_v7 }
 0xa8c   : > { %17843 = vmatmul.mubr.msk.bf16.vlgmr.msra.gmra.mrb[100].mxu0 %vm3525_vm3, %v6485_v56 }
 0xa8d   : > { %17846 = vmatprep.mubr.msk.bf16.mxu0 %vm3525_vm3, %v6486_v40  ;;  %17851 = vmatpush3.bf16.msra.mxu0 %v19907_v2  ;;  %v17770_v45 = vpop.f32.mrb[40].mxu1 }
 0xa8e   : > { %v5883_v39 = vpop.f32.mrb[41].mxu1  ;;  %17860 = vmatprep.subr.bf16.mxu0 %v19908_v43 }
 0xa8f   : > { %v17771_v3 = vpop.f32.mrb[42].mxu1 }
 0xa90   : > { %v6582_v9 = vpack.c.bf16 %v17771_v3, %v17770_v45  ;;  %v5886_v44 = vpop.f32.mrb[43].mxu1 }
 0xa91   : > { %v6581_v0 = vpack.c.bf16 %v5886_v44, %v5883_v39 }
 0xa94   : > { %17847 = vmatmul.mubr.msk.bf16.gmra.mrb[104].mxu0 %vm3525_vm3, %v6487_v5 }
 0xa95   : > { %17852 = vmatprep.mubr.msk.bf16.mxu0 %vm3525_vm3, %v6579_v42  ;;  %v17774_v4 = vpop.f32.mrb[44].mxu1 }
 0xa96   : > { %v5899_v49 = vpop.f32.mrb[45].mxu1 }
 0xa97   : > { %v17775_v41 = vpop.f32.mrb[46].mxu1 }
 0xa98   : > { %v6675_v47 = vpack.c.bf16 %v17775_v41, %v17774_v4  ;;  %v5902_v7 = vpop.f32.mrb[47].mxu1 }
 0xa99   : > { %v6674_v56 = vpack.c.bf16 %v5902_v7, %v5899_v49 }
 0xa9c   : > { %17853 = vmatmul.mubr.msk.bf16.vlgmr.msra.gmra.mrb[100].mxu0 %vm3525_vm3, %v6580_v54  ;;  %v16000_v54 = vld [vmem:[%s23477_s11] ss:$0 sm:$0xff]  ;;  %s23488_s11 = sld [smem:[#allocation30_spill]] }
 0xa9d   : > { %17856 = vmatprep.mubr.msk.bf16.mxu0 %vm3525_vm3, %v6581_v0  ;;  %17861 = vmatpush3.bf16.msra.mxu0 %v19908_v43  ;;  %v17778_v2 = vpop.f32.mrb[48].mxu1 }
 0xa9e   : > { %v5915_v40 = vpop.f32.mrb[49].mxu1 }
 0xa9f   : > { %v17779_v55 = vpop.f32.mrb[50].mxu1 }
 0xaa0   : > { %v6677_v35 = vpack.c.bf16 %v17779_v55, %v17778_v2  ;;  %v5918_v45 = vpop.f32.mrb[51].mxu1 }
 0xaa1   : > { %v6676_v5 = vpack.c.bf16 %v5918_v45, %v5915_v40 }
 0xaa4   : > { %17857 = vmatmul.mubr.msk.bf16.gmra.mrb[104].mxu0 %vm3525_vm3, %v6582_v9 }
 0xaa5   : > { %17862 = vmatprep.mubr.msk.bf16.mxu0 %vm3525_vm3, %v6674_v56 }
 0xaac   : > { %17863 = vmatmul.mubr.msk.bf16.vlgmr.msra.gmra.mrb[100].mxu0 %vm3525_vm3, %v6675_v47 }
 0xaad   : > { %17866 = vmatprep.mubr.msk.bf16.mxu0 %vm3525_vm3, %v6676_v5 }
 0xab4   : > { %17867 = vmatmul.mubr.msk.bf16.gmra.mrb[104].mxu0 %vm3525_vm3, %v6677_v35 }
 0xb7f   : > { %v17864_v42 = vpop.f32.mrb[100].mxu0 }
 0xb80   : > { %v6778_v39 = vadd.f32 %v17864_v42, %v16000_v54  ;;  %v6730_v43 = vpop.f32.mrb[101].mxu0 }
 0xb81   : > { %v6776_v3 = vadd.f32 %v16000_v54, %v6730_v43  ;;  %v17865_v44 = vpop.f32.mrb[102].mxu0 }
 0xb82   : > { %v6779_v0 = vadd.f32 %v17865_v44, %v16000_v54  ;;  %v6733_v4 = vpop.f32.mrb[103].mxu0  ;;  %v6786_v41 = vmax.f32 %v6778_v39, 0.0 }
 0xb83   : > { %v6777_v49 = vadd.f32 %v16000_v54, %v6733_v4  ;;  %v6784_v9 = vmax.f32 %v6776_v3, 0.0 }
 0xb84   : > { %v6787_v7 = vmax.f32 %v6779_v0, 0.0 }
 0xb85   : > { %v6785_v2 = vmax.f32 %v6777_v49, 0.0 }
 0xb86   : > { %v6811_v56 = vpack.c.bf16 %v6787_v7, %v6786_v41 }
 0xb87   : > { %v17868_v40 = vpop.f32.mrb[104].mxu0  ;;  %v6810_v47 = vpack.c.bf16 %v6785_v2, %v6784_v9 }
 0xb88   : > { %v6782_v55 = vadd.f32 %v17868_v40, %v16000_v54  ;;  %v6746_v45 = vpop.f32.mrb[105].mxu0 }
 0xb89   : > { %v6780_v5 = vadd.f32 %v16000_v54, %v6746_v45  ;;  %v17869_v35 = vpop.f32.mrb[106].mxu0  ;;  %17870 = vmatprep.subr.bf16.mxu1 %v6810_v47  ;;  %v19912_v45 = vld [vmem:[%s23478_s2 + $0x18] sm:$0xff]  }
 0xb8a   : > { %v6783_v60 = vadd.f32 %v17869_v35, %v16000_v54  ;;  %v6749_v42 = vpop.f32.mrb[107].mxu0  ;;  %17871 = vmatpush3.bf16.msra.mxu1 %v6810_v47  ;;  %v6790_v44 = vmax.f32 %v6782_v55, 0.0 }
 0xb8b   : > { %v6781_v43 = vadd.f32 %v16000_v54, %v6749_v42  ;;  %17872 = vmatprep.subr.bf16.mxu1 %v6811_v56  ;;  %v6788_v4 = vmax.f32 %v6780_v5, 0.0 }
 0xb8c   : > { %v6791_v53 = vmax.f32 %v6783_v60, 0.0  ;;  %v19909_v60 = vld [vmem:[%s23478_s2 + $0x8] sm:$0xff]  }
 0xb8d   : > { %v6789_v39 = vmax.f32 %v6781_v43, 0.0  ;;  %17950 = vmatprep.subr.bf16.mxu0 %v19909_v60 }
 0xb8e   : > { %17873 = vmatpush3.bf16.msra.mxu1 %v6811_v56  ;;  %v6813_v3 = vpack.c.bf16 %v6791_v53, %v6790_v44  ;;  %17951 = vmatpush3.bf16.msra.mxu0 %v19909_v60  ;;  %v20237_v53 = vld [vmem:[%s20705_s21 + $0xe8] sm:$0xff]  }
 0xb8f   : > { %v6812_v0 = vpack.c.bf16 %v6789_v39, %v6788_v4 }
 0xb91   : > { %17874 = vmatprep.subr.bf16.mxu1 %v6812_v0 }
 0xb92   : > { %17875 = vmatpush3.bf16.msra.mxu1 %v6812_v0 }
 0xb93   : > { %17876 = vmatprep.subr.bf16.mxu1 %v6813_v3 }
 0xb96   : > { %17877 = vmatpush3.bf16.msra.mxu1 %v6813_v3 }
 0xb99   : > { %17879 = vmatmul.mubr.msk.bf16.vlgmr.msra.gmra.mrb[52].mxu1 %vm3081_vm2, %v21778_v46  ;;  %v20238_v46 = vld [vmem:[%s20705_s21 + $0xf0] sm:$0xff]  }
 0xb9a   : > { %17882 = vmatprep.mubr.msk.bf16.mxu1 %vm3081_vm2, %v21783_v11  ;;  %v19910_v11 = vld [vmem:[%s23478_s2] sm:$0xff]  }
 0xb9b   : > { %17960 = vmatprep.subr.bf16.mxu0 %v19910_v11 }
 0xba1   : > { %17883 = vmatmul.mubr.msk.bf16.gmra.mrb[56].mxu1 %vm3081_vm2, %v21788_v13  ;;  %v20239_v13 = vld [vmem:[%s20705_s21 + $0xf8] sm:$0xff]  }
 0xba2   : > { %17886 = vmatprep.mubr.msk.bf16.mxu1 %vm3081_vm2, %v21793_v14  ;;  %v20240_v14 = vld [vmem:[%s20705_s21 + $0x100] sm:$0xff]  }
 0xba9   : > { %17887 = vmatmul.mubr.msk.bf16.gmra.mrb[60].mxu1 %vm3081_vm2, %v21798_v12  ;;  %v20241_v12 = vld [vmem:[%s20705_s21 + $0x108] sm:$0xff]  }
 0xbaa   : > { %17890 = vmatprep.mubr.msk.bf16.mxu1 %vm3081_vm2, %v21803_v15  ;;  %v20242_v15 = vld [vmem:[%s20705_s21 + $0x110] sm:$0xff]  }
 0xbb1   : > { %17891 = vmatmul.mubr.msk.bf16.gmra.mrb[64].mxu1 %vm3081_vm2, %v21808_v16  ;;  %v20243_v16 = vld [vmem:[%s20705_s21 + $0x118] sm:$0xff]  }
 0xbb2   : > { %17894 = vmatprep.mubr.msk.bf16.mxu1 %vm3081_vm2, %v21813_v17 }
 0xbb9   : > { %17895 = vmatmul.mubr.msk.bf16.gmra.mrb[68].mxu1 %vm3081_vm2, %v21818_v18 }
 0xbba   : > { %17898 = vmatprep.mubr.msk.bf16.mxu1 %vm3081_vm2, %v21823_v52 }
 0xbc1   : > { %17899 = vmatmul.mubr.msk.bf16.gmra.mrb[72].mxu1 %vm3081_vm2, %v21828_v20 }
 0xbc2   : > { %17902 = vmatprep.mubr.msk.bf16.mxu1 %vm3081_vm2, %v21833_v21 }
 0xbc9   : > { %17903 = vmatmul.mubr.msk.bf16.gmra.mrb[76].mxu1 %vm3081_vm2, %v21838_v22 }
 0xbca   : > { %17906 = vmatprep.mubr.msk.bf16.mxu1 %vm3081_vm2, %v21843_v23 }
 0xbd1   : > { %17907 = vmatmul.mubr.msk.bf16.gmra.mrb[80].mxu1 %vm3081_vm2, %v21848_v19 }
 0xbd2   : > { %17910 = vmatprep.mubr.msk.bf16.mxu1 %vm3081_vm2, %v21853_v24 }
 0xbd9   : > { %17911 = vmatmul.mubr.msk.bf16.gmra.mrb[84].mxu1 %vm3081_vm2, %v21858_v25 }
 0xbda   : > { %17914 = vmatprep.mubr.msk.bf16.mxu1 %vm3081_vm2, %v21863_v26 }
 0xbe1   : > { %17915 = vmatmul.mubr.msk.bf16.gmra.mrb[88].mxu1 %vm3081_vm2, %v21868_v27 }
 0xbe2   : > { %17918 = vmatprep.mubr.msk.bf16.mxu1 %vm3081_vm2, %v21873_v36 }
 0xbe9   : > { %17919 = vmatmul.mubr.msk.bf16.gmra.mrb[92].mxu1 %vm3081_vm2, %v21878_v28 }
 0xbea   : > { %17922 = vmatprep.mubr.msk.bf16.mxu1 %vm3081_vm2, %v21883_v29 }
 0xbf1   : > { %17923 = vmatmul.mubr.msk.bf16.gmra.mrb[96].mxu1 %vm3081_vm2, %v21888_v30 }
 0xbf2   : > { %17926 = vmatprep.mubr.msk.bf16.mxu1 %vm3081_vm2, %v21893_v32 }
 0xbf9   : > { %17927 = vmatmul.mubr.msk.bf16.gmra.mrb[100].mxu1 %vm3081_vm2, %v21898_v33 }
 0xbfa   : > { %17930 = vmatprep.mubr.msk.bf16.mxu1 %vm3081_vm2, %v21903_v34  ;;  %v19911_v34 = vld [vmem:[%s23478_s2 + $0x10] sm:$0xff]  }
 0xc01   : > { %17931 = vmatmul.mubr.msk.bf16.gmra.mrb[104].mxu1 %vm3081_vm2, %v21909_v31 }
 0xc02   : > { %17934 = vmatprep.mubr.msk.bf16.mxu1 %vm3081_vm2, %v21914_v1 }
 0xc09   : > { %17935 = vmatmul.mubr.msk.bf16.gmra.mrb[108].mxu1 %vm3081_vm2, %v20237_v53 }
 0xc0a   : > { %17938 = vmatprep.mubr.msk.bf16.mxu1 %vm3081_vm2, %v20238_v46 }
 0xc11   : > { %17939 = vmatmul.mubr.msk.bf16.gmra.mrb[112].mxu1 %vm3081_vm2, %v20239_v13 }
 0xc12   : > { %17942 = vmatprep.mubr.msk.bf16.mxu1 %vm3081_vm2, %v20240_v14 }
 0xc19   : > { %17943 = vmatmul.mubr.msk.bf16.gmra.mrb[116].mxu1 %vm3081_vm2, %v20241_v12 }
 0xc1a   : > { %17946 = vmatprep.mubr.msk.bf16.mxu1 %vm3081_vm2, %v20242_v15 }
 0xc21   : > { %17947 = vmatmul.mubr.msk.bf16.gmra.mrb[120].mxu1 %vm3081_vm2, %v20243_v16 }
 0xc6c   : > { %v17880_v17 = vpop.f32.mrb[52].mxu1 }
 0xc6d   : > { %v6848_v18 = vpop.f32.mrb[53].mxu1 }
 0xc6e   : > { %v17881_v52 = vpop.f32.mrb[54].mxu1 }
 0xc6f   : > { %v7136_v20 = vpack.c.bf16 %v17881_v52, %v17880_v17  ;;  %v6851_v21 = vpop.f32.mrb[55].mxu1 }
 0xc70   : > { %v7135_v22 = vpack.c.bf16 %v6851_v21, %v6848_v18 }
 0xc74   : > { %v17884_v23 = vpop.f32.mrb[56].mxu1 }
 0xc75   : > { %v6864_v19 = vpop.f32.mrb[57].mxu1 }
 0xc76   : > { %v17885_v24 = vpop.f32.mrb[58].mxu1 }
 0xc77   : > { %v7138_v25 = vpack.c.bf16 %v17885_v24, %v17884_v23  ;;  %v6867_v26 = vpop.f32.mrb[59].mxu1 }
 0xc78   : > { %v7137_v27 = vpack.c.bf16 %v6867_v26, %v6864_v19  ;;  %v19914_v19 = vld [vmem:[%s23478_s2 + $0x28] sm:$0xff]  }
 0xc7c   : > { %v17888_v36 = vpop.f32.mrb[60].mxu1 }
 0xc7d   : > { %v6880_v28 = vpop.f32.mrb[61].mxu1 }
 0xc7e   : > { %v17889_v29 = vpop.f32.mrb[62].mxu1 }
 0xc7f   : > { %v7140_v30 = vpack.c.bf16 %v17889_v29, %v17888_v36  ;;  %v6883_v32 = vpop.f32.mrb[63].mxu1 }
 0xc80   : > { %v7139_v33 = vpack.c.bf16 %v6883_v32, %v6880_v28 }
 0xc82   : > { %17952 = vmatprep.mubr.msk.bf16.mxu0 %vm3525_vm3, %v7139_v33 }
 0xc83   : > { %17953 = vmatmul.mubr.msk.bf16.vlgmr.msra.gmra.mrb[108].mxu0 %vm3525_vm3, %v7140_v30 }
 0xc84   : > { %v17892_v31 = vpop.f32.mrb[64].mxu1  ;;  %17961 = vmatpush3.bf16.msra.mxu0 %v19910_v11  ;;  %v19913_v11 = vld [vmem:[%s23478_s2 + $0x20] sm:$0xff]  }
 0xc85   : > { %v6896_v1 = vpop.f32.mrb[65].mxu1  ;;  %17970 = vmatprep.subr.bf16.mxu0 %v19911_v34 }
 0xc86   : > { %v17893_v54 = vpop.f32.mrb[66].mxu1 }
 0xc87   : > { %v7142_v49 = vpack.c.bf16 %v17893_v54, %v17892_v31  ;;  %v6899_v41 = vpop.f32.mrb[67].mxu1 }
 0xc88   : > { %v7141_v7 = vpack.c.bf16 %v6899_v41, %v6896_v1  ;;  %v19915_v1 = vld [vmem:[%s23478_s2 + $0x30] sm:$0xff]  }
 0xc8a   : > { %17956 = vmatprep.mubr.msk.bf16.mxu0 %vm3525_vm3, %v7141_v7 }
 0xc8b   : > { %17957 = vmatmul.mubr.msk.bf16.gmra.mrb[112].mxu0 %vm3525_vm3, %v7142_v49 }
 0xc8c   : > { %17962 = vmatprep.mubr.msk.bf16.mxu0 %vm3525_vm3, %v7135_v22  ;;  %v17896_v9 = vpop.f32.mrb[68].mxu1 }
 0xc8d   : > { %v6912_v2 = vpop.f32.mrb[69].mxu1 }
 0xc8e   : > { %v17897_v56 = vpop.f32.mrb[70].mxu1 }
 0xc8f   : > { %v7310_v40 = vpack.c.bf16 %v17897_v56, %v17896_v9  ;;  %v6915_v47 = vpop.f32.mrb[71].mxu1 }
 0xc90   : > { %v7309_v55 = vpack.c.bf16 %v6915_v47, %v6912_v2 }
 0xc93   : > { %17963 = vmatmul.mubr.msk.bf16.vlgmr.msra.gmra.mrb[108].mxu0 %vm3525_vm3, %v7136_v20 }
 0xc94   : > { %17966 = vmatprep.mubr.msk.bf16.mxu0 %vm3525_vm3, %v7137_v27  ;;  %17971 = vmatpush3.bf16.msra.mxu0 %v19911_v34  ;;  %v17900_v5 = vpop.f32.mrb[72].mxu1 }
 0xc95   : > { %v6928_v35 = vpop.f32.mrb[73].mxu1  ;;  %17980 = vmatprep.subr.bf16.mxu0 %v19912_v45 }
 0xc96   : > { %v17901_v42 = vpop.f32.mrb[74].mxu1 }
 0xc97   : > { %v7312_v43 = vpack.c.bf16 %v17901_v42, %v17900_v5  ;;  %v6931_v44 = vpop.f32.mrb[75].mxu1 }
 0xc98   : > { %v7311_v4 = vpack.c.bf16 %v6931_v44, %v6928_v35  ;;  %v19916_v35 = vld [vmem:[%s23478_s2 + $0x38] sm:$0xff]  }
 0xc9b   : > { %17967 = vmatmul.mubr.msk.bf16.gmra.mrb[112].mxu0 %vm3525_vm3, %v7138_v25 }
 0xc9c   : > { %17972 = vmatprep.mubr.msk.bf16.mxu0 %vm3525_vm3, %v7309_v55  ;;  %v17904_v39 = vpop.f32.mrb[76].mxu1 }
 0xc9d   : > { %v6944_v3 = vpop.f32.mrb[77].mxu1 }
 0xc9e   : > { %v17905_v0 = vpop.f32.mrb[78].mxu1 }
 0xc9f   : > { %v7405_v60 = vpack.c.bf16 %v17905_v0, %v17904_v39  ;;  %v6947_v53 = vpop.f32.mrb[79].mxu1 }
 0xca0   : > { %v7404_v46 = vpack.c.bf16 %v6947_v53, %v6944_v3 }
 0xca3   : > { %17973 = vmatmul.mubr.msk.bf16.vlgmr.msra.gmra.mrb[108].mxu0 %vm3525_vm3, %v7310_v40 }
 0xca4   : > { %17976 = vmatprep.mubr.msk.bf16.mxu0 %vm3525_vm3, %v7311_v4  ;;  %17981 = vmatpush3.bf16.msra.mxu0 %v19912_v45  ;;  %v17908_v13 = vpop.f32.mrb[80].mxu1 }
 0xca5   : > { %v6960_v14 = vpop.f32.mrb[81].mxu1  ;;  %17990 = vmatprep.subr.bf16.mxu0 %v19913_v11 }
 0xca6   : > { %v17909_v12 = vpop.f32.mrb[82].mxu1 }
 0xca7   : > { %v7407_v15 = vpack.c.bf16 %v17909_v12, %v17908_v13  ;;  %v6963_v16 = vpop.f32.mrb[83].mxu1 }
 0xca8   : > { %v7406_v17 = vpack.c.bf16 %v6963_v16, %v6960_v14  ;;  %v19917_v14 = vld [vmem:[%s23478_s2 + $0x40] sm:$0xff]  }
 0xcab   : > { %17977 = vmatmul.mubr.msk.bf16.gmra.mrb[112].mxu0 %vm3525_vm3, %v7312_v43 }
 0xcac   : > { %17982 = vmatprep.mubr.msk.bf16.mxu0 %vm3525_vm3, %v7404_v46  ;;  %v17912_v18 = vpop.f32.mrb[84].mxu1 }
 0xcad   : > { %v6976_v52 = vpop.f32.mrb[85].mxu1 }
 0xcae   : > { %v17913_v20 = vpop.f32.mrb[86].mxu1 }
 0xcaf   : > { %v7500_v21 = vpack.c.bf16 %v17913_v20, %v17912_v18  ;;  %v6979_v22 = vpop.f32.mrb[87].mxu1 }
 0xcb0   : > { %v7499_v23 = vpack.c.bf16 %v6979_v22, %v6976_v52 }
 0xcb3   : > { %17983 = vmatmul.mubr.msk.bf16.vlgmr.msra.gmra.mrb[108].mxu0 %vm3525_vm3, %v7405_v60 }
 0xcb4   : > { %17986 = vmatprep.mubr.msk.bf16.mxu0 %vm3525_vm3, %v7406_v17  ;;  %17991 = vmatpush3.bf16.msra.mxu0 %v19913_v11  ;;  %v17916_v24 = vpop.f32.mrb[88].mxu1 }
 0xcb5   : > { %v6992_v25 = vpop.f32.mrb[89].mxu1  ;;  %18000 = vmatprep.subr.bf16.mxu0 %v19914_v19 }
 0xcb6   : > { %v17917_v26 = vpop.f32.mrb[90].mxu1 }
 0xcb7   : > { %v7502_v27 = vpack.c.bf16 %v17917_v26, %v17916_v24  ;;  %v6995_v36 = vpop.f32.mrb[91].mxu1 }
 0xcb8   : > { %v7501_v28 = vpack.c.bf16 %v6995_v36, %v6992_v25 }
 0xcbb   : > { %17987 = vmatmul.mubr.msk.bf16.gmra.mrb[112].mxu0 %vm3525_vm3, %v7407_v15 }
 0xcbc   : > { %17992 = vmatprep.mubr.msk.bf16.mxu0 %vm3525_vm3, %v7499_v23  ;;  %v17920_v29 = vpop.f32.mrb[92].mxu1 }
 0xcbd   : > { %v7008_v30 = vpop.f32.mrb[93].mxu1 }
 0xcbe   : > { %v17921_v32 = vpop.f32.mrb[94].mxu1 }
 0xcbf   : > { %v7595_v33 = vpack.c.bf16 %v17921_v32, %v17920_v29  ;;  %v7011_v34 = vpop.f32.mrb[95].mxu1  ;;  %v16082_v32 = vld [vmem:[%s23479_s16] ss:$0 sm:$0xff]  ;;  %s23489_s16 = sld [smem:[#allocation46_spill]] }
 0xcc0   : > { %v7594_v31 = vpack.c.bf16 %v7011_v34, %v7008_v30  ;;  %v20674_v30 = vmov 0.0  }
 0xcc1   : > { %18040 = vmatprep.subr.bf16.mxu1 %v20674_v30  ;;  %18048 = vmatprep.mubr.msk.bf16.mxu1 %vm20675_vm4, %v20674_v30 }
 0xcc3   : > { %17993 = vmatmul.mubr.msk.bf16.vlgmr.msra.gmra.mrb[108].mxu0 %vm3525_vm3, %v7500_v21 }
 0xcc4   : > { %17996 = vmatprep.mubr.msk.bf16.mxu0 %vm3525_vm3, %v7501_v28  ;;  %18001 = vmatpush3.bf16.msra.mxu0 %v19914_v19  ;;  %v17924_v54 = vpop.f32.mrb[96].mxu1 }
 0xcc5   : > { %v7024_v49 = vpop.f32.mrb[97].mxu1  ;;  %18010 = vmatprep.subr.bf16.mxu0 %v19915_v1 }
 0xcc6   : > { %v17925_v41 = vpop.f32.mrb[98].mxu1 }
 0xcc7   : > { %v7597_v7 = vpack.c.bf16 %v17925_v41, %v17924_v54  ;;  %v7027_v9 = vpop.f32.mrb[99].mxu1 }
 0xcc8   : > { %v7596_v2 = vpack.c.bf16 %v7027_v9, %v7024_v49 }
 0xccb   : > { %17997 = vmatmul.mubr.msk.bf16.gmra.mrb[112].mxu0 %vm3525_vm3, %v7502_v27 }
 0xccc   : > { %18002 = vmatprep.mubr.msk.bf16.mxu0 %vm3525_vm3, %v7594_v31  ;;  %v17928_v56 = vpop.f32.mrb[100].mxu1 }
 0xccd   : > { %v7040_v40 = vpop.f32.mrb[101].mxu1 }
 0xcce   : > { %v17929_v47 = vpop.f32.mrb[102].mxu1 }
 0xccf   : > { %v7690_v55 = vpack.c.bf16 %v17929_v47, %v17928_v56  ;;  %v7043_v45 = vpop.f32.mrb[103].mxu1 }
 0xcd0   : > { %v7689_v5 = vpack.c.bf16 %v7043_v45, %v7040_v40 }
 0xcd3   : > { %18003 = vmatmul.mubr.msk.bf16.vlgmr.msra.gmra.mrb[108].mxu0 %vm3525_vm3, %v7595_v33 }
 0xcd4   : > { %18006 = vmatprep.mubr.msk.bf16.mxu0 %vm3525_vm3, %v7596_v2  ;;  %18011 = vmatpush3.bf16.msra.mxu0 %v19915_v1  ;;  %v17932_v42 = vpop.f32.mrb[104].mxu1 }
 0xcd5   : > { %v7056_v43 = vpop.f32.mrb[105].mxu1  ;;  %18020 = vmatprep.subr.bf16.mxu0 %v19916_v35 }
 0xcd6   : > { %v17933_v44 = vpop.f32.mrb[106].mxu1 }
 0xcd7   : > { %v7692_v4 = vpack.c.bf16 %v17933_v44, %v17932_v42  ;;  %v7059_v39 = vpop.f32.mrb[107].mxu1 }
 0xcd8   : > { %v7691_v3 = vpack.c.bf16 %v7059_v39, %v7056_v43 }
 0xcdb   : > { %18007 = vmatmul.mubr.msk.bf16.gmra.mrb[112].mxu0 %vm3525_vm3, %v7597_v7 }
 0xcdc   : > { %18012 = vmatprep.mubr.msk.bf16.mxu0 %vm3525_vm3, %v7689_v5  ;;  %v17936_v0 = vpop.f32.mrb[108].mxu1 }
 0xcdd   : > { %v7072_v60 = vpop.f32.mrb[109].mxu1 }
 0xcde   : > { %v17937_v53 = vpop.f32.mrb[110].mxu1 }
 0xcdf   : > { %v7785_v46 = vpack.c.bf16 %v17937_v53, %v17936_v0  ;;  %v7075_v11 = vpop.f32.mrb[111].mxu1 }
 0xce0   : > { %v7784_v13 = vpack.c.bf16 %v7075_v11, %v7072_v60  ;;  %v19921_v11 = vld [vmem:[%s23481_s18 + $0x18] sm:$0xff]  }
 0xce3   : > { %18013 = vmatmul.mubr.msk.bf16.vlgmr.msra.gmra.mrb[108].mxu0 %vm3525_vm3, %v7690_v55 }
 0xce4   : > { %18016 = vmatprep.mubr.msk.bf16.mxu0 %vm3525_vm3, %v7691_v3  ;;  %18021 = vmatpush3.bf16.msra.mxu0 %v19916_v35  ;;  %v17940_v12 = vpop.f32.mrb[112].mxu1  ;;  %v23483_v3 = vmax.f32 %v21763_v6, 0.0  ;;  %v19918_v6 = vld [vmem:[%s23480_s22] sm:$0xff]   ;;  %s23490_s22 = sld [smem:[#allocation48_spill]] }
 0xce5   : > { %v7088_v15 = vpop.f32.mrb[113].mxu1  ;;  %18030 = vmatprep.subr.bf16.mxu0 %v19917_v14 }
 0xce6   : > { %v17941_v16 = vpop.f32.mrb[114].mxu1 }
 0xce7   : > { %v7787_v17 = vpack.c.bf16 %v17941_v16, %v17940_v12  ;;  %v7091_v18 = vpop.f32.mrb[115].mxu1  ;;  %v19924_v12 = vld [vmem:[%s23481_s18 + $0x30] sm:$0xff]   ;;  %v19926_v16 = vld [vmem:[%s23481_s18 + $0x40] sm:$0xff]  }
 0xce8   : > { %v7786_v52 = vpack.c.bf16 %v7091_v18, %v7088_v15  ;;  %v19925_v15 = vld [vmem:[%s23481_s18 + $0x38] sm:$0xff]   ;;  %v19935_v18 = vld [vmem:[%s23485_s1 + $0x40] sm:$0xff]  }
 0xceb   : > { %18017 = vmatmul.mubr.msk.bf16.gmra.mrb[112].mxu0 %vm3525_vm3, %v7692_v4  ;;  %v23482_v4 = vmax.f32 %v21757_v48, 0.0 }
 0xcec   : > { %18022 = vmatprep.mubr.msk.bf16.mxu0 %vm3525_vm3, %v7784_v13  ;;  %v17944_v20 = vpop.f32.mrb[116].mxu1  ;;  %v19922_v13 = vld [vmem:[%s23481_s18 + $0x20] sm:$0xff]  }
 0xced   : > { %v7104_v21 = vpop.f32.mrb[117].mxu1 }
 0xcee   : > { %v17945_v22 = vpop.f32.mrb[118].mxu1 }
 0xcef   : > { %v7880_v23 = vpack.c.bf16 %v17945_v22, %v17944_v20  ;;  %v7107_v19 = vpop.f32.mrb[119].mxu1 }
 0xcf0   : > { %v7879_v24 = vpack.c.bf16 %v7107_v19, %v7104_v21 }
 0xcf3   : > { %18023 = vmatmul.mubr.msk.bf16.vlgmr.msra.gmra.mrb[108].mxu0 %vm3525_vm3, %v7785_v46  ;;  %v19920_v46 = vld [vmem:[%s23481_s18 + $0x10] sm:$0xff]  }
 0xcf4   : > { %18026 = vmatprep.mubr.msk.bf16.mxu0 %vm3525_vm3, %v7786_v52  ;;  %18031 = vmatpush3.bf16.msra.mxu0 %v19917_v14  ;;  %v17948_v25 = vpop.f32.mrb[120].mxu1  ;;  %v19923_v14 = vld [vmem:[%s23481_s18 + $0x28] sm:$0xff]  }
 0xcf5   : > { %v7120_v26 = vpop.f32.mrb[121].mxu1  ;;  %18084 = vmatprep.subr.bf16.mxu0 %v20674_v30 }
 0xcf6   : > { %v17949_v27 = vpop.f32.mrb[122].mxu1 }
 0xcf7   : > { %v7882_v36 = vpack.c.bf16 %v17949_v27, %v17948_v25  ;;  %v7123_v28 = vpop.f32.mrb[123].mxu1 }
 0xcf8   : > { %v7881_v29 = vpack.c.bf16 %v7123_v28, %v7120_v26  ;;  %v19928_v26 = vld [vmem:[%s23485_s1] sm:$0xff]  }
 0xcfb   : > { %18027 = vmatmul.mubr.msk.bf16.gmra.mrb[112].mxu0 %vm3525_vm3, %v7787_v17  ;;  %v19927_v17 = vld [vmem:[%s23484_s26 + $0x8] sm:$0xff]   ;;  %s23491_s26 = sld [smem:[#allocation47_spill]] }
 0xcfc   : > { %18032 = vmatprep.mubr.msk.bf16.mxu0 %vm3525_vm3, %v7879_v24 }
 0xd03   : > { %18033 = vmatmul.mubr.msk.bf16.vlgmr.msra.gmra.mrb[108].mxu0 %vm3525_vm3, %v7880_v23 }
 0xd04   : > { %18036 = vmatprep.mubr.msk.bf16.mxu0 %vm3525_vm3, %v7881_v29  ;;  %18085 = vmatpush3.bf16.msra.mxu0 %v19927_v17 }
 0xd05   : > { %18090 = vmatprep.subr.bf16.mxu0 %v20674_v30 }
 0xd0b   : > { %18037 = vmatmul.mubr.msk.bf16.gmra.mrb[112].mxu0 %vm3525_vm3, %v7882_v36 }
 0xd0c   : > { %18086 = vmatprep.mubr.msk.bf16.mxu0 %vm20675_vm4, %v20674_v30 }
 0xdd6   : > { %v18034_v33 = vpop.f32.mrb[108].mxu0 }
 0xdd7   : > { %v7983_v34 = vadd.f32 %v18034_v33, %v16082_v32  ;;  %v7935_v31 = vpop.f32.mrb[109].mxu0  ;;  %v19929_v33 = vld [vmem:[%s23485_s1 + $0x10] sm:$0xff]  }
 0xdd8   : > { %v7981_v1 = vadd.f32 %v16082_v32, %v7935_v31  ;;  %v18035_v54 = vpop.f32.mrb[110].mxu0 }
 0xdd9   : > { %v7991_v49 = vadd.f32 %v7983_v34, %v5581_v58  ;;  %v7984_v41 = vadd.f32 %v18035_v54, %v16082_v32  ;;  %v7938_v7 = vpop.f32.mrb[111].mxu0 }
 0xdda   : > { %v7989_v9 = vadd.f32 %v7981_v1, %v5579_v63  ;;  %v7982_v2 = vadd.f32 %v16082_v32, %v7938_v7 }
 0xddb   : > { %v7992_v56 = vadd.f32 %v7984_v41, %v5582_v57  ;;  %v7999_v47 = vmax.f32 %v7991_v49, 0.0  ;;  %v19930_v41 = vld [vmem:[%s23485_s1 + $0x18] sm:$0xff]  }
 0xddc   : > { %v7990_v40 = vadd.f32 %v7982_v2, %v5580_v50  ;;  %v7997_v45 = vmax.f32 %v7989_v9, 0.0 }
 0xddd   : > { %v8000_v55 = vmax.f32 %v7992_v56, 0.0 }
 0xdde   : > { %v7998_v5 = vmax.f32 %v7990_v40, 0.0  ;;  %v18038_v35 = vpop.f32.mrb[112].mxu0 }
 0xddf   : > { %v7987_v42 = vadd.f32 %v18038_v35, %v16082_v32  ;;  %v7951_v59 = vpop.f32.mrb[113].mxu0  ;;  %v22109_v58 = vpack.c.bf16 %v8000_v55, %v7999_v47  ;;  %v19931_v47 = vld [vmem:[%s23485_s1 + $0x20] sm:$0xff]  }
 0xde0   : > { %v7985_v43 = vadd.f32 %v16082_v32, %v7951_v59  ;;  %v18039_v44 = vpop.f32.mrb[114].mxu0  ;;  %v22111_v38 = vpack.c.bf16 %v7998_v5, %v7997_v45  ;;  %v19932_v59 = vld [vmem:[%s23485_s1 + $0x28] sm:$0xff]  }
 0xde1   : > { %v7995_v10 = vadd.f32 %v7987_v42, %v5585_v8  ;;  %v7988_v63 = vadd.f32 %v18039_v44, %v16082_v32  ;;  %v7954_v57 = vpop.f32.mrb[115].mxu0 }
 0xde2   : > { %v7993_v62 = vadd.f32 %v7985_v43, %v5583_v61  ;;  %v7986_v50 = vadd.f32 %v16082_v32, %v7954_v57  ;;  %18041 = vmatpush3.bf16.msra.mxu1 %v22111_v38  ;;  %v19919_v61 = vld [vmem:[%s23481_s18 + $0x8] sm:$0xff]  }
 0xde3   : > { %v7996_v39 = vadd.f32 %v7988_v63, %v23482_v4  ;;  %18042 = vmatprep.subr.bf16.mxu1 %v20674_v30  ;;  %v8003_v51 = vmax.f32 %v7995_v10, 0.0 }
 0xde4   : > { %v7994_v0 = vadd.f32 %v7986_v50, %v23483_v3  ;;  %v8001_v60 = vmax.f32 %v7993_v62, 0.0  ;;  %v19933_v62 = vld [vmem:[%s23485_s1 + $0x30] sm:$0xff]  }
 0xde5   : > { %v8004_v8 = vmax.f32 %v7996_v39, 0.0 }
 0xde6   : > { %v8002_v53 = vmax.f32 %v7994_v0, 0.0  ;;  %18043 = vmatpush3.bf16.msra.mxu1 %v22109_v58 }
 0xde7   : > { %18044 = vmatprep.subr.bf16.mxu1 %v20674_v30  ;;  %v22125_v37 = vpack.c.bf16 %v8004_v8, %v8003_v51  ;;  %v19934_v51 = vld [vmem:[%s23485_s1 + $0x38] sm:$0xff]  }
 0xde8   : > { %v22127_v48 = vpack.c.bf16 %v8002_v53, %v8001_v60 }
 0xdea   : > { %18045 = vmatpush3.bf16.msra.mxu1 %v22127_v48 }
 0xdeb   : > { %18046 = vmatprep.subr.bf16.mxu1 %v20674_v30 }
 0xdee   : > { %18047 = vmatpush3.bf16.msra.mxu1 %v22125_v37 }
 0xdef   : > { %18132 = vmatprep.subr.bf16.mxu1 %v20674_v30 }
 0xdf1   : > { %18049 = vmatmul.mubr.msk.bf16.vlgmr.msra.gmra.mrb[124].mxu1 %vm3081_vm2, %v19918_v6 }
 0xdf2   : > { %18052 = vmatprep.mubr.msk.bf16.mxu1 %vm20675_vm4, %v20674_v30  ;;  %18133 = vmatpush3.bf16.msra.mxu1 %v19935_v18 }
 0xdf3   : > { %18176 = vmatprep.subr.bf16.mxu1 %v20674_v30 }
 0xdf9   : > { %18053 = vmatmul.mubr.msk.bf16.gmra.mrb[128].mxu1 %vm3081_vm2, %v19919_v61 }
 0xdfa   : > { %18056 = vmatprep.mubr.msk.bf16.mxu1 %vm20675_vm4, %v20674_v30 }
 0xe01   : > { %18057 = vmatmul.mubr.msk.bf16.gmra.mrb[132].mxu1 %vm3081_vm2, %v19920_v46 }
 0xe02   : > { %18060 = vmatprep.mubr.msk.bf16.mxu1 %vm20675_vm4, %v20674_v30 }
 0xe09   : > { %18061 = vmatmul.mubr.msk.bf16.gmra.mrb[136].mxu1 %vm3081_vm2, %v19921_v11 }
 0xe0a   : > { %18064 = vmatprep.mubr.msk.bf16.mxu1 %vm20675_vm4, %v20674_v30 }
 0xe11   : > { %18065 = vmatmul.mubr.msk.bf16.gmra.mrb[140].mxu1 %vm3081_vm2, %v19922_v13 }
 0xe12   : > { %18068 = vmatprep.mubr.msk.bf16.mxu1 %vm20675_vm4, %v20674_v30 }
 0xe19   : > { %18069 = vmatmul.mubr.msk.bf16.gmra.mrb[144].mxu1 %vm3081_vm2, %v19923_v14 }
 0xe1a   : > { %18072 = vmatprep.mubr.msk.bf16.mxu1 %vm20675_vm4, %v20674_v30 }
 0xe21   : > { %18073 = vmatmul.mubr.msk.bf16.gmra.mrb[148].mxu1 %vm3081_vm2, %v19924_v12 }
 0xe22   : > { %18076 = vmatprep.mubr.msk.bf16.mxu1 %vm20675_vm4, %v20674_v30 }
 0xe29   : > { %18077 = vmatmul.mubr.msk.bf16.gmra.mrb[152].mxu1 %vm3081_vm2, %v19925_v15 }
 0xe2a   : > { %18080 = vmatprep.mubr.msk.bf16.mxu1 %vm20675_vm4, %v20674_v30 }
 0xe31   : > { %18081 = vmatmul.mubr.msk.bf16.gmra.mrb[156].mxu1 %vm3081_vm2, %v19926_v16 }
 0xe32   : > { %18134 = vmatprep.mubr.msk.bf16.mxu1 %vm20675_vm4, %v20674_v30 }
 0xec4   : > { %v8151_v52 = vpop.f32.mrb[124].mxu1 }
 0xec5   : > { %v18050_v20 = vpop.f32.mrb[125].mxu1 }
 0xec6   : > { %v8154_v21 = vpop.f32.mrb[126].mxu1 }
 0xec7   : > { %v8222_v22 = vpack.c.bf16 %v8154_v21, %v8151_v52  ;;  %v18051_v23 = vpop.f32.mrb[127].mxu1 }
 0xecc   : > { %v8159_v19 = vpop.f32.mrb[128].mxu1 }
 0xecd   : > { %v18054_v24 = vpop.f32.mrb[129].mxu1 }
 0xece   : > { %v8162_v25 = vpop.f32.mrb[130].mxu1 }
 0xecf   : > { %v8223_v27 = vpack.c.bf16 %v8162_v25, %v8159_v19  ;;  %v18055_v36 = vpop.f32.mrb[131].mxu1 }
 0xed1   : > { %18087 = vmatmul.mubr.msk.bf16.vlgmr.msra.gmra.mrb[116].mxu0 %vm3525_vm3, %v8223_v27 }
 0xed2   : > { %18091 = vmatpush3.bf16.msra.mxu0 %v19928_v26  ;;  %18092 = vmatprep.mubr.msk.bf16.mxu0 %vm20675_vm4, %v20674_v30 }
 0xed3   : > { %18096 = vmatprep.subr.bf16.mxu0 %v20674_v30 }
 0xed4   : > { %v8167_v28 = vpop.f32.mrb[132].mxu1 }
 0xed5   : > { %v18058_v29 = vpop.f32.mrb[133].mxu1 }
 0xed6   : > { %v8170_v32 = vpop.f32.mrb[134].mxu1 }
 0xed7   : > { %v8324_v34 = vpack.c.bf16 %v8170_v32, %v8167_v28  ;;  %v18059_v31 = vpop.f32.mrb[135].mxu1 }
 0xed9   : > { %18093 = vmatmul.mubr.msk.bf16.vlgmr.msra.gmra.mrb[120].mxu0 %vm3525_vm3, %v8222_v22 }
 0xeda   : > { %18097 = vmatpush3.bf16.msra.mxu0 %v19929_v33  ;;  %18098 = vmatprep.mubr.msk.bf16.mxu0 %vm20675_vm4, %v20674_v30 }
 0xedb   : > { %18102 = vmatprep.subr.bf16.mxu0 %v20674_v30 }
 0xedc   : > { %v8175_v1 = vpop.f32.mrb[136].mxu1 }
 0xedd   : > { %v18062_v54 = vpop.f32.mrb[137].mxu1 }
 0xede   : > { %v8178_v49 = vpop.f32.mrb[138].mxu1 }
 0xedf   : > { %v8377_v7 = vpack.c.bf16 %v8178_v49, %v8175_v1  ;;  %v18063_v9 = vpop.f32.mrb[139].mxu1 }
 0xee1   : > { %18099 = vmatmul.mubr.msk.bf16.vlgmr.msra.gmra.mrb[124].mxu0 %vm3525_vm3, %v8324_v34 }
 0xee2   : > { %18103 = vmatpush3.bf16.msra.mxu0 %v19930_v41  ;;  %18104 = vmatprep.mubr.msk.bf16.mxu0 %vm20675_vm4, %v20674_v30 }
 0xee3   : > { %18108 = vmatprep.subr.bf16.mxu0 %v20674_v30 }
 0xee4   : > { %v8183_v2 = vpop.f32.mrb[140].mxu1 }
 0xee5   : > { %v18066_v56 = vpop.f32.mrb[141].mxu1 }
 0xee6   : > { %v8186_v40 = vpop.f32.mrb[142].mxu1 }
 0xee7   : > { %v8430_v55 = vpack.c.bf16 %v8186_v40, %v8183_v2  ;;  %v18067_v45 = vpop.f32.mrb[143].mxu1 }
 0xee9   : > { %18105 = vmatmul.mubr.msk.bf16.vlgmr.msra.gmra.mrb[128].mxu0 %vm3525_vm3, %v8377_v7 }
 0xeea   : > { %18109 = vmatpush3.bf16.msra.mxu0 %v19931_v47  ;;  %18110 = vmatprep.mubr.msk.bf16.mxu0 %vm20675_vm4, %v20674_v30 }
 0xeeb   : > { %18114 = vmatprep.subr.bf16.mxu0 %v20674_v30 }
 0xeec   : > { %v8191_v5 = vpop.f32.mrb[144].mxu1 }
 0xeed   : > { %v18070_v35 = vpop.f32.mrb[145].mxu1 }
 0xeee   : > { %v8194_v42 = vpop.f32.mrb[146].mxu1 }
 0xeef   : > { %v8483_v43 = vpack.c.bf16 %v8194_v42, %v8191_v5  ;;  %v18071_v44 = vpop.f32.mrb[147].mxu1 }
 0xef1   : > { %18111 = vmatmul.mubr.msk.bf16.vlgmr.msra.gmra.mrb[132].mxu0 %vm3525_vm3, %v8430_v55 }
 0xef2   : > { %18115 = vmatpush3.bf16.msra.mxu0 %v19932_v59  ;;  %18116 = vmatprep.mubr.msk.bf16.mxu0 %vm20675_vm4, %v20674_v30 }
 0xef3   : > { %18120 = vmatprep.subr.bf16.mxu0 %v20674_v30 }
 0xef4   : > { %v8199_v10 = vpop.f32.mrb[148].mxu1 }
 0xef5   : > { %v18074_v63 = vpop.f32.mrb[149].mxu1 }
 0xef6   : > { %v8202_v57 = vpop.f32.mrb[150].mxu1 }
 0xef7   : > { %v8536_v50 = vpack.c.bf16 %v8202_v57, %v8199_v10  ;;  %v18075_v4 = vpop.f32.mrb[151].mxu1 }
 0xef9   : > { %18117 = vmatmul.mubr.msk.bf16.vlgmr.msra.gmra.mrb[136].mxu0 %vm3525_vm3, %v8483_v43 }
 0xefa   : > { %18121 = vmatpush3.bf16.msra.mxu0 %v19933_v62  ;;  %18122 = vmatprep.mubr.msk.bf16.mxu0 %vm20675_vm4, %v20674_v30 }
 0xefb   : > { %18126 = vmatprep.subr.bf16.mxu0 %v20674_v30 }
 0xefc   : > { %v8207_v39 = vpop.f32.mrb[152].mxu1 }
 0xefd   : > { %v18078_v3 = vpop.f32.mrb[153].mxu1 }
 0xefe   : > { %v8210_v0 = vpop.f32.mrb[154].mxu1 }
 0xeff   : > { %v8589_v8 = vpack.c.bf16 %v8210_v0, %v8207_v39  ;;  %v18079_v60 = vpop.f32.mrb[155].mxu1 }
 0xf01   : > { %18123 = vmatmul.mubr.msk.bf16.vlgmr.msra.gmra.mrb[140].mxu0 %vm3525_vm3, %v8536_v50  ;;  %v16119_v50 = vld [vmem:[%s23486_s8] ss:$0 sm:$0xff]  ;;  %s23492_s8 = sld [smem:[#allocation49_spill]] }
 0xf02   : > { %18127 = vmatpush3.bf16.msra.mxu0 %v19934_v51  ;;  %18128 = vmatprep.mubr.msk.bf16.mxu0 %vm20675_vm4, %v20674_v30 }
 0xf03   : > { %18138 = vmatprep.subr.bf16.mxu0 %v20674_v30 }
 0xf04   : > { %v8215_v53 = vpop.f32.mrb[156].mxu1 }
 0xf05   : > { %v18082_v6 = vpop.f32.mrb[157].mxu1 }
 0xf06   : > { %v8218_v61 = vpop.f32.mrb[158].mxu1 }
 0xf07   : > { %v8642_v46 = vpack.c.bf16 %v8218_v61, %v8215_v53  ;;  %v18083_v11 = vpop.f32.mrb[159].mxu1 }
 0xf08   : > { %v22216_v11 = vld [vmem:[%s23487_s10] sm:$0xff]  }
 0xf09   : > { %18129 = vmatmul.mubr.msk.bf16.vlgmr.msra.gmra.mrb[144].mxu0 %vm3525_vm3, %v8589_v8  ;;  %18135 = vmatmul.mubr.msk.bf16.vlgmr.msra.gmra.mrb[160].mxu1 %vm3525_vm3, %v8642_v46 }
 0xf0a   : > { %18140 = vmatprep.mubr.msk.bf16.mxu0 %vm20675_vm4, %v20674_v30  ;;  %18180 = vmatprep.mubr.msk.bf16.mxu1 %vm20675_vm4, %v20674_v30 }
 0xfa4   : > { %v8267_v13 = vpop.f32.mrb[116].mxu0 }
 0xfa5   : > { %v18088_v14 = vpop.f32.mrb[117].mxu0 }
 0xfa6   : > { %v8270_v12 = vpop.f32.mrb[118].mxu0  ;;  %v22267_v14 = vld [vmem:[%s23487_s10 + $0x30] sm:$0xff]  }
 0xfa7   : > { %v18089_v15 = vpop.f32.mrb[119].mxu0 }
 0xfa8   : > { %v22281_v15 = vld [vmem:[%s23487_s10 + $0x40] sm:$0xff]  }
 0xfac   : > { %v8317_v16 = vpop.f32.mrb[120].mxu0 }
 0xfad   : > { %v8318_v17 = vadd.f32 %v8317_v16, %v8267_v13  ;;  %v18094_v18 = vpop.f32.mrb[121].mxu0  ;;  %v22226_v13 = vld [vmem:[%s23487_s10 + $0x8] sm:$0xff]   ;;  %v19945_v16 = vld [vmem:[%s23488_s11] sm:$0xff]   ;;  %s23493_s11 = sld [smem:[#allocation50_spill]] }
 0xfae   : > { %v8320_v52 = vpop.f32.mrb[122].mxu0  ;;  %v19947_v18 = vld [vmem:[%s23489_s16 + $0x18] sm:$0xff]  }
 0xfaf   : > { %v8321_v20 = vadd.f32 %v8320_v52, %v8270_v12  ;;  %v18095_v21 = vpop.f32.mrb[123].mxu0  ;;  %v22274_v12 = vld [vmem:[%s23487_s10 + $0x38] sm:$0xff]  }
 0xfb4   : > { %v8368_v22 = vpop.f32.mrb[124].mxu0 }
 0xfb5   : > { %v8375_v23 = vadd.f32 %v8368_v22, %v8318_v17  ;;  %v18100_v19 = vpop.f32.mrb[125].mxu0  ;;  %v19946_v17 = vld [vmem:[%s23489_s16 + $0x10] sm:$0xff]  }
 0xfb6   : > { %v8371_v24 = vpop.f32.mrb[126].mxu0  ;;  %18177 = vmatpush3.bf16.msra.mxu1 %v19946_v17 }
 0xfb7   : > { %v8376_v25 = vadd.f32 %v8371_v24, %v8321_v20  ;;  %v18101_v26 = vpop.f32.mrb[127].mxu0  ;;  %18178 = vmatprep.subr.bf16.mxu1 %v20674_v30 }
 0xfb8   : > { %v19948_v26 = vld [vmem:[%s23489_s16] sm:$0xff]  }
 0xfba   : > { %18179 = vmatpush3.bf16.msra.mxu1 %v19947_v18 }
 0xfbb   : > { %18184 = vmatprep.subr.bf16.mxu1 %v20674_v30 }
 0xfbc   : > { %v8421_v27 = vpop.f32.mrb[128].mxu0 }
 0xfbd   : > { %v8428_v36 = vadd.f32 %v8421_v27, %v8375_v23  ;;  %v18106_v28 = vpop.f32.mrb[129].mxu0 }
 0xfbe   : > { %v8424_v29 = vpop.f32.mrb[130].mxu0  ;;  %v19949_v28 = vld [vmem:[%s23489_s16 + $0x8] sm:$0xff]  }
 0xfbf   : > { %v8429_v32 = vadd.f32 %v8424_v29, %v8376_v25  ;;  %v18107_v33 = vpop.f32.mrb[131].mxu0 }
 0xfc4   : > { %v8474_v34 = vpop.f32.mrb[132].mxu0 }
 0xfc5   : > { %v8481_v31 = vadd.f32 %v8474_v34, %v8428_v36  ;;  %v18112_v1 = vpop.f32.mrb[133].mxu0 }
 0xfc6   : > { %v8477_v54 = vpop.f32.mrb[134].mxu0  ;;  %v19950_v1 = vld [vmem:[%s23489_s16 + $0x20] sm:$0xff]  }
 0xfc7   : > { %v8482_v49 = vadd.f32 %v8477_v54, %v8429_v32  ;;  %v18113_v41 = vpop.f32.mrb[135].mxu0 }
 0xfc8   : > { %v19951_v41 = vld [vmem:[%s23489_s16 + $0x28] sm:$0xff]  }
 0xfcc   : > { %v8527_v7 = vpop.f32.mrb[136].mxu0 }
 0xfcd   : > { %v8534_v9 = vadd.f32 %v8527_v7, %v8481_v31  ;;  %v18118_v2 = vpop.f32.mrb[137].mxu0 }
 0xfce   : > { %v8530_v56 = vpop.f32.mrb[138].mxu0 }
 0xfcf   : > { %v8535_v40 = vadd.f32 %v8530_v56, %v8482_v49  ;;  %v18119_v47 = vpop.f32.mrb[139].mxu0 }
 0xfd0   : > { %v19952_v47 = vld [vmem:[%s23489_s16 + $0x30] sm:$0xff]  }
 0xfd4   : > { %v8580_v55 = vpop.f32.mrb[140].mxu0 }
 0xfd5   : > { %v8587_v45 = vadd.f32 %v8580_v55, %v8534_v9  ;;  %v18124_v5 = vpop.f32.mrb[141].mxu0 }
 0xfd6   : > { %v8583_v35 = vpop.f32.mrb[142].mxu0 }
 0xfd7   : > { %v8588_v42 = vadd.f32 %v8583_v35, %v8535_v40  ;;  %v18125_v59 = vpop.f32.mrb[143].mxu0  ;;  %v19953_v35 = vld [vmem:[%s23489_s16 + $0x38] sm:$0xff]  }
 0xfdc   : > { %v8633_v43 = vpop.f32.mrb[144].mxu0  ;;  %v8686_v44 = vpop.f32.mrb[160].mxu1 }
 0xfdd   : > { %v18130_v10 = vpop.f32.mrb[145].mxu0  ;;  %v8640_v63 = vadd.f32 %v8633_v43, %v8587_v45  ;;  %v18136_v57 = vpop.f32.mrb[161].mxu1 }
 0xfde   : > { %v8636_v62 = vpop.f32.mrb[146].mxu0  ;;  %v8689_v4 = vpop.f32.mrb[162].mxu1 }
 0xfdf   : > { %v8693_v39 = vadd.f32 %v8686_v44, %v8640_v63  ;;  %v8641_v3 = vadd.f32 %v8636_v62, %v8588_v42  ;;  %v18131_v0 = vpop.f32.mrb[147].mxu0  ;;  %v18137_v51 = vpop.f32.mrb[163].mxu1  ;;  %v19954_v63 = vld [vmem:[%s23489_s16 + $0x40] sm:$0xff]  }
 0xfe1   : > { %v8702_v8 = vadd.f32 %v16119_v50, %v8693_v39  ;;  %v8694_v60 = vadd.f32 %v8689_v4, %v8641_v3 }
 0xfe3   : > { %v8703_v53 = vadd.f32 %v16119_v50, %v8694_v60  ;;  %v8704_v6 = vmax.f32 %v8702_v8, 0.0  ;;  %v19955_v50 = vld [vmem:[%s23489_s16 + $0x48] sm:$0xff]   ;;  %v19956_v8 = vld [vmem:[%s23489_s16 + $0x50] sm:$0xff]  }
 0xfe5   : > { %v8705_v61 = vmax.f32 %v8703_v53, 0.0 }
 0xfe7   : > { %v8760_v46 = vpack.c.bf16 %v8705_v61, %v8704_v6  ;;  %v19957_v61 = vld [vmem:[%s23489_s16 + $0x58] sm:$0xff]  }
 0xfe9   : > { %18139 = vmatpush3.bf16.msra.mxu0 %v8760_v46 }
 0xfea   : > { %18248 = vmatprep.subr.bf16.mxu0 %v20674_v30 }
 0xfec   : > { %18141 = vmatmul.mubr.msk.bf16.vlgmr.msra.gmra.mrb[148].mxu0 %vm3525_vm3, %v22216_v11 }
 0xfed   : > { %18249 = vmatpush3.bf16.msra.mxu0 %v22111_v38  ;;  %18144 = vmatprep.mubr.msk.bf16.mxu0 %vm20675_vm4, %v20674_v30  ;;  %v22237_v38 = vld [vmem:[%s23487_s10 + $0x10] sm:$0xff]  }
 0xfee   : > { %18250 = vmatprep.subr.bf16.mxu0 %v20674_v30 }
 0xff1   : > { %18251 = vmatpush3.bf16.msra.mxu0 %v22109_v58  ;;  %v22246_v58 = vld [vmem:[%s23487_s10 + $0x18] sm:$0xff]  }
 0xff2   : > { %18252 = vmatprep.subr.bf16.mxu0 %v20674_v30 }
 0xff4   : > { %18145 = vmatmul.mubr.msk.bf16.gmra.mrb[152].mxu0 %vm3525_vm3, %v22226_v13 }
 0xff5   : > { %18253 = vmatpush3.bf16.msra.mxu0 %v22127_v48  ;;  %18148 = vmatprep.mubr.msk.bf16.mxu0 %vm20675_vm4, %v20674_v30  ;;  %v22260_v48 = vld [vmem:[%s23487_s10 + $0x28] sm:$0xff]  }
 0xff6   : > { %18254 = vmatprep.subr.bf16.mxu0 %v20674_v30 }
 0xff9   : > { %18255 = vmatpush3.bf16.msra.mxu0 %v22125_v37  ;;  %v22253_v37 = vld [vmem:[%s23487_s10 + $0x20] sm:$0xff]  }
 0xffa   : > { %18266 = vmatprep.subr.bf16.mxu0 %v20674_v30 }
 0xffc   : > { %18149 = vmatmul.mubr.msk.bf16.gmra.mrb[156].mxu0 %vm3525_vm3, %v22237_v38 }
 0xffd   : > { %18152 = vmatprep.mubr.msk.bf16.mxu0 %vm20675_vm4, %v20674_v30 }
0x1004   : > { %18153 = vmatmul.mubr.msk.bf16.gmra.mrb[160].mxu0 %vm3525_vm3, %v22246_v58 }
0x1005   : > { %18156 = vmatprep.mubr.msk.bf16.mxu0 %vm20675_vm4, %v20674_v30 }
0x100c   : > { %18157 = vmatmul.mubr.msk.bf16.gmra.mrb[164].mxu0 %vm3525_vm3, %v22253_v37 }
0x100d   : > { %18160 = vmatprep.mubr.msk.bf16.mxu0 %vm20675_vm4, %v20674_v30 }
0x1014   : > { %18161 = vmatmul.mubr.msk.bf16.gmra.mrb[168].mxu0 %vm3525_vm3, %v22260_v48 }
0x1015   : > { %18164 = vmatprep.mubr.msk.bf16.mxu0 %vm20675_vm4, %v20674_v30 }
0x101c   : > { %18165 = vmatmul.mubr.msk.bf16.gmra.mrb[172].mxu0 %vm3525_vm3, %v22267_v14 }
0x101d   : > { %18168 = vmatprep.mubr.msk.bf16.mxu0 %vm20675_vm4, %v20674_v30 }
0x1024   : > { %18169 = vmatmul.mubr.msk.bf16.gmra.mrb[176].mxu0 %vm3525_vm3, %v22274_v12 }
0x1025   : > { %18172 = vmatprep.mubr.msk.bf16.mxu0 %vm20675_vm4, %v20674_v30 }
0x102c   : > { %18173 = vmatmul.mubr.msk.bf16.gmra.mrb[180].mxu0 %vm3525_vm3, %v22281_v15 }
0x102d   : > { %18256 = vmatprep.mubr.msk.bf16.mxu0 %vm20675_vm4, %v20674_v30 }
0x1034   : > { %18257 = vmatmul.mubr.msk.bf16.vlgmr.msra.gmra.mrb[184].mxu0 %vm3081_vm2, %v19945_v16 }
0x1035   : > { %18268 = vmatprep.mubr.msk.bf16.mxu0 %vm20675_vm4, %v20674_v30 }
0x10bf   : > { %v8867_v52 = vpop.f32.mrb[148].mxu0 }
0x10c0   : > { %v18142_v20 = vpop.f32.mrb[149].mxu0 }
0x10c1   : > { %v8870_v21 = vpop.f32.mrb[150].mxu0  ;;  %v19958_v20 = vld [vmem:[%s23489_s16 + $0x60] sm:$0xff]  }
0x10c2   : > { %v8938_v22 = vpack.c.bf16 %v8870_v21, %v8867_v52  ;;  %v18143_v23 = vpop.f32.mrb[151].mxu0 }
0x10c3   : > { %v19959_v23 = vld [vmem:[%s23489_s16 + $0x68] sm:$0xff]  }
0x10c7   : > { %v8875_v19 = vpop.f32.mrb[152].mxu0 }
0x10c8   : > { %v18146_v24 = vpop.f32.mrb[153].mxu0 }
0x10c9   : > { %v8878_v25 = vpop.f32.mrb[154].mxu0 }
0x10ca   : > { %v8939_v27 = vpack.c.bf16 %v8878_v25, %v8875_v19  ;;  %v18147_v36 = vpop.f32.mrb[155].mxu0 }
0x10cb   : > { %v19962_v36 = vld [vmem:[%s23489_s16 + $0x80] sm:$0xff]  }
0x10cc   : > { %18181 = vmatmul.mubr.msk.bf16.vlgmr.msra.gmra.mrb[164].mxu1 %vm8952_vm5, %v8939_v27  ;;  %v19961_v27 = vld [vmem:[%s23489_s16 + $0x78] sm:$0xff]  }
0x10cd   : > { %18185 = vmatpush3.bf16.msra.mxu1 %v19948_v26  ;;  %18188 = vmatprep.mubr.msk.bf16.mxu1 %vm20675_vm4, %v20674_v30  ;;  %v19960_v26 = vld [vmem:[%s23489_s16 + $0x70] sm:$0xff]  }
0x10ce   : > { %18186 = vmatprep.subr.bf16.mxu1 %v20674_v30 }
0x10cf   : > { %v8883_v29 = vpop.f32.mrb[156].mxu0 }
0x10d0   : > { %v18150_v32 = vpop.f32.mrb[157].mxu0 }
0x10d1   : > { %18187 = vmatpush3.bf16.msra.mxu1 %v19949_v28  ;;  %v8886_v33 = vpop.f32.mrb[158].mxu0  ;;  %v19963_v28 = vld [vmem:[%s23489_s16 + $0x88] sm:$0xff]   ;;  %v16165_v32 = vld [vmem:[%s23491_s26] ss:$0 sm:$0xff]  ;;  %s23495_s26 = sld [smem:[#allocation52_spill]] }
0x10d2   : > { %18192 = vmatprep.subr.bf16.mxu1 %v20674_v30  ;;  %v9053_v34 = vpack.c.bf16 %v8886_v33, %v8883_v29  ;;  %v18151_v31 = vpop.f32.mrb[159].mxu0  ;;  %v19964_v29 = vld [vmem:[%s23490_s22] sm:$0xff]   ;;  %s23494_s22 = sld [smem:[#allocation51_spill]] }
0x10d3   : > { %v16168_v33 = vld [vmem:[%s23492_s8] ss:$0 sm:$0xff] }
0x10d7   : > { %v8891_v54 = vpop.f32.mrb[160].mxu0  ;;  %s23496_s8 = smov %s23495_s26 }
0x10d8   : > { %18189 = vmatmul.mubr.msk.bf16.vlgmr.msra.gmra.mrb[164].mxu1 %vm8952_vm5, %v8938_v22  ;;  %v18154_v49 = vpop.f32.mrb[161].mxu0 }
0x10d9   : > { %18193 = vmatpush3.bf16.msra.mxu1 %v19950_v1  ;;  %18196 = vmatprep.mubr.msk.bf16.mxu1 %vm20675_vm4, %v20674_v30  ;;  %v8894_v7 = vpop.f32.mrb[162].mxu0 }
0x10da   : > { %18194 = vmatprep.subr.bf16.mxu1 %v20674_v30  ;;  %v9112_v9 = vpack.c.bf16 %v8894_v7, %v8891_v54  ;;  %v18155_v2 = vpop.f32.mrb[163].mxu0 }
0x10dd   : > { %18195 = vmatpush3.bf16.msra.mxu1 %v19951_v41 }
0x10de   : > { %18200 = vmatprep.subr.bf16.mxu1 %v20674_v30 }
0x10df   : > { %v8899_v56 = vpop.f32.mrb[164].mxu0 }
0x10e0   : > { %v18158_v40 = vpop.f32.mrb[165].mxu0 }
0x10e1   : > { %v8902_v55 = vpop.f32.mrb[166].mxu0  ;;  %v19965_v40 = vld [vmem:[%s23493_s11 + $0x10] sm:$0xff]  }
0x10e2   : > { %v9171_v45 = vpack.c.bf16 %v8902_v55, %v8899_v56  ;;  %v18159_v5 = vpop.f32.mrb[167].mxu0 }
0x10e4   : > { %18197 = vmatmul.mubr.msk.bf16.vlgmr.msra.gmra.mrb[164].mxu1 %vm8952_vm5, %v9053_v34  ;;  %v19200_v34 = vadd.f32 %v16168_v33, %v16165_v32 }
0x10e5   : > { %18201 = vmatpush3.bf16.msra.mxu1 %v19952_v47  ;;  %18204 = vmatprep.mubr.msk.bf16.mxu1 %vm20675_vm4, %v20674_v30  ;;  %v19966_v47 = vld [vmem:[%s23493_s11 + $0x18] sm:$0xff]  }
0x10e6   : > { %18202 = vmatprep.subr.bf16.mxu1 %v20674_v30 }
0x10e7   : > { %v8907_v42 = vpop.f32.mrb[168].mxu0 }
0x10e8   : > { %v18162_v59 = vpop.f32.mrb[169].mxu0 }
0x10e9   : > { %18203 = vmatpush3.bf16.msra.mxu1 %v19953_v35  ;;  %v8910_v43 = vpop.f32.mrb[170].mxu0 }
0x10ea   : > { %18208 = vmatprep.subr.bf16.mxu1 %v20674_v30  ;;  %v9230_v44 = vpack.c.bf16 %v8910_v43, %v8907_v42  ;;  %v18163_v10 = vpop.f32.mrb[171].mxu0 }
0x10eb   : > { %v19967_v10 = vld [vmem:[%s23493_s11] sm:$0xff]  }
0x10ef   : > { %v8915_v57 = vpop.f32.mrb[172].mxu0 }
0x10f0   : > { %18205 = vmatmul.mubr.msk.bf16.vlgmr.msra.gmra.mrb[164].mxu1 %vm8952_vm5, %v9112_v9  ;;  %v18166_v62 = vpop.f32.mrb[173].mxu0 }
0x10f1   : > { %18209 = vmatpush3.bf16.msra.mxu1 %v19954_v63  ;;  %18212 = vmatprep.mubr.msk.bf16.mxu1 %vm20675_vm4, %v20674_v30  ;;  %v8918_v4 = vpop.f32.mrb[174].mxu0  ;;  %v19968_v62 = vld [vmem:[%s23493_s11 + $0x8] sm:$0xff]  }
0x10f2   : > { %18210 = vmatprep.subr.bf16.mxu1 %v20674_v30  ;;  %v9289_v39 = vpack.c.bf16 %v8918_v4, %v8915_v57  ;;  %v18167_v3 = vpop.f32.mrb[175].mxu0 }
0x10f5   : > { %18211 = vmatpush3.bf16.msra.mxu1 %v19955_v50 }
0x10f6   : > { %18216 = vmatprep.subr.bf16.mxu1 %v20674_v30 }
0x10f7   : > { %v8923_v0 = vpop.f32.mrb[176].mxu0 }
0x10f8   : > { %v18170_v51 = vpop.f32.mrb[177].mxu0 }
0x10f9   : > { %v8926_v60 = vpop.f32.mrb[178].mxu0 }
0x10fa   : > { %v9348_v53 = vpack.c.bf16 %v8926_v60, %v8923_v0  ;;  %v18171_v6 = vpop.f32.mrb[179].mxu0 }
0x10fb   : > { %v19971_v6 = vld [vmem:[%s23493_s11 + $0x30] sm:$0xff]  }
0x10fc   : > { %18213 = vmatmul.mubr.msk.bf16.vlgmr.msra.gmra.mrb[164].mxu1 %vm8952_vm5, %v9171_v45 }
0x10fd   : > { %18217 = vmatpush3.bf16.msra.mxu1 %v19956_v8  ;;  %18220 = vmatprep.mubr.msk.bf16.mxu1 %vm20675_vm4, %v20674_v30  ;;  %v19970_v8 = vld [vmem:[%s23493_s11 + $0x28] sm:$0xff]  }
0x10fe   : > { %18218 = vmatprep.subr.bf16.mxu1 %v20674_v30 }
0x10ff   : > { %v8931_v46 = vpop.f32.mrb[180].mxu0 }
0x1100   : > { %v18174_v16 = vpop.f32.mrb[181].mxu0 }
0x1101   : > { %18219 = vmatpush3.bf16.msra.mxu1 %v19957_v61  ;;  %v8934_v17 = vpop.f32.mrb[182].mxu0 }
0x1102   : > { %18224 = vmatprep.subr.bf16.mxu1 %v20674_v30  ;;  %v9407_v18 = vpack.c.bf16 %v8934_v17, %v8931_v46  ;;  %v18175_v52 = vpop.f32.mrb[183].mxu0  ;;  %v19972_v17 = vld [vmem:[%s23493_s11 + $0x38] sm:$0xff]  }
0x1107   : > { %v9519_v21 = vpop.f32.mrb[184].mxu0 }
0x1108   : > { %18221 = vmatmul.mubr.msk.bf16.vlgmr.msra.gmra.mrb[164].mxu1 %vm8952_vm5, %v9230_v44  ;;  %v18258_v22 = vpop.f32.mrb[185].mxu0 }
0x1109   : > { %18225 = vmatpush3.bf16.msra.mxu1 %v19958_v20  ;;  %18228 = vmatprep.mubr.msk.bf16.mxu1 %vm20675_vm4, %v20674_v30  ;;  %v9522_v19 = vpop.f32.mrb[186].mxu0  ;;  %v19973_v20 = vld [vmem:[%s23493_s11 + $0x40] sm:$0xff]  }
0x110a   : > { %18226 = vmatprep.subr.bf16.mxu1 %v20674_v30  ;;  %v9528_v24 = vpack.c.bf16 %v9522_v19, %v9519_v21  ;;  %v18259_v25 = vpop.f32.mrb[187].mxu0  ;;  %v19974_v19 = vld [vmem:[%s23493_s11 + $0x48] sm:$0xff]  }
0x110d   : > { %18227 = vmatpush3.bf16.msra.mxu1 %v19959_v23 }
0x110e   : > { %18232 = vmatprep.subr.bf16.mxu1 %v20674_v30 }
0x1114   : > { %18229 = vmatmul.mubr.msk.bf16.vlgmr.msra.gmra.mrb[164].mxu1 %vm8952_vm5, %v9289_v39  ;;  %v19969_v39 = vld [vmem:[%s23493_s11 + $0x20] sm:$0xff]  }
0x1115   : > { %18233 = vmatpush3.bf16.msra.mxu1 %v19960_v26  ;;  %18236 = vmatprep.mubr.msk.bf16.mxu1 %vm20675_vm4, %v20674_v30  ;;  %v19975_v26 = vld [vmem:[%s23493_s11 + $0x50] sm:$0xff]  }
0x1116   : > { %18234 = vmatprep.subr.bf16.mxu1 %v20674_v30 }
0x1119   : > { %18235 = vmatpush3.bf16.msra.mxu1 %v19961_v27 }
0x111a   : > { %18240 = vmatprep.subr.bf16.mxu1 %v20674_v30 }
0x1120   : > { %18237 = vmatmul.mubr.msk.bf16.vlgmr.msra.gmra.mrb[164].mxu1 %vm8952_vm5, %v9348_v53 }
0x1121   : > { %18241 = vmatpush3.bf16.msra.mxu1 %v19962_v36  ;;  %18244 = vmatprep.mubr.msk.bf16.mxu1 %vm20675_vm4, %v20674_v30 }
0x1122   : > { %18242 = vmatprep.subr.bf16.mxu1 %v20674_v30 }
0x1125   : > { %18243 = vmatpush3.bf16.msra.mxu1 %v19963_v28 }
0x1126   : > { %18260 = vmatprep.subr.bf16.mxu1 %v20674_v30 }
0x112c   : > { %18245 = vmatmul.mubr.msk.bf16.vlgmr.msra.gmra.mrb[164].mxu1 %vm8952_vm5, %v9407_v18 }
0x112d   : > { %18261 = vmatpush3.bf16.msra.mxu1 %v19964_v29  ;;  %18262 = vmatprep.mubr.msk.bf16.mxu1 %vm20675_vm4, %v20674_v30  ;;  %v19976_v29 = vld [vmem:[%s23493_s11 + $0x58] sm:$0xff]  }
0x112e   : > { %18304 = vmatprep.subr.bf16.mxu1 %v20674_v30 }
0x1138   : > { %18263 = vmatmul.mubr.msk.bf16.vlgmr.msra.gmra.mrb[164].mxu1 %vm3525_vm3, %v9528_v24 }
0x1139   : > { %18308 = vmatprep.mubr.msk.bf16.mxu1 %vm20675_vm4, %v20674_v30  ;;  %18305 = vmatpush3.bf16.msra.mxu1 %v19965_v40 }
0x113a   : > { %18306 = vmatprep.subr.bf16.mxu1 %v20674_v30 }
0x113d   : > { %18307 = vmatpush3.bf16.msra.mxu1 %v19966_v47  ;;  %v19979_v47 = vld [vmem:[%s23493_s11 + $0x70] sm:$0xff]  }
0x113e   : > { %18312 = vmatprep.subr.bf16.mxu1 %v20674_v30 }
0x120b   : > { %v9579_v31 = vpop.f32.mrb[164].mxu1 }
0x120c   : > { %v22361_v1 = vadd.f32 %v19200_v34, %v9579_v31  ;;  %v18264_v54 = vpop.f32.mrb[165].mxu1 }
0x120d   : > { %v9582_v49 = vpop.f32.mrb[166].mxu1 }
0x120e   : > { %v22363_v41 = vadd.f32 %v19200_v34, %v9582_v49  ;;  %v18265_v7 = vpop.f32.mrb[167].mxu1  ;;  %v9588_v9 = vmax.f32 %v22361_v1, 0.0  ;;  %v19977_v34 = vld [vmem:[%s23493_s11 + $0x60] sm:$0xff]  }
0x120f   : > { %v19978_v7 = vld [vmem:[%s23493_s11 + $0x68] sm:$0xff]  }
0x1210   : > { %v9589_v2 = vmax.f32 %v22363_v41, 0.0 }
0x1212   : > { %v9626_v56 = vpack.c.bf16 %v9589_v2, %v9588_v9 }
0x1214   : > { %18267 = vmatpush3.bf16.msra.mxu0 %v9626_v56 }
0x1215   : > { %18376 = vmatprep.subr.bf16.mxu0 %v20674_v30 }
0x1217   : > { %18269 = vmatmul.mubr.msk.bf16.vlgmr.msra.gmra.mrb[188].mxu0 %vm3525_vm3, %v22216_v11 }
0x1218   : > { %18272 = vmatprep.mubr.msk.bf16.mxu0 %vm20675_vm4, %v20674_v30 }
0x121f   : > { %18273 = vmatmul.mubr.msk.bf16.gmra.mrb[192].mxu0 %vm3525_vm3, %v22226_v13 }
0x1220   : > { %18276 = vmatprep.mubr.msk.bf16.mxu0 %vm20675_vm4, %v20674_v30 }
0x1227   : > { %18277 = vmatmul.mubr.msk.bf16.gmra.mrb[196].mxu0 %vm3525_vm3, %v22237_v38 }
0x1228   : > { %18280 = vmatprep.mubr.msk.bf16.mxu0 %vm20675_vm4, %v20674_v30 }
0x122f   : > { %18281 = vmatmul.mubr.msk.bf16.gmra.mrb[200].mxu0 %vm3525_vm3, %v22246_v58 }
0x1230   : > { %18284 = vmatprep.mubr.msk.bf16.mxu0 %vm20675_vm4, %v20674_v30 }
0x1237   : > { %18285 = vmatmul.mubr.msk.bf16.gmra.mrb[204].mxu0 %vm3525_vm3, %v22253_v37 }
0x1238   : > { %18288 = vmatprep.mubr.msk.bf16.mxu0 %vm20675_vm4, %v20674_v30 }
0x123f   : > { %18289 = vmatmul.mubr.msk.bf16.gmra.mrb[208].mxu0 %vm3525_vm3, %v22260_v48 }
0x1240   : > { %18292 = vmatprep.mubr.msk.bf16.mxu0 %vm20675_vm4, %v20674_v30 }
0x1247   : > { %18293 = vmatmul.mubr.msk.bf16.gmra.mrb[212].mxu0 %vm3525_vm3, %v22267_v14 }
0x1248   : > { %18296 = vmatprep.mubr.msk.bf16.mxu0 %vm20675_vm4, %v20674_v30 }
0x124f   : > { %18297 = vmatmul.mubr.msk.bf16.gmra.mrb[216].mxu0 %vm3525_vm3, %v22274_v12 }
0x1250   : > { %18300 = vmatprep.mubr.msk.bf16.mxu0 %vm20675_vm4, %v20674_v30 }
0x1257   : > { %18301 = vmatmul.mubr.msk.bf16.gmra.mrb[220].mxu0 %vm3525_vm3, %v22281_v15 }
0x1258   : > { %18378 = vmatprep.mubr.msk.bf16.mxu0 %vm20675_vm4, %v20674_v30 }
0x12ea   : > { %v9661_v55 = vpop.f32.mrb[188].mxu0 }
0x12eb   : > { %v18270_v45 = vpop.f32.mrb[189].mxu0 }
0x12ec   : > { %v9664_v5 = vpop.f32.mrb[190].mxu0 }
0x12ed   : > { %v9732_v35 = vpack.c.bf16 %v9664_v5, %v9661_v55  ;;  %v18271_v42 = vpop.f32.mrb[191].mxu0 }
0x12f2   : > { %v9669_v59 = vpop.f32.mrb[192].mxu0 }
0x12f3   : > { %v18274_v43 = vpop.f32.mrb[193].mxu0 }
0x12f4   : > { %v9672_v44 = vpop.f32.mrb[194].mxu0  ;;  %v19981_v43 = vld [vmem:[%s23493_s11 + $0x80] sm:$0xff]  }
0x12f5   : > { %v9733_v63 = vpack.c.bf16 %v9672_v44, %v9669_v59  ;;  %v18275_v57 = vpop.f32.mrb[195].mxu0 }
0x12f6   : > { %v19982_v57 = vld [vmem:[%s23493_s11 + $0x88] sm:$0xff]  }
0x12f7   : > { %18309 = vmatmul.mubr.msk.bf16.vlgmr.msra.gmra.mrb[168].mxu1 %vm8952_vm5, %v9733_v63 }
0x12f8   : > { %18313 = vmatpush3.bf16.msra.mxu1 %v19967_v10  ;;  %18316 = vmatprep.mubr.msk.bf16.mxu1 %vm20675_vm4, %v20674_v30 }
0x12f9   : > { %18314 = vmatprep.subr.bf16.mxu1 %v20674_v30 }
0x12fa   : > { %v9677_v50 = vpop.f32.mrb[196].mxu0 }
0x12fb   : > { %v18278_v4 = vpop.f32.mrb[197].mxu0 }
0x12fc   : > { %18315 = vmatpush3.bf16.msra.mxu1 %v19968_v62  ;;  %v9680_v3 = vpop.f32.mrb[198].mxu0 }
0x12fd   : > { %18320 = vmatprep.subr.bf16.mxu1 %v20674_v30  ;;  %v9846_v0 = vpack.c.bf16 %v9680_v3, %v9677_v50  ;;  %v18279_v51 = vpop.f32.mrb[199].mxu0 }
0x12ff   : > { %18317 = vmatmul.mubr.msk.bf16.vlgmr.msra.gmra.mrb[172].mxu1 %vm8952_vm5, %v9732_v35  ;;  %v19980_v35 = vld [vmem:[%s23493_s11 + $0x78] sm:$0xff]  }
0x1300   : > { %18321 = vmatpush3.bf16.msra.mxu1 %v19969_v39  ;;  %18324 = vmatprep.mubr.msk.bf16.mxu1 %vm20675_vm4, %v20674_v30 }
0x1301   : > { %18322 = vmatprep.subr.bf16.mxu1 %v20674_v30 }
0x1302   : > { %v9685_v60 = vpop.f32.mrb[200].mxu0 }
0x1303   : > { %v18282_v53 = vpop.f32.mrb[201].mxu0 }
0x1304   : > { %18323 = vmatpush3.bf16.msra.mxu1 %v19970_v8  ;;  %v9688_v61 = vpop.f32.mrb[202].mxu0 }
0x1305   : > { %18328 = vmatprep.subr.bf16.mxu1 %v20674_v30  ;;  %v9905_v46 = vpack.c.bf16 %v9688_v61, %v9685_v60  ;;  %v18283_v16 = vpop.f32.mrb[203].mxu0 }
0x1307   : > { %18325 = vmatmul.mubr.msk.bf16.vlgmr.msra.gmra.mrb[176].mxu1 %vm8952_vm5, %v9846_v0 }
0x1308   : > { %18329 = vmatpush3.bf16.msra.mxu1 %v19971_v6  ;;  %18332 = vmatprep.mubr.msk.bf16.mxu1 %vm20675_vm4, %v20674_v30 }
0x1309   : > { %18330 = vmatprep.subr.bf16.mxu1 %v20674_v30 }
0x130a   : > { %v9693_v18 = vpop.f32.mrb[204].mxu0 }
0x130b   : > { %v18286_v52 = vpop.f32.mrb[205].mxu0 }
0x130c   : > { %18331 = vmatpush3.bf16.msra.mxu1 %v19972_v17  ;;  %v9696_v21 = vpop.f32.mrb[206].mxu0 }
0x130d   : > { %18336 = vmatprep.subr.bf16.mxu1 %v20674_v30  ;;  %v9964_v22 = vpack.c.bf16 %v9696_v21, %v9693_v18  ;;  %v18287_v23 = vpop.f32.mrb[207].mxu0 }
0x130f   : > { %18333 = vmatmul.mubr.msk.bf16.vlgmr.msra.gmra.mrb[180].mxu1 %vm8952_vm5, %v9905_v46 }
0x1310   : > { %18337 = vmatpush3.bf16.msra.mxu1 %v19973_v20  ;;  %18340 = vmatprep.mubr.msk.bf16.mxu1 %vm20675_vm4, %v20674_v30 }
0x1311   : > { %18338 = vmatprep.subr.bf16.mxu1 %v20674_v30 }
0x1312   : > { %v9701_v24 = vpop.f32.mrb[208].mxu0 }
0x1313   : > { %v18290_v25 = vpop.f32.mrb[209].mxu0 }
0x1314   : > { %18339 = vmatpush3.bf16.msra.mxu1 %v19974_v19  ;;  %v9704_v27 = vpop.f32.mrb[210].mxu0 }
0x1315   : > { %18344 = vmatprep.subr.bf16.mxu1 %v20674_v30  ;;  %v10023_v36 = vpack.c.bf16 %v9704_v27, %v9701_v24  ;;  %v18291_v28 = vpop.f32.mrb[211].mxu0 }
0x1317   : > { %18341 = vmatmul.mubr.msk.bf16.vlgmr.msra.gmra.mrb[184].mxu1 %vm8952_vm5, %v9964_v22 }
0x1318   : > { %18345 = vmatpush3.bf16.msra.mxu1 %v19975_v26  ;;  %18348 = vmatprep.mubr.msk.bf16.mxu1 %vm20675_vm4, %v20674_v30 }
0x1319   : > { %18346 = vmatprep.subr.bf16.mxu1 %v20674_v30 }
0x131a   : > { %v9709_v32 = vpop.f32.mrb[212].mxu0 }
0x131b   : > { %v18294_v33 = vpop.f32.mrb[213].mxu0 }
0x131c   : > { %18347 = vmatpush3.bf16.msra.mxu1 %v19976_v29  ;;  %v9712_v31 = vpop.f32.mrb[214].mxu0 }
0x131d   : > { %18352 = vmatprep.subr.bf16.mxu1 %v20674_v30  ;;  %v10082_v54 = vpack.c.bf16 %v9712_v31, %v9709_v32  ;;  %v18295_v49 = vpop.f32.mrb[215].mxu0 }
0x131f   : > { %18349 = vmatmul.mubr.msk.bf16.vlgmr.msra.gmra.mrb[188].mxu1 %vm8952_vm5, %v10023_v36 }
0x1320   : > { %18353 = vmatpush3.bf16.msra.mxu1 %v19977_v34  ;;  %18356 = vmatprep.mubr.msk.bf16.mxu1 %vm20675_vm4, %v20674_v30 }
0x1321   : > { %18354 = vmatprep.subr.bf16.mxu1 %v20674_v30 }
0x1322   : > { %v9717_v56 = vpop.f32.mrb[216].mxu0 }
0x1323   : > { %v18298_v40 = vpop.f32.mrb[217].mxu0 }
0x1324   : > { %18355 = vmatpush3.bf16.msra.mxu1 %v19978_v7  ;;  %v9720_v55 = vpop.f32.mrb[218].mxu0 }
0x1325   : > { %18360 = vmatprep.subr.bf16.mxu1 %v20674_v30  ;;  %v10141_v45 = vpack.c.bf16 %v9720_v55, %v9717_v56  ;;  %v18299_v5 = vpop.f32.mrb[219].mxu0 }
0x1327   : > { %18357 = vmatmul.mubr.msk.bf16.vlgmr.msra.gmra.mrb[192].mxu1 %vm8952_vm5, %v10082_v54 }
0x1328   : > { %18361 = vmatpush3.bf16.msra.mxu1 %v19979_v47  ;;  %18364 = vmatprep.mubr.msk.bf16.mxu1 %vm20675_vm4, %v20674_v30 }
0x1329   : > { %18362 = vmatprep.subr.bf16.mxu1 %v20674_v30 }
0x132a   : > { %v9725_v42 = vpop.f32.mrb[220].mxu0 }
0x132b   : > { %v18302_v59 = vpop.f32.mrb[221].mxu0 }
0x132c   : > { %18363 = vmatpush3.bf16.msra.mxu1 %v19980_v35  ;;  %v9728_v44 = vpop.f32.mrb[222].mxu0 }
0x132d   : > { %18368 = vmatprep.subr.bf16.mxu1 %v20674_v30  ;;  %v10200_v10 = vpack.c.bf16 %v9728_v44, %v9725_v42  ;;  %v18303_v63 = vpop.f32.mrb[223].mxu0 }
0x132f   : > { %18365 = vmatmul.mubr.msk.bf16.vlgmr.msra.gmra.mrb[196].mxu1 %vm8952_vm5, %v10141_v45 }
0x1330   : > { %18369 = vmatpush3.bf16.msra.mxu1 %v19981_v43  ;;  %18372 = vmatprep.mubr.msk.bf16.mxu1 %vm20675_vm4, %v20674_v30 }
0x1331   : > { %18370 = vmatprep.subr.bf16.mxu1 %v20674_v30 }
0x1334   : > { %18371 = vmatpush3.bf16.msra.mxu1 %v19982_v57 }
0x1335   : > { %18414 = vmatprep.subr.bf16.mxu1 %v20674_v30 }
0x1337   : > { %18373 = vmatmul.mubr.msk.bf16.vlgmr.msra.gmra.mrb[200].mxu1 %vm8952_vm5, %v10200_v10  ;;  %v16207_v10 = vld [vmem:[%s23494_s22] ss:$0 sm:$0xff]  ;;  %s23497_s22 = sld [smem:[#allocation54_spill]] }
0x1338   : > { %18418 = vmatprep.mubr.msk.bf16.mxu1 %vm20675_vm4, %v20674_v30 }
0x133d   : > { %s23498_s1 = smov %s23497_s22 }
0x13ca   : > { %v9783_v62 = vpop.f32.mrb[168].mxu1 }
0x13cb   : > { %v18310_v50 = vpop.f32.mrb[169].mxu1 }
0x13cc   : > { %v9786_v4 = vpop.f32.mrb[170].mxu1 }
0x13cd   : > { %v18311_v39 = vpop.f32.mrb[171].mxu1 }
0x13d2   : > { %v9839_v3 = vpop.f32.mrb[172].mxu1 }
0x13d3   : > { %v9840_v0 = vadd.f32 %v9839_v3, %v9783_v62  ;;  %v18318_v51 = vpop.f32.mrb[173].mxu1 }
0x13d4   : > { %v9842_v8 = vpop.f32.mrb[174].mxu1 }
0x13d5   : > { %v9843_v60 = vadd.f32 %v9842_v8, %v9786_v4  ;;  %v18319_v53 = vpop.f32.mrb[175].mxu1 }
0x13d6   : > { %v19985_v53 = vld [vmem:[%s23496_s8] sm:$0xff]  }
0x13da   : > { %v9896_v6 = vpop.f32.mrb[176].mxu1 }
0x13db   : > { %v9903_v61 = vadd.f32 %v9896_v6, %v9840_v0  ;;  %v18326_v46 = vpop.f32.mrb[177].mxu1 }
0x13dc   : > { %v9899_v16 = vpop.f32.mrb[178].mxu1  ;;  %v19986_v46 = vld [vmem:[%s23496_s8 + $0x8] sm:$0xff]  }
0x13dd   : > { %v9904_v17 = vadd.f32 %v9899_v16, %v9843_v60  ;;  %v18327_v18 = vpop.f32.mrb[179].mxu1 }
0x13de   : > { %v19987_v18 = vld [vmem:[%s23496_s8 + $0x20] sm:$0xff]  }
0x13e2   : > { %v9955_v52 = vpop.f32.mrb[180].mxu1 }
0x13e3   : > { %v9962_v20 = vadd.f32 %v9955_v52, %v9903_v61  ;;  %v18334_v21 = vpop.f32.mrb[181].mxu1 }
0x13e4   : > { %v9958_v22 = vpop.f32.mrb[182].mxu1 }
0x13e5   : > { %v9963_v23 = vadd.f32 %v9958_v22, %v9904_v17  ;;  %v18335_v19 = vpop.f32.mrb[183].mxu1  ;;  %v19988_v22 = vld [vmem:[%s23496_s8 + $0x28] sm:$0xff]  }
0x13ea   : > { %v10014_v24 = vpop.f32.mrb[184].mxu1 }
0x13eb   : > { %v10021_v25 = vadd.f32 %v10014_v24, %v9962_v20  ;;  %v18342_v26 = vpop.f32.mrb[185].mxu1  ;;  %v19989_v24 = vld [vmem:[%s23496_s8 + $0x30] sm:$0xff]  }
0x13ec   : > { %v10017_v27 = vpop.f32.mrb[186].mxu1 }
0x13ed   : > { %v10022_v36 = vadd.f32 %v10017_v27, %v9963_v23  ;;  %v18343_v28 = vpop.f32.mrb[187].mxu1 }
0x13f2   : > { %v10073_v29 = vpop.f32.mrb[188].mxu1 }
0x13f3   : > { %v10080_v32 = vadd.f32 %v10073_v29, %v10021_v25  ;;  %v18350_v33 = vpop.f32.mrb[189].mxu1 }
0x13f4   : > { %v10076_v34 = vpop.f32.mrb[190].mxu1 }
0x13f5   : > { %v10081_v31 = vadd.f32 %v10076_v34, %v10022_v36  ;;  %v18351_v54 = vpop.f32.mrb[191].mxu1  ;;  %v19990_v36 = vld [vmem:[%s23496_s8 + $0x38] sm:$0xff]  }
0x13f6   : > { %v19992_v54 = vld [vmem:[%s23496_s8 + $0x48] sm:$0xff]  }
0x13fa   : > { %v10132_v49 = vpop.f32.mrb[192].mxu1 }
0x13fb   : > { %v10139_v7 = vadd.f32 %v10132_v49, %v10080_v32  ;;  %v18358_v56 = vpop.f32.mrb[193].mxu1  ;;  %v19991_v32 = vld [vmem:[%s23496_s8 + $0x40] sm:$0xff]  }
0x13fc   : > { %v10135_v40 = vpop.f32.mrb[194].mxu1  ;;  %v19993_v56 = vld [vmem:[%s23496_s8 + $0x50] sm:$0xff]  }
0x13fd   : > { %v10140_v47 = vadd.f32 %v10135_v40, %v10081_v31  ;;  %v18359_v55 = vpop.f32.mrb[195].mxu1 }
0x1402   : > { %v10191_v45 = vpop.f32.mrb[196].mxu1 }
0x1403   : > { %v10198_v5 = vadd.f32 %v10191_v45, %v10139_v7  ;;  %v18366_v35 = vpop.f32.mrb[197].mxu1  ;;  %v19994_v45 = vld [vmem:[%s23496_s8 + $0x58] sm:$0xff]  }
0x1404   : > { %v10194_v42 = vpop.f32.mrb[198].mxu1 }
0x1405   : > { %v10199_v59 = vadd.f32 %v10194_v42, %v10140_v47  ;;  %v18367_v43 = vpop.f32.mrb[199].mxu1  ;;  %v19995_v42 = vld [vmem:[%s23496_s8 + $0x60] sm:$0xff]  }
0x140a   : > { %v10250_v44 = vpop.f32.mrb[200].mxu1 }
0x140b   : > { %v10257_v63 = vadd.f32 %v10250_v44, %v10198_v5  ;;  %v18374_v57 = vpop.f32.mrb[201].mxu1 }
0x140c   : > { %v10253_v62 = vpop.f32.mrb[202].mxu1 }
0x140d   : > { %v10266_v50 = vadd.f32 %v16207_v10, %v10257_v63  ;;  %v10258_v4 = vadd.f32 %v10253_v62, %v10199_v59  ;;  %v18375_v39 = vpop.f32.mrb[203].mxu1  ;;  %v19997_v62 = vld [vmem:[%s23496_s8 + $0x70] sm:$0xff]  }
0x140f   : > { %v10267_v3 = vadd.f32 %v16207_v10, %v10258_v4  ;;  %v10268_v0 = vmax.f32 %v10266_v50, 0.0  ;;  %v19996_v10 = vld [vmem:[%s23496_s8 + $0x68] sm:$0xff]  }
0x1411   : > { %v10269_v51 = vmax.f32 %v10267_v3, 0.0  ;;  %v19998_v3 = vld [vmem:[%s23496_s8 + $0x78] sm:$0xff]  }
0x1413   : > { %v10306_v8 = vpack.c.bf16 %v10269_v51, %v10268_v0 }
0x1415   : > { %18377 = vmatpush3.bf16.msra.mxu0 %v10306_v8  ;;  %v19999_v8 = vld [vmem:[%s23496_s8 + $0x80] sm:$0xff]  }
0x1416   : > { %18486 = vmatprep.subr.bf16.mxu0 %v20674_v30 }
0x1418   : > { %18379 = vmatmul.mubr.msk.bf16.vlgmr.msra.gmra.mrb[224].mxu0 %vm3525_vm3, %v22216_v11  ;;  %v19983_v11 = vld [vmem:[%s23495_s26 + $0x10] sm:$0xff]   ;;  %s23499_s26 = sld [smem:[#allocation53_spill]] }
0x1419   : > { %18382 = vmatprep.mubr.msk.bf16.mxu0 %vm20675_vm4, %v20674_v30  ;;  %18415 = vmatpush3.bf16.msra.mxu1 %v19983_v11 }
0x141a   : > { %18416 = vmatprep.subr.bf16.mxu1 %v20674_v30 }
0x1420   : > { %18383 = vmatmul.mubr.msk.bf16.gmra.mrb[228].mxu0 %vm3525_vm3, %v22226_v13  ;;  %v19984_v13 = vld [vmem:[%s23496_s8 + $0x18] sm:$0xff]  }
0x1421   : > { %18386 = vmatprep.mubr.msk.bf16.mxu0 %vm20675_vm4, %v20674_v30  ;;  %18417 = vmatpush3.bf16.msra.mxu1 %v19984_v13 }
0x1422   : > { %18422 = vmatprep.subr.bf16.mxu1 %v20674_v30 }
0x1428   : > { %18387 = vmatmul.mubr.msk.bf16.gmra.mrb[232].mxu0 %vm3525_vm3, %v22237_v38 }
0x1429   : > { %18390 = vmatprep.mubr.msk.bf16.mxu0 %vm20675_vm4, %v20674_v30 }
0x1430   : > { %18391 = vmatmul.mubr.msk.bf16.gmra.mrb[236].mxu0 %vm3525_vm3, %v22246_v58 }
0x1431   : > { %18394 = vmatprep.mubr.msk.bf16.mxu0 %vm20675_vm4, %v20674_v30 }
0x1438   : > { %18395 = vmatmul.mubr.msk.bf16.gmra.mrb[240].mxu0 %vm3525_vm3, %v22253_v37 }
0x1439   : > { %18398 = vmatprep.mubr.msk.bf16.mxu0 %vm20675_vm4, %v20674_v30 }
0x1440   : > { %18399 = vmatmul.mubr.msk.bf16.gmra.mrb[244].mxu0 %vm3525_vm3, %v22260_v48 }
0x1441   : > { %18402 = vmatprep.mubr.msk.bf16.mxu0 %vm20675_vm4, %v20674_v30 }
0x1448   : > { %18403 = vmatmul.mubr.msk.bf16.gmra.mrb[248].mxu0 %vm3525_vm3, %v22267_v14 }
0x1449   : > { %18406 = vmatprep.mubr.msk.bf16.mxu0 %vm20675_vm4, %v20674_v30 }
0x1450   : > { %18407 = vmatmul.mubr.msk.bf16.gmra.mrb[252].mxu0 %vm3525_vm3, %v22274_v12 }
0x1451   : > { %18410 = vmatprep.mubr.msk.bf16.mxu0 %vm20675_vm4, %v20674_v30 }
0x1458   : > { %18411 = vmatmul.mubr.msk.bf16.gmra.mrb[0].mxu0 %vm3525_vm3, %v22281_v15 }
0x1459   : > { %18488 = vmatprep.mubr.msk.bf16.mxu0 %vm20675_vm4, %v20674_v30 }
0x14eb   : > { %v10341_v38 = vpop.f32.mrb[224].mxu0 }
0x14ec   : > { %v18380_v58 = vpop.f32.mrb[225].mxu0 }
0x14ed   : > { %v10344_v37 = vpop.f32.mrb[226].mxu0  ;;  %v20000_v58 = vld [vmem:[%s23496_s8 + $0x88] sm:$0xff]  }
0x14ee   : > { %v10412_v48 = vpack.c.bf16 %v10344_v37, %v10341_v38  ;;  %v18381_v14 = vpop.f32.mrb[227].mxu0  ;;  %v20006_v37 = vld [vmem:[%s23497_s22 + $0x10] sm:$0xff]   ;;  %s23500_s22 = sld [smem:[#allocation31_spill]] }
0x14f3   : > { %v10349_v12 = vpop.f32.mrb[228].mxu0 }
0x14f4   : > { %v18384_v15 = vpop.f32.mrb[229].mxu0  ;;  %s23501_s2 = smov %s23500_s22 }
0x14f5   : > { %v10352_v60 = vpop.f32.mrb[230].mxu0  ;;  %v20002_v1 = vld [vmem:[%s23501_s2 + $0x8] sm:$0xff]   ;;  %v20003_v41 = vld [vmem:[%s23501_s2 + $0x10] sm:$0xff]  }
0x14f6   : > { %v10413_v6 = vpack.c.bf16 %v10352_v60, %v10349_v12  ;;  %v18385_v61 = vpop.f32.mrb[231].mxu0 }
0x14f8   : > { %18419 = vmatmul.mubr.msk.bf16.vlgmr.msra.gmra.mrb[204].mxu1 %vm8952_vm5, %v10413_v6 }
0x14f9   : > { %18423 = vmatpush3.bf16.msra.mxu1 %v19985_v53  ;;  %18426 = vmatprep.mubr.msk.bf16.mxu1 %vm20675_vm4, %v20674_v30 }
0x14fa   : > { %18424 = vmatprep.subr.bf16.mxu1 %v20674_v30 }
0x14fb   : > { %v10357_v16 = vpop.f32.mrb[232].mxu0 }
0x14fc   : > { %v18388_v17 = vpop.f32.mrb[233].mxu0 }
0x14fd   : > { %18425 = vmatpush3.bf16.msra.mxu1 %v19986_v46  ;;  %v10360_v52 = vpop.f32.mrb[234].mxu0 }
0x14fe   : > { %18430 = vmatprep.subr.bf16.mxu1 %v20674_v30  ;;  %v10526_v20 = vpack.c.bf16 %v10360_v52, %v10357_v16  ;;  %v18389_v21 = vpop.f32.mrb[235].mxu0 }
0x1500   : > { %18427 = vmatmul.mubr.msk.bf16.vlgmr.msra.gmra.mrb[208].mxu1 %vm8952_vm5, %v10412_v48 }
0x1501   : > { %18431 = vmatpush3.bf16.msra.mxu1 %v19987_v18  ;;  %18434 = vmatprep.mubr.msk.bf16.mxu1 %vm20675_vm4, %v20674_v30 }
0x1502   : > { %18432 = vmatprep.subr.bf16.mxu1 %v20674_v30 }
0x1503   : > { %v10365_v23 = vpop.f32.mrb[236].mxu0 }
0x1504   : > { %v18392_v19 = vpop.f32.mrb[237].mxu0 }
0x1505   : > { %18433 = vmatpush3.bf16.msra.mxu1 %v19988_v22  ;;  %v10368_v25 = vpop.f32.mrb[238].mxu0 }
0x1506   : > { %18438 = vmatprep.subr.bf16.mxu1 %v20674_v30  ;;  %v10585_v26 = vpack.c.bf16 %v10368_v25, %v10365_v23  ;;  %v18393_v27 = vpop.f32.mrb[239].mxu0 }
0x1508   : > { %18435 = vmatmul.mubr.msk.bf16.vlgmr.msra.gmra.mrb[212].mxu1 %vm8952_vm5, %v10526_v20 }
0x1509   : > { %18439 = vmatpush3.bf16.msra.mxu1 %v19989_v24  ;;  %18442 = vmatprep.mubr.msk.bf16.mxu1 %vm20675_vm4, %v20674_v30 }
0x150a   : > { %18440 = vmatprep.subr.bf16.mxu1 %v20674_v30 }
0x150b   : > { %v10373_v28 = vpop.f32.mrb[240].mxu0 }
0x150c   : > { %v18396_v29 = vpop.f32.mrb[241].mxu0 }
0x150d   : > { %18441 = vmatpush3.bf16.msra.mxu1 %v19990_v36  ;;  %v10376_v33 = vpop.f32.mrb[242].mxu0 }
0x150e   : > { %18446 = vmatprep.subr.bf16.mxu1 %v20674_v30  ;;  %v10644_v34 = vpack.c.bf16 %v10376_v33, %v10373_v28  ;;  %v18397_v31 = vpop.f32.mrb[243].mxu0 }
0x1510   : > { %18443 = vmatmul.mubr.msk.bf16.vlgmr.msra.gmra.mrb[216].mxu1 %vm8952_vm5, %v10585_v26 }
0x1511   : > { %18447 = vmatpush3.bf16.msra.mxu1 %v19991_v32  ;;  %18450 = vmatprep.mubr.msk.bf16.mxu1 %vm20675_vm4, %v20674_v30 }
0x1512   : > { %18448 = vmatprep.subr.bf16.mxu1 %v20674_v30 }
0x1513   : > { %v10381_v49 = vpop.f32.mrb[244].mxu0 }
0x1514   : > { %v18400_v7 = vpop.f32.mrb[245].mxu0 }
0x1515   : > { %18449 = vmatpush3.bf16.msra.mxu1 %v19992_v54  ;;  %v10384_v40 = vpop.f32.mrb[246].mxu0 }
0x1516   : > { %18454 = vmatprep.subr.bf16.mxu1 %v20674_v30  ;;  %v10703_v47 = vpack.c.bf16 %v10384_v40, %v10381_v49  ;;  %v18401_v55 = vpop.f32.mrb[247].mxu0 }
0x1518   : > { %18451 = vmatmul.mubr.msk.bf16.vlgmr.msra.gmra.mrb[220].mxu1 %vm8952_vm5, %v10644_v34 }
0x1519   : > { %18455 = vmatpush3.bf16.msra.mxu1 %v19993_v56  ;;  %18458 = vmatprep.mubr.msk.bf16.mxu1 %vm20675_vm4, %v20674_v30 }
0x151a   : > { %18456 = vmatprep.subr.bf16.mxu1 %v20674_v30 }
0x151b   : > { %v10389_v5 = vpop.f32.mrb[248].mxu0 }
0x151c   : > { %v18404_v35 = vpop.f32.mrb[249].mxu0 }
0x151d   : > { %18457 = vmatpush3.bf16.msra.mxu1 %v19994_v45  ;;  %v10392_v59 = vpop.f32.mrb[250].mxu0 }
0x151e   : > { %18462 = vmatprep.subr.bf16.mxu1 %v20674_v30  ;;  %v10762_v43 = vpack.c.bf16 %v10392_v59, %v10389_v5  ;;  %v18405_v44 = vpop.f32.mrb[251].mxu0 }
0x1520   : > { %18459 = vmatmul.mubr.msk.bf16.vlgmr.msra.gmra.mrb[224].mxu1 %vm8952_vm5, %v10703_v47 }
0x1521   : > { %18463 = vmatpush3.bf16.msra.mxu1 %v19995_v42  ;;  %18466 = vmatprep.mubr.msk.bf16.mxu1 %vm20675_vm4, %v20674_v30 }
0x1522   : > { %18464 = vmatprep.subr.bf16.mxu1 %v20674_v30 }
0x1523   : > { %v10397_v63 = vpop.f32.mrb[252].mxu0 }
0x1524   : > { %v18408_v57 = vpop.f32.mrb[253].mxu0 }
0x1525   : > { %18465 = vmatpush3.bf16.msra.mxu1 %v19996_v10  ;;  %v10400_v50 = vpop.f32.mrb[254].mxu0 }
0x1526   : > { %18470 = vmatprep.subr.bf16.mxu1 %v20674_v30  ;;  %v10821_v4 = vpack.c.bf16 %v10400_v50, %v10397_v63  ;;  %v18409_v39 = vpop.f32.mrb[255].mxu0  ;;  %v16244_v50 = vld [vmem:[%s23499_s26] ss:$0 sm:$0xff]  ;;  %s23502_s26 = sld [smem:[#allocation55_spill]] }
0x1528   : > { %18467 = vmatmul.mubr.msk.bf16.vlgmr.msra.gmra.mrb[228].mxu1 %vm8952_vm5, %v10762_v43 }
0x1529   : > { %18471 = vmatpush3.bf16.msra.mxu1 %v19997_v62  ;;  %18474 = vmatprep.mubr.msk.bf16.mxu1 %vm20675_vm4, %v20674_v30 }
0x152a   : > { %18472 = vmatprep.subr.bf16.mxu1 %v20674_v30 }
0x152b   : > { %v10405_v0 = vpop.f32.mrb[0].mxu0 }
0x152c   : > { %v18412_v51 = vpop.f32.mrb[1].mxu0 }
0x152d   : > { %18473 = vmatpush3.bf16.msra.mxu1 %v19998_v3  ;;  %v10408_v11 = vpop.f32.mrb[2].mxu0 }
0x152e   : > { %18478 = vmatprep.subr.bf16.mxu1 %v20674_v30  ;;  %v10880_v13 = vpack.c.bf16 %v10408_v11, %v10405_v0  ;;  %v18413_v38 = vpop.f32.mrb[3].mxu0 }
0x1530   : > { %18475 = vmatmul.mubr.msk.bf16.vlgmr.msra.gmra.mrb[232].mxu1 %vm8952_vm5, %v10821_v4 }
0x1531   : > { %18479 = vmatpush3.bf16.msra.mxu1 %v19999_v8  ;;  %18482 = vmatprep.mubr.msk.bf16.mxu1 %vm20675_vm4, %v20674_v30 }
0x1532   : > { %18480 = vmatprep.subr.bf16.mxu1 %v20674_v30 }
0x1535   : > { %18481 = vmatpush3.bf16.msra.mxu1 %v20000_v58 }
0x1536   : > { %18508 = vmatprep.subr.bf16.mxu1 %v20674_v30 }
0x1538   : > { %18483 = vmatmul.mubr.msk.bf16.vlgmr.msra.gmra.mrb[236].mxu1 %vm8952_vm5, %v10880_v13 }
0x1539   : > { %18512 = vmatprep.mubr.msk.bf16.mxu1 %vm20675_vm4, %v20674_v30  ;;  %18509 = vmatpush3.bf16.msra.mxu1 %v20006_v37 }
0x153a   : > { %18510 = vmatprep.subr.bf16.mxu1 %v20674_v30 }
0x15cb   : > { %v10463_v48 = vpop.f32.mrb[204].mxu1 }
0x15cc   : > { %v18420_v14 = vpop.f32.mrb[205].mxu1 }
0x15cd   : > { %v10466_v12 = vpop.f32.mrb[206].mxu1  ;;  %v20001_v14 = vld [vmem:[%s23500_s22] sm:$0xff]   ;;  %s23504_s22 = sld [smem:[#allocation32_spill]] }
0x15ce   : > { %v18421_v15 = vpop.f32.mrb[207].mxu1 }
0x15cf   : > { %v20016_v15 = vld [vmem:[%s23498_s1 + $0x50] sm:$0xff]  }
0x15d3   : > { %v10519_v60 = vpop.f32.mrb[208].mxu1 }
0x15d4   : > { %v10520_v53 = vadd.f32 %v10519_v60, %v10463_v48  ;;  %v18428_v6 = vpop.f32.mrb[209].mxu1  ;;  %v20018_v60 = vld [vmem:[%s23498_s1 + $0x58] sm:$0xff]  }
0x15d5   : > { %v10522_v61 = vpop.f32.mrb[210].mxu1 }
0x15d6   : > { %v10523_v46 = vadd.f32 %v10522_v61, %v10466_v12  ;;  %v18429_v16 = vpop.f32.mrb[211].mxu1  ;;  %v20007_v12 = vld [vmem:[%s23498_s1 + $0x18] sm:$0xff]  }
0x15d7   : > { %18511 = vmatpush3.bf16.msra.mxu1 %v20007_v12 }
0x15d8   : > { %18516 = vmatprep.subr.bf16.mxu1 %v20674_v30 }
0x15db   : > { %v10576_v17 = vpop.f32.mrb[212].mxu1 }
0x15dc   : > { %v10583_v18 = vadd.f32 %v10576_v17, %v10520_v53  ;;  %v18436_v52 = vpop.f32.mrb[213].mxu1 }
0x15dd   : > { %v10579_v20 = vpop.f32.mrb[214].mxu1 }
0x15de   : > { %v10584_v21 = vadd.f32 %v10579_v20, %v10523_v46  ;;  %v18437_v22 = vpop.f32.mrb[215].mxu1  ;;  %v20008_v46 = vld [vmem:[%s23498_s1] sm:$0xff]  }
0x15e3   : > { %v10635_v23 = vpop.f32.mrb[216].mxu1 }
0x15e4   : > { %v10642_v19 = vadd.f32 %v10635_v23, %v10583_v18  ;;  %v18444_v24 = vpop.f32.mrb[217].mxu1  ;;  %v20009_v18 = vld [vmem:[%s23498_s1 + $0x8] sm:$0xff]  }
0x15e5   : > { %v10638_v25 = vpop.f32.mrb[218].mxu1  ;;  %v20011_v24 = vld [vmem:[%s23498_s1 + $0x28] sm:$0xff]  }
0x15e6   : > { %v10643_v26 = vadd.f32 %v10638_v25, %v10584_v21  ;;  %v18445_v27 = vpop.f32.mrb[219].mxu1  ;;  %v20010_v21 = vld [vmem:[%s23498_s1 + $0x20] sm:$0xff]  }
0x15eb   : > { %v10694_v36 = vpop.f32.mrb[220].mxu1 }
0x15ec   : > { %v10701_v28 = vadd.f32 %v10694_v36, %v10642_v19  ;;  %v18452_v29 = vpop.f32.mrb[221].mxu1  ;;  %v20012_v36 = vld [vmem:[%s23498_s1 + $0x30] sm:$0xff]  }
0x15ed   : > { %v10697_v32 = vpop.f32.mrb[222].mxu1 }
0x15ee   : > { %v10702_v33 = vadd.f32 %v10697_v32, %v10643_v26  ;;  %v18453_v34 = vpop.f32.mrb[223].mxu1 }
0x15ef   : > { %v20013_v34 = vld [vmem:[%s23498_s1 + $0x38] sm:$0xff]  }
0x15f3   : > { %v10753_v31 = vpop.f32.mrb[224].mxu1 }
0x15f4   : > { %v10760_v54 = vadd.f32 %v10753_v31, %v10701_v28  ;;  %v18460_v49 = vpop.f32.mrb[225].mxu1  ;;  %v20022_v31 = vld [vmem:[%s23498_s1 + $0x78] sm:$0xff]  }
0x15f5   : > { %v10756_v7 = vpop.f32.mrb[226].mxu1 }
0x15f6   : > { %v10761_v56 = vadd.f32 %v10756_v7, %v10702_v33  ;;  %v18461_v40 = vpop.f32.mrb[227].mxu1  ;;  %v20020_v33 = vld [vmem:[%s23498_s1 + $0x70] sm:$0xff]   ;;  %v20014_v7 = vld [vmem:[%s23498_s1 + $0x40] sm:$0xff]  }
0x15fb   : > { %v10812_v47 = vpop.f32.mrb[228].mxu1 }
0x15fc   : > { %v10819_v55 = vadd.f32 %v10812_v47, %v10760_v54  ;;  %v18468_v45 = vpop.f32.mrb[229].mxu1 }
0x15fd   : > { %v10815_v5 = vpop.f32.mrb[230].mxu1  ;;  %v20015_v45 = vld [vmem:[%s23498_s1 + $0x48] sm:$0xff]  }
0x15fe   : > { %v10820_v35 = vadd.f32 %v10815_v5, %v10761_v56  ;;  %v18469_v42 = vpop.f32.mrb[231].mxu1 }
0x1603   : > { %v10871_v59 = vpop.f32.mrb[232].mxu1 }
0x1604   : > { %v10878_v43 = vadd.f32 %v10871_v59, %v10819_v55  ;;  %v18476_v44 = vpop.f32.mrb[233].mxu1  ;;  %v20017_v59 = vld [vmem:[%s23498_s1 + $0x60] sm:$0xff]  }
0x1605   : > { %v10874_v10 = vpop.f32.mrb[234].mxu1 }
0x1606   : > { %v10879_v63 = vadd.f32 %v10874_v10, %v10820_v35  ;;  %v18477_v57 = vpop.f32.mrb[235].mxu1  ;;  %v20019_v10 = vld [vmem:[%s23498_s1 + $0x68] sm:$0xff]  }
0x1607   : > { %v20021_v57 = vld [vmem:[%s23498_s1 + $0x80] sm:$0xff]  }
0x160b   : > { %v10930_v62 = vpop.f32.mrb[236].mxu1 }
0x160c   : > { %v10937_v4 = vadd.f32 %v10930_v62, %v10878_v43  ;;  %v18484_v39 = vpop.f32.mrb[237].mxu1  ;;  %v20023_v62 = vld [vmem:[%s23498_s1 + $0x88] sm:$0xff]   ;;  %s23505_s1 = smov %s23504_s22 }
0x160d   : > { %v10933_v3 = vpop.f32.mrb[238].mxu1 }
0x160e   : > { %v10946_v0 = vadd.f32 %v16244_v50, %v10937_v4  ;;  %v10938_v51 = vadd.f32 %v10933_v3, %v10879_v63  ;;  %v18485_v8 = vpop.f32.mrb[239].mxu1  ;;  %v20029_v4 = vld [vmem:[%s23502_s26 + $0x20] sm:$0xff]  }
0x1610   : > { %v10948_v11 = vadd.f32 %v10946_v0, %v9588_v9  ;;  %v10947_v13 = vadd.f32 %v16244_v50, %v10938_v51  ;;  %v20004_v9 = vld [vmem:[%s23501_s2 + $0x18] sm:$0xff]  }
0x1612   : > { %v10949_v38 = vadd.f32 %v10947_v13, %v9589_v2  ;;  %v10950_v58 = vmax.f32 %v10948_v11, 0.0  ;;  %v20005_v2 = vld [vmem:[%s23501_s2 + $0x20] ss:$0 sps:$4 sm:$0xff]   ;;  %s23503_s2 = smov %s23502_s26  ;;  %s23506_s26 = sld [smem:[#allocation33_spill]] }
0x1613   : > { %v20030_v39 = vld [vmem:[%s23503_s2 + $0x28] sm:$0xff]   ;;  %v20031_v3 = vld [vmem:[%s23503_s2 + $0x30] sm:$0xff]  }
0x1614   : > { %v10951_v37 = vmax.f32 %v10949_v38, 0.0 }
0x1616   : > { %v22579_v48 = vpack.c.bf16 %v10951_v37, %v10950_v58 }
0x1618   : > { %18487 = vmatpush3.bf16.msra.mxu0 %v22579_v48 }
0x1619   : > { %18548 = vmatprep.subr.bf16.mxu0 %v20674_v30 }
0x161b   : > { %18489 = vmatmul.mubr.msk.bf16.vlgmr.msra.gmra.mrb[4].mxu0 %vm3525_vm3, %v20001_v14 }
0x161c   : > { %18492 = vmatprep.mubr.msk.bf16.mxu0 %vm20675_vm4, %v20674_v30  ;;  %18549 = vmatpush3.bf16.msra.mxu0 %v20016_v15 }
0x161d   : > { %18550 = vmatprep.subr.bf16.mxu0 %v20674_v30 }
0x1620   : > { %18551 = vmatpush3.bf16.msra.mxu0 %v20018_v60 }
0x1621   : > { %18564 = vmatprep.subr.bf16.mxu0 %v20674_v30 }
0x1623   : > { %18493 = vmatmul.mubr.msk.bf16.gmra.mrb[8].mxu0 %vm3525_vm3, %v20002_v1 }
0x1624   : > { %18496 = vmatprep.mubr.msk.bf16.mxu0 %vm20675_vm4, %v20674_v30 }
0x162b   : > { %18497 = vmatmul.mubr.msk.bf16.gmra.mrb[12].mxu0 %vm3525_vm3, %v20003_v41 }
0x162c   : > { %18500 = vmatprep.mubr.msk.bf16.mxu0 %vm20675_vm4, %v20674_v30 }
0x1633   : > { %18501 = vmatmul.mubr.msk.bf16.gmra.mrb[16].mxu0 %vm3525_vm3, %v20004_v9 }
0x1634   : > { %18504 = vmatprep.mubr.msk.bf16.mxu0 %vm20675_vm4, %v20674_v30 }
0x163b   : > { %18505 = vmatmul.mubr.msk.bf16.gmra.mrb[20].mxu0 %vm3525_vm3, %v20005_v2 }
0x163c   : > { %18552 = vmatprep.mubr.msk.bf16.mxu0 %vm20675_vm4, %v20674_v30 }
0x16ee   : > { %v11070_v53 = vpop.f32.mrb[4].mxu0 }
0x16ef   : > { %v18490_v6 = vpop.f32.mrb[5].mxu0  ;;  %v11108_v23 = vpack.c.bf16 %v11070_v53, %v11070_v53 }
0x16f0   : > { %v11073_v61 = vpop.f32.mrb[6].mxu0 }
0x16f1   : > { %v11109_v16 = vpack.c.bf16 %v11073_v61, %v11073_v61  ;;  %v18491_v17 = vpop.f32.mrb[7].mxu0 }
0x16f3   : > { %18513 = vmatmul.mubr.msk.bf16.vlgmr.msra.gmra.mrb[240].mxu1 %vm8952_vm5, %v11109_v16 }
0x16f4   : > { %18517 = vmatpush3.bf16.msra.mxu1 %v20008_v46  ;;  %18520 = vmatprep.mubr.msk.bf16.mxu1 %vm20675_vm4, %v20674_v30 }
0x16f5   : > { %18518 = vmatprep.subr.bf16.mxu1 %v20674_v30 }
0x16f6   : > { %v11078_v52 = vpop.f32.mrb[8].mxu0 }
0x16f7   : > { %v18494_v20 = vpop.f32.mrb[9].mxu0  ;;  %v11220_v26 = vpack.c.bf16 %v11078_v52, %v11078_v52 }
0x16f8   : > { %18519 = vmatpush3.bf16.msra.mxu1 %v20009_v18  ;;  %v11081_v22 = vpop.f32.mrb[10].mxu0 }
0x16f9   : > { %18524 = vmatprep.subr.bf16.mxu1 %v20674_v30  ;;  %v18495_v19 = vpop.f32.mrb[11].mxu0  ;;  %v11277_v40 = vpack.c.bf16 %v11081_v22, %v11081_v22 }
0x16fb   : > { %18521 = vmatmul.mubr.msk.bf16.vlgmr.msra.gmra.mrb[244].mxu1 %vm8952_vm5, %v11108_v23 }
0x16fc   : > { %18525 = vmatpush3.bf16.msra.mxu1 %v20010_v21  ;;  %18528 = vmatprep.mubr.msk.bf16.mxu1 %vm20675_vm4, %v20674_v30 }
0x16fd   : > { %18526 = vmatprep.subr.bf16.mxu1 %v20674_v30 }
0x16fe   : > { %v11086_v25 = vpop.f32.mrb[12].mxu0 }
0x16ff   : > { %v18498_v27 = vpop.f32.mrb[13].mxu0  ;;  %v11334_v35 = vpack.c.bf16 %v11086_v25, %v11086_v25 }
0x1700   : > { %18527 = vmatpush3.bf16.msra.mxu1 %v20011_v24  ;;  %v11089_v28 = vpop.f32.mrb[14].mxu0 }
0x1701   : > { %18532 = vmatprep.subr.bf16.mxu1 %v20674_v30  ;;  %v11391_v29 = vpack.c.bf16 %v11089_v28, %v11089_v28  ;;  %v18499_v32 = vpop.f32.mrb[15].mxu0 }
0x1703   : > { %18529 = vmatmul.mubr.msk.bf16.vlgmr.msra.gmra.mrb[248].mxu1 %vm8952_vm5, %v11220_v26  ;;  %18553 = vmatmul.mubr.msk.bf16.vlgmr.msra.gmra.mrb[24].mxu0 %vm8952_vm5, %v11391_v29 }
0x1704   : > { %18533 = vmatpush3.bf16.msra.mxu1 %v20012_v36  ;;  %18536 = vmatprep.mubr.msk.bf16.mxu1 %vm20675_vm4, %v20674_v30 }
0x1705   : > { %18534 = vmatprep.subr.bf16.mxu1 %v20674_v30  ;;  %18565 = vmatpush3.bf16.msra.mxu0 %v20020_v33 }
0x1706   : > { %v11094_v54 = vpop.f32.mrb[16].mxu0  ;;  %18566 = vmatprep.subr.bf16.mxu0 %v20674_v30  ;;  %18568 = vmatprep.mubr.msk.bf16.mxu0 %vm20675_vm4, %v20674_v30 }
0x1707   : > { %v18502_v49 = vpop.f32.mrb[17].mxu0  ;;  %v11448_v63 = vpack.c.bf16 %v11094_v54, %v11094_v54  ;;  %v16282_v54 = vld [vmem:[#allocation2] ss:$0 sm:$0xff] }
0x1708   : > { %18535 = vmatpush3.bf16.msra.mxu1 %v20013_v34  ;;  %v11097_v56 = vpop.f32.mrb[18].mxu0 }
0x1709   : > { %18540 = vmatprep.subr.bf16.mxu1 %v20674_v30  ;;  %v11505_v47 = vpack.c.bf16 %v11097_v56, %v11097_v56  ;;  %18567 = vmatpush3.bf16.msra.mxu0 %v20022_v31  ;;  %v18503_v55 = vpop.f32.mrb[19].mxu0 }
0x170a   : > { %18580 = vmatprep.subr.bf16.mxu0 %v20674_v30 }
0x170b   : > { %18537 = vmatmul.mubr.msk.bf16.vlgmr.msra.gmra.mrb[252].mxu1 %vm8952_vm5, %v11277_v40 }
0x170c   : > { %18541 = vmatpush3.bf16.msra.mxu1 %v20014_v7  ;;  %18544 = vmatprep.mubr.msk.bf16.mxu1 %vm20675_vm4, %v20674_v30 }
0x170d   : > { %18542 = vmatprep.subr.bf16.mxu1 %v20674_v30  ;;  %18569 = vmatmul.mubr.msk.bf16.vlgmr.msra.gmra.mrb[28].mxu0 %vm8952_vm5, %v11505_v47 }
0x170e   : > { %v11102_v5 = vpop.f32.mrb[20].mxu0  ;;  %18582 = vmatprep.mubr.msk.bf16.mxu0 %vm20675_vm4, %v20674_v30 }
0x170f   : > { %v18506_v42 = vpop.f32.mrb[21].mxu0  ;;  %v11562_v50 = vpack.c.bf16 %v11102_v5, %v11102_v5 }
0x1710   : > { %18543 = vmatpush3.bf16.msra.mxu1 %v20015_v45  ;;  %v11105_v43 = vpop.f32.mrb[22].mxu0  ;;  %v22682_v42 = vld [vmem:[%s23505_s1 + $0x8] sm:$0xff]  }
0x1711   : > { %18556 = vmatprep.subr.bf16.mxu1 %v20674_v30  ;;  %v18507_v44 = vpop.f32.mrb[23].mxu0  ;;  %v22703_v43 = vld [vmem:[%s23505_s1 + $0x20] ss:$0 sps:$4 sm:$0xff]  }
0x1712   : > { %v12452_v44 = vld [vmem:[%s23506_s26] sm:$0xf]  ;;  %s23509_s26 = sld [smem:[#allocation58_spill]] }
0x1713   : > { %18545 = vmatmul.mubr.msk.bf16.vlgmr.msra.gmra.mrb[0].mxu1 %vm8952_vm5, %v11334_v35  ;;  %v22672_v35 = vld [vmem:[%s23504_s22] sm:$0xff]   ;;  %s23507_s22 = sld [smem:[#allocation57_spill]] }
0x1714   : > { %18557 = vmatpush3.bf16.msra.mxu1 %v20017_v59  ;;  %18560 = vmatprep.mubr.msk.bf16.mxu1 %vm20675_vm4, %v20674_v30  ;;  %v22689_v59 = vld [vmem:[%s23505_s1 + $0x10] sm:$0xff]  }
0x1715   : > { %18558 = vmatprep.subr.bf16.mxu1 %v20674_v30 }
0x1718   : > { %18559 = vmatpush3.bf16.msra.mxu1 %v20019_v10  ;;  %v20032_v10 = vld [vmem:[%s23503_s2 + $0x38] sm:$0xff]  }
0x1719   : > { %18572 = vmatprep.subr.bf16.mxu1 %v20674_v30 }
0x171b   : > { %18561 = vmatmul.mubr.msk.bf16.vlgmr.msra.gmra.mrb[4].mxu1 %vm8952_vm5, %v11448_v63 }
0x171c   : > { %18573 = vmatpush3.bf16.msra.mxu1 %v20021_v57  ;;  %18576 = vmatprep.mubr.msk.bf16.mxu1 %vm20675_vm4, %v20674_v30 }
0x171d   : > { %18574 = vmatprep.subr.bf16.mxu1 %v20674_v30 }
0x1720   : > { %18575 = vmatpush3.bf16.msra.mxu1 %v20023_v62 }
0x1721   : > { %18602 = vmatprep.subr.bf16.mxu1 %v20674_v30 }
0x1723   : > { %18577 = vmatmul.mubr.msk.bf16.vlgmr.msra.gmra.mrb[8].mxu1 %vm8952_vm5, %v11562_v50  ;;  %v20033_v50 = vld [vmem:[%s23503_s2] sm:$0xff]  }
0x1724   : > { %18610 = vmatprep.mubr.msk.bf16.mxu1 %vm20675_vm4, %v20674_v30  ;;  %18603 = vmatpush3.bf16.msra.mxu1 %v20029_v4 }
0x1725   : > { %18604 = vmatprep.subr.bf16.mxu1 %v20674_v30 }
0x1728   : > { %18605 = vmatpush3.bf16.msra.mxu1 %v20030_v39 }
0x1729   : > { %18606 = vmatprep.subr.bf16.mxu1 %v20674_v30 }
0x172c   : > { %18607 = vmatpush3.bf16.msra.mxu1 %v20031_v3  ;;  %v20034_v3 = vld [vmem:[%s23503_s2 + $0x8] sm:$0xff]  }
0x172d   : > { %18608 = vmatprep.subr.bf16.mxu1 %v20674_v30 }
0x1730   : > { %18609 = vmatpush3.bf16.msra.mxu1 %v20032_v10  ;;  %v20059_v10 = vld [vmem:[%s23503_s2 + $0xf0] sm:$0xff]  }
0x1731   : > { %18614 = vmatprep.subr.bf16.mxu1 %v20674_v30 }
0x17c6   : > { %v11159_v0 = vpop.f32.mrb[240].mxu1 }
0x17c7   : > { %v18514_v51 = vpop.f32.mrb[241].mxu1 }
0x17c8   : > { %v11162_v8 = vpop.f32.mrb[242].mxu1 }
0x17c9   : > { %v18515_v11 = vpop.f32.mrb[243].mxu1  ;;  %v20035_v8 = vld [vmem:[%s23503_s2 + $0x10] sm:$0xff]  }
0x17ce   : > { %v11214_v13 = vpop.f32.mrb[244].mxu1 }
0x17cf   : > { %v11215_v38 = vadd.f32 %v11214_v13, %v11159_v0  ;;  %v18522_v58 = vpop.f32.mrb[245].mxu1 }
0x17d0   : > { %v11217_v37 = vpop.f32.mrb[246].mxu1 }
0x17d1   : > { %v18523_v14 = vpop.f32.mrb[247].mxu1 }
0x17d2   : > { %v20037_v14 = vld [vmem:[%s23503_s2 + $0x40] sm:$0xff]  }
0x17d6   : > { %v11270_v1 = vpop.f32.mrb[248].mxu1  ;;  %v11441_v41 = vpop.f32.mrb[24].mxu0 }
0x17d7   : > { %v11276_v9 = vadd.f32 %v11270_v1, %v11215_v38  ;;  %v18530_v2 = vpop.f32.mrb[249].mxu1  ;;  %v18554_v12 = vpop.f32.mrb[25].mxu0  ;;  %v20036_v38 = vld [vmem:[%s23503_s2 + $0x18] sm:$0xff]  }
0x17d8   : > { %v11273_v15 = vpop.f32.mrb[250].mxu1  ;;  %v11444_v60 = vpop.f32.mrb[26].mxu0  ;;  %v20038_v2 = vld [vmem:[%s23503_s2 + $0x48] sm:$0xff]  }
0x17d9   : > { %v18531_v53 = vpop.f32.mrb[251].mxu1  ;;  %v18555_v6 = vpop.f32.mrb[27].mxu0  ;;  %v20039_v60 = vld [vmem:[%s23503_s2 + $0x50] sm:$0xff]  }
0x17de   : > { %v11327_v61 = vpop.f32.mrb[252].mxu1 }
0x17df   : > { %v11333_v46 = vadd.f32 %v11327_v61, %v11276_v9  ;;  %v18538_v16 = vpop.f32.mrb[253].mxu1  ;;  %v20040_v61 = vld [vmem:[%s23503_s2 + $0x58] sm:$0xff]  }
0x17e0   : > { %v11330_v17 = vpop.f32.mrb[254].mxu1  ;;  %v11555_v18 = vpop.f32.mrb[28].mxu0 }
0x17e1   : > { %v18539_v52 = vpop.f32.mrb[255].mxu1  ;;  %v18570_v20 = vpop.f32.mrb[29].mxu0 }
0x17e2   : > { %v11558_v21 = vpop.f32.mrb[30].mxu0 }
0x17e3   : > { %v18571_v22 = vpop.f32.mrb[31].mxu0  ;;  %v20042_v21 = vld [vmem:[%s23503_s2 + $0x68] sm:$0xff]  }
0x17e6   : > { %v11384_v23 = vpop.f32.mrb[0].mxu1 }
0x17e7   : > { %v11390_v19 = vadd.f32 %v11384_v23, %v11333_v46  ;;  %v18546_v24 = vpop.f32.mrb[1].mxu1 }
0x17e8   : > { %v11387_v25 = vpop.f32.mrb[2].mxu1 }
0x17e9   : > { %v11447_v26 = vadd.f32 %v11441_v41, %v11390_v19  ;;  %v18547_v27 = vpop.f32.mrb[3].mxu1  ;;  %v20043_v19 = vld [vmem:[%s23503_s2 + $0x70] sm:$0xff]  }
0x17ea   : > { %v20045_v27 = vld [vmem:[%s23503_s2 + $0x80] sm:$0xff]  }
0x17ee   : > { %v11498_v36 = vpop.f32.mrb[4].mxu1 }
0x17ef   : > { %v11504_v28 = vadd.f32 %v11498_v36, %v11447_v26  ;;  %v18562_v29 = vpop.f32.mrb[5].mxu1  ;;  %v20044_v26 = vld [vmem:[%s23503_s2 + $0x78] sm:$0xff]  }
0x17f0   : > { %v11501_v32 = vpop.f32.mrb[6].mxu1  ;;  %v20047_v29 = vld [vmem:[%s23503_s2 + $0x90] sm:$0xff]  }
0x17f1   : > { %v11561_v33 = vadd.f32 %v11555_v18, %v11504_v28  ;;  %v18563_v34 = vpop.f32.mrb[7].mxu1  ;;  %v20041_v18 = vld [vmem:[%s23503_s2 + $0x60] sm:$0xff]   ;;  %v20046_v28 = vld [vmem:[%s23503_s2 + $0x88] sm:$0xff]   ;;  %v20048_v32 = vld [vmem:[%s23503_s2 + $0x98] sm:$0xff]  }
0x17f2   : > { %v20049_v34 = vld [vmem:[%s23503_s2 + $0xa0] sm:$0xff]  }
0x17f6   : > { %v11612_v31 = vpop.f32.mrb[8].mxu1 }
0x17f7   : > { %v11618_v49 = vadd.f32 %v11612_v31, %v11561_v33  ;;  %v18578_v7 = vpop.f32.mrb[9].mxu1  ;;  %v20050_v31 = vld [vmem:[%s23503_s2 + $0xa8] sm:$0xff]  }
0x17f8   : > { %v11615_v56 = vpop.f32.mrb[10].mxu1  ;;  %v20053_v7 = vld [vmem:[%s23503_s2 + $0xc0] sm:$0xff]  }
0x17f9   : > { %v11626_v40 = vadd.f32 %v16282_v54, %v11618_v49  ;;  %v18579_v47 = vpop.f32.mrb[11].mxu1  ;;  %v20051_v54 = vld [vmem:[%s23503_s2 + $0xb0] sm:$0xff]   ;;  %v20052_v49 = vld [vmem:[%s23503_s2 + $0xb8] sm:$0xff]  }
0x17fa   : > { %v20055_v47 = vld [vmem:[%s23503_s2 + $0xd0] sm:$0xff]  }
0x17fb   : > { %v11627_v55 = vmax.f32 %v11626_v40, 0.0  ;;  %v20054_v40 = vld [vmem:[%s23503_s2 + $0xc8] sm:$0xff]  }
0x17fd   : > { %v11709_v45 = vpack.c.bf16 %v11627_v55, %v11627_v55  ;;  %v20056_v55 = vld [vmem:[%s23503_s2 + $0xd8] sm:$0xff]  }
0x17ff   : > { %v11751_v5 = vsel %vm11749_vm6, %v11709_v45, 0 }
0x1800   : > { %18581 = vmatpush3.bf16.msra.mxu0 %v11751_v5  ;;  %v20057_v5 = vld [vmem:[%s23503_s2 + $0xe0] sm:$0xff]  }
0x1801   : > { %18710 = vmatprep.subr.bf16.mxu0 %v20674_v30 }
0x1803   : > { %18583 = vmatmul.mubr.msk.bf16.vlgmr.msra.gmra.mrb[32].mxu0 %vm11733_vm7, %v22672_v35 }
0x1804   : > { %18711 = vmatpush3.bf16.msra.mxu0 %v22579_v48  ;;  %18586 = vmatprep.mubr.msk.bf16.mxu0 %vm20675_vm4, %v20674_v30  ;;  %v22696_v48 = vld [vmem:[%s23505_s1 + $0x18] sm:$0xff]   ;;  %s23508_s1 = smov %s23507_s22 }
0x1805   : > { %18724 = vmatprep.subr.bf16.mxu0 %v20674_v30 }
0x180b   : > { %18587 = vmatmul.mubr.msk.bf16.gmra.mrb[36].mxu0 %vm11733_vm7, %v22682_v42 }
0x180c   : > { %18590 = vmatprep.mubr.msk.bf16.mxu0 %vm20675_vm4, %v20674_v30 }
0x1813   : > { %18591 = vmatmul.mubr.msk.bf16.gmra.mrb[40].mxu0 %vm11733_vm7, %v22689_v59 }
0x1814   : > { %18594 = vmatprep.mubr.msk.bf16.mxu0 %vm20675_vm4, %v20674_v30 }
0x181b   : > { %18595 = vmatmul.mubr.msk.bf16.gmra.mrb[44].mxu0 %vm11733_vm7, %v22696_v48 }
0x181c   : > { %18598 = vmatprep.mubr.msk.bf16.mxu0 %vm20675_vm4, %v20674_v30 }
0x1823   : > { %18599 = vmatmul.mubr.msk.bf16.gmra.mrb[48].mxu0 %vm11733_vm7, %v22703_v43 }
0x1824   : > { %18712 = vmatprep.mubr.msk.bf16.mxu0 %vm20675_vm4, %v20674_v30 }
0x182b   : > { %18713 = vmatmul.mubr.msk.bf16.vlgmr.msra.gmra.mrb[52].mxu0 %vm3525_vm3, %v12452_v44  ;;  %v20058_v44 = vld [vmem:[%s23503_s2 + $0xe8] sm:$0xff]  }
0x182c   : > { %18726 = vmatprep.mubr.msk.bf16.mxu0 %vm20675_vm4, %v20674_v30 }
0x18d6   : > { %v11787_v63 = vpop.f32.mrb[32].mxu0 }
0x18d7   : > { %v18584_v57 = vpop.f32.mrb[33].mxu0  ;;  %v11825_v41 = vpack.c.bf16 %v11787_v63, %v11787_v63  ;;  %v20060_v63 = vld [vmem:[%s23503_s2 + $0xf8] sm:$0xff]  }
0x18d8   : > { %v11790_v62 = vpop.f32.mrb[34].mxu0  ;;  %v20061_v57 = vld [vmem:[%s23503_s2 + $0x100] sm:$0xff]  }
0x18d9   : > { %v11826_v4 = vpack.c.bf16 %v11790_v62, %v11790_v62  ;;  %v18585_v39 = vpop.f32.mrb[35].mxu0 }
0x18da   : > { %v20064_v39 = vld [vmem:[%s23503_s2 + $0x118] sm:$0xff]  }
0x18db   : > { %18611 = vmatmul.mubr.msk.bf16.vlgmr.msra.gmra.mrb[12].mxu1 %vm3081_vm2, %v11826_v4  ;;  %v20063_v4 = vld [vmem:[%s23503_s2 + $0x110] sm:$0xff]  }
0x18dc   : > { %18615 = vmatpush3.bf16.msra.mxu1 %v20033_v50  ;;  %18622 = vmatprep.mubr.msk.bf16.mxu1 %vm20675_vm4, %v20674_v30  ;;  %v20062_v50 = vld [vmem:[%s23503_s2 + $0x108] sm:$0xff]   ;;  %s23510_s2 = smov %s23509_s26 }
0x18dd   : > { %18616 = vmatprep.subr.bf16.mxu1 %v20674_v30 }
0x18de   : > { %v11795_v0 = vpop.f32.mrb[36].mxu0 }
0x18df   : > { %v18588_v51 = vpop.f32.mrb[37].mxu0  ;;  %v11961_v16 = vpack.c.bf16 %v11795_v0, %v11795_v0  ;;  %v20065_v0 = vld [vmem:[%s23507_s22] sm:$0xff]   ;;  %s23511_s22 = sld [smem:[#allocation60_spill]] }
0x18e0   : > { %18617 = vmatpush3.bf16.msra.mxu1 %v20034_v3  ;;  %v11798_v11 = vpop.f32.mrb[38].mxu0  ;;  %v20066_v51 = vld [vmem:[%s23508_s1 + $0x8] sm:$0xff]  }
0x18e1   : > { %18618 = vmatprep.subr.bf16.mxu1 %v20674_v30  ;;  %v18589_v13 = vpop.f32.mrb[39].mxu0  ;;  %v12030_v36 = vpack.c.bf16 %v11798_v11, %v11798_v11  ;;  %v16338_v11 = vld [vmem:[#allocation5] ss:$0 sm:$0xff] }
0x18e2   : > { %v16340_v13 = vld [vmem:[#allocation7] ss:$0 sm:$0xff] }
0x18e4   : > { %18619 = vmatpush3.bf16.msra.mxu1 %v20035_v8 }
0x18e5   : > { %18620 = vmatprep.subr.bf16.mxu1 %v20674_v30  ;;  %s23512_s1 = smov %s23511_s22 }
0x18e6   : > { %v22725_v58 = vpop.f32.mrb[40].mxu0 }
0x18e7   : > { %v18592_v37 = vpop.f32.mrb[41].mxu0  ;;  %v12099_v33 = vpack.c.bf16 %v22725_v58, %v22725_v58 }
0x18e8   : > { %18621 = vmatpush3.bf16.msra.mxu1 %v20036_v38  ;;  %v22728_v1 = vpop.f32.mrb[42].mxu0  ;;  %v19204_v38 = vadd.f32 %v16340_v13, %v16338_v11  ;;  %v20081_v11 = vld [vmem:[%s23510_s2 + $0x70] sm:$0xff]   ;;  %v20082_v13 = vld [vmem:[%s23510_s2 + $0x78] sm:$0xff]  }
0x18e9   : > { %18626 = vmatprep.subr.bf16.mxu1 %v20674_v30  ;;  %v18593_v9 = vpop.f32.mrb[43].mxu0  ;;  %v12168_v56 = vpack.c.bf16 %v22728_v1, %v22728_v1 }
0x18eb   : > { %18623 = vmatmul.mubr.msk.bf16.vlgmr.msra.gmra.mrb[12].mxu1 %vm3081_vm2, %v11825_v41 }
0x18ec   : > { %18627 = vmatpush3.bf16.msra.mxu1 %v20037_v14  ;;  %18634 = vmatprep.mubr.msk.bf16.mxu1 %vm20675_vm4, %v20674_v30 }
0x18ed   : > { %18628 = vmatprep.subr.bf16.mxu1 %v20674_v30 }
0x18ee   : > { %v22736_v12 = vpop.f32.mrb[44].mxu0 }
0x18ef   : > { %v18596_v15 = vpop.f32.mrb[45].mxu0  ;;  %v12237_v45 = vpack.c.bf16 %v22736_v12, %v22736_v12 }
0x18f0   : > { %18629 = vmatpush3.bf16.msra.mxu1 %v20038_v2  ;;  %v22739_v53 = vpop.f32.mrb[46].mxu0  ;;  %v20067_v15 = vld [vmem:[%s23509_s26 + $0x20] sm:$0xff]   ;;  %s23513_s26 = sld [smem:[#allocation61_spill]] }
0x18f1   : > { %18630 = vmatprep.subr.bf16.mxu1 %v20674_v30  ;;  %v18597_v6 = vpop.f32.mrb[47].mxu0  ;;  %v12306_v62 = vpack.c.bf16 %v22739_v53, %v22739_v53  ;;  %v20069_v53 = vld [vmem:[%s23510_s2 + $0x30] sm:$0xff]  }
0x18f2   : > { %v20070_v6 = vld [vmem:[%s23510_s2 + $0x38] sm:$0xff]  }
0x18f4   : > { %18631 = vmatpush3.bf16.msra.mxu1 %v20039_v60  ;;  %v20068_v60 = vld [vmem:[%s23510_s2 + $0x28] sm:$0xff]  }
0x18f5   : > { %18632 = vmatprep.subr.bf16.mxu1 %v20674_v30 }
0x18f6   : > { %v22744_v46 = vpop.f32.mrb[48].mxu0 }
0x18f7   : > { %v18600_v17 = vpop.f32.mrb[49].mxu0  ;;  %v12375_v3 = vpack.c.bf16 %v22744_v46, %v22744_v46  ;;  %v20089_v46 = vld [vmem:[%s23510_s2 + $0xa8] sm:$0xff]  }
0x18f8   : > { %18633 = vmatpush3.bf16.msra.mxu1 %v20040_v61  ;;  %v11822_v52 = vpop.f32.mrb[50].mxu0  ;;  %v20087_v61 = vld [vmem:[%s23510_s2 + $0xa0] sm:$0xff]   ;;  %v20093_v17 = vld [vmem:[%s23510_s2 + $0xb8] sm:$0xff]  }
0x18f9   : > { %18638 = vmatprep.subr.bf16.mxu1 %v20674_v30  ;;  %v18601_v20 = vpop.f32.mrb[51].mxu0 }
0x18fb   : > { %18635 = vmatmul.mubr.msk.bf16.vlgmr.msra.gmra.mrb[12].mxu1 %vm3081_vm2, %v11961_v16  ;;  %v20091_v16 = vld [vmem:[%s23510_s2 + $0xb0] sm:$0xff]  }
0x18fc   : > { %18639 = vmatpush3.bf16.msra.mxu1 %v20041_v18  ;;  %18646 = vmatprep.mubr.msk.bf16.mxu1 %vm20675_vm4, %v20674_v30 }
0x18fd   : > { %18640 = vmatprep.subr.bf16.mxu1 %v20674_v30 }
0x18fe   : > { %v22753_v22 = vpop.f32.mrb[52].mxu0 }
0x18ff   : > { %v18714_v23 = vpop.f32.mrb[53].mxu0  ;;  %v12500_v8 = vpack.c.bf16 %v22753_v22, %v22753_v22 }
0x1900   : > { %18641 = vmatpush3.bf16.msra.mxu1 %v20042_v21  ;;  %v12493_v24 = vpop.f32.mrb[54].mxu0  ;;  %v20071_v21 = vld [vmem:[%s23510_s2] sm:$0xff]  }
0x1901   : > { %18642 = vmatprep.subr.bf16.mxu1 %v20674_v30  ;;  %v18715_v25 = vpop.f32.mrb[55].mxu0 }
0x1904   : > { %18643 = vmatpush3.bf16.msra.mxu1 %v20043_v19  ;;  %v20072_v19 = vld [vmem:[%s23510_s2 + $0x8] sm:$0xff]  }
0x1905   : > { %18644 = vmatprep.subr.bf16.mxu1 %v20674_v30 }
0x1908   : > { %18645 = vmatpush3.bf16.msra.mxu1 %v20044_v26  ;;  %v20073_v26 = vld [vmem:[%s23510_s2 + $0x10] sm:$0xff]  }
0x1909   : > { %18650 = vmatprep.subr.bf16.mxu1 %v20674_v30 }
0x190b   : > { %18647 = vmatmul.mubr.msk.bf16.vlgmr.msra.gmra.mrb[12].mxu1 %vm3081_vm2, %v12030_v36 }
0x190c   : > { %18651 = vmatpush3.bf16.msra.mxu1 %v20045_v27  ;;  %18658 = vmatprep.mubr.msk.bf16.mxu1 %vm20675_vm4, %v20674_v30 }
0x190d   : > { %18652 = vmatprep.subr.bf16.mxu1 %v20674_v30 }
0x1910   : > { %18653 = vmatpush3.bf16.msra.mxu1 %v20046_v28  ;;  %v20074_v28 = vld [vmem:[%s23510_s2 + $0x18] sm:$0xff]  }
0x1911   : > { %18654 = vmatprep.subr.bf16.mxu1 %v20674_v30 }
0x1914   : > { %18655 = vmatpush3.bf16.msra.mxu1 %v20047_v29 }
0x1915   : > { %18656 = vmatprep.subr.bf16.mxu1 %v20674_v30 }
0x1918   : > { %18657 = vmatpush3.bf16.msra.mxu1 %v20048_v32 }
0x1919   : > { %18662 = vmatprep.subr.bf16.mxu1 %v20674_v30 }
0x191b   : > { %18659 = vmatmul.mubr.msk.bf16.vlgmr.msra.gmra.mrb[12].mxu1 %vm3081_vm2, %v12099_v33  ;;  %v20075_v33 = vld [vmem:[%s23510_s2 + $0x40] sm:$0xff]  }
0x191c   : > { %18663 = vmatpush3.bf16.msra.mxu1 %v20049_v34  ;;  %18670 = vmatprep.mubr.msk.bf16.mxu1 %vm20675_vm4, %v20674_v30 }
0x191d   : > { %18664 = vmatprep.subr.bf16.mxu1 %v20674_v30 }
0x1920   : > { %18665 = vmatpush3.bf16.msra.mxu1 %v20050_v31 }
0x1921   : > { %18666 = vmatprep.subr.bf16.mxu1 %v20674_v30 }
0x1924   : > { %18667 = vmatpush3.bf16.msra.mxu1 %v20051_v54 }
0x1925   : > { %18668 = vmatprep.subr.bf16.mxu1 %v20674_v30 }
0x1928   : > { %18669 = vmatpush3.bf16.msra.mxu1 %v20052_v49 }
0x1929   : > { %18674 = vmatprep.subr.bf16.mxu1 %v20674_v30 }
0x192b   : > { %18671 = vmatmul.mubr.msk.bf16.vlgmr.msra.gmra.mrb[12].mxu1 %vm3081_vm2, %v12168_v56  ;;  %v20076_v56 = vld [vmem:[%s23510_s2 + $0x48] sm:$0xff]  }
0x192c   : > { %18675 = vmatpush3.bf16.msra.mxu1 %v20053_v7  ;;  %18682 = vmatprep.mubr.msk.bf16.mxu1 %vm20675_vm4, %v20674_v30  ;;  %v20095_v7 = vld [vmem:[%s23510_s2 + $0xe0] sm:$0xff]  }
0x192d   : > { %18676 = vmatprep.subr.bf16.mxu1 %v20674_v30 }
0x1930   : > { %18677 = vmatpush3.bf16.msra.mxu1 %v20054_v40  ;;  %v20097_v40 = vld [vmem:[%s23510_s2 + $0xe8] sm:$0xff]  }
0x1931   : > { %18678 = vmatprep.subr.bf16.mxu1 %v20674_v30 }
0x1934   : > { %18679 = vmatpush3.bf16.msra.mxu1 %v20055_v47 }
0x1935   : > { %18680 = vmatprep.subr.bf16.mxu1 %v20674_v30 }
0x1938   : > { %18681 = vmatpush3.bf16.msra.mxu1 %v20056_v55 }
0x1939   : > { %18686 = vmatprep.subr.bf16.mxu1 %v20674_v30 }
0x193b   : > { %18683 = vmatmul.mubr.msk.bf16.vlgmr.msra.gmra.mrb[12].mxu1 %vm3081_vm2, %v12237_v45  ;;  %v20077_v45 = vld [vmem:[%s23510_s2 + $0x50] sm:$0xff]  }
0x193c   : > { %18687 = vmatpush3.bf16.msra.mxu1 %v20057_v5  ;;  %18694 = vmatprep.mubr.msk.bf16.mxu1 %vm20675_vm4, %v20674_v30 }
0x193d   : > { %18688 = vmatprep.subr.bf16.mxu1 %v20674_v30 }
0x1940   : > { %18689 = vmatpush3.bf16.msra.mxu1 %v20058_v44  ;;  %v20099_v44 = vld [vmem:[%s23510_s2 + $0xf0] sm:$0xff]  }
0x1941   : > { %18690 = vmatprep.subr.bf16.mxu1 %v20674_v30 }
0x1944   : > { %18691 = vmatpush3.bf16.msra.mxu1 %v20059_v10 }
0x1945   : > { %18692 = vmatprep.subr.bf16.mxu1 %v20674_v30 }
0x1948   : > { %18693 = vmatpush3.bf16.msra.mxu1 %v20060_v63  ;;  %v20078_v63 = vld [vmem:[%s23510_s2 + $0x58] sm:$0xff]  }
0x1949   : > { %18698 = vmatprep.subr.bf16.mxu1 %v20674_v30 }
0x194b   : > { %18695 = vmatmul.mubr.msk.bf16.vlgmr.msra.gmra.mrb[12].mxu1 %vm3081_vm2, %v12306_v62 }
0x194c   : > { %18699 = vmatpush3.bf16.msra.mxu1 %v20061_v57  ;;  %18706 = vmatprep.mubr.msk.bf16.mxu1 %vm20675_vm4, %v20674_v30  ;;  %v20101_v57 = vld [vmem:[%s23510_s2 + $0xf8] sm:$0xff]  }
0x194d   : > { %18700 = vmatprep.subr.bf16.mxu1 %v20674_v30 }
0x1950   : > { %18701 = vmatpush3.bf16.msra.mxu1 %v20062_v50 }
0x1951   : > { %18702 = vmatprep.subr.bf16.mxu1 %v20674_v30 }
0x1954   : > { %18703 = vmatpush3.bf16.msra.mxu1 %v20063_v4 }
0x1955   : > { %18704 = vmatprep.subr.bf16.mxu1 %v20674_v30 }
0x1958   : > { %18705 = vmatpush3.bf16.msra.mxu1 %v20064_v39  ;;  %v20079_v39 = vld [vmem:[%s23510_s2 + $0x60] sm:$0xff]  }
0x1959   : > { %18716 = vmatprep.subr.bf16.mxu1 %v20674_v30 }
0x195b   : > { %18707 = vmatmul.mubr.msk.bf16.vlgmr.msra.gmra.mrb[12].mxu1 %vm3081_vm2, %v12375_v3 }
0x195c   : > { %18717 = vmatpush3.bf16.msra.mxu1 %v20065_v0  ;;  %18720 = vmatprep.mubr.msk.bf16.mxu1 %vm20675_vm4, %v20674_v30 }
0x195d   : > { %18718 = vmatprep.subr.bf16.mxu1 %v20674_v30 }
0x1960   : > { %18719 = vmatpush3.bf16.msra.mxu1 %v20066_v51 }
0x1961   : > { %18806 = vmatprep.subr.bf16.mxu1 %v20674_v30 }
0x1967   : > { %18721 = vmatmul.mubr.msk.bf16.vlgmr.msra.gmra.mrb[12].mxu1 %vm8952_vm5, %v12500_v8  ;;  %v20080_v8 = vld [vmem:[%s23510_s2 + $0x68] sm:$0xff]  }
0x1968   : > { %18814 = vmatprep.mubr.msk.bf16.mxu1 %vm20675_vm4, %v20674_v30  ;;  %18807 = vmatpush3.bf16.msra.mxu1 %v20087_v61  ;;  %v20098_v61 = vld [vmem:[%s23510_s2 + $0x108] sm:$0xff]  }
0x1969   : > { %18808 = vmatprep.subr.bf16.mxu1 %v20674_v30 }
0x196c   : > { %18809 = vmatpush3.bf16.msra.mxu1 %v20089_v46  ;;  %v20100_v46 = vld [vmem:[%s23510_s2 + $0x110] sm:$0xff]  }
0x196d   : > { %18810 = vmatprep.subr.bf16.mxu1 %v20674_v30 }
0x1970   : > { %18811 = vmatpush3.bf16.msra.mxu1 %v20091_v16  ;;  %v20102_v16 = vld [vmem:[%s23510_s2 + $0x118] sm:$0xff]  }
0x1971   : > { %18812 = vmatprep.subr.bf16.mxu1 %v20674_v30 }
0x1974   : > { %18813 = vmatpush3.bf16.msra.mxu1 %v20093_v17 }
0x1975   : > { %18830 = vmatprep.subr.bf16.mxu1 %v20674_v30 }
0x1a3a   : > { %v12557_v58 = vpop.f32.mrb[12].mxu1 }
0x1a3b   : > { %v19205_v37 = vadd.f32 %v19204_v38, %v12557_v58  ;;  %v18722_v14 = vpop.f32.mrb[13].mxu1  ;;  %v20083_v38 = vld [vmem:[%s23510_s2 + $0x80] sm:$0xff]  }
0x1a3c   : > { %v12560_v1 = vpop.f32.mrb[14].mxu1  ;;  %v20085_v14 = vld [vmem:[%s23510_s2 + $0x90] sm:$0xff]  }
0x1a3d   : > { %v22837_v41 = vmax.f32 %v19205_v37, 0.0  ;;  %v18723_v9 = vpop.f32.mrb[15].mxu1  ;;  %v20084_v37 = vld [vmem:[%s23510_s2 + $0x88] sm:$0xff]   ;;  %v20086_v1 = vld [vmem:[%s23510_s2 + $0x98] sm:$0xff]  }
0x1a3f   : > { %v12637_v2 = vpack.c.bf16 %v22837_v41, %v22837_v41 }
0x1a41   : > { %v12639_v12 = vsel %vm11749_vm6, %v12637_v2, 0  ;;  %v20088_v2 = vld [vmem:[%s23510_s2 + $0xc0] sm:$0xff]  }
0x1a42   : > { %18725 = vmatpush3.bf16.msra.mxu0 %v12639_v12  ;;  %v20090_v12 = vld [vmem:[%s23510_s2 + $0xc8] sm:$0xff]  }
0x1a43   : > { %18746 = vmatprep.subr.bf16.mxu0 %v20674_v30 }
0x1a45   : > { %18727 = vmatmul.mubr.msk.bf16.vlgmr.msra.gmra.mrb[56].mxu0 %vm11733_vm7, %v22672_v35 }
0x1a46   : > { %18730 = vmatprep.mubr.msk.bf16.mxu0 %vm20675_vm4, %v20674_v30  ;;  %18747 = vmatpush3.bf16.msra.mxu0 %v20067_v15  ;;  %v20092_v15 = vld [vmem:[%s23510_s2 + $0xd0] sm:$0xff]  }
0x1a47   : > { %18748 = vmatprep.subr.bf16.mxu0 %v20674_v30 }
0x1a4a   : > { %18749 = vmatpush3.bf16.msra.mxu0 %v20068_v60  ;;  %v20094_v60 = vld [vmem:[%s23510_s2 + $0xd8] sm:$0xff]  }
0x1a4b   : > { %18750 = vmatprep.subr.bf16.mxu0 %v20674_v30 }
0x1a4d   : > { %18731 = vmatmul.mubr.msk.bf16.gmra.mrb[60].mxu0 %vm11733_vm7, %v22682_v42 }
0x1a4e   : > { %18734 = vmatprep.mubr.msk.bf16.mxu0 %vm20675_vm4, %v20674_v30  ;;  %18751 = vmatpush3.bf16.msra.mxu0 %v20069_v53 }
0x1a4f   : > { %18752 = vmatprep.subr.bf16.mxu0 %v20674_v30 }
0x1a52   : > { %18753 = vmatpush3.bf16.msra.mxu0 %v20070_v6  ;;  %v20096_v6 = vld [vmem:[%s23510_s2 + $0x100] sm:$0xff]   ;;  %s23514_s2 = smov %s23513_s26 }
0x1a53   : > { %18758 = vmatprep.subr.bf16.mxu0 %v20674_v30 }
0x1a55   : > { %18735 = vmatmul.mubr.msk.bf16.gmra.mrb[64].mxu0 %vm11733_vm7, %v22689_v59 }
0x1a56   : > { %18738 = vmatprep.mubr.msk.bf16.mxu0 %vm20675_vm4, %v20674_v30 }
0x1a5d   : > { %18739 = vmatmul.mubr.msk.bf16.gmra.mrb[68].mxu0 %vm11733_vm7, %v22696_v48 }
0x1a5e   : > { %18742 = vmatprep.mubr.msk.bf16.mxu0 %vm20675_vm4, %v20674_v30 }
0x1a65   : > { %18743 = vmatmul.mubr.msk.bf16.gmra.mrb[72].mxu0 %vm11733_vm7, %v22703_v43 }
0x1a66   : > { %18754 = vmatprep.mubr.msk.bf16.mxu0 %vm20675_vm4, %v20674_v30 }
0x1b18   : > { %v12675_v18 = vpop.f32.mrb[56].mxu0 }
0x1b19   : > { %v18728_v52 = vpop.f32.mrb[57].mxu0  ;;  %v12713_v31 = vpack.c.bf16 %v12675_v18, %v12675_v18 }
0x1b1a   : > { %v12678_v20 = vpop.f32.mrb[58].mxu0 }
0x1b1b   : > { %v12714_v22 = vpack.c.bf16 %v12678_v20, %v12678_v20  ;;  %v18729_v23 = vpop.f32.mrb[59].mxu0 }
0x1b1c   : > { %v20104_v23 = vld [vmem:[%s23512_s1 + $0x28] sm:$0xff]  }
0x1b1d   : > { %18755 = vmatmul.mubr.msk.bf16.vlgmr.msra.gmra.mrb[76].mxu0 %vm3081_vm2, %v12714_v22  ;;  %v20103_v22 = vld [vmem:[%s23511_s22 + $0x20] sm:$0xff]   ;;  %s23515_s22 = sld [smem:[#allocation34_spill]] }
0x1b1e   : > { %18759 = vmatpush3.bf16.msra.mxu0 %v20071_v21  ;;  %18766 = vmatprep.mubr.msk.bf16.mxu0 %vm20675_vm4, %v20674_v30 }
0x1b1f   : > { %18760 = vmatprep.subr.bf16.mxu0 %v20674_v30 }
0x1b20   : > { %v12683_v24 = vpop.f32.mrb[60].mxu0 }
0x1b21   : > { %v18732_v25 = vpop.f32.mrb[61].mxu0  ;;  %v12849_v50 = vpack.c.bf16 %v12683_v24, %v12683_v24 }
0x1b22   : > { %18761 = vmatpush3.bf16.msra.mxu0 %v20072_v19  ;;  %v22886_v27 = vpop.f32.mrb[62].mxu0 }
0x1b23   : > { %18762 = vmatprep.subr.bf16.mxu0 %v20674_v30  ;;  %v18733_v36 = vpop.f32.mrb[63].mxu0  ;;  %v12918_v58 = vpack.c.bf16 %v22886_v27, %v22886_v27 }
0x1b26   : > { %18763 = vmatpush3.bf16.msra.mxu0 %v20073_v26 }
0x1b27   : > { %18764 = vmatprep.subr.bf16.mxu0 %v20674_v30 }
0x1b28   : > { %v22891_v29 = vpop.f32.mrb[64].mxu0 }
0x1b29   : > { %v18736_v32 = vpop.f32.mrb[65].mxu0  ;;  %v12987_v9 = vpack.c.bf16 %v22891_v29, %v22891_v29 }
0x1b2a   : > { %18765 = vmatpush3.bf16.msra.mxu0 %v20074_v28  ;;  %v12694_v34 = vpop.f32.mrb[66].mxu0 }
0x1b2b   : > { %18770 = vmatprep.subr.bf16.mxu0 %v20674_v30  ;;  %v13056_v54 = vpack.c.bf16 %v12694_v34, %v12694_v34  ;;  %v18737_v49 = vpop.f32.mrb[67].mxu0 }
0x1b2d   : > { %18767 = vmatmul.mubr.msk.bf16.vlgmr.msra.gmra.mrb[80].mxu0 %vm3081_vm2, %v12713_v31  ;;  %18815 = vmatmul.mubr.msk.bf16.vlgmr.msra.gmra.mrb[16].mxu1 %vm3081_vm2, %v13056_v54 }
0x1b2e   : > { %18771 = vmatpush3.bf16.msra.mxu0 %v20075_v33  ;;  %18778 = vmatprep.mubr.msk.bf16.mxu0 %vm20675_vm4, %v20674_v30  ;;  %v20105_v33 = vld [vmem:[%s23512_s1 + $0x30] sm:$0xff]  }
0x1b2f   : > { %18772 = vmatprep.subr.bf16.mxu0 %v20674_v30  ;;  %18831 = vmatpush3.bf16.msra.mxu1 %v20095_v7 }
0x1b30   : > { %v22903_v47 = vpop.f32.mrb[68].mxu0  ;;  %18832 = vmatprep.subr.bf16.mxu1 %v20674_v30  ;;  %18838 = vmatprep.mubr.msk.bf16.mxu1 %vm20675_vm4, %v20674_v30 }
0x1b31   : > { %v18740_v55 = vpop.f32.mrb[69].mxu0  ;;  %v13125_v53 = vpack.c.bf16 %v22903_v47, %v22903_v47 }
0x1b32   : > { %18773 = vmatpush3.bf16.msra.mxu0 %v20076_v56  ;;  %v12702_v5 = vpop.f32.mrb[70].mxu0 }
0x1b33   : > { %18774 = vmatprep.subr.bf16.mxu0 %v20674_v30  ;;  %18833 = vmatpush3.bf16.msra.mxu1 %v20097_v40  ;;  %v18741_v10 = vpop.f32.mrb[71].mxu0  ;;  %v13194_v0 = vpack.c.bf16 %v12702_v5, %v12702_v5 }
0x1b34   : > { %18834 = vmatprep.subr.bf16.mxu1 %v20674_v30 }
0x1b36   : > { %18775 = vmatpush3.bf16.msra.mxu0 %v20077_v45 }
0x1b37   : > { %18776 = vmatprep.subr.bf16.mxu0 %v20674_v30  ;;  %18835 = vmatpush3.bf16.msra.mxu1 %v20099_v44 }
0x1b38   : > { %18836 = vmatprep.subr.bf16.mxu1 %v20674_v30  ;;  %v22916_v62 = vpop.f32.mrb[72].mxu0 }
0x1b39   : > { %v18744_v4 = vpop.f32.mrb[73].mxu0  ;;  %v13263_v17 = vpack.c.bf16 %v22916_v62, %v22916_v62 }
0x1b3a   : > { %18777 = vmatpush3.bf16.msra.mxu0 %v20078_v63  ;;  %v12710_v3 = vpop.f32.mrb[74].mxu0 }
0x1b3b   : > { %18782 = vmatprep.subr.bf16.mxu0 %v20674_v30  ;;  %18837 = vmatpush3.bf16.msra.mxu1 %v20101_v57  ;;  %v18745_v51 = vpop.f32.mrb[75].mxu0 }
0x1b3c   : > { %18854 = vmatprep.subr.bf16.mxu1 %v20674_v30 }
0x1b3d   : > { %18779 = vmatmul.mubr.msk.bf16.vlgmr.msra.gmra.mrb[84].mxu0 %vm3081_vm2, %v12849_v50 }
0x1b3e   : > { %18783 = vmatpush3.bf16.msra.mxu0 %v20079_v39  ;;  %18790 = vmatprep.mubr.msk.bf16.mxu0 %vm20675_vm4, %v20674_v30 }
0x1b3f   : > { %18784 = vmatprep.subr.bf16.mxu0 %v20674_v30  ;;  %18839 = vmatmul.mubr.msk.bf16.vlgmr.msra.gmra.mrb[20].mxu1 %vm3081_vm2, %v13194_v0 }
0x1b40   : > { %18856 = vmatprep.mubr.msk.bf16.mxu1 %vm20675_vm4, %v20674_v30 }
0x1b42   : > { %18785 = vmatpush3.bf16.msra.mxu0 %v20080_v8 }
0x1b43   : > { %18786 = vmatprep.subr.bf16.mxu0 %v20674_v30 }
0x1b46   : > { %18787 = vmatpush3.bf16.msra.mxu0 %v20081_v11 }
0x1b47   : > { %18788 = vmatprep.subr.bf16.mxu0 %v20674_v30 }
0x1b4a   : > { %18789 = vmatpush3.bf16.msra.mxu0 %v20082_v13 }
0x1b4b   : > { %18794 = vmatprep.subr.bf16.mxu0 %v20674_v30 }
0x1b4d   : > { %18791 = vmatmul.mubr.msk.bf16.vlgmr.msra.gmra.mrb[88].mxu0 %vm3081_vm2, %v12918_v58 }
0x1b4e   : > { %18795 = vmatpush3.bf16.msra.mxu0 %v20083_v38  ;;  %18802 = vmatprep.mubr.msk.bf16.mxu0 %vm20675_vm4, %v20674_v30 }
0x1b4f   : > { %18796 = vmatprep.subr.bf16.mxu0 %v20674_v30 }
0x1b52   : > { %18797 = vmatpush3.bf16.msra.mxu0 %v20084_v37  ;;  %v16394_v37 = vld [vmem:[#allocation8] ss:$0 sm:$0xff] }
0x1b53   : > { %18798 = vmatprep.subr.bf16.mxu0 %v20674_v30 }
0x1b56   : > { %18799 = vmatpush3.bf16.msra.mxu0 %v20085_v14 }
0x1b57   : > { %18800 = vmatprep.subr.bf16.mxu0 %v20674_v30 }
0x1b5a   : > { %18801 = vmatpush3.bf16.msra.mxu0 %v20086_v1 }
0x1b5b   : > { %18818 = vmatprep.subr.bf16.mxu0 %v20674_v30 }
0x1b5d   : > { %18803 = vmatmul.mubr.msk.bf16.vlgmr.msra.gmra.mrb[92].mxu0 %vm3081_vm2, %v12987_v9 }
0x1b5e   : > { %18819 = vmatpush3.bf16.msra.mxu0 %v20088_v2  ;;  %18826 = vmatprep.mubr.msk.bf16.mxu0 %vm20675_vm4, %v20674_v30 }
0x1b5f   : > { %18820 = vmatprep.subr.bf16.mxu0 %v20674_v30 }
0x1b62   : > { %18821 = vmatpush3.bf16.msra.mxu0 %v20090_v12 }
0x1b63   : > { %18822 = vmatprep.subr.bf16.mxu0 %v20674_v30 }
0x1b66   : > { %18823 = vmatpush3.bf16.msra.mxu0 %v20092_v15 }
0x1b67   : > { %18824 = vmatprep.subr.bf16.mxu0 %v20674_v30 }
0x1b6a   : > { %18825 = vmatpush3.bf16.msra.mxu0 %v20094_v60 }
0x1b6b   : > { %18842 = vmatprep.subr.bf16.mxu0 %v20674_v30 }
0x1b6d   : > { %18827 = vmatmul.mubr.msk.bf16.vlgmr.msra.gmra.mrb[96].mxu0 %vm3081_vm2, %v13125_v53 }
0x1b6e   : > { %18843 = vmatpush3.bf16.msra.mxu0 %v20096_v6  ;;  %18850 = vmatprep.mubr.msk.bf16.mxu0 %vm20675_vm4, %v20674_v30 }
0x1b6f   : > { %18844 = vmatprep.subr.bf16.mxu0 %v20674_v30 }
0x1b72   : > { %18845 = vmatpush3.bf16.msra.mxu0 %v20098_v61 }
0x1b73   : > { %18846 = vmatprep.subr.bf16.mxu0 %v20674_v30 }
0x1b76   : > { %18847 = vmatpush3.bf16.msra.mxu0 %v20100_v46 }
0x1b77   : > { %18848 = vmatprep.subr.bf16.mxu0 %v20674_v30 }
0x1b7a   : > { %18849 = vmatpush3.bf16.msra.mxu0 %v20102_v16  ;;  %v20107_v16 = vld [vmem:[%s23512_s1] sm:$0xff]  }
0x1b7b   : > { %18876 = vmatprep.subr.bf16.mxu0 %v20674_v30 }
0x1b7d   : > { %18851 = vmatmul.mubr.msk.bf16.vlgmr.msra.gmra.mrb[100].mxu0 %vm3081_vm2, %v13263_v17 }
0x1b7e   : > { %18884 = vmatprep.mubr.msk.bf16.mxu0 %vm20675_vm4, %v20674_v30  ;;  %18877 = vmatpush3.bf16.msra.mxu0 %v20103_v22 }
0x1b7f   : > { %18878 = vmatprep.subr.bf16.mxu0 %v20674_v30 }
0x1b82   : > { %18879 = vmatpush3.bf16.msra.mxu0 %v20104_v23 }
0x1b83   : > { %18880 = vmatprep.subr.bf16.mxu0 %v20674_v30 }
0x1b86   : > { %18881 = vmatpush3.bf16.msra.mxu0 %v20105_v33 }
0x1b87   : > { %18882 = vmatprep.subr.bf16.mxu0 %v20674_v30 }
0x1bf0   : > { %v12776_v18 = vpop.f32.mrb[76].mxu0 }
0x1bf1   : > { %v18756_v52 = vpop.f32.mrb[77].mxu0 }
0x1bf2   : > { %v12779_v20 = vpop.f32.mrb[78].mxu0  ;;  %v20109_v52 = vld [vmem:[%s23512_s1 + $0x8] sm:$0xff]  }
0x1bf3   : > { %v18757_v21 = vpop.f32.mrb[79].mxu0 }
0x1bf4   : > { %v20116_v21 = vld [vmem:[%s23512_s1 + $0x80] sm:$0xff]  }
0x1c00   : > { %v12843_v19 = vpop.f32.mrb[80].mxu0  ;;  %v13118_v24 = vpop.f32.mrb[16].mxu1 }
0x1c01   : > { %v12844_v25 = vadd.f32 %v12843_v19, %v12776_v18  ;;  %v18768_v26 = vpop.f32.mrb[81].mxu0  ;;  %v18816_v27 = vpop.f32.mrb[17].mxu1  ;;  %v20111_v19 = vld [vmem:[%s23512_s1 + $0x10] sm:$0xff]  }
0x1c02   : > { %v12846_v36 = vpop.f32.mrb[82].mxu0  ;;  %v13121_v28 = vpop.f32.mrb[18].mxu1  ;;  %v20118_v26 = vld [vmem:[%s23512_s1 + $0x88] sm:$0xff]   ;;  %v20113_v27 = vld [vmem:[%s23512_s1 + $0x18] sm:$0xff]  }
0x1c03   : > { %v18769_v29 = vpop.f32.mrb[83].mxu0  ;;  %v18817_v32 = vpop.f32.mrb[19].mxu1  ;;  %v20120_v36 = vld [vmem:[%s23512_s1 + $0x90] sm:$0xff]  }
0x1c04   : > { %v20115_v32 = vld [vmem:[%s23512_s1 + $0x60] sm:$0xff]  }
0x1c10   : > { %v12911_v34 = vpop.f32.mrb[84].mxu0 }
0x1c11   : > { %v12917_v31 = vadd.f32 %v12911_v34, %v12844_v25  ;;  %v18780_v54 = vpop.f32.mrb[85].mxu0 }
0x1c12   : > { %v12914_v49 = vpop.f32.mrb[86].mxu0  ;;  %v13256_v7 = vpop.f32.mrb[20].mxu1  ;;  %v20122_v54 = vld [vmem:[%s23512_s1 + $0x98] sm:$0xff]  }
0x1c13   : > { %v18781_v56 = vpop.f32.mrb[87].mxu0  ;;  %v18840_v40 = vpop.f32.mrb[21].mxu1  ;;  %v20117_v49 = vld [vmem:[%s23512_s1 + $0x68] sm:$0xff]  }
0x1c14   : > { %v13259_v47 = vpop.f32.mrb[22].mxu1  ;;  %v20124_v56 = vld [vmem:[%s23512_s1 + $0xc0] sm:$0xff]  }
0x1c15   : > { %v18841_v55 = vpop.f32.mrb[23].mxu1 }
0x1c16   : > { %v20119_v55 = vld [vmem:[%s23512_s1 + $0x70] sm:$0xff]  }
0x1c20   : > { %v12980_v45 = vpop.f32.mrb[88].mxu0 }
0x1c21   : > { %v12986_v5 = vadd.f32 %v12980_v45, %v12917_v31  ;;  %v18792_v44 = vpop.f32.mrb[89].mxu0 }
0x1c22   : > { %v12983_v10 = vpop.f32.mrb[90].mxu0  ;;  %v20126_v44 = vld [vmem:[%s23512_s1 + $0xc8] sm:$0xff]  }
0x1c23   : > { %v18793_v63 = vpop.f32.mrb[91].mxu0  ;;  %v20121_v10 = vld [vmem:[%s23512_s1 + $0x78] sm:$0xff]  }
0x1c24   : > { %v20128_v63 = vld [vmem:[%s23512_s1 + $0xd0] sm:$0xff]  }
0x1c30   : > { %v13049_v57 = vpop.f32.mrb[92].mxu0 }
0x1c31   : > { %v13055_v62 = vadd.f32 %v13049_v57, %v12986_v5  ;;  %v18804_v50 = vpop.f32.mrb[93].mxu0 }
0x1c32   : > { %v13052_v4 = vpop.f32.mrb[94].mxu0  ;;  %v20123_v50 = vld [vmem:[%s23512_s1 + $0xa0] sm:$0xff]  }
0x1c33   : > { %v13124_v39 = vadd.f32 %v13118_v24, %v13055_v62  ;;  %v18805_v3 = vpop.f32.mrb[95].mxu0 }
0x1c40   : > { %v13187_v0 = vpop.f32.mrb[96].mxu0 }
0x1c41   : > { %v13193_v51 = vadd.f32 %v13187_v0, %v13124_v39  ;;  %v18828_v8 = vpop.f32.mrb[97].mxu0  ;;  %v20130_v0 = vld [vmem:[%s23512_s1 + $0xd8] sm:$0xff]  }
0x1c42   : > { %v13190_v11 = vpop.f32.mrb[98].mxu0 }
0x1c43   : > { %v13262_v13 = vadd.f32 %v13256_v7, %v13193_v51  ;;  %v18829_v38 = vpop.f32.mrb[99].mxu0  ;;  %v20125_v51 = vld [vmem:[%s23512_s1 + $0xa8] sm:$0xff]   ;;  %v20132_v11 = vld [vmem:[%s23512_s1 + $0x100] sm:$0xff]  }
0x1c44   : > { %v20134_v38 = vld [vmem:[%s23512_s1 + $0x108] sm:$0xff]  }
0x1c50   : > { %v13325_v58 = vpop.f32.mrb[100].mxu0 }
0x1c51   : > { %v13331_v14 = vadd.f32 %v13325_v58, %v13262_v13  ;;  %v18852_v1 = vpop.f32.mrb[101].mxu0  ;;  %v20127_v13 = vld [vmem:[%s23512_s1 + $0xb0] sm:$0xff]   ;;  %v20129_v58 = vld [vmem:[%s23512_s1 + $0xb8] sm:$0xff]  }
0x1c52   : > { %v13328_v9 = vpop.f32.mrb[102].mxu0 }
0x1c53   : > { %v13339_v2 = vadd.f32 %v16394_v37, %v13331_v14  ;;  %v18853_v12 = vpop.f32.mrb[103].mxu0  ;;  %v20136_v37 = vld [vmem:[%s23512_s1 + $0x110] sm:$0xff]   ;;  %v20131_v14 = vld [vmem:[%s23512_s1 + $0xe0] sm:$0xff]   ;;  %v20138_v9 = vld [vmem:[%s23512_s1 + $0x118] sm:$0xff]  }
0x1c55   : > { %v13340_v15 = vmax.f32 %v13339_v2, 0.0  ;;  %v20133_v2 = vld [vmem:[%s23512_s1 + $0xe8] sm:$0xff]  }
0x1c57   : > { %v13413_v60 = vpack.c.bf16 %v13340_v15, %v13340_v15  ;;  %v20135_v15 = vld [vmem:[%s23512_s1 + $0xf0] sm:$0xff]  }
0x1c59   : > { %v13415_v53 = vsel %vm11749_vm6, %v13413_v60, 0  ;;  %v20137_v60 = vld [vmem:[%s23512_s1 + $0xf8] sm:$0xff]  }
0x1c5a   : > { %18855 = vmatpush3.bf16.msra.mxu1 %v13415_v53 }
0x1c5b   : > { %18900 = vmatprep.subr.bf16.mxu1 %v20674_v30 }
0x1c5d   : > { %18857 = vmatmul.mubr.msk.bf16.vlgmr.msra.gmra.mrb[24].mxu1 %vm11733_vm7, %v22672_v35  ;;  %v20106_v35 = vld [vmem:[%s23512_s1 + $0x38] sm:$0xff]  }
0x1c5e   : > { %18860 = vmatprep.mubr.msk.bf16.mxu1 %vm20675_vm4, %v20674_v30  ;;  %18883 = vmatpush3.bf16.msra.mxu0 %v20106_v35  ;;  %v20144_v35 = vld [vmem:[%s23513_s26 + $0x20] sm:$0xff]   ;;  %s23517_s26 = sld [smem:[#allocation35_spill]] }
0x1c5f   : > { %18888 = vmatprep.subr.bf16.mxu0 %v20674_v30 }
0x1c65   : > { %18861 = vmatmul.mubr.msk.bf16.gmra.mrb[28].mxu1 %vm11733_vm7, %v22682_v42  ;;  %v20108_v42 = vld [vmem:[%s23512_s1 + $0x40] sm:$0xff]  }
0x1c66   : > { %18864 = vmatprep.mubr.msk.bf16.mxu1 %vm20675_vm4, %v20674_v30  ;;  %18901 = vmatpush3.bf16.msra.mxu1 %v20108_v42  ;;  %v20145_v42 = vld [vmem:[%s23514_s2 + $0x28] sm:$0xff]  }
0x1c67   : > { %18902 = vmatprep.subr.bf16.mxu1 %v20674_v30 }
0x1c6d   : > { %18865 = vmatmul.mubr.msk.bf16.gmra.mrb[32].mxu1 %vm11733_vm7, %v22689_v59  ;;  %v20110_v59 = vld [vmem:[%s23512_s1 + $0x48] sm:$0xff]  }
0x1c6e   : > { %18868 = vmatprep.mubr.msk.bf16.mxu1 %vm20675_vm4, %v20674_v30  ;;  %18903 = vmatpush3.bf16.msra.mxu1 %v20110_v59  ;;  %v20147_v59 = vld [vmem:[%s23514_s2 + $0x30] sm:$0xff]  }
0x1c6f   : > { %18904 = vmatprep.subr.bf16.mxu1 %v20674_v30 }
0x1c75   : > { %18869 = vmatmul.mubr.msk.bf16.gmra.mrb[36].mxu1 %vm11733_vm7, %v22696_v48  ;;  %v20112_v48 = vld [vmem:[%s23512_s1 + $0x50] sm:$0xff]  }
0x1c76   : > { %18872 = vmatprep.mubr.msk.bf16.mxu1 %vm20675_vm4, %v20674_v30  ;;  %18905 = vmatpush3.bf16.msra.mxu1 %v20112_v48 }
0x1c77   : > { %18906 = vmatprep.subr.bf16.mxu1 %v20674_v30 }
0x1c7d   : > { %18873 = vmatmul.mubr.msk.bf16.gmra.mrb[40].mxu1 %vm11733_vm7, %v22703_v43  ;;  %v20114_v43 = vld [vmem:[%s23512_s1 + $0x58] sm:$0xff]   ;;  %s23516_s1 = smov %s23515_s22 }
0x1c7e   : > { %18908 = vmatprep.mubr.msk.bf16.mxu1 %vm20675_vm4, %v20674_v30  ;;  %18907 = vmatpush3.bf16.msra.mxu1 %v20114_v43 }
0x1c7f   : > { %18924 = vmatprep.subr.bf16.mxu1 %v20674_v30 }
0x1d30   : > { %v13451_v6 = vpop.f32.mrb[24].mxu1 }
0x1d31   : > { %v18858_v61 = vpop.f32.mrb[25].mxu1  ;;  %v13489_v34 = vpack.c.bf16 %v13451_v6, %v13451_v6 }
0x1d32   : > { %v13454_v46 = vpop.f32.mrb[26].mxu1 }
0x1d33   : > { %v13490_v17 = vpack.c.bf16 %v13454_v46, %v13454_v46  ;;  %v18859_v18 = vpop.f32.mrb[27].mxu1 }
0x1d35   : > { %18885 = vmatmul.mubr.msk.bf16.vlgmr.msra.gmra.mrb[104].mxu0 %vm3081_vm2, %v13490_v17 }
0x1d36   : > { %18889 = vmatpush3.bf16.msra.mxu0 %v20107_v16  ;;  %18896 = vmatprep.mubr.msk.bf16.mxu0 %vm20675_vm4, %v20674_v30 }
0x1d37   : > { %18890 = vmatprep.subr.bf16.mxu0 %v20674_v30 }
0x1d38   : > { %v13459_v20 = vpop.f32.mrb[28].mxu1 }
0x1d39   : > { %v13625_v22 = vpack.c.bf16 %v13459_v20, %v13459_v20  ;;  %v18862_v23 = vpop.f32.mrb[29].mxu1 }
0x1d3a   : > { %18891 = vmatpush3.bf16.msra.mxu0 %v20109_v52  ;;  %v23024_v24 = vpop.f32.mrb[30].mxu1 }
0x1d3b   : > { %18892 = vmatprep.subr.bf16.mxu0 %v20674_v30  ;;  %18909 = vmatmul.mubr.msk.bf16.vlgmr.msra.gmra.mrb[44].mxu1 %vm3081_vm2, %v13625_v22  ;;  %v18863_v25 = vpop.f32.mrb[31].mxu1  ;;  %v13694_v39 = vpack.c.bf16 %v23024_v24, %v23024_v24 }
0x1d3c   : > { %18925 = vmatpush3.bf16.msra.mxu1 %v20116_v21  ;;  %18932 = vmatprep.mubr.msk.bf16.mxu1 %vm20675_vm4, %v20674_v30 }
0x1d3d   : > { %18926 = vmatprep.subr.bf16.mxu1 %v20674_v30 }
0x1d3e   : > { %18893 = vmatpush3.bf16.msra.mxu0 %v20111_v19 }
0x1d3f   : > { %18894 = vmatprep.subr.bf16.mxu0 %v20674_v30 }
0x1d40   : > { %18927 = vmatpush3.bf16.msra.mxu1 %v20118_v26  ;;  %v13467_v28 = vpop.f32.mrb[32].mxu1 }
0x1d41   : > { %18928 = vmatprep.subr.bf16.mxu1 %v20674_v30  ;;  %v18866_v29 = vpop.f32.mrb[33].mxu1  ;;  %v13763_v7 = vpack.c.bf16 %v13467_v28, %v13467_v28 }
0x1d42   : > { %18895 = vmatpush3.bf16.msra.mxu0 %v20113_v27  ;;  %v23037_v33 = vpop.f32.mrb[34].mxu1 }
0x1d43   : > { %18912 = vmatprep.subr.bf16.mxu0 %v20674_v30  ;;  %v18867_v31 = vpop.f32.mrb[35].mxu1  ;;  %v13832_v1 = vpack.c.bf16 %v23037_v33, %v23037_v33 }
0x1d44   : > { %18929 = vmatpush3.bf16.msra.mxu1 %v20120_v36 }
0x1d45   : > { %18897 = vmatmul.mubr.msk.bf16.vlgmr.msra.gmra.mrb[108].mxu0 %vm3081_vm2, %v13489_v34  ;;  %18930 = vmatprep.subr.bf16.mxu1 %v20674_v30 }
0x1d46   : > { %18913 = vmatpush3.bf16.msra.mxu0 %v20115_v32  ;;  %18920 = vmatprep.mubr.msk.bf16.mxu0 %vm20675_vm4, %v20674_v30 }
0x1d47   : > { %18914 = vmatprep.subr.bf16.mxu0 %v20674_v30 }
0x1d48   : > { %18931 = vmatpush3.bf16.msra.mxu1 %v20122_v54  ;;  %v13475_v40 = vpop.f32.mrb[36].mxu1 }
0x1d49   : > { %18948 = vmatprep.subr.bf16.mxu1 %v20674_v30  ;;  %v18870_v47 = vpop.f32.mrb[37].mxu1  ;;  %v13901_v8 = vpack.c.bf16 %v13475_v40, %v13475_v40 }
0x1d4a   : > { %18915 = vmatpush3.bf16.msra.mxu0 %v20117_v49  ;;  %v23050_v45 = vpop.f32.mrb[38].mxu1 }
0x1d4b   : > { %18916 = vmatprep.subr.bf16.mxu0 %v20674_v30  ;;  %18933 = vmatmul.mubr.msk.bf16.vlgmr.msra.gmra.mrb[48].mxu1 %vm3081_vm2, %v13763_v7  ;;  %v18871_v5 = vpop.f32.mrb[39].mxu1  ;;  %v13970_v53 = vpack.c.bf16 %v23050_v45, %v23050_v45 }
0x1d4c   : > { %18949 = vmatpush3.bf16.msra.mxu1 %v20124_v56  ;;  %18956 = vmatprep.mubr.msk.bf16.mxu1 %vm20675_vm4, %v20674_v30 }
0x1d4d   : > { %18950 = vmatprep.subr.bf16.mxu1 %v20674_v30 }
0x1d4e   : > { %18917 = vmatpush3.bf16.msra.mxu0 %v20119_v55 }
0x1d4f   : > { %18918 = vmatprep.subr.bf16.mxu0 %v20674_v30 }
0x1d50   : > { %18951 = vmatpush3.bf16.msra.mxu1 %v20126_v44  ;;  %v13483_v57 = vpop.f32.mrb[40].mxu1 }
0x1d51   : > { %18952 = vmatprep.subr.bf16.mxu1 %v20674_v30  ;;  %v18874_v62 = vpop.f32.mrb[41].mxu1  ;;  %v14039_v12 = vpack.c.bf16 %v13483_v57, %v13483_v57 }
0x1d52   : > { %18919 = vmatpush3.bf16.msra.mxu0 %v20121_v10  ;;  %v13486_v4 = vpop.f32.mrb[42].mxu1 }
0x1d53   : > { %18936 = vmatprep.subr.bf16.mxu0 %v20674_v30  ;;  %v18875_v3 = vpop.f32.mrb[43].mxu1 }
0x1d54   : > { %18953 = vmatpush3.bf16.msra.mxu1 %v20128_v63 }
0x1d55   : > { %18921 = vmatmul.mubr.msk.bf16.vlgmr.msra.gmra.mrb[112].mxu0 %vm3081_vm2, %v13694_v39  ;;  %18954 = vmatprep.subr.bf16.mxu1 %v20674_v30  ;;  %v16445_v39 = vld [vmem:[#allocation10] ss:$0 sm:$0xff] }
0x1d56   : > { %18937 = vmatpush3.bf16.msra.mxu0 %v20123_v50  ;;  %18944 = vmatprep.mubr.msk.bf16.mxu0 %vm20675_vm4, %v20674_v30 }
0x1d57   : > { %18938 = vmatprep.subr.bf16.mxu0 %v20674_v30 }
0x1d58   : > { %18955 = vmatpush3.bf16.msra.mxu1 %v20130_v0 }
0x1d59   : > { %18972 = vmatprep.subr.bf16.mxu1 %v20674_v30 }
0x1d5a   : > { %18939 = vmatpush3.bf16.msra.mxu0 %v20125_v51 }
0x1d5b   : > { %18940 = vmatprep.subr.bf16.mxu0 %v20674_v30  ;;  %18957 = vmatmul.mubr.msk.bf16.vlgmr.msra.gmra.mrb[52].mxu1 %vm3081_vm2, %v13901_v8 }
0x1d5c   : > { %18973 = vmatpush3.bf16.msra.mxu1 %v20132_v11  ;;  %18980 = vmatprep.mubr.msk.bf16.mxu1 %vm20675_vm4, %v20674_v30 }
0x1d5d   : > { %18974 = vmatprep.subr.bf16.mxu1 %v20674_v30 }
0x1d5e   : > { %18941 = vmatpush3.bf16.msra.mxu0 %v20127_v13 }
0x1d5f   : > { %18942 = vmatprep.subr.bf16.mxu0 %v20674_v30 }
0x1d60   : > { %18975 = vmatpush3.bf16.msra.mxu1 %v20134_v38 }
0x1d61   : > { %18976 = vmatprep.subr.bf16.mxu1 %v20674_v30 }
0x1d62   : > { %18943 = vmatpush3.bf16.msra.mxu0 %v20129_v58 }
0x1d63   : > { %18960 = vmatprep.subr.bf16.mxu0 %v20674_v30 }
0x1d64   : > { %18977 = vmatpush3.bf16.msra.mxu1 %v20136_v37  ;;  %v20139_v37 = vld [vmem:[%s23515_s22] sm:$0xff]   ;;  %s23518_s22 = sld [smem:[#allocation62_spill]] }
0x1d65   : > { %18945 = vmatmul.mubr.msk.bf16.vlgmr.msra.gmra.mrb[116].mxu0 %vm3081_vm2, %v13832_v1  ;;  %18978 = vmatprep.subr.bf16.mxu1 %v20674_v30  ;;  %v20140_v1 = vld [vmem:[%s23516_s1 + $0x8] sm:$0xff]  }
0x1d66   : > { %18961 = vmatpush3.bf16.msra.mxu0 %v20131_v14  ;;  %18968 = vmatprep.mubr.msk.bf16.mxu0 %vm20675_vm4, %v20674_v30  ;;  %v20146_v14 = vld [vmem:[%s23514_s2 + $0x40] sm:$0xff]  }
0x1d67   : > { %18962 = vmatprep.subr.bf16.mxu0 %v20674_v30 }
0x1d68   : > { %18979 = vmatpush3.bf16.msra.mxu1 %v20138_v9  ;;  %v20141_v9 = vld [vmem:[%s23516_s1 + $0x10] sm:$0xff]  }
0x1d69   : > { %19006 = vmatprep.subr.bf16.mxu1 %v20674_v30 }
0x1d6a   : > { %18963 = vmatpush3.bf16.msra.mxu0 %v20133_v2  ;;  %v20142_v2 = vld [vmem:[%s23516_s1 + $0x18] sm:$0xff]  }
0x1d6b   : > { %18964 = vmatprep.subr.bf16.mxu0 %v20674_v30  ;;  %18981 = vmatmul.mubr.msk.bf16.vlgmr.msra.gmra.mrb[56].mxu1 %vm3081_vm2, %v14039_v12  ;;  %v20143_v12 = vld [vmem:[%s23516_s1 + $0x20] ss:$0 sps:$4 sm:$0xff]   ;;  %s23519_s1 = smov %s23518_s22 }
0x1d6c   : > { %19014 = vmatprep.mubr.msk.bf16.mxu1 %vm20675_vm4, %v20674_v30  ;;  %19007 = vmatpush3.bf16.msra.mxu1 %v20144_v35 }
0x1d6d   : > { %19008 = vmatprep.subr.bf16.mxu1 %v20674_v30 }
0x1d6e   : > { %18965 = vmatpush3.bf16.msra.mxu0 %v20135_v15  ;;  %v20149_v15 = vld [vmem:[%s23514_s2 + $0x38] sm:$0xff]  }
0x1d6f   : > { %18966 = vmatprep.subr.bf16.mxu0 %v20674_v30 }
0x1d70   : > { %19009 = vmatpush3.bf16.msra.mxu1 %v20145_v42 }
0x1d71   : > { %19010 = vmatprep.subr.bf16.mxu1 %v20674_v30 }
0x1d72   : > { %18967 = vmatpush3.bf16.msra.mxu0 %v20137_v60  ;;  %v20150_v60 = vld [vmem:[%s23514_s2 + $0x50] sm:$0xff]  }
0x1d73   : > { %18984 = vmatprep.subr.bf16.mxu0 %v20674_v30 }
0x1d74   : > { %19011 = vmatpush3.bf16.msra.mxu1 %v20147_v59 }
0x1d75   : > { %18969 = vmatmul.mubr.msk.bf16.vlgmr.msra.gmra.mrb[120].mxu0 %vm3081_vm2, %v13970_v53  ;;  %19012 = vmatprep.subr.bf16.mxu1 %v20674_v30  ;;  %v20152_v53 = vld [vmem:[%s23514_s2 + $0x58] sm:$0xff]  }
0x1d76   : > { %18986 = vmatprep.mubr.msk.bf16.mxu0 %vm20675_vm4, %v20674_v30 }
0x1d78   : > { %19013 = vmatpush3.bf16.msra.mxu1 %v20149_v15  ;;  %v20182_v15 = vld [vmem:[%s23519_s1 + $0x110] sm:$0xff]  }
0x1d79   : > { %19018 = vmatprep.subr.bf16.mxu1 %v20674_v30 }
0x1e08   : > { %v13552_v48 = vpop.f32.mrb[104].mxu0 }
0x1e09   : > { %v18886_v43 = vpop.f32.mrb[105].mxu0 }
0x1e0a   : > { %v13555_v6 = vpop.f32.mrb[106].mxu0 }
0x1e0b   : > { %v18887_v61 = vpop.f32.mrb[107].mxu0 }
0x1e0c   : > { %v20153_v61 = vld [vmem:[%s23514_s2 + $0x8] sm:$0xff]  }
0x1e0e   : > { %v13687_v46 = vpop.f32.mrb[44].mxu1 }
0x1e0f   : > { %v18910_v16 = vpop.f32.mrb[45].mxu1 }
0x1e10   : > { %v13690_v17 = vpop.f32.mrb[46].mxu1  ;;  %v20154_v16 = vld [vmem:[%s23514_s2 + $0x80] sm:$0xff]  }
0x1e11   : > { %v18911_v18 = vpop.f32.mrb[47].mxu1 }
0x1e18   : > { %v13619_v52 = vpop.f32.mrb[108].mxu0 }
0x1e19   : > { %v13620_v20 = vadd.f32 %v13619_v52, %v13552_v48  ;;  %v18898_v21 = vpop.f32.mrb[109].mxu0  ;;  %v20151_v48 = vld [vmem:[%s23514_s2] sm:$0xff]   ;;  %v20155_v52 = vld [vmem:[%s23514_s2 + $0x10] sm:$0xff]  }
0x1e1a   : > { %v13622_v22 = vpop.f32.mrb[110].mxu0 }
0x1e1b   : > { %v13693_v23 = vadd.f32 %v13687_v46, %v13620_v20  ;;  %v18899_v19 = vpop.f32.mrb[111].mxu0  ;;  %v20156_v22 = vld [vmem:[%s23514_s2 + $0x88] sm:$0xff]  }
0x1e1c   : > { %v20158_v19 = vld [vmem:[%s23514_s2 + $0x90] sm:$0xff]  }
0x1e1e   : > { %v13825_v24 = vpop.f32.mrb[48].mxu1 }
0x1e1f   : > { %v18934_v25 = vpop.f32.mrb[49].mxu1 }
0x1e20   : > { %v13828_v26 = vpop.f32.mrb[50].mxu1 }
0x1e21   : > { %v18935_v27 = vpop.f32.mrb[51].mxu1  ;;  %v20159_v26 = vld [vmem:[%s23514_s2 + $0x60] sm:$0xff]  }
0x1e28   : > { %v13756_v36 = vpop.f32.mrb[112].mxu0 }
0x1e29   : > { %v13762_v28 = vadd.f32 %v13756_v36, %v13693_v23  ;;  %v18922_v29 = vpop.f32.mrb[113].mxu0  ;;  %v20157_v23 = vld [vmem:[%s23514_s2 + $0x18] sm:$0xff]  }
0x1e2a   : > { %v13759_v32 = vpop.f32.mrb[114].mxu0  ;;  %v20160_v29 = vld [vmem:[%s23514_s2 + $0x98] sm:$0xff]  }
0x1e2b   : > { %v13831_v33 = vadd.f32 %v13825_v24, %v13762_v28  ;;  %v18923_v34 = vpop.f32.mrb[115].mxu0  ;;  %v20161_v32 = vld [vmem:[%s23514_s2 + $0x68] sm:$0xff]  }
0x1e2c   : > { %v20162_v34 = vld [vmem:[%s23514_s2 + $0xc0] sm:$0xff]  }
0x1e2e   : > { %v13963_v31 = vpop.f32.mrb[52].mxu1 }
0x1e2f   : > { %v18958_v54 = vpop.f32.mrb[53].mxu1 }
0x1e30   : > { %v13966_v49 = vpop.f32.mrb[54].mxu1 }
0x1e31   : > { %v18959_v7 = vpop.f32.mrb[55].mxu1  ;;  %v20163_v49 = vld [vmem:[%s23514_s2 + $0x70] sm:$0xff]  }
0x1e38   : > { %v13894_v56 = vpop.f32.mrb[116].mxu0 }
0x1e39   : > { %v13900_v40 = vadd.f32 %v13894_v56, %v13831_v33  ;;  %v18946_v47 = vpop.f32.mrb[117].mxu0 }
0x1e3a   : > { %v13897_v55 = vpop.f32.mrb[118].mxu0  ;;  %v20165_v47 = vld [vmem:[%s23514_s2 + $0x78] sm:$0xff]  }
0x1e3b   : > { %v13969_v45 = vadd.f32 %v13963_v31, %v13900_v40  ;;  %v18947_v5 = vpop.f32.mrb[119].mxu0  ;;  %v20164_v40 = vld [vmem:[%s23514_s2 + $0xc8] sm:$0xff]   ;;  %v20166_v55 = vld [vmem:[%s23514_s2 + $0xd0] sm:$0xff]  }
0x1e3e   : > { %v14101_v44 = vpop.f32.mrb[56].mxu1 }
0x1e3f   : > { %v18982_v10 = vpop.f32.mrb[57].mxu1 }
0x1e40   : > { %v14104_v63 = vpop.f32.mrb[58].mxu1 }
0x1e41   : > { %v18983_v57 = vpop.f32.mrb[59].mxu1 }
0x1e48   : > { %v14032_v62 = vpop.f32.mrb[120].mxu0 }
0x1e49   : > { %v14038_v50 = vadd.f32 %v14032_v62, %v13969_v45  ;;  %v18970_v4 = vpop.f32.mrb[121].mxu0  ;;  %v20168_v62 = vld [vmem:[%s23514_s2 + $0xd8] sm:$0xff]  }
0x1e4a   : > { %v14035_v3 = vpop.f32.mrb[122].mxu0 }
0x1e4b   : > { %v14107_v0 = vadd.f32 %v14101_v44, %v14038_v50  ;;  %v18971_v51 = vpop.f32.mrb[123].mxu0  ;;  %v20167_v44 = vld [vmem:[%s23514_s2 + $0xa0] sm:$0xff]   ;;  %v20169_v50 = vld [vmem:[%s23514_s2 + $0xa8] sm:$0xff]   ;;  %v20171_v3 = vld [vmem:[%s23514_s2 + $0xb0] sm:$0xff]  }
0x1e4c   : > { %v20173_v51 = vld [vmem:[%s23514_s2 + $0xb8] sm:$0xff]  }
0x1e4d   : > { %v14115_v8 = vadd.f32 %v16445_v39, %v14107_v0  ;;  %v20170_v39 = vld [vmem:[%s23514_s2 + $0x100] sm:$0xff]   ;;  %v20172_v0 = vld [vmem:[%s23514_s2 + $0x108] sm:$0xff]  }
0x1e4f   : > { %v14116_v11 = vadd.f32 %v14115_v8, %v22837_v41  ;;  %v20148_v41 = vld [vmem:[%s23514_s2 + $0x48] sm:$0xff]   ;;  %v20174_v8 = vld [vmem:[%s23514_s2 + $0x110] sm:$0xff]  }
0x1e51   : > { %v14117_v13 = vmax.f32 %v14116_v11, 0.0  ;;  %v20175_v11 = vld [vmem:[%s23514_s2 + $0xe0] sm:$0xff]  }
0x1e53   : > { %v14199_v38 = vpack.c.bf16 %v14117_v13, %v14117_v13 }
0x1e55   : > { %v23119_v58 = vsel %vm11749_vm6, %v14199_v38, 0  ;;  %v20176_v38 = vld [vmem:[%s23514_s2 + $0x118] sm:$0xff]  }
0x1e56   : > { %18985 = vmatpush3.bf16.msra.mxu0 %v23119_v58 }
0x1e57   : > { %19030 = vmatprep.subr.bf16.mxu0 %v20674_v30 }
0x1e59   : > { %18987 = vmatmul.mubr.msk.bf16.vlgmr.msra.gmra.mrb[124].mxu0 %vm11733_vm7, %v20139_v37  ;;  %v20177_v37 = vld [vmem:[%s23514_s2 + $0xe8] sm:$0xff]  }
0x1e5a   : > { %18990 = vmatprep.mubr.msk.bf16.mxu0 %vm20675_vm4, %v20674_v30  ;;  %19031 = vmatpush3.bf16.msra.mxu0 %v20146_v14 }
0x1e5b   : > { %19032 = vmatprep.subr.bf16.mxu0 %v20674_v30 }
0x1e5e   : > { %19033 = vmatpush3.bf16.msra.mxu0 %v20148_v41  ;;  %v20178_v41 = vld [vmem:[%s23514_s2 + $0xf0] sm:$0xff]  }
0x1e5f   : > { %19034 = vmatprep.subr.bf16.mxu0 %v20674_v30 }
0x1e61   : > { %18991 = vmatmul.mubr.msk.bf16.gmra.mrb[128].mxu0 %vm11733_vm7, %v20140_v1  ;;  %v20179_v1 = vld [vmem:[%s23514_s2 + $0xf8] sm:$0xff]  }
0x1e62   : > { %18994 = vmatprep.mubr.msk.bf16.mxu0 %vm20675_vm4, %v20674_v30  ;;  %19035 = vmatpush3.bf16.msra.mxu0 %v20150_v60  ;;  %v20183_v60 = vld [vmem:[%s23519_s1 + $0x118] sm:$0xff]  }
0x1e63   : > { %19036 = vmatprep.subr.bf16.mxu0 %v20674_v30 }
0x1e66   : > { %19037 = vmatpush3.bf16.msra.mxu0 %v20152_v53  ;;  %v20184_v53 = vld [vmem:[%s23519_s1 + $0x120] sm:$0xff]  }
0x1e67   : > { %19054 = vmatprep.subr.bf16.mxu0 %v20674_v30 }
0x1e69   : > { %18995 = vmatmul.mubr.msk.bf16.gmra.mrb[132].mxu0 %vm11733_vm7, %v20141_v9  ;;  %v15041_v9 = vld [vmem:[%s23517_s26] sm:$0xf]  ;;  %s23520_s26 = sld [smem:[#allocation65_spill]] }
0x1e6a   : > { %18998 = vmatprep.mubr.msk.bf16.mxu0 %vm20675_vm4, %v20674_v30 }
0x1e6f   : > { %s23521_s2 = smov %s23520_s26 }
0x1e71   : > { %18999 = vmatmul.mubr.msk.bf16.gmra.mrb[136].mxu0 %vm11733_vm7, %v20142_v2  ;;  %v20180_v2 = vld [vmem:[%s23518_s22 + $0x100] sm:$0xff]   ;;  %s23522_s22 = sld [smem:[#allocation64_spill]] }
0x1e72   : > { %19002 = vmatprep.mubr.msk.bf16.mxu0 %vm20675_vm4, %v20674_v30 }
0x1e79   : > { %19003 = vmatmul.mubr.msk.bf16.gmra.mrb[140].mxu0 %vm11733_vm7, %v20143_v12 }
0x1e7a   : > { %19038 = vmatprep.mubr.msk.bf16.mxu0 %vm20675_vm4, %v20674_v30 }
0x1f2c   : > { %v14275_v35 = vpop.f32.mrb[124].mxu0 }
0x1f2d   : > { %v18988_v42 = vpop.f32.mrb[125].mxu0  ;;  %v14313_v36 = vpack.c.bf16 %v14275_v35, %v14275_v35  ;;  %v20185_v35 = vld [vmem:[%s23519_s1 + $0x128] sm:$0xff]  }
0x1f2e   : > { %v14278_v59 = vpop.f32.mrb[126].mxu0  ;;  %v20186_v42 = vld [vmem:[%s23519_s1 + $0x130] sm:$0xff]  }
0x1f2f   : > { %v14314_v43 = vpack.c.bf16 %v14278_v59, %v14278_v59  ;;  %v18989_v6 = vpop.f32.mrb[127].mxu0  ;;  %v20187_v59 = vld [vmem:[%s23519_s1 + $0x138] sm:$0xff]  }
0x1f30   : > { %v20194_v6 = vld [vmem:[%s23521_s2 + $0x110] sm:$0xff]  }
0x1f31   : > { %19015 = vmatmul.mubr.msk.bf16.vlgmr.msra.gmra.mrb[60].mxu1 %vm3081_vm2, %v14314_v43  ;;  %v20193_v43 = vld [vmem:[%s23521_s2 + $0x108] sm:$0xff]  }
0x1f32   : > { %19019 = vmatpush3.bf16.msra.mxu1 %v20151_v48  ;;  %19026 = vmatprep.mubr.msk.bf16.mxu1 %vm20675_vm4, %v20674_v30  ;;  %v20192_v48 = vld [vmem:[%s23520_s26 + $0x100] sm:$0xff]   ;;  %s1635_s26 = sand.u32 1, %s20602_s23  }
0x1f33   : > { %19020 = vmatprep.subr.bf16.mxu1 %v20674_v30  ;;  %s15384_s5 = scalar_lea.sflag [#allocation4], %s1635_s26 }
0x1f34   : > { %v14283_v46 = vpop.f32.mrb[128].mxu0 }
0x1f35   : > { %v14449_v17 = vpack.c.bf16 %v14283_v46, %v14283_v46  ;;  %v18992_v18 = vpop.f32.mrb[129].mxu0  ;;  %v20196_v46 = vld [vmem:[%s23521_s2 + $0x120] sm:$0xff]  }
0x1f36   : > { %19021 = vmatpush3.bf16.msra.mxu1 %v20153_v61  ;;  %v23161_v20 = vpop.f32.mrb[130].mxu0  ;;  %v20195_v61 = vld [vmem:[%s23521_s2 + $0x118] sm:$0xff]  }
0x1f37   : > { %19039 = vmatmul.mubr.msk.bf16.vlgmr.msra.gmra.mrb[144].mxu0 %vm3081_vm2, %v14449_v17  ;;  %19022 = vmatprep.subr.bf16.mxu1 %v20674_v30  ;;  %v18993_v21 = vpop.f32.mrb[131].mxu0  ;;  %v14518_v63 = vpack.c.bf16 %v23161_v20, %v23161_v20 }
0x1f38   : > { %19055 = vmatpush3.bf16.msra.mxu0 %v20154_v16  ;;  %19062 = vmatprep.mubr.msk.bf16.mxu0 %vm20675_vm4, %v20674_v30  ;;  %v20197_v16 = vld [vmem:[%s23521_s2 + $0x128] sm:$0xff]  }
0x1f39   : > { %19056 = vmatprep.subr.bf16.mxu0 %v20674_v30 }
0x1f3a   : > { %19023 = vmatpush3.bf16.msra.mxu1 %v20155_v52 }
0x1f3b   : > { %19024 = vmatprep.subr.bf16.mxu1 %v20674_v30 }
0x1f3c   : > { %19057 = vmatpush3.bf16.msra.mxu0 %v20156_v22  ;;  %v14291_v24 = vpop.f32.mrb[132].mxu0 }
0x1f3d   : > { %19058 = vmatprep.subr.bf16.mxu0 %v20674_v30  ;;  %v18996_v25 = vpop.f32.mrb[133].mxu0  ;;  %v14587_v33 = vpack.c.bf16 %v14291_v24, %v14291_v24 }
0x1f3e   : > { %19025 = vmatpush3.bf16.msra.mxu1 %v20157_v23  ;;  %v23174_v27 = vpop.f32.mrb[134].mxu0 }
0x1f3f   : > { %19042 = vmatprep.subr.bf16.mxu1 %v20674_v30  ;;  %v18997_v28 = vpop.f32.mrb[135].mxu0  ;;  %v14656_v13 = vpack.c.bf16 %v23174_v27, %v23174_v27 }
0x1f40   : > { %19059 = vmatpush3.bf16.msra.mxu0 %v20158_v19 }
0x1f41   : > { %19027 = vmatmul.mubr.msk.bf16.vlgmr.msra.gmra.mrb[64].mxu1 %vm3081_vm2, %v14313_v36  ;;  %19060 = vmatprep.subr.bf16.mxu0 %v20674_v30 }
0x1f42   : > { %19043 = vmatpush3.bf16.msra.mxu1 %v20159_v26  ;;  %19050 = vmatprep.mubr.msk.bf16.mxu1 %vm20675_vm4, %v20674_v30 }
0x1f43   : > { %19044 = vmatprep.subr.bf16.mxu1 %v20674_v30 }
0x1f44   : > { %19061 = vmatpush3.bf16.msra.mxu0 %v20160_v29  ;;  %v14299_v31 = vpop.f32.mrb[136].mxu0 }
0x1f45   : > { %19078 = vmatprep.subr.bf16.mxu0 %v20674_v30  ;;  %v19000_v54 = vpop.f32.mrb[137].mxu0  ;;  %v14725_v4 = vpack.c.bf16 %v14299_v31, %v14299_v31 }
0x1f46   : > { %19045 = vmatpush3.bf16.msra.mxu1 %v20161_v32  ;;  %v23187_v7 = vpop.f32.mrb[138].mxu0 }
0x1f47   : > { %19063 = vmatmul.mubr.msk.bf16.vlgmr.msra.gmra.mrb[148].mxu0 %vm3081_vm2, %v14587_v33  ;;  %19046 = vmatprep.subr.bf16.mxu1 %v20674_v30  ;;  %v19001_v56 = vpop.f32.mrb[139].mxu0  ;;  %v14794_v12 = vpack.c.bf16 %v23187_v7, %v23187_v7 }
0x1f48   : > { %19079 = vmatpush3.bf16.msra.mxu0 %v20162_v34  ;;  %19086 = vmatprep.mubr.msk.bf16.mxu0 %vm20675_vm4, %v20674_v30 }
0x1f49   : > { %19080 = vmatprep.subr.bf16.mxu0 %v20674_v30 }
0x1f4a   : > { %19047 = vmatpush3.bf16.msra.mxu1 %v20163_v49 }
0x1f4b   : > { %19048 = vmatprep.subr.bf16.mxu1 %v20674_v30 }
0x1f4c   : > { %19081 = vmatpush3.bf16.msra.mxu0 %v20164_v40  ;;  %v14307_v45 = vpop.f32.mrb[140].mxu0 }
0x1f4d   : > { %19082 = vmatprep.subr.bf16.mxu0 %v20674_v30  ;;  %v19004_v5 = vpop.f32.mrb[141].mxu0  ;;  %v14863_v14 = vpack.c.bf16 %v14307_v45, %v14307_v45 }
0x1f4e   : > { %19049 = vmatpush3.bf16.msra.mxu1 %v20165_v47  ;;  %v14310_v10 = vpop.f32.mrb[142].mxu0 }
0x1f4f   : > { %19066 = vmatprep.subr.bf16.mxu1 %v20674_v30  ;;  %v19005_v57 = vpop.f32.mrb[143].mxu0 }
0x1f50   : > { %19083 = vmatpush3.bf16.msra.mxu0 %v20166_v55 }
0x1f51   : > { %19051 = vmatmul.mubr.msk.bf16.vlgmr.msra.gmra.mrb[68].mxu1 %vm3081_vm2, %v14518_v63  ;;  %19084 = vmatprep.subr.bf16.mxu0 %v20674_v30 }
0x1f52   : > { %19067 = vmatpush3.bf16.msra.mxu1 %v20167_v44  ;;  %19074 = vmatprep.mubr.msk.bf16.mxu1 %vm20675_vm4, %v20674_v30 }
0x1f53   : > { %19068 = vmatprep.subr.bf16.mxu1 %v20674_v30 }
0x1f54   : > { %19085 = vmatpush3.bf16.msra.mxu0 %v20168_v62 }
0x1f55   : > { %19102 = vmatprep.subr.bf16.mxu0 %v20674_v30 }
0x1f56   : > { %19069 = vmatpush3.bf16.msra.mxu1 %v20169_v50 }
0x1f57   : > { %19087 = vmatmul.mubr.msk.bf16.vlgmr.msra.gmra.mrb[152].mxu0 %vm3081_vm2, %v14725_v4  ;;  %19070 = vmatprep.subr.bf16.mxu1 %v20674_v30 }
0x1f58   : > { %19103 = vmatpush3.bf16.msra.mxu0 %v20170_v39  ;;  %19110 = vmatprep.mubr.msk.bf16.mxu0 %vm20675_vm4, %v20674_v30 }
0x1f59   : > { %19104 = vmatprep.subr.bf16.mxu0 %v20674_v30 }
0x1f5a   : > { %19071 = vmatpush3.bf16.msra.mxu1 %v20171_v3 }
0x1f5b   : > { %19072 = vmatprep.subr.bf16.mxu1 %v20674_v30 }
0x1f5c   : > { %19105 = vmatpush3.bf16.msra.mxu0 %v20172_v0 }
0x1f5d   : > { %19106 = vmatprep.subr.bf16.mxu0 %v20674_v30 }
0x1f5e   : > { %19073 = vmatpush3.bf16.msra.mxu1 %v20173_v51 }
0x1f5f   : > { %19090 = vmatprep.subr.bf16.mxu1 %v20674_v30 }
0x1f60   : > { %19107 = vmatpush3.bf16.msra.mxu0 %v20174_v8 }
0x1f61   : > { %19075 = vmatmul.mubr.msk.bf16.vlgmr.msra.gmra.mrb[72].mxu1 %vm3081_vm2, %v14656_v13  ;;  %19108 = vmatprep.subr.bf16.mxu0 %v20674_v30 }
0x1f62   : > { %19091 = vmatpush3.bf16.msra.mxu1 %v20175_v11  ;;  %19098 = vmatprep.mubr.msk.bf16.mxu1 %vm20675_vm4, %v20674_v30 }
0x1f63   : > { %19092 = vmatprep.subr.bf16.mxu1 %v20674_v30 }
0x1f64   : > { %19109 = vmatpush3.bf16.msra.mxu0 %v20176_v38 }
0x1f65   : > { %19134 = vmatprep.subr.bf16.mxu0 %v20674_v30 }
0x1f66   : > { %19093 = vmatpush3.bf16.msra.mxu1 %v20177_v37 }
0x1f67   : > { %19111 = vmatmul.mubr.msk.bf16.vlgmr.msra.gmra.mrb[156].mxu0 %vm3081_vm2, %v14863_v14  ;;  %19094 = vmatprep.subr.bf16.mxu1 %v20674_v30 }
0x1f68   : > { %19135 = vmatpush3.bf16.msra.mxu0 %v23119_v58  ;;  %19136 = vmatprep.mubr.msk.bf16.mxu0 %vm20675_vm4, %v20674_v30  ;;  %v20181_v58 = vld [vmem:[%s23519_s1 + $0x108] sm:$0xff]   ;;  %s23523_s1 = smov %s23522_s22 }
0x1f69   : > { %19152 = vmatprep.subr.bf16.mxu0 %v20674_v30 }
0x1f6a   : > { %19095 = vmatpush3.bf16.msra.mxu1 %v20178_v41  ;;  %v14932_v41 = vld [vmem:[#allocation11] sm:$0x1] }
0x1f6b   : > { %19096 = vmatprep.subr.bf16.mxu1 %v20674_v30 }
0x1f6e   : > { %19097 = vmatpush3.bf16.msra.mxu1 %v20179_v1 }
0x1f6f   : > { %19137 = vmatmul.mubr.msk.bf16.vlgmr.msra.gmra.mrb[160].mxu0 %vm11733_vm7, %v15041_v9  ;;  %19114 = vmatprep.subr.bf16.mxu1 %v20674_v30 }
0x1f70   : > { %19168 = vmatprep.mubr.msk.bf16.mxu0 %vm20675_vm4, %v20674_v30  ;;  %19153 = vmatpush3.bf16.msra.mxu0 %v20192_v48  ;;  %v20198_v48 = vld [vmem:[%s23521_s2 + $0x130] sm:$0xff]  }
0x1f71   : > { %19099 = vmatmul.mubr.msk.bf16.vlgmr.msra.gmra.mrb[76].mxu1 %vm3081_vm2, %v14794_v12  ;;  %19154 = vmatprep.subr.bf16.mxu0 %v20674_v30 }
0x1f72   : > { %19115 = vmatpush3.bf16.msra.mxu1 %v20180_v2  ;;  %19130 = vmatprep.mubr.msk.bf16.mxu1 %vm20675_vm4, %v20674_v30 }
0x1f73   : > { %19116 = vmatprep.subr.bf16.mxu1 %v20674_v30 }
0x1f74   : > { %19155 = vmatpush3.bf16.msra.mxu0 %v20193_v43  ;;  %v20199_v43 = vld [vmem:[%s23521_s2 + $0x138] sm:$0xff]  }
0x1f75   : > { %19156 = vmatprep.subr.bf16.mxu0 %v20674_v30 }
0x1f76   : > { %19117 = vmatpush3.bf16.msra.mxu1 %v20181_v58 }
0x1f77   : > { %19118 = vmatprep.subr.bf16.mxu1 %v20674_v30 }
0x1f78   : > { %19157 = vmatpush3.bf16.msra.mxu0 %v20194_v6  ;;  %v14952_v6 = vld [vmem:[#allocation13] sm:$0x1] }
0x1f79   : > { %19158 = vmatprep.subr.bf16.mxu0 %v20674_v30 }
0x1f7a   : > { %19119 = vmatpush3.bf16.msra.mxu1 %v20182_v15  ;;  %v20188_v15 = vld [vmem:[%s23522_s22] sm:$0xff]   ;;  %s16531_s22 = sshll.u32 %s20963_s0, 4  ;;  %s20676_s0 = smov [#allocation19]  }
0x1f7b   : > { %19120 = vmatprep.subr.bf16.mxu1 %v20674_v30  ;;  %s23316_s4 = scalar_lea.hbm %s20940_s3, %s16531_s22  ;;  %s20528_s7 = sshll.u32 %s20676_s0, 4  ;;  %s20529_s7 = int_to_ptr.vmem [resolvable:$false] %s20528_s7 }
0x1f7c   : > { %19159 = vmatpush3.bf16.msra.mxu0 %v20195_v61  ;;  %v15094_v61 = vld [vmem:[#allocation14] sm:$0x1]  ;;  %s20530_s8 = scalar_lea.vmem %s20529_s7, 32 }
0x1f7d   : > { %19160 = vmatprep.subr.bf16.mxu0 %v20674_v30 }
0x1f7e   : > { %19121 = vmatpush3.bf16.msra.mxu1 %v20183_v60 }
0x1f7f   : > { %19122 = vmatprep.subr.bf16.mxu1 %v20674_v30 }
0x1f80   : > { %19161 = vmatpush3.bf16.msra.mxu0 %v20196_v46  ;;  %v19206_v46 = vadd.f32 %v15094_v61, %v14952_v6 }
0x1f81   : > { %19162 = vmatprep.subr.bf16.mxu0 %v20674_v30 }
0x1f82   : > { %19123 = vmatpush3.bf16.msra.mxu1 %v20184_v53  ;;  %v20189_v53 = vld [vmem:[%s23523_s1 + $0x8] sm:$0xff]  }
0x1f83   : > { %19124 = vmatprep.subr.bf16.mxu1 %v20674_v30 }
0x1f84   : > { %19163 = vmatpush3.bf16.msra.mxu0 %v20197_v16 }
0x1f85   : > { %19164 = vmatprep.subr.bf16.mxu0 %v20674_v30 }
0x1f86   : > { %19125 = vmatpush3.bf16.msra.mxu1 %v20185_v35  ;;  %v20190_v35 = vld [vmem:[%s23523_s1 + $0x10] sm:$0xff]  }
0x1f87   : > { %19126 = vmatprep.subr.bf16.mxu1 %v20674_v30 }
0x1f88   : > { %19165 = vmatpush3.bf16.msra.mxu0 %v20198_v48 }
0x1f89   : > { %19166 = vmatprep.subr.bf16.mxu0 %v20674_v30 }
0x1f8a   : > { %19127 = vmatpush3.bf16.msra.mxu1 %v20186_v42  ;;  %v20191_v42 = vld [vmem:[%s23523_s1 + $0x18] sm:$0xff]   ;;  %s1636_s1 = scalar_lea.vmem [#allocation19], %s1635_s26 }
0x1f8b   : > { %19128 = vmatprep.subr.bf16.mxu1 %v20674_v30  ;;  %s15396_s2 = sshll.u32 %s1636_s1, 4  ;;  %s23318_s2 = int_to_ptr.vmem [resolvable:$true] %s15396_s2 }
0x1f8c   : > { %19167 = vmatpush3.bf16.msra.mxu0 %v20199_v43  ;;  %s20524_s6 = scalar_lea.vmem %s23318_s2, 16  ;;  %p20531_p3 = scmp.lt.s32.totalorder %s23318_s2, %s20529_s7 }
0x1f8d   : > { %19172 = vmatprep.subr.bf16.mxu0 %v20674_v30  ;;  %p20525_p13 = scmp.ne.s32.totalorder %s23318_s2, %s20524_s6  ;;  %p20532_p4 = scmp.lt.s32.totalorder %s20530_s8, %s20524_s6 }
0x1f8e   : > { %19129 = vmatpush3.bf16.msra.mxu1 %v20187_v59 }
0x1f8f   : > { %19140 = vmatprep.subr.bf16.mxu1 %v20674_v30  ;;  %p20526_p2 = pnand %p20525_p13, %p23524_p1  ;;  %p20533_p12 = por %p20532_p4, %p20531_p3 }
0x1f91   : > { %p20527_p0 = pneg %p20526_p2 }
0x1f93   : > { %p20534_p5 = pnand %p20533_p12, %p20527_p0 }
0x2004   : > { %v14376_v17 = vpop.f32.mrb[60].mxu1 }
0x2005   : > { %v19016_v18 = vpop.f32.mrb[61].mxu1 }
0x2006   : > { %v14379_v52 = vpop.f32.mrb[62].mxu1 }
0x2007   : > { %v19017_v20 = vpop.f32.mrb[63].mxu1 }
0x200a   : > { %v14511_v21 = vpop.f32.mrb[144].mxu0 }
0x200b   : > { %v19040_v22 = vpop.f32.mrb[145].mxu0 }
0x200c   : > { %v14514_v23 = vpop.f32.mrb[146].mxu0  ;;  %v20200_v22 = vld [vmem:[%s20930_s14 + $0x100] sm:$0xff]  }
0x200d   : > { %v19041_v19 = vpop.f32.mrb[147].mxu0 }
0x200e   : > { %v20201_v19 = vld [vmem:[%s20930_s14 + $0x108] sm:$0xff]  }
0x2014   : > { %v14443_v24 = vpop.f32.mrb[64].mxu1 }
0x2015   : > { %v14444_v25 = vadd.f32 %v14443_v24, %v14376_v17  ;;  %v19028_v26 = vpop.f32.mrb[65].mxu1  ;;  %v20202_v24 = vld [vmem:[%s20930_s14 + $0x110] sm:$0xff]  }
0x2016   : > { %v14446_v27 = vpop.f32.mrb[66].mxu1  ;;  %v20204_v26 = vld [vmem:[%s20930_s14 + $0x120] sm:$0xff]  }
0x2017   : > { %v14517_v36 = vadd.f32 %v14511_v21, %v14444_v25  ;;  %v19029_v28 = vpop.f32.mrb[67].mxu1  ;;  %v20203_v25 = vld [vmem:[%s20930_s14 + $0x118] sm:$0xff]   ;;  %v20205_v27 = vld [vmem:[%s20930_s14 + $0x128] sm:$0xff]  }
0x2018   : > { %v20207_v28 = vld [vmem:[%s20930_s14 + $0x138] sm:$0xff]  }
0x201a   : > { %v14649_v29 = vpop.f32.mrb[148].mxu0 }
0x201b   : > { %v19064_v32 = vpop.f32.mrb[149].mxu0 }
0x201c   : > { %v14652_v33 = vpop.f32.mrb[150].mxu0 }
0x201d   : > { %v19065_v34 = vpop.f32.mrb[151].mxu0 }
0x2024   : > { %v14580_v31 = vpop.f32.mrb[68].mxu1 }
0x2025   : > { %v14586_v54 = vadd.f32 %v14580_v31, %v14517_v36  ;;  %v19052_v49 = vpop.f32.mrb[69].mxu1  ;;  %v20206_v36 = vld [vmem:[%s20930_s14 + $0x130] sm:$0xff]  }
0x2026   : > { %v14583_v7 = vpop.f32.mrb[70].mxu1 }
0x2027   : > { %v14655_v56 = vadd.f32 %v14649_v29, %v14586_v54  ;;  %v19053_v40 = vpop.f32.mrb[71].mxu1  ;;  %v15181_v29 = vld [vmem:[#allocation16] sm:$0x1] }
0x202a   : > { %v14787_v47 = vpop.f32.mrb[152].mxu0 }
0x202b   : > { %v19088_v55 = vpop.f32.mrb[153].mxu0 }
0x202c   : > { %v14790_v45 = vpop.f32.mrb[154].mxu0 }
0x202d   : > { %v19089_v5 = vpop.f32.mrb[155].mxu0 }
0x2034   : > { %v14718_v44 = vpop.f32.mrb[72].mxu1 }
0x2035   : > { %v14724_v10 = vadd.f32 %v14718_v44, %v14655_v56  ;;  %v19076_v63 = vpop.f32.mrb[73].mxu1  ;;  %v15288_v56 = vld [vmem:[#allocation17] sm:$0x1] }
0x2036   : > { %v14721_v57 = vpop.f32.mrb[74].mxu1 }
0x2037   : > { %v14793_v62 = vadd.f32 %v14787_v47, %v14724_v10  ;;  %v19077_v50 = vpop.f32.mrb[75].mxu1 }
0x203a   : > { %v14925_v4 = vpop.f32.mrb[156].mxu0 }
0x203b   : > { %v19112_v39 = vpop.f32.mrb[157].mxu0 }
0x203c   : > { %v14928_v3 = vpop.f32.mrb[158].mxu0 }
0x203d   : > { %v19113_v0 = vpop.f32.mrb[159].mxu0 }
0x2042   : > { %v15079_v51 = vpop.f32.mrb[160].mxu0 }
0x2043   : > { %v19138_v8 = vpop.f32.mrb[161].mxu0  ;;  %v15093_v59 = vpack.c.bf16 %v15079_v51, %v15079_v51 }
0x2044   : > { %v14856_v11 = vpop.f32.mrb[76].mxu1  ;;  %v15082_v13 = vpop.f32.mrb[162].mxu0 }
0x2045   : > { %v14862_v38 = vadd.f32 %v14856_v11, %v14793_v62  ;;  %v19100_v37 = vpop.f32.mrb[77].mxu1  ;;  %v19139_v14 = vpop.f32.mrb[163].mxu0 }
0x2046   : > { %v14859_v1 = vpop.f32.mrb[78].mxu1 }
0x2047   : > { %v14931_v9 = vadd.f32 %v14925_v4, %v14862_v38  ;;  %v19101_v2 = vpop.f32.mrb[79].mxu1 }
0x2049   : > { %v14933_v12 = vadd.f32 %v14932_v41, %v14931_v9 }
0x204b   : > { %v14934_v58 = vmax.f32 %v14933_v12, 0.0 }
0x204d   : > { %v14951_v60 = vpack.c.bf16 %v14934_v58, %v14934_v58 }
0x204f   : > { %19131 = vmatmul.mubr.bf16.vlgmr.msra.gmra.mrb[80].mxu1 %v14951_v60 }
0x2050   : > { %19141 = vmatpush3.bf16.msra.mxu1 %v20188_v15  ;;  %19148 = vmatprep.mubr.msk.bf16.mxu1 %vm20675_vm4, %v20674_v30 }
0x2051   : > { %19142 = vmatprep.subr.bf16.mxu1 %v20674_v30 }
0x2054   : > { %19143 = vmatpush3.bf16.msra.mxu1 %v20189_v53 }
0x2055   : > { %19144 = vmatprep.subr.bf16.mxu1 %v20674_v30 }
0x2058   : > { %19145 = vmatpush3.bf16.msra.mxu1 %v20190_v35 }
0x2059   : > { %19146 = vmatprep.subr.bf16.mxu1 %v20674_v30 }
0x205c   : > { %19147 = vmatpush3.bf16.msra.mxu1 %v20191_v42 }
0x205f   : > { %19149 = vmatmul.mubr.msk.bf16.vlgmr.msra.gmra.mrb[80].mxu1 %vm3081_vm2, %v15093_v59 }
0x2132   : > { %v15156_v16 = vpop.f32.mrb[80].mxu1 }
0x2133   : > { %v19207_v17 = vadd.f32 %v19206_v46, %v15156_v16  ;;  %v19150_v18 = vpop.f32.mrb[81].mxu1 }
0x2134   : > { %v15159_v52 = vpop.f32.mrb[82].mxu1 }
0x2135   : > { %v15163_v20 = vmax.f32 %v19207_v17, 0.0  ;;  %v19151_v21 = vpop.f32.mrb[83].mxu1 }
0x2137   : > { %v15180_v23 = vpack.c.bf16 %v15163_v20, %v15163_v20 }
0x2139   : > { %19169 = vmatmul.mubr.bf16.vlgmr.msra.gmra.mrb[164].mxu0 %v15180_v23 }
0x213a   : > { %19173 = vmatpush3.bf16.msra.mxu0 %v20200_v22  ;;  %19188 = vmatprep.mubr.msk.bf16.mxu0 %vm20675_vm4, %v20674_v30 }
0x213b   : > { %19174 = vmatprep.subr.bf16.mxu0 %v20674_v30 }
0x213e   : > { %19175 = vmatpush3.bf16.msra.mxu0 %v20201_v19 }
0x213f   : > { %19176 = vmatprep.subr.bf16.mxu0 %v20674_v30 }
0x2142   : > { %19177 = vmatpush3.bf16.msra.mxu0 %v20202_v24 }
0x2143   : > { %19178 = vmatprep.subr.bf16.mxu0 %v20674_v30 }
0x2146   : > { %19179 = vmatpush3.bf16.msra.mxu0 %v20203_v25 }
0x2147   : > { %19180 = vmatprep.subr.bf16.mxu0 %v20674_v30 }
0x214a   : > { %19181 = vmatpush3.bf16.msra.mxu0 %v20204_v26 }
0x214b   : > { %19182 = vmatprep.subr.bf16.mxu0 %v20674_v30 }
0x214e   : > { %19183 = vmatpush3.bf16.msra.mxu0 %v20205_v27 }
0x214f   : > { %19184 = vmatprep.subr.bf16.mxu0 %v20674_v30 }
0x2152   : > { %19185 = vmatpush3.bf16.msra.mxu0 %v20206_v36 }
0x2153   : > { %19186 = vmatprep.subr.bf16.mxu0 %v20674_v30 }
0x2156   : > { %19187 = vmatpush3.bf16.msra.mxu0 %v20207_v28 }
0x220c   : > { %v15264_v32 = vpop.f32.mrb[164].mxu0 }
0x220d   : > { %v15265_v33 = vadd.f32 %v15264_v32, %v15181_v29  ;;  %v19170_v34 = vpop.f32.mrb[165].mxu0 }
0x220e   : > { %v15267_v31 = vpop.f32.mrb[166].mxu0 }
0x220f   : > { %v15270_v54 = vmax.f32 %v15265_v33, 0.0  ;;  %v19171_v49 = vpop.f32.mrb[167].mxu0 }
0x2211   : > { %v15287_v7 = vpack.c.bf16 %v15270_v54, %v15270_v54 }
0x2213   : > { %19189 = vmatmul.mubr.bf16.vlgmr.msra.gmra.mrb[168].mxu0 %v15287_v7 }
0x22e6   : > { %v15371_v40 = vpop.f32.mrb[168].mxu0 }
0x22e7   : > { %v15372_v47 = vadd.f32 %v15371_v40, %v15288_v56  ;;  %v19190_v55 = vpop.f32.mrb[169].mxu0 }
0x22e8   : > { %v15374_v30 = vpop.f32.mrb[170].mxu0 }
0x22e9   : > { %v15377_v45 = vadd.f32 %v15372_v47, %v15163_v20  ;;  %v19191_v5 = vpop.f32.mrb[171].mxu0 }
0x22eb   : > { %v15378_v44 = vmax.f32 %v15377_v45, 0.0 }
0x22ed   : > { %vm15380_vm8 = vcmp.gt.f32.partialorder %v15378_v44, -1e+20 }
0x22ee   : > { %v15381_v10 = vsel %vm15380_vm8, %v15378_v44, -1e+20 }
0x22ef   : > { %15382 = vst [vmem:[%s1636_s1] sm:$0x1] %v15381_v10 }
0x22f0   : > { %20537 = shalt.err (!%p20534_p5)
}
0x22f1   : > { %s20538_s1 = scalar_lea.hbm %s23316_s4, 16  ;;  %s20542_s26 = scalar_lea.hbm %s20940_s3, 32 }
0x22f2   : > { %p20539_p6 = scmp.ne.s32.totalorder %s23316_s4, %s20538_s1  ;;  %p20543_p7 = scmp.lt.u32.totalorder %s23316_s4, %s20940_s3 }
0x22f3   : > { %p20544_p8 = scmp.lt.u32.totalorder %s20542_s26, %s20538_s1  ;;  %p20546_p13 = scmp.lt.u32.totalorder %s20538_s1, %s23316_s4 }
0x22f4   : > { %p20540_p9 = pnand %p20539_p6, %p23524_p1 }
0x22f5   : > { %p20545_p11 = por %p20544_p8, %p20543_p7 }
0x22f6   : > { %p20541_p10 = pneg %p20540_p9 }
0x22f7   : > { %p20547_p2 = por %p20546_p13, %p20545_p11 }
0x22f9   : > { %p20548_p0 = pnand %p20547_p2, %p20541_p10 }
0x22fb   : > { %20551 = shalt.err (!%p20548_p0)
}
0x22fc   : > { %19580 = dma.vmem_to_hbm [thread:$0]  (%p23524_p1), %s23318_s2, 16, %s23316_s4, %s15384_s5  }
0x22fd PF: > { %s23525_s6 = sld [smem:[#allocation66_spill]]  ;;  %s23526_s7 = sld [smem:[#allocation70_spill]] }
0x22fe   : > { %p19637_p3 = scmp.ge.s32.totalorder %s20610_s28, 2 }
0x2303   : > { %s15408_s8 = sand.u32 1, %s23525_s6   ;;  %p23527_p4 = scmp.ne.s32.totalorder %s23526_s7, 0 }
0x2304   : > { %s15409_s22 = scalar_lea.sflag [#allocation4], %s15408_s8 }
0x2305   : > { %p19614_p12 = pnand %p19637_p3, %p23527_p4 }
0x2307   : > { %20593 = dma.done.wait (!%p19614_p12), %s15409_s22, 16  }
0x2308   : > { %20595 = vsyncadd (!%p19614_p12), %s15409_s22, 4294967280  ;;  %s23528_s28 = sld [smem:[#allocation68_spill]]  ;;  %s23529_s0 = sld [smem:[#allocation67_spill]] }
0x2309   : > { %s23530_s26 = sld [smem:[#allocation69_spill]]  ;;  %s23531_s22 = smov %s20602_s23 }
0x230e   : > { %p119_p5 = scmp.ge.s32.totalorder %s23528_s28, 4   ;;  %s23532_s23 = smov %s23529_s0 }
0x2310   :  { %121 = sbr.rel (!%p119_p5) target bundleno = 106 (0x6a), region = 351 }
0x2317   :  { %15413 = vsyncpa [#allocation3], 1 }
0x2318   :  { %15415 = vsyncpa [#allocation3 + $0x1], 1 }
0x2319   :  { %15416 = vsyncpa [#allocation6], 1 }
0x231a   :  { %15417 = vsyncpa [#allocation9], 1 }
0x231b   :  { %15418 = vsyncpa [#allocation12], 1 }
0x231c   :  { %15419 = vsyncpa [#allocation15], 1 }
0x231d   :  { %15420 = vsyncpa [#allocation18], 1 }
0x231e   :  { %15421 = vsyncpa [#allocation4], 1 }
0x231f   :  { %15423 = vsyncpa [#allocation4 + $0x1], 1 }

</bundles_post_ra>
